<compile_context>
chip_gen: v7x
topology: tpu7x:2x2x1
jax: 0.10.0
libtpu: 0.0.40
codegen_flags: <defaults>
</compile_context>

<pallas_src>
import jax
import jax.numpy as jnp
from jax.experimental import pallas as pl
from jax.experimental.pallas import tpu as pltpu

NEG_SLOPE = 0.2
BN_EPS = 1e-5


# --------------------------------------------------------------------------- #
# in-kernel helpers (all loop/slice indices are static Python ints)            #
# --------------------------------------------------------------------------- #
def _zero_pad_border(a_ref):
    """Zero only the padding ring of a paired-layout activation scratch.

    Layout: a[n, h, wq, p*C + c] == x_padded[n, h, 2*wq + p, c].
    The interior (rows 1..Hp-2, and the halves of columns 0 / Wq-1 that hold
    real data) is fully overwritten by the scatter, so it is never zeroed.
    """
    N, Hp, Wq, L = a_ref.shape
    dt = a_ref.dtype
    a_ref[:, 0:1, :, :] = jnp.zeros((N, 1, Wq, L), dt)
    a_ref[:, Hp - 1:Hp, :, :] = jnp.zeros((N, 1, Wq, L), dt)
    a_ref[:, :, 0:1, :] = jnp.zeros((N, Hp, 1, L), dt)
    a_ref[:, :, Wq - 1:Wq, :] = jnp.zeros((N, Hp, 1, L), dt)


def _im2col(act_ref, t_ref, N, Ho, Wo):
    """Build the (N*Ho*Wo, 16*Cin) bf16 patch matrix of a k=4,s=2,p=1 conv.

    act_ref is the zero-padded activation in paired-lane layout, so every
    4-tap window along W is a contiguous lane slice (unit-stride reads only).
    """
    for n in range(N):
        for i in range(Ho):
            slab = act_ref[n, 2 * i:2 * i + 4, :, :]      # (4, Wq, 2*Cin)
            pieces = []
            for di in range(4):
                row = slab[di]                            # (Wq, 2*Cin)
                pieces.append(row[0:Wo, :])               # taps dj = 0, 1
                pieces.append(row[1:Wo + 1, :])           # taps dj = 2, 3
            r0 = (n * Ho + i) * Wo
            t_ref[r0:r0 + Wo, :] = jnp.concatenate(pieces, axis=-1)


def _conv_bn_lrelu(t_ref, w_ref, g_ref, b_ref):
    """Conv-as-GEMM (bf16 MXU, f32 acc) + training-mode BN + LeakyReLU.

    BN statistics are over the full M = N*Ho*Wo rows (whole batch lives in one
    block / one grid step).  Centered two-pass variance for numerical safety.
    """
    conv = jnp.dot(t_ref[...], w_ref[...], preferred_element_type=jnp.float32)
    inv_m = 1.0 / conv.shape[0]
    mean = jnp.sum(conv, axis=0, keepdims=True) * inv_m
    d = conv - mean
    var = jnp.sum(d * d, axis=0, keepdims=True) * inv_m
    y = d * (g_ref[...] * jax.lax.rsqrt(var + BN_EPS)) + b_ref[...]
    return jnp.where(y >= 0.0, y, NEG_SLOPE * y)


def _strided(start, size):
    """Even/odd-row slice helper (stride-2 sublane read from a VMEM ref)."""
    return pl.ds(start, size, 2) if size > 1 else pl.ds(start, 1)


def _fold_and_scatter(y_scr, o_ref, a_next, N, Ho, Wo, Cout):
    """Per (n,i) group: fold y rows pairwise into the lane-dense output and
    scatter them (shifted by one wq slot) into the next block's paired layout.

      o_ref[q, :]                 = [ y[2q, :] | y[2q+1, :] ]
      a_next[n, 1+i, wq, 0:C]     = y[(n,i) row 2*wq-1]   (odd rows, shifted)
      a_next[n, 1+i, wq, C:2C]    = y[(n,i) row 2*wq]     (even rows)
    """
    Wo2 = Wo // 2
    Wq = Wo2 + 1
    for n in range(N):
        for i in range(Ho):
            r0 = (n * Ho + i) * Wo
            q0 = r0 // 2
            ev = y_scr[_strided(r0, Wo2), :]          # rows j = 0, 2, ...
            od = y_scr[_strided(r0 + 1, Wo2), :]      # rows j = 1, 3, ...
            o_ref[q0:q0 + Wo2, :] = jnp.concatenate([ev, od], axis=-1)
            a_next[n, 1 + i, 1:Wq, 0:Cout] = od.astype(a_next.dtype)
            a_next[n, 1 + i, 0:Wq - 1, Cout:2 * Cout] = ev.astype(a_next.dtype)


def _block(a_in, w, g, b, t, y_scr, o_ref, a_out, N, Ho, Cout):
    _im2col(a_in, t, N, Ho, Ho)
    y_scr[...] = _conv_bn_lrelu(t, w, g, b)
    _fold_and_scatter(y_scr, o_ref, a_out, N, Ho, Ho, Cout)


def _make_kernel(N, hos, couts):
    def kernel(x_ref,
               w1, g1, b1, w2, g2, b2, w3, g3, b3, w4, g4, b4,
               o1, o2, o3, o4,
               a2, a3, a4, t1, t2, t3, t4, y1, y2, y3):
        # zero only the pad ring of the intermediate activation scratches
        _zero_pad_border(a2)
        _zero_pad_border(a3)
        _zero_pad_border(a4)

        _block(x_ref, w1, g1, b1, t1, y1, o1, a2, N, hos[0], couts[0])
        _block(a2,    w2, g2, b2, t2, y2, o2, a3, N, hos[1], couts[1])
        _block(a3,    w3, g3, b3, t3, y3, o3, a4, N, hos[2], couts[2])

        # last block: Cout=256 is already lane-dense, no next block to feed
        _im2col(a4, t4, N, hos[3], hos[3])
        o4[...] = _conv_bn_lrelu(t4, w4, g4, b4)

    return kernel


# --------------------------------------------------------------------------- #
# wrapper                                                                      #
# --------------------------------------------------------------------------- #
def _full_spec(shape):
    rank = len(shape)
    return pl.BlockSpec(shape, lambda i, _r=rank: (0,) * _r)


def _vmem_limit_bytes():
    """Generation-aware VMEM budget (128 MiB phys on v5e/v6e, 64 MiB on v7x)."""
    cap = None
    try:
        cap = int(pltpu.get_tpu_info().vmem_capacity_bytes)
    except Exception:
        cap = None
    if not cap or cap <= 0:
        cap = 128 * 1024 * 1024
    # leave ~12.5% headroom for the compiler's own scratch, cap at 100 MiB
    return max(32 * 1024 * 1024, min(cap - cap // 8, 100 * 1024 * 1024))


def critic_blocks_forward(x_nchw, params):
    """Matches CriticBlocks.forward: returns (out4, [out1..out4]) in NCHW."""
    N, C0, H, W = x_nchw.shape
    assert H == W and H % 16 == 0

    # NCHW -> padded, paired-lane layout: x_pad[n, h, wq, p*C + c] = xpad[n, h, 2wq+p, c]
    x = jnp.transpose(x_nchw, (0, 2, 3, 1))
    x = jnp.pad(x, ((0, 0), (1, 1), (1, 1), (0, 0)))
    x_pad = x.reshape(N, H + 2, (W + 2) // 2, 2 * C0).astype(jnp.bfloat16)

    hos, cins, couts = [], [], []
    h = H
    for (w, _, _) in params:
        couts.append(int(w.shape[0]))
        cins.append(int(w.shape[1]))
        h //= 2
        hos.append(h)
    assert cins[0] == C0

    flat_inputs = [x_pad]
    for (w, g, b) in params:
        co, ci, kh, kw = w.shape
        # OIHW -> (kh, kw, Cin, Cout) -> (16*Cin, Cout); bf16 MXU operand
        w2d = jnp.transpose(w, (2, 3, 1, 0)).reshape(kh * kw * ci, co).astype(jnp.bfloat16)
        flat_inputs += [w2d,
                        g.reshape(1, co).astype(jnp.float32),
                        b.reshape(1, co).astype(jnp.float32)]

    Ms = [N * hos[i] * hos[i] for i in range(4)]
    # o1..o3 are lane-dense folded slabs (M/2, 2*Cout); o4 is already 256-lane wide
    out_shapes = (
        jax.ShapeDtypeStruct((Ms[0] // 2, 2 * couts[0]), jnp.float32),
        jax.ShapeDtypeStruct((Ms[1] // 2, 2 * couts[1]), jnp.float32),
        jax.ShapeDtypeStruct((Ms[2] // 2, 2 * couts[2]), jnp.float32),
        jax.ShapeDtypeStruct((Ms[3], couts[3]), jnp.float32),
    )

    scratch = []
    # bf16 paired-layout padded activation scratches for blocks 2..4
    for i in range(1, 4):
        scratch.append(pltpu.VMEM(
            (N, hos[i - 1] + 2, hos[i - 1] // 2 + 1, 2 * cins[i]), jnp.bfloat16))
    # bf16 im2col patch scratches for blocks 1..4
    for i in range(4):
        scratch.append(pltpu.VMEM((Ms[i], 16 * cins[i]), jnp.bfloat16))
    # f32 post-activation scratches (blocks 1..3) feeding the fold/scatter
    for i in range(3):
        scratch.append(pltpu.VMEM((Ms[i], couts[i]), jnp.float32))

    outs = pl.pallas_call(
        _make_kernel(N, hos, couts),
        grid=(1,),
        out_shape=out_shapes,
        in_specs=[_full_spec(tuple(a.shape)) for a in flat_inputs],
        out_specs=tuple(_full_spec(tuple(s.shape)) for s in out_shapes),
        scratch_shapes=scratch,
        compiler_params=pltpu.CompilerParams(
            dimension_semantics=("arbitrary",),
            vmem_limit_bytes=_vmem_limit_bytes()),
    )(*flat_inputs)

    feats = []
    for i in range(4):
        # folded (M/2, 2*Cout) / plain (M, Cout) row-major == (N, Ho, Wo, Cout) row-major
        f = outs[i].reshape(N, hos[i], hos[i], couts[i]).transpose(0, 3, 1, 2)
        feats.append(f)
    return feats[-1], feats


# --------------------------------------------------------------------------- #
# deterministic example                                                        #
# --------------------------------------------------------------------------- #
def init_params(key):
    # Conv weight shapes exactly as in the PyTorch module (Cout, Cin, 4, 4).
    specs = [(64, 64), (64, 64), (128, 64), (256, 128)]  # (Cout, Cin) per block
    params = []
    for i, (co, ci) in enumerate(specs):
        kw_key, kg_key, kb_key = jax.random.split(jax.random.fold_in(key, i), 3)
        fan_in = ci * 4 * 4
        w = jax.random.normal(kw_key, (co, ci, 4, 4), jnp.float32) / jnp.sqrt(
            jnp.asarray(fan_in, jnp.float32))
        gamma = 1.0 + 0.1 * jax.random.normal(kg_key, (co,), jnp.float32)
        beta = 0.1 * jax.random.normal(kb_key, (co,), jnp.float32)
        params.append((w, gamma, beta))
    return params


if __name__ == "__main__":
    key = jax.random.PRNGKey(0)
    params = init_params(jax.random.fold_in(key, 100))
    # Input channels are fixed at 64 by the module; small batch/spatial otherwise.
    x = jax.random.normal(jax.random.fold_in(key, 0), (2, 64, 16, 16), jnp.float32)

    out4, feature_list = jax.jit(critic_blocks_forward)(x, params)
    out4 = jax.block_until_ready(out4)
    feature_list = [jax.block_until_ready(f) for f in feature_list]

    assert out4.shape == (2, 256, 1, 1), out4.shape
    expected = [(2, 64, 8, 8), (2, 64, 4, 4), (2, 128, 2, 2), (2, 256, 1, 1)]
    assert [tuple(f.shape) for f in feature_list] == expected
    assert all(bool(jnp.isfinite(f).all()) for f in feature_list)

    print("KERNEL_OK")
</pallas_src>

<mosaic_0001>
module attributes {stable_mosaic.version = 11 : i64} {
  func.func @kernel(%arg0: i32, %arg1: memref<2x18x9x128xbf16, #tpu.memory_space<vmem>>, %arg2: memref<1024x64xbf16, #tpu.memory_space<vmem>>, %arg3: memref<1x64xf32, #tpu.memory_space<vmem>>, %arg4: memref<1x64xf32, #tpu.memory_space<vmem>>, %arg5: memref<1024x64xbf16, #tpu.memory_space<vmem>>, %arg6: memref<1x64xf32, #tpu.memory_space<vmem>>, %arg7: memref<1x64xf32, #tpu.memory_space<vmem>>, %arg8: memref<1024x128xbf16, #tpu.memory_space<vmem>>, %arg9: memref<1x128xf32, #tpu.memory_space<vmem>>, %arg10: memref<1x128xf32, #tpu.memory_space<vmem>>, %arg11: memref<2048x256xbf16, #tpu.memory_space<vmem>>, %arg12: memref<1x256xf32, #tpu.memory_space<vmem>>, %arg13: memref<1x256xf32, #tpu.memory_space<vmem>>, %arg14: memref<64x128xf32, #tpu.memory_space<vmem>>, %arg15: memref<16x128xf32, #tpu.memory_space<vmem>>, %arg16: memref<4x256xf32, #tpu.memory_space<vmem>>, %arg17: memref<2x256xf32, #tpu.memory_space<vmem>>, %arg18: memref<2x10x5x128xbf16, #tpu.memory_space<vmem>>, %arg19: memref<2x6x3x128xbf16, #tpu.memory_space<vmem>>, %arg20: memref<2x4x2x256xbf16, #tpu.memory_space<vmem>>, %arg21: memref<128x1024xbf16, #tpu.memory_space<vmem>>, %arg22: memref<32x1024xbf16, #tpu.memory_space<vmem>>, %arg23: memref<8x1024xbf16, #tpu.memory_space<vmem>>, %arg24: memref<2x2048xbf16, #tpu.memory_space<vmem>>, %arg25: memref<128x64xf32, #tpu.memory_space<vmem>>, %arg26: memref<32x64xf32, #tpu.memory_space<vmem>>, %arg27: memref<8x128xf32, #tpu.memory_space<vmem>>) attributes {dimension_semantics = [#tpu.dimension_semantics<arbitrary>], iteration_bounds = array<i64: 1>, scalar_prefetch = 0 : i64, scratch_operands = 10 : i64, tpu.core_type = #tpu.core_type<tc>, window_params = [{pipeline_mode = #tpu.pipeline_mode<synchronous>, transform_indices = @transform_0, window_bounds = array<i64: 2, 18, 9, 128>}, {pipeline_mode = #tpu.pipeline_mode<synchronous>, transform_indices = @transform_1, window_bounds = array<i64: 1024, 64>}, {pipeline_mode = #tpu.pipeline_mode<synchronous>, transform_indices = @transform_2, window_bounds = array<i64: 1, 64>}, {pipeline_mode = #tpu.pipeline_mode<synchronous>, transform_indices = @transform_3, window_bounds = array<i64: 1, 64>}, {pipeline_mode = #tpu.pipeline_mode<synchronous>, transform_indices = @transform_4, window_bounds = array<i64: 1024, 64>}, {pipeline_mode = #tpu.pipeline_mode<synchronous>, transform_indices = @transform_5, window_bounds = array<i64: 1, 64>}, {pipeline_mode = #tpu.pipeline_mode<synchronous>, transform_indices = @transform_6, window_bounds = array<i64: 1, 64>}, {pipeline_mode = #tpu.pipeline_mode<synchronous>, transform_indices = @transform_7, window_bounds = array<i64: 1024, 128>}, {pipeline_mode = #tpu.pipeline_mode<synchronous>, transform_indices = @transform_8, window_bounds = array<i64: 1, 128>}, {pipeline_mode = #tpu.pipeline_mode<synchronous>, transform_indices = @transform_9, window_bounds = array<i64: 1, 128>}, {pipeline_mode = #tpu.pipeline_mode<synchronous>, transform_indices = @transform_10, window_bounds = array<i64: 2048, 256>}, {pipeline_mode = #tpu.pipeline_mode<synchronous>, transform_indices = @transform_11, window_bounds = array<i64: 1, 256>}, {pipeline_mode = #tpu.pipeline_mode<synchronous>, transform_indices = @transform_12, window_bounds = array<i64: 1, 256>}, {pipeline_mode = #tpu.pipeline_mode<synchronous>, transform_indices = @transform_13, window_bounds = array<i64: 64, 128>}, {pipeline_mode = #tpu.pipeline_mode<synchronous>, transform_indices = @transform_14, window_bounds = array<i64: 16, 128>}, {pipeline_mode = #tpu.pipeline_mode<synchronous>, transform_indices = @transform_15, window_bounds = array<i64: 4, 256>}, {pipeline_mode = #tpu.pipeline_mode<synchronous>, transform_indices = @transform_16, window_bounds = array<i64: 2, 256>}]} {
    %cst = arith.constant 0.000000e+00 : bf16
    %0 = vector.broadcast %cst : bf16 to vector<2x1x5x128xbf16>
    %c0 = arith.constant 0 : index
    %c0_0 = arith.constant 0 : index
    %c0_1 = arith.constant 0 : index
    %c0_2 = arith.constant 0 : index
    %1 = vector.load %arg18[%c0, %c0_0, %c0_1, %c0_2] : memref<2x10x5x128xbf16, #tpu.memory_space<vmem>>, vector<2x1x5x128xbf16>
    tpu.vector_store %arg18[%c0, %c0_0, %c0_1, %c0_2], %0 {strides = array<i32>} : memref<2x10x5x128xbf16, #tpu.memory_space<vmem>>, vector<2x1x5x128xbf16>,
    %cst_3 = arith.constant 0.000000e+00 : bf16
    %2 = vector.broadcast %cst_3 : bf16 to vector<2x1x5x128xbf16>
    %c0_4 = arith.constant 0 : index
    %c9 = arith.constant 9 : index
    %c0_5 = arith.constant 0 : index
    %c0_6 = arith.constant 0 : index
    %3 = vector.load %arg18[%c0_4, %c9, %c0_5, %c0_6] : memref<2x10x5x128xbf16, #tpu.memory_space<vmem>>, vector<2x1x5x128xbf16>
    tpu.vector_store %arg18[%c0_4, %c9, %c0_5, %c0_6], %2 {strides = array<i32>} : memref<2x10x5x128xbf16, #tpu.memory_space<vmem>>, vector<2x1x5x128xbf16>,
    %cst_7 = arith.constant 0.000000e+00 : bf16
    %4 = vector.broadcast %cst_7 : bf16 to vector<2x10x1x128xbf16>
    %c0_8 = arith.constant 0 : index
    %c0_9 = arith.constant 0 : index
    %c0_10 = arith.constant 0 : index
    %c0_11 = arith.constant 0 : index
    %5 = vector.load %arg18[%c0_8, %c0_9, %c0_10, %c0_11] : memref<2x10x5x128xbf16, #tpu.memory_space<vmem>>, vector<2x10x1x128xbf16>
    tpu.vector_store %arg18[%c0_8, %c0_9, %c0_10, %c0_11], %4 {strides = array<i32>} : memref<2x10x5x128xbf16, #tpu.memory_space<vmem>>, vector<2x10x1x128xbf16>,
    %cst_12 = arith.constant 0.000000e+00 : bf16
    %6 = vector.broadcast %cst_12 : bf16 to vector<2x10x1x128xbf16>
    %c0_13 = arith.constant 0 : index
    %c0_14 = arith.constant 0 : index
    %c4 = arith.constant 4 : index
    %c0_15 = arith.constant 0 : index
    %7 = vector.load %arg18[%c0_13, %c0_14, %c4, %c0_15] : memref<2x10x5x128xbf16, #tpu.memory_space<vmem>>, vector<2x10x1x128xbf16>
    tpu.vector_store %arg18[%c0_13, %c0_14, %c4, %c0_15], %6 {strides = array<i32>} : memref<2x10x5x128xbf16, #tpu.memory_space<vmem>>, vector<2x10x1x128xbf16>,
    %cst_16 = arith.constant 0.000000e+00 : bf16
    %8 = vector.broadcast %cst_16 : bf16 to vector<2x1x3x128xbf16>
    %c0_17 = arith.constant 0 : index
    %c0_18 = arith.constant 0 : index
    %c0_19 = arith.constant 0 : index
    %c0_20 = arith.constant 0 : index
    %9 = vector.load %arg19[%c0_17, %c0_18, %c0_19, %c0_20] : memref<2x6x3x128xbf16, #tpu.memory_space<vmem>>, vector<2x1x3x128xbf16>
    tpu.vector_store %arg19[%c0_17, %c0_18, %c0_19, %c0_20], %8 {strides = array<i32>} : memref<2x6x3x128xbf16, #tpu.memory_space<vmem>>, vector<2x1x3x128xbf16>,
    %cst_21 = arith.constant 0.000000e+00 : bf16
    %10 = vector.broadcast %cst_21 : bf16 to vector<2x1x3x128xbf16>
    %c0_22 = arith.constant 0 : index
    %c5 = arith.constant 5 : index
    %c0_23 = arith.constant 0 : index
    %c0_24 = arith.constant 0 : index
    %11 = vector.load %arg19[%c0_22, %c5, %c0_23, %c0_24] : memref<2x6x3x128xbf16, #tpu.memory_space<vmem>>, vector<2x1x3x128xbf16>
    tpu.vector_store %arg19[%c0_22, %c5, %c0_23, %c0_24], %10 {strides = array<i32>} : memref<2x6x3x128xbf16, #tpu.memory_space<vmem>>, vector<2x1x3x128xbf16>,
    %cst_25 = arith.constant 0.000000e+00 : bf16
    %12 = vector.broadcast %cst_25 : bf16 to vector<2x6x1x128xbf16>
    %c0_26 = arith.constant 0 : index
    %c0_27 = arith.constant 0 : index
    %c0_28 = arith.constant 0 : index
    %c0_29 = arith.constant 0 : index
    %13 = vector.load %arg19[%c0_26, %c0_27, %c0_28, %c0_29] : memref<2x6x3x128xbf16, #tpu.memory_space<vmem>>, vector<2x6x1x128xbf16>
    tpu.vector_store %arg19[%c0_26, %c0_27, %c0_28, %c0_29], %12 {strides = array<i32>} : memref<2x6x3x128xbf16, #tpu.memory_space<vmem>>, vector<2x6x1x128xbf16>,
    %cst_30 = arith.constant 0.000000e+00 : bf16
    %14 = vector.broadcast %cst_30 : bf16 to vector<2x6x1x128xbf16>
    %c0_31 = arith.constant 0 : index
    %c0_32 = arith.constant 0 : index
    %c2 = arith.constant 2 : index
    %c0_33 = arith.constant 0 : index
    %15 = vector.load %arg19[%c0_31, %c0_32, %c2, %c0_33] : memref<2x6x3x128xbf16, #tpu.memory_space<vmem>>, vector<2x6x1x128xbf16>
    tpu.vector_store %arg19[%c0_31, %c0_32, %c2, %c0_33], %14 {strides = array<i32>} : memref<2x6x3x128xbf16, #tpu.memory_space<vmem>>, vector<2x6x1x128xbf16>,
    %cst_34 = arith.constant 0.000000e+00 : bf16
    %16 = vector.broadcast %cst_34 : bf16 to vector<2x1x2x256xbf16>
    %c0_35 = arith.constant 0 : index
    %c0_36 = arith.constant 0 : index
    %c0_37 = arith.constant 0 : index
    %c0_38 = arith.constant 0 : index
    %17 = vector.load %arg20[%c0_35, %c0_36, %c0_37, %c0_38] : memref<2x4x2x256xbf16, #tpu.memory_space<vmem>>, vector<2x1x2x256xbf16>
    tpu.vector_store %arg20[%c0_35, %c0_36, %c0_37, %c0_38], %16 {strides = array<i32>} : memref<2x4x2x256xbf16, #tpu.memory_space<vmem>>, vector<2x1x2x256xbf16>,
    %cst_39 = arith.constant 0.000000e+00 : bf16
    %18 = vector.broadcast %cst_39 : bf16 to vector<2x1x2x256xbf16>
    %c0_40 = arith.constant 0 : index
    %c3 = arith.constant 3 : index
    %c0_41 = arith.constant 0 : index
    %c0_42 = arith.constant 0 : index
    %19 = vector.load %arg20[%c0_40, %c3, %c0_41, %c0_42] : memref<2x4x2x256xbf16, #tpu.memory_space<vmem>>, vector<2x1x2x256xbf16>
    tpu.vector_store %arg20[%c0_40, %c3, %c0_41, %c0_42], %18 {strides = array<i32>} : memref<2x4x2x256xbf16, #tpu.memory_space<vmem>>, vector<2x1x2x256xbf16>,
    %cst_43 = arith.constant 0.000000e+00 : bf16
    %20 = vector.broadcast %cst_43 : bf16 to vector<2x4x1x256xbf16>
    %c0_44 = arith.constant 0 : index
    %c0_45 = arith.constant 0 : index
    %c0_46 = arith.constant 0 : index
    %c0_47 = arith.constant 0 : index
    %21 = vector.load %arg20[%c0_44, %c0_45, %c0_46, %c0_47] : memref<2x4x2x256xbf16, #tpu.memory_space<vmem>>, vector<2x4x1x256xbf16>
    tpu.vector_store %arg20[%c0_44, %c0_45, %c0_46, %c0_47], %20 {strides = array<i32>} : memref<2x4x2x256xbf16, #tpu.memory_space<vmem>>, vector<2x4x1x256xbf16>,
    %cst_48 = arith.constant 0.000000e+00 : bf16
    %22 = vector.broadcast %cst_48 : bf16 to vector<2x4x1x256xbf16>
    %c0_49 = arith.constant 0 : index
    %c0_50 = arith.constant 0 : index
    %c1 = arith.constant 1 : index
    %c0_51 = arith.constant 0 : index
    %23 = vector.load %arg20[%c0_49, %c0_50, %c1, %c0_51] : memref<2x4x2x256xbf16, #tpu.memory_space<vmem>>, vector<2x4x1x256xbf16>
    tpu.vector_store %arg20[%c0_49, %c0_50, %c1, %c0_51], %22 {strides = array<i32>} : memref<2x4x2x256xbf16, #tpu.memory_space<vmem>>, vector<2x4x1x256xbf16>,
    %c0_52 = arith.constant 0 : index
    %c0_53 = arith.constant 0 : index
    %c0_54 = arith.constant 0 : index
    %c0_55 = arith.constant 0 : index
    %24 = vector.load %arg1[%c0_52, %c0_53, %c0_54, %c0_55] : memref<2x18x9x128xbf16, #tpu.memory_space<vmem>>, vector<1x4x9x128xbf16>
    %25 = vector.shape_cast %24 : vector<1x4x9x128xbf16> to vector<4x9x128xbf16>
    %26 = vector.extract_strided_slice %25 {offsets = [0, 0, 0], sizes = [1, 9, 128], strides = [1, 1, 1]} : vector<4x9x128xbf16> to vector<1x9x128xbf16>
    %27 = vector.shape_cast %26 : vector<1x9x128xbf16> to vector<9x128xbf16>
    %28 = vector.extract_strided_slice %27 {offsets = [0, 0], sizes = [8, 128], strides = [1, 1]} : vector<9x128xbf16> to vector<8x128xbf16>
    %29 = vector.extract_strided_slice %27 {offsets = [1, 0], sizes = [8, 128], strides = [1, 1]} : vector<9x128xbf16> to vector<8x128xbf16>
    %30 = vector.extract_strided_slice %25 {offsets = [1, 0, 0], sizes = [1, 9, 128], strides = [1, 1, 1]} : vector<4x9x128xbf16> to vector<1x9x128xbf16>
    %31 = vector.shape_cast %30 : vector<1x9x128xbf16> to vector<9x128xbf16>
    %32 = vector.extract_strided_slice %31 {offsets = [0, 0], sizes = [8, 128], strides = [1, 1]} : vector<9x128xbf16> to vector<8x128xbf16>
    %33 = vector.extract_strided_slice %31 {offsets = [1, 0], sizes = [8, 128], strides = [1, 1]} : vector<9x128xbf16> to vector<8x128xbf16>
    %34 = vector.extract_strided_slice %25 {offsets = [2, 0, 0], sizes = [1, 9, 128], strides = [1, 1, 1]} : vector<4x9x128xbf16> to vector<1x9x128xbf16>
    %35 = vector.shape_cast %34 : vector<1x9x128xbf16> to vector<9x128xbf16>
    %36 = vector.extract_strided_slice %35 {offsets = [0, 0], sizes = [8, 128], strides = [1, 1]} : vector<9x128xbf16> to vector<8x128xbf16>
    %37 = vector.extract_strided_slice %35 {offsets = [1, 0], sizes = [8, 128], strides = [1, 1]} : vector<9x128xbf16> to vector<8x128xbf16>
    %38 = vector.extract_strided_slice %25 {offsets = [3, 0, 0], sizes = [1, 9, 128], strides = [1, 1, 1]} : vector<4x9x128xbf16> to vector<1x9x128xbf16>
    %39 = vector.shape_cast %38 : vector<1x9x128xbf16> to vector<9x128xbf16>
    %40 = vector.extract_strided_slice %39 {offsets = [0, 0], sizes = [8, 128], strides = [1, 1]} : vector<9x128xbf16> to vector<8x128xbf16>
    %41 = vector.extract_strided_slice %39 {offsets = [1, 0], sizes = [8, 128], strides = [1, 1]} : vector<9x128xbf16> to vector<8x128xbf16>
    %42 = tpu.concatenate %28, %29, %32, %33, %36, %37, %40, %41 in 1 : vector<8x128xbf16>, vector<8x128xbf16>, vector<8x128xbf16>, vector<8x128xbf16>, vector<8x128xbf16>, vector<8x128xbf16>, vector<8x128xbf16>, vector<8x128xbf16> -> vector<8x1024xbf16>
    %c0_56 = arith.constant 0 : index
    %c0_57 = arith.constant 0 : index
    %43 = vector.load %arg21[%c0_56, %c0_57] : memref<128x1024xbf16, #tpu.memory_space<vmem>>, vector<8x1024xbf16>
    tpu.vector_store %arg21[%c0_56, %c0_57], %42 {strides = array<i32>} : memref<128x1024xbf16, #tpu.memory_space<vmem>>, vector<8x1024xbf16>,
    %c0_58 = arith.constant 0 : index
    %c2_59 = arith.constant 2 : index
    %c0_60 = arith.constant 0 : index
    %c0_61 = arith.constant 0 : index
    %44 = vector.load %arg1[%c0_58, %c2_59, %c0_60, %c0_61] : memref<2x18x9x128xbf16, #tpu.memory_space<vmem>>, vector<1x4x9x128xbf16>
    %45 = vector.shape_cast %44 : vector<1x4x9x128xbf16> to vector<4x9x128xbf16>
    %46 = vector.extract_strided_slice %45 {offsets = [0, 0, 0], sizes = [1, 9, 128], strides = [1, 1, 1]} : vector<4x9x128xbf16> to vector<1x9x128xbf16>
    %47 = vector.shape_cast %46 : vector<1x9x128xbf16> to vector<9x128xbf16>
    %48 = vector.extract_strided_slice %47 {offsets = [0, 0], sizes = [8, 128], strides = [1, 1]} : vector<9x128xbf16> to vector<8x128xbf16>
    %49 = vector.extract_strided_slice %47 {offsets = [1, 0], sizes = [8, 128], strides = [1, 1]} : vector<9x128xbf16> to vector<8x128xbf16>
    %50 = vector.extract_strided_slice %45 {offsets = [1, 0, 0], sizes = [1, 9, 128], strides = [1, 1, 1]} : vector<4x9x128xbf16> to vector<1x9x128xbf16>
    %51 = vector.shape_cast %50 : vector<1x9x128xbf16> to vector<9x128xbf16>
    %52 = vector.extract_strided_slice %51 {offsets = [0, 0], sizes = [8, 128], strides = [1, 1]} : vector<9x128xbf16> to vector<8x128xbf16>
    %53 = vector.extract_strided_slice %51 {offsets = [1, 0], sizes = [8, 128], strides = [1, 1]} : vector<9x128xbf16> to vector<8x128xbf16>
    %54 = vector.extract_strided_slice %45 {offsets = [2, 0, 0], sizes = [1, 9, 128], strides = [1, 1, 1]} : vector<4x9x128xbf16> to vector<1x9x128xbf16>
    %55 = vector.shape_cast %54 : vector<1x9x128xbf16> to vector<9x128xbf16>
    %56 = vector.extract_strided_slice %55 {offsets = [0, 0], sizes = [8, 128], strides = [1, 1]} : vector<9x128xbf16> to vector<8x128xbf16>
    %57 = vector.extract_strided_slice %55 {offsets = [1, 0], sizes = [8, 128], strides = [1, 1]} : vector<9x128xbf16> to vector<8x128xbf16>
    %58 = vector.extract_strided_slice %45 {offsets = [3, 0, 0], sizes = [1, 9, 128], strides = [1, 1, 1]} : vector<4x9x128xbf16> to vector<1x9x128xbf16>
    %59 = vector.shape_cast %58 : vector<1x9x128xbf16> to vector<9x128xbf16>
    %60 = vector.extract_strided_slice %59 {offsets = [0, 0], sizes = [8, 128], strides = [1, 1]} : vector<9x128xbf16> to vector<8x128xbf16>
    %61 = vector.extract_strided_slice %59 {offsets = [1, 0], sizes = [8, 128], strides = [1, 1]} : vector<9x128xbf16> to vector<8x128xbf16>
    %62 = tpu.concatenate %48, %49, %52, %53, %56, %57, %60, %61 in 1 : vector<8x128xbf16>, vector<8x128xbf16>, vector<8x128xbf16>, vector<8x128xbf16>, vector<8x128xbf16>, vector<8x128xbf16>, vector<8x128xbf16>, vector<8x128xbf16> -> vector<8x1024xbf16>
    %c8 = arith.constant 8 : index
    %c0_62 = arith.constant 0 : index
    %63 = vector.load %arg21[%c8, %c0_62] : memref<128x1024xbf16, #tpu.memory_space<vmem>>, vector<8x1024xbf16>
    tpu.vector_store %arg21[%c8, %c0_62], %62 {strides = array<i32>} : memref<128x1024xbf16, #tpu.memory_space<vmem>>, vector<8x1024xbf16>,
    %c0_63 = arith.constant 0 : index
    %c4_64 = arith.constant 4 : index
    %c0_65 = arith.constant 0 : index
    %c0_66 = arith.constant 0 : index
    %64 = vector.load %arg1[%c0_63, %c4_64, %c0_65, %c0_66] : memref<2x18x9x128xbf16, #tpu.memory_space<vmem>>, vector<1x4x9x128xbf16>
    %65 = vector.shape_cast %64 : vector<1x4x9x128xbf16> to vector<4x9x128xbf16>
    %66 = vector.extract_strided_slice %65 {offsets = [0, 0, 0], sizes = [1, 9, 128], strides = [1, 1, 1]} : vector<4x9x128xbf16> to vector<1x9x128xbf16>
    %67 = vector.shape_cast %66 : vector<1x9x128xbf16> to vector<9x128xbf16>
    %68 = vector.extract_strided_slice %67 {offsets = [0, 0], sizes = [8, 128], strides = [1, 1]} : vector<9x128xbf16> to vector<8x128xbf16>
    %69 = vector.extract_strided_slice %67 {offsets = [1, 0], sizes = [8, 128], strides = [1, 1]} : vector<9x128xbf16> to vector<8x128xbf16>
    %70 = vector.extract_strided_slice %65 {offsets = [1, 0, 0], sizes = [1, 9, 128], strides = [1, 1, 1]} : vector<4x9x128xbf16> to vector<1x9x128xbf16>
    %71 = vector.shape_cast %70 : vector<1x9x128xbf16> to vector<9x128xbf16>
    %72 = vector.extract_strided_slice %71 {offsets = [0, 0], sizes = [8, 128], strides = [1, 1]} : vector<9x128xbf16> to vector<8x128xbf16>
    %73 = vector.extract_strided_slice %71 {offsets = [1, 0], sizes = [8, 128], strides = [1, 1]} : vector<9x128xbf16> to vector<8x128xbf16>
    %74 = vector.extract_strided_slice %65 {offsets = [2, 0, 0], sizes = [1, 9, 128], strides = [1, 1, 1]} : vector<4x9x128xbf16> to vector<1x9x128xbf16>
    %75 = vector.shape_cast %74 : vector<1x9x128xbf16> to vector<9x128xbf16>
    %76 = vector.extract_strided_slice %75 {offsets = [0, 0], sizes = [8, 128], strides = [1, 1]} : vector<9x128xbf16> to vector<8x128xbf16>
    %77 = vector.extract_strided_slice %75 {offsets = [1, 0], sizes = [8, 128], strides = [1, 1]} : vector<9x128xbf16> to vector<8x128xbf16>
    %78 = vector.extract_strided_slice %65 {offsets = [3, 0, 0], sizes = [1, 9, 128], strides = [1, 1, 1]} : vector<4x9x128xbf16> to vector<1x9x128xbf16>
    %79 = vector.shape_cast %78 : vector<1x9x128xbf16> to vector<9x128xbf16>
    %80 = vector.extract_strided_slice %79 {offsets = [0, 0], sizes = [8, 128], strides = [1, 1]} : vector<9x128xbf16> to vector<8x128xbf16>
    %81 = vector.extract_strided_slice %79 {offsets = [1, 0], sizes = [8, 128], strides = [1, 1]} : vector<9x128xbf16> to vector<8x128xbf16>
    %82 = tpu.concatenate %68, %69, %72, %73, %76, %77, %80, %81 in 1 : vector<8x128xbf16>, vector<8x128xbf16>, vector<8x128xbf16>, vector<8x128xbf16>, vector<8x128xbf16>, vector<8x128xbf16>, vector<8x128xbf16>, vector<8x128xbf16> -> vector<8x1024xbf16>
    %c16 = arith.constant 16 : index
    %c0_67 = arith.constant 0 : index
    %83 = vector.load %arg21[%c16, %c0_67] : memref<128x1024xbf16, #tpu.memory_space<vmem>>, vector<8x1024xbf16>
    tpu.vector_store %arg21[%c16, %c0_67], %82 {strides = array<i32>} : memref<128x1024xbf16, #tpu.memory_space<vmem>>, vector<8x1024xbf16>,
    %c0_68 = arith.constant 0 : index
    %c6 = arith.constant 6 : index
    %c0_69 = arith.constant 0 : index
    %c0_70 = arith.constant 0 : index
    %84 = vector.load %arg1[%c0_68, %c6, %c0_69, %c0_70] : memref<2x18x9x128xbf16, #tpu.memory_space<vmem>>, vector<1x4x9x128xbf16>
    %85 = vector.shape_cast %84 : vector<1x4x9x128xbf16> to vector<4x9x128xbf16>
    %86 = vector.extract_strided_slice %85 {offsets = [0, 0, 0], sizes = [1, 9, 128], strides = [1, 1, 1]} : vector<4x9x128xbf16> to vector<1x9x128xbf16>
    %87 = vector.shape_cast %86 : vector<1x9x128xbf16> to vector<9x128xbf16>
    %88 = vector.extract_strided_slice %87 {offsets = [0, 0], sizes = [8, 128], strides = [1, 1]} : vector<9x128xbf16> to vector<8x128xbf16>
    %89 = vector.extract_strided_slice %87 {offsets = [1, 0], sizes = [8, 128], strides = [1, 1]} : vector<9x128xbf16> to vector<8x128xbf16>
    %90 = vector.extract_strided_slice %85 {offsets = [1, 0, 0], sizes = [1, 9, 128], strides = [1, 1, 1]} : vector<4x9x128xbf16> to vector<1x9x128xbf16>
    %91 = vector.shape_cast %90 : vector<1x9x128xbf16> to vector<9x128xbf16>
    %92 = vector.extract_strided_slice %91 {offsets = [0, 0], sizes = [8, 128], strides = [1, 1]} : vector<9x128xbf16> to vector<8x128xbf16>
    %93 = vector.extract_strided_slice %91 {offsets = [1, 0], sizes = [8, 128], strides = [1, 1]} : vector<9x128xbf16> to vector<8x128xbf16>
    %94 = vector.extract_strided_slice %85 {offsets = [2, 0, 0], sizes = [1, 9, 128], strides = [1, 1, 1]} : vector<4x9x128xbf16> to vector<1x9x128xbf16>
    %95 = vector.shape_cast %94 : vector<1x9x128xbf16> to vector<9x128xbf16>
    %96 = vector.extract_strided_slice %95 {offsets = [0, 0], sizes = [8, 128], strides = [1, 1]} : vector<9x128xbf16> to vector<8x128xbf16>
    %97 = vector.extract_strided_slice %95 {offsets = [1, 0], sizes = [8, 128], strides = [1, 1]} : vector<9x128xbf16> to vector<8x128xbf16>
    %98 = vector.extract_strided_slice %85 {offsets = [3, 0, 0], sizes = [1, 9, 128], strides = [1, 1, 1]} : vector<4x9x128xbf16> to vector<1x9x128xbf16>
    %99 = vector.shape_cast %98 : vector<1x9x128xbf16> to vector<9x128xbf16>
    %100 = vector.extract_strided_slice %99 {offsets = [0, 0], sizes = [8, 128], strides = [1, 1]} : vector<9x128xbf16> to vector<8x128xbf16>
    %101 = vector.extract_strided_slice %99 {offsets = [1, 0], sizes = [8, 128], strides = [1, 1]} : vector<9x128xbf16> to vector<8x128xbf16>
    %102 = tpu.concatenate %88, %89, %92, %93, %96, %97, %100, %101 in 1 : vector<8x128xbf16>, vector<8x128xbf16>, vector<8x128xbf16>, vector<8x128xbf16>, vector<8x128xbf16>, vector<8x128xbf16>, vector<8x128xbf16>, vector<8x128xbf16> -> vector<8x1024xbf16>
    %c24 = arith.constant 24 : index
    %c0_71 = arith.constant 0 : index
    %103 = vector.load %arg21[%c24, %c0_71] : memref<128x1024xbf16, #tpu.memory_space<vmem>>, vector<8x1024xbf16>
    tpu.vector_store %arg21[%c24, %c0_71], %102 {strides = array<i32>} : memref<128x1024xbf16, #tpu.memory_space<vmem>>, vector<8x1024xbf16>,
    %c0_72 = arith.constant 0 : index
    %c8_73 = arith.constant 8 : index
    %c0_74 = arith.constant 0 : index
    %c0_75 = arith.constant 0 : index
    %104 = vector.load %arg1[%c0_72, %c8_73, %c0_74, %c0_75] : memref<2x18x9x128xbf16, #tpu.memory_space<vmem>>, vector<1x4x9x128xbf16>
    %105 = vector.shape_cast %104 : vector<1x4x9x128xbf16> to vector<4x9x128xbf16>
    %106 = vector.extract_strided_slice %105 {offsets = [0, 0, 0], sizes = [1, 9, 128], strides = [1, 1, 1]} : vector<4x9x128xbf16> to vector<1x9x128xbf16>
    %107 = vector.shape_cast %106 : vector<1x9x128xbf16> to vector<9x128xbf16>
    %108 = vector.extract_strided_slice %107 {offsets = [0, 0], sizes = [8, 128], strides = [1, 1]} : vector<9x128xbf16> to vector<8x128xbf16>
    %109 = vector.extract_strided_slice %107 {offsets = [1, 0], sizes = [8, 128], strides = [1, 1]} : vector<9x128xbf16> to vector<8x128xbf16>
    %110 = vector.extract_strided_slice %105 {offsets = [1, 0, 0], sizes = [1, 9, 128], strides = [1, 1, 1]} : vector<4x9x128xbf16> to vector<1x9x128xbf16>
    %111 = vector.shape_cast %110 : vector<1x9x128xbf16> to vector<9x128xbf16>
    %112 = vector.extract_strided_slice %111 {offsets = [0, 0], sizes = [8, 128], strides = [1, 1]} : vector<9x128xbf16> to vector<8x128xbf16>
    %113 = vector.extract_strided_slice %111 {offsets = [1, 0], sizes = [8, 128], strides = [1, 1]} : vector<9x128xbf16> to vector<8x128xbf16>
    %114 = vector.extract_strided_slice %105 {offsets = [2, 0, 0], sizes = [1, 9, 128], strides = [1, 1, 1]} : vector<4x9x128xbf16> to vector<1x9x128xbf16>
    %115 = vector.shape_cast %114 : vector<1x9x128xbf16> to vector<9x128xbf16>
    %116 = vector.extract_strided_slice %115 {offsets = [0, 0], sizes = [8, 128], strides = [1, 1]} : vector<9x128xbf16> to vector<8x128xbf16>
    %117 = vector.extract_strided_slice %115 {offsets = [1, 0], sizes = [8, 128], strides = [1, 1]} : vector<9x128xbf16> to vector<8x128xbf16>
    %118 = vector.extract_strided_slice %105 {offsets = [3, 0, 0], sizes = [1, 9, 128], strides = [1, 1, 1]} : vector<4x9x128xbf16> to vector<1x9x128xbf16>
    %119 = vector.shape_cast %118 : vector<1x9x128xbf16> to vector<9x128xbf16>
    %120 = vector.extract_strided_slice %119 {offsets = [0, 0], sizes = [8, 128], strides = [1, 1]} : vector<9x128xbf16> to vector<8x128xbf16>
    %121 = vector.extract_strided_slice %119 {offsets = [1, 0], sizes = [8, 128], strides = [1, 1]} : vector<9x128xbf16> to vector<8x128xbf16>
    %122 = tpu.concatenate %108, %109, %112, %113, %116, %117, %120, %121 in 1 : vector<8x128xbf16>, vector<8x128xbf16>, vector<8x128xbf16>, vector<8x128xbf16>, vector<8x128xbf16>, vector<8x128xbf16>, vector<8x128xbf16>, vector<8x128xbf16> -> vector<8x1024xbf16>
    %c32 = arith.constant 32 : index
    %c0_76 = arith.constant 0 : index
    %123 = vector.load %arg21[%c32, %c0_76] : memref<128x1024xbf16, #tpu.memory_space<vmem>>, vector<8x1024xbf16>
    tpu.vector_store %arg21[%c32, %c0_76], %122 {strides = array<i32>} : memref<128x1024xbf16, #tpu.memory_space<vmem>>, vector<8x1024xbf16>,
    %c0_77 = arith.constant 0 : index
    %c10 = arith.constant 10 : index
    %c0_78 = arith.constant 0 : index
    %c0_79 = arith.constant 0 : index
    %124 = vector.load %arg1[%c0_77, %c10, %c0_78, %c0_79] : memref<2x18x9x128xbf16, #tpu.memory_space<vmem>>, vector<1x4x9x128xbf16>
    %125 = vector.shape_cast %124 : vector<1x4x9x128xbf16> to vector<4x9x128xbf16>
    %126 = vector.extract_strided_slice %125 {offsets = [0, 0, 0], sizes = [1, 9, 128], strides = [1, 1, 1]} : vector<4x9x128xbf16> to vector<1x9x128xbf16>
    %127 = vector.shape_cast %126 : vector<1x9x128xbf16> to vector<9x128xbf16>
    %128 = vector.extract_strided_slice %127 {offsets = [0, 0], sizes = [8, 128], strides = [1, 1]} : vector<9x128xbf16> to vector<8x128xbf16>
    %129 = vector.extract_strided_slice %127 {offsets = [1, 0], sizes = [8, 128], strides = [1, 1]} : vector<9x128xbf16> to vector<8x128xbf16>
    %130 = vector.extract_strided_slice %125 {offsets = [1, 0, 0], sizes = [1, 9, 128], strides = [1, 1, 1]} : vector<4x9x128xbf16> to vector<1x9x128xbf16>
    %131 = vector.shape_cast %130 : vector<1x9x128xbf16> to vector<9x128xbf16>
    %132 = vector.extract_strided_slice %131 {offsets = [0, 0], sizes = [8, 128], strides = [1, 1]} : vector<9x128xbf16> to vector<8x128xbf16>
    %133 = vector.extract_strided_slice %131 {offsets = [1, 0], sizes = [8, 128], strides = [1, 1]} : vector<9x128xbf16> to vector<8x128xbf16>
    %134 = vector.extract_strided_slice %125 {offsets = [2, 0, 0], sizes = [1, 9, 128], strides = [1, 1, 1]} : vector<4x9x128xbf16> to vector<1x9x128xbf16>
    %135 = vector.shape_cast %134 : vector<1x9x128xbf16> to vector<9x128xbf16>
    %136 = vector.extract_strided_slice %135 {offsets = [0, 0], sizes = [8, 128], strides = [1, 1]} : vector<9x128xbf16> to vector<8x128xbf16>
    %137 = vector.extract_strided_slice %135 {offsets = [1, 0], sizes = [8, 128], strides = [1, 1]} : vector<9x128xbf16> to vector<8x128xbf16>
    %138 = vector.extract_strided_slice %125 {offsets = [3, 0, 0], sizes = [1, 9, 128], strides = [1, 1, 1]} : vector<4x9x128xbf16> to vector<1x9x128xbf16>
    %139 = vector.shape_cast %138 : vector<1x9x128xbf16> to vector<9x128xbf16>
    %140 = vector.extract_strided_slice %139 {offsets = [0, 0], sizes = [8, 128], strides = [1, 1]} : vector<9x128xbf16> to vector<8x128xbf16>
    %141 = vector.extract_strided_slice %139 {offsets = [1, 0], sizes = [8, 128], strides = [1, 1]} : vector<9x128xbf16> to vector<8x128xbf16>
    %142 = tpu.concatenate %128, %129, %132, %133, %136, %137, %140, %141 in 1 : vector<8x128xbf16>, vector<8x128xbf16>, vector<8x128xbf16>, vector<8x128xbf16>, vector<8x128xbf16>, vector<8x128xbf16>, vector<8x128xbf16>, vector<8x128xbf16> -> vector<8x1024xbf16>
    %c40 = arith.constant 40 : index
    %c0_80 = arith.constant 0 : index
    %143 = vector.load %arg21[%c40, %c0_80] : memref<128x1024xbf16, #tpu.memory_space<vmem>>, vector<8x1024xbf16>
    tpu.vector_store %arg21[%c40, %c0_80], %142 {strides = array<i32>} : memref<128x1024xbf16, #tpu.memory_space<vmem>>, vector<8x1024xbf16>,
    %c0_81 = arith.constant 0 : index
    %c12 = arith.constant 12 : index
    %c0_82 = arith.constant 0 : index
    %c0_83 = arith.constant 0 : index
    %144 = vector.load %arg1[%c0_81, %c12, %c0_82, %c0_83] : memref<2x18x9x128xbf16, #tpu.memory_space<vmem>>, vector<1x4x9x128xbf16>
    %145 = vector.shape_cast %144 : vector<1x4x9x128xbf16> to vector<4x9x128xbf16>
    %146 = vector.extract_strided_slice %145 {offsets = [0, 0, 0], sizes = [1, 9, 128], strides = [1, 1, 1]} : vector<4x9x128xbf16> to vector<1x9x128xbf16>
    %147 = vector.shape_cast %146 : vector<1x9x128xbf16> to vector<9x128xbf16>
    %148 = vector.extract_strided_slice %147 {offsets = [0, 0], sizes = [8, 128], strides = [1, 1]} : vector<9x128xbf16> to vector<8x128xbf16>
    %149 = vector.extract_strided_slice %147 {offsets = [1, 0], sizes = [8, 128], strides = [1, 1]} : vector<9x128xbf16> to vector<8x128xbf16>
    %150 = vector.extract_strided_slice %145 {offsets = [1, 0, 0], sizes = [1, 9, 128], strides = [1, 1, 1]} : vector<4x9x128xbf16> to vector<1x9x128xbf16>
    %151 = vector.shape_cast %150 : vector<1x9x128xbf16> to vector<9x128xbf16>
    %152 = vector.extract_strided_slice %151 {offsets = [0, 0], sizes = [8, 128], strides = [1, 1]} : vector<9x128xbf16> to vector<8x128xbf16>
    %153 = vector.extract_strided_slice %151 {offsets = [1, 0], sizes = [8, 128], strides = [1, 1]} : vector<9x128xbf16> to vector<8x128xbf16>
    %154 = vector.extract_strided_slice %145 {offsets = [2, 0, 0], sizes = [1, 9, 128], strides = [1, 1, 1]} : vector<4x9x128xbf16> to vector<1x9x128xbf16>
    %155 = vector.shape_cast %154 : vector<1x9x128xbf16> to vector<9x128xbf16>
    %156 = vector.extract_strided_slice %155 {offsets = [0, 0], sizes = [8, 128], strides = [1, 1]} : vector<9x128xbf16> to vector<8x128xbf16>
    %157 = vector.extract_strided_slice %155 {offsets = [1, 0], sizes = [8, 128], strides = [1, 1]} : vector<9x128xbf16> to vector<8x128xbf16>
    %158 = vector.extract_strided_slice %145 {offsets = [3, 0, 0], sizes = [1, 9, 128], strides = [1, 1, 1]} : vector<4x9x128xbf16> to vector<1x9x128xbf16>
    %159 = vector.shape_cast %158 : vector<1x9x128xbf16> to vector<9x128xbf16>
    %160 = vector.extract_strided_slice %159 {offsets = [0, 0], sizes = [8, 128], strides = [1, 1]} : vector<9x128xbf16> to vector<8x128xbf16>
    %161 = vector.extract_strided_slice %159 {offsets = [1, 0], sizes = [8, 128], strides = [1, 1]} : vector<9x128xbf16> to vector<8x128xbf16>
    %162 = tpu.concatenate %148, %149, %152, %153, %156, %157, %160, %161 in 1 : vector<8x128xbf16>, vector<8x128xbf16>, vector<8x128xbf16>, vector<8x128xbf16>, vector<8x128xbf16>, vector<8x128xbf16>, vector<8x128xbf16>, vector<8x128xbf16> -> vector<8x1024xbf16>
    %c48 = arith.constant 48 : index
    %c0_84 = arith.constant 0 : index
    %163 = vector.load %arg21[%c48, %c0_84] : memref<128x1024xbf16, #tpu.memory_space<vmem>>, vector<8x1024xbf16>
    tpu.vector_store %arg21[%c48, %c0_84], %162 {strides = array<i32>} : memref<128x1024xbf16, #tpu.memory_space<vmem>>, vector<8x1024xbf16>,
    %c0_85 = arith.constant 0 : index
    %c14 = arith.constant 14 : index
    %c0_86 = arith.constant 0 : index
    %c0_87 = arith.constant 0 : index
    %164 = vector.load %arg1[%c0_85, %c14, %c0_86, %c0_87] : memref<2x18x9x128xbf16, #tpu.memory_space<vmem>>, vector<1x4x9x128xbf16>
    %165 = vector.shape_cast %164 : vector<1x4x9x128xbf16> to vector<4x9x128xbf16>
    %166 = vector.extract_strided_slice %165 {offsets = [0, 0, 0], sizes = [1, 9, 128], strides = [1, 1, 1]} : vector<4x9x128xbf16> to vector<1x9x128xbf16>
    %167 = vector.shape_cast %166 : vector<1x9x128xbf16> to vector<9x128xbf16>
    %168 = vector.extract_strided_slice %167 {offsets = [0, 0], sizes = [8, 128], strides = [1, 1]} : vector<9x128xbf16> to vector<8x128xbf16>
    %169 = vector.extract_strided_slice %167 {offsets = [1, 0], sizes = [8, 128], strides = [1, 1]} : vector<9x128xbf16> to vector<8x128xbf16>
    %170 = vector.extract_strided_slice %165 {offsets = [1, 0, 0], sizes = [1, 9, 128], strides = [1, 1, 1]} : vector<4x9x128xbf16> to vector<1x9x128xbf16>
    %171 = vector.shape_cast %170 : vector<1x9x128xbf16> to vector<9x128xbf16>
    %172 = vector.extract_strided_slice %171 {offsets = [0, 0], sizes = [8, 128], strides = [1, 1]} : vector<9x128xbf16> to vector<8x128xbf16>
    %173 = vector.extract_strided_slice %171 {offsets = [1, 0], sizes = [8, 128], strides = [1, 1]} : vector<9x128xbf16> to vector<8x128xbf16>
    %174 = vector.extract_strided_slice %165 {offsets = [2, 0, 0], sizes = [1, 9, 128], strides = [1, 1, 1]} : vector<4x9x128xbf16> to vector<1x9x128xbf16>
    %175 = vector.shape_cast %174 : vector<1x9x128xbf16> to vector<9x128xbf16>
    %176 = vector.extract_strided_slice %175 {offsets = [0, 0], sizes = [8, 128], strides = [1, 1]} : vector<9x128xbf16> to vector<8x128xbf16>
    %177 = vector.extract_strided_slice %175 {offsets = [1, 0], sizes = [8, 128], strides = [1, 1]} : vector<9x128xbf16> to vector<8x128xbf16>
    %178 = vector.extract_strided_slice %165 {offsets = [3, 0, 0], sizes = [1, 9, 128], strides = [1, 1, 1]} : vector<4x9x128xbf16> to vector<1x9x128xbf16>
    %179 = vector.shape_cast %178 : vector<1x9x128xbf16> to vector<9x128xbf16>
    %180 = vector.extract_strided_slice %179 {offsets = [0, 0], sizes = [8, 128], strides = [1, 1]} : vector<9x128xbf16> to vector<8x128xbf16>
    %181 = vector.extract_strided_slice %179 {offsets = [1, 0], sizes = [8, 128], strides = [1, 1]} : vector<9x128xbf16> to vector<8x128xbf16>
    %182 = tpu.concatenate %168, %169, %172, %173, %176, %177, %180, %181 in 1 : vector<8x128xbf16>, vector<8x128xbf16>, vector<8x128xbf16>, vector<8x128xbf16>, vector<8x128xbf16>, vector<8x128xbf16>, vector<8x128xbf16>, vector<8x128xbf16> -> vector<8x1024xbf16>
    %c56 = arith.constant 56 : index
    %c0_88 = arith.constant 0 : index
    %183 = vector.load %arg21[%c56, %c0_88] : memref<128x1024xbf16, #tpu.memory_space<vmem>>, vector<8x1024xbf16>
    tpu.vector_store %arg21[%c56, %c0_88], %182 {strides = array<i32>} : memref<128x1024xbf16, #tpu.memory_space<vmem>>, vector<8x1024xbf16>,
    %c1_89 = arith.constant 1 : index
    %c0_90 = arith.constant 0 : index
    %c0_91 = arith.constant 0 : index
    %c0_92 = arith.constant 0 : index
    %184 = vector.load %arg1[%c1_89, %c0_90, %c0_91, %c0_92] : memref<2x18x9x128xbf16, #tpu.memory_space<vmem>>, vector<1x4x9x128xbf16>
    %185 = vector.shape_cast %184 : vector<1x4x9x128xbf16> to vector<4x9x128xbf16>
    %186 = vector.extract_strided_slice %185 {offsets = [0, 0, 0], sizes = [1, 9, 128], strides = [1, 1, 1]} : vector<4x9x128xbf16> to vector<1x9x128xbf16>
    %187 = vector.shape_cast %186 : vector<1x9x128xbf16> to vector<9x128xbf16>
    %188 = vector.extract_strided_slice %187 {offsets = [0, 0], sizes = [8, 128], strides = [1, 1]} : vector<9x128xbf16> to vector<8x128xbf16>
    %189 = vector.extract_strided_slice %187 {offsets = [1, 0], sizes = [8, 128], strides = [1, 1]} : vector<9x128xbf16> to vector<8x128xbf16>
    %190 = vector.extract_strided_slice %185 {offsets = [1, 0, 0], sizes = [1, 9, 128], strides = [1, 1, 1]} : vector<4x9x128xbf16> to vector<1x9x128xbf16>
    %191 = vector.shape_cast %190 : vector<1x9x128xbf16> to vector<9x128xbf16>
    %192 = vector.extract_strided_slice %191 {offsets = [0, 0], sizes = [8, 128], strides = [1, 1]} : vector<9x128xbf16> to vector<8x128xbf16>
    %193 = vector.extract_strided_slice %191 {offsets = [1, 0], sizes = [8, 128], strides = [1, 1]} : vector<9x128xbf16> to vector<8x128xbf16>
    %194 = vector.extract_strided_slice %185 {offsets = [2, 0, 0], sizes = [1, 9, 128], strides = [1, 1, 1]} : vector<4x9x128xbf16> to vector<1x9x128xbf16>
    %195 = vector.shape_cast %194 : vector<1x9x128xbf16> to vector<9x128xbf16>
    %196 = vector.extract_strided_slice %195 {offsets = [0, 0], sizes = [8, 128], strides = [1, 1]} : vector<9x128xbf16> to vector<8x128xbf16>
    %197 = vector.extract_strided_slice %195 {offsets = [1, 0], sizes = [8, 128], strides = [1, 1]} : vector<9x128xbf16> to vector<8x128xbf16>
    %198 = vector.extract_strided_slice %185 {offsets = [3, 0, 0], sizes = [1, 9, 128], strides = [1, 1, 1]} : vector<4x9x128xbf16> to vector<1x9x128xbf16>
    %199 = vector.shape_cast %198 : vector<1x9x128xbf16> to vector<9x128xbf16>
    %200 = vector.extract_strided_slice %199 {offsets = [0, 0], sizes = [8, 128], strides = [1, 1]} : vector<9x128xbf16> to vector<8x128xbf16>
    %201 = vector.extract_strided_slice %199 {offsets = [1, 0], sizes = [8, 128], strides = [1, 1]} : vector<9x128xbf16> to vector<8x128xbf16>
    %202 = tpu.concatenate %188, %189, %192, %193, %196, %197, %200, %201 in 1 : vector<8x128xbf16>, vector<8x128xbf16>, vector<8x128xbf16>, vector<8x128xbf16>, vector<8x128xbf16>, vector<8x128xbf16>, vector<8x128xbf16>, vector<8x128xbf16> -> vector<8x1024xbf16>
    %c64 = arith.constant 64 : index
    %c0_93 = arith.constant 0 : index
    %203 = vector.load %arg21[%c64, %c0_93] : memref<128x1024xbf16, #tpu.memory_space<vmem>>, vector<8x1024xbf16>
    tpu.vector_store %arg21[%c64, %c0_93], %202 {strides = array<i32>} : memref<128x1024xbf16, #tpu.memory_space<vmem>>, vector<8x1024xbf16>,
    %c1_94 = arith.constant 1 : index
    %c2_95 = arith.constant 2 : index
    %c0_96 = arith.constant 0 : index
    %c0_97 = arith.constant 0 : index
    %204 = vector.load %arg1[%c1_94, %c2_95, %c0_96, %c0_97] : memref<2x18x9x128xbf16, #tpu.memory_space<vmem>>, vector<1x4x9x128xbf16>
    %205 = vector.shape_cast %204 : vector<1x4x9x128xbf16> to vector<4x9x128xbf16>
    %206 = vector.extract_strided_slice %205 {offsets = [0, 0, 0], sizes = [1, 9, 128], strides = [1, 1, 1]} : vector<4x9x128xbf16> to vector<1x9x128xbf16>
    %207 = vector.shape_cast %206 : vector<1x9x128xbf16> to vector<9x128xbf16>
    %208 = vector.extract_strided_slice %207 {offsets = [0, 0], sizes = [8, 128], strides = [1, 1]} : vector<9x128xbf16> to vector<8x128xbf16>
    %209 = vector.extract_strided_slice %207 {offsets = [1, 0], sizes = [8, 128], strides = [1, 1]} : vector<9x128xbf16> to vector<8x128xbf16>
    %210 = vector.extract_strided_slice %205 {offsets = [1, 0, 0], sizes = [1, 9, 128], strides = [1, 1, 1]} : vector<4x9x128xbf16> to vector<1x9x128xbf16>
    %211 = vector.shape_cast %210 : vector<1x9x128xbf16> to vector<9x128xbf16>
    %212 = vector.extract_strided_slice %211 {offsets = [0, 0], sizes = [8, 128], strides = [1, 1]} : vector<9x128xbf16> to vector<8x128xbf16>
    %213 = vector.extract_strided_slice %211 {offsets = [1, 0], sizes = [8, 128], strides = [1, 1]} : vector<9x128xbf16> to vector<8x128xbf16>
    %214 = vector.extract_strided_slice %205 {offsets = [2, 0, 0], sizes = [1, 9, 128], strides = [1, 1, 1]} : vector<4x9x128xbf16> to vector<1x9x128xbf16>
    %215 = vector.shape_cast %214 : vector<1x9x128xbf16> to vector<9x128xbf16>
    %216 = vector.extract_strided_slice %215 {offsets = [0, 0], sizes = [8, 128], strides = [1, 1]} : vector<9x128xbf16> to vector<8x128xbf16>
    %217 = vector.extract_strided_slice %215 {offsets = [1, 0], sizes = [8, 128], strides = [1, 1]} : vector<9x128xbf16> to vector<8x128xbf16>
    %218 = vector.extract_strided_slice %205 {offsets = [3, 0, 0], sizes = [1, 9, 128], strides = [1, 1, 1]} : vector<4x9x128xbf16> to vector<1x9x128xbf16>
    %219 = vector.shape_cast %218 : vector<1x9x128xbf16> to vector<9x128xbf16>
    %220 = vector.extract_strided_slice %219 {offsets = [0, 0], sizes = [8, 128], strides = [1, 1]} : vector<9x128xbf16> to vector<8x128xbf16>
    %221 = vector.extract_strided_slice %219 {offsets = [1, 0], sizes = [8, 128], strides = [1, 1]} : vector<9x128xbf16> to vector<8x128xbf16>
    %222 = tpu.concatenate %208, %209, %212, %213, %216, %217, %220, %221 in 1 : vector<8x128xbf16>, vector<8x128xbf16>, vector<8x128xbf16>, vector<8x128xbf16>, vector<8x128xbf16>, vector<8x128xbf16>, vector<8x128xbf16>, vector<8x128xbf16> -> vector<8x1024xbf16>
    %c72 = arith.constant 72 : index
    %c0_98 = arith.constant 0 : index
    %223 = vector.load %arg21[%c72, %c0_98] : memref<128x1024xbf16, #tpu.memory_space<vmem>>, vector<8x1024xbf16>
    tpu.vector_store %arg21[%c72, %c0_98], %222 {strides = array<i32>} : memref<128x1024xbf16, #tpu.memory_space<vmem>>, vector<8x1024xbf16>,
    %c1_99 = arith.constant 1 : index
    %c4_100 = arith.constant 4 : index
    %c0_101 = arith.constant 0 : index
    %c0_102 = arith.constant 0 : index
    %224 = vector.load %arg1[%c1_99, %c4_100, %c0_101, %c0_102] : memref<2x18x9x128xbf16, #tpu.memory_space<vmem>>, vector<1x4x9x128xbf16>
    %225 = vector.shape_cast %224 : vector<1x4x9x128xbf16> to vector<4x9x128xbf16>
    %226 = vector.extract_strided_slice %225 {offsets = [0, 0, 0], sizes = [1, 9, 128], strides = [1, 1, 1]} : vector<4x9x128xbf16> to vector<1x9x128xbf16>
    %227 = vector.shape_cast %226 : vector<1x9x128xbf16> to vector<9x128xbf16>
    %228 = vector.extract_strided_slice %227 {offsets = [0, 0], sizes = [8, 128], strides = [1, 1]} : vector<9x128xbf16> to vector<8x128xbf16>
    %229 = vector.extract_strided_slice %227 {offsets = [1, 0], sizes = [8, 128], strides = [1, 1]} : vector<9x128xbf16> to vector<8x128xbf16>
    %230 = vector.extract_strided_slice %225 {offsets = [1, 0, 0], sizes = [1, 9, 128], strides = [1, 1, 1]} : vector<4x9x128xbf16> to vector<1x9x128xbf16>
    %231 = vector.shape_cast %230 : vector<1x9x128xbf16> to vector<9x128xbf16>
    %232 = vector.extract_strided_slice %231 {offsets = [0, 0], sizes = [8, 128], strides = [1, 1]} : vector<9x128xbf16> to vector<8x128xbf16>
    %233 = vector.extract_strided_slice %231 {offsets = [1, 0], sizes = [8, 128], strides = [1, 1]} : vector<9x128xbf16> to vector<8x128xbf16>
    %234 = vector.extract_strided_slice %225 {offsets = [2, 0, 0], sizes = [1, 9, 128], strides = [1, 1, 1]} : vector<4x9x128xbf16> to vector<1x9x128xbf16>
    %235 = vector.shape_cast %234 : vector<1x9x128xbf16> to vector<9x128xbf16>
    %236 = vector.extract_strided_slice %235 {offsets = [0, 0], sizes = [8, 128], strides = [1, 1]} : vector<9x128xbf16> to vector<8x128xbf16>
    %237 = vector.extract_strided_slice %235 {offsets = [1, 0], sizes = [8, 128], strides = [1, 1]} : vector<9x128xbf16> to vector<8x128xbf16>
    %238 = vector.extract_strided_slice %225 {offsets = [3, 0, 0], sizes = [1, 9, 128], strides = [1, 1, 1]} : vector<4x9x128xbf16> to vector<1x9x128xbf16>
    %239 = vector.shape_cast %238 : vector<1x9x128xbf16> to vector<9x128xbf16>
    %240 = vector.extract_strided_slice %239 {offsets = [0, 0], sizes = [8, 128], strides = [1, 1]} : vector<9x128xbf16> to vector<8x128xbf16>
    %241 = vector.extract_strided_slice %239 {offsets = [1, 0], sizes = [8, 128], strides = [1, 1]} : vector<9x128xbf16> to vector<8x128xbf16>
    %242 = tpu.concatenate %228, %229, %232, %233, %236, %237, %240, %241 in 1 : vector<8x128xbf16>, vector<8x128xbf16>, vector<8x128xbf16>, vector<8x128xbf16>, vector<8x128xbf16>, vector<8x128xbf16>, vector<8x128xbf16>, vector<8x128xbf16> -> vector<8x1024xbf16>
    %c80 = arith.constant 80 : index
    %c0_103 = arith.constant 0 : index
    %243 = vector.load %arg21[%c80, %c0_103] : memref<128x1024xbf16, #tpu.memory_space<vmem>>, vector<8x1024xbf16>
    tpu.vector_store %arg21[%c80, %c0_103], %242 {strides = array<i32>} : memref<128x1024xbf16, #tpu.memory_space<vmem>>, vector<8x1024xbf16>,
    %c1_104 = arith.constant 1 : index
    %c6_105 = arith.constant 6 : index
    %c0_106 = arith.constant 0 : index
    %c0_107 = arith.constant 0 : index
    %244 = vector.load %arg1[%c1_104, %c6_105, %c0_106, %c0_107] : memref<2x18x9x128xbf16, #tpu.memory_space<vmem>>, vector<1x4x9x128xbf16>
    %245 = vector.shape_cast %244 : vector<1x4x9x128xbf16> to vector<4x9x128xbf16>
    %246 = vector.extract_strided_slice %245 {offsets = [0, 0, 0], sizes = [1, 9, 128], strides = [1, 1, 1]} : vector<4x9x128xbf16> to vector<1x9x128xbf16>
    %247 = vector.shape_cast %246 : vector<1x9x128xbf16> to vector<9x128xbf16>
    %248 = vector.extract_strided_slice %247 {offsets = [0, 0], sizes = [8, 128], strides = [1, 1]} : vector<9x128xbf16> to vector<8x128xbf16>
    %249 = vector.extract_strided_slice %247 {offsets = [1, 0], sizes = [8, 128], strides = [1, 1]} : vector<9x128xbf16> to vector<8x128xbf16>
    %250 = vector.extract_strided_slice %245 {offsets = [1, 0, 0], sizes = [1, 9, 128], strides = [1, 1, 1]} : vector<4x9x128xbf16> to vector<1x9x128xbf16>
    %251 = vector.shape_cast %250 : vector<1x9x128xbf16> to vector<9x128xbf16>
    %252 = vector.extract_strided_slice %251 {offsets = [0, 0], sizes = [8, 128], strides = [1, 1]} : vector<9x128xbf16> to vector<8x128xbf16>
    %253 = vector.extract_strided_slice %251 {offsets = [1, 0], sizes = [8, 128], strides = [1, 1]} : vector<9x128xbf16> to vector<8x128xbf16>
    %254 = vector.extract_strided_slice %245 {offsets = [2, 0, 0], sizes = [1, 9, 128], strides = [1, 1, 1]} : vector<4x9x128xbf16> to vector<1x9x128xbf16>
    %255 = vector.shape_cast %254 : vector<1x9x128xbf16> to vector<9x128xbf16>
    %256 = vector.extract_strided_slice %255 {offsets = [0, 0], sizes = [8, 128], strides = [1, 1]} : vector<9x128xbf16> to vector<8x128xbf16>
    %257 = vector.extract_strided_slice %255 {offsets = [1, 0], sizes = [8, 128], strides = [1, 1]} : vector<9x128xbf16> to vector<8x128xbf16>
    %258 = vector.extract_strided_slice %245 {offsets = [3, 0, 0], sizes = [1, 9, 128], strides = [1, 1, 1]} : vector<4x9x128xbf16> to vector<1x9x128xbf16>
    %259 = vector.shape_cast %258 : vector<1x9x128xbf16> to vector<9x128xbf16>
    %260 = vector.extract_strided_slice %259 {offsets = [0, 0], sizes = [8, 128], strides = [1, 1]} : vector<9x128xbf16> to vector<8x128xbf16>
    %261 = vector.extract_strided_slice %259 {offsets = [1, 0], sizes = [8, 128], strides = [1, 1]} : vector<9x128xbf16> to vector<8x128xbf16>
    %262 = tpu.concatenate %248, %249, %252, %253, %256, %257, %260, %261 in 1 : vector<8x128xbf16>, vector<8x128xbf16>, vector<8x128xbf16>, vector<8x128xbf16>, vector<8x128xbf16>, vector<8x128xbf16>, vector<8x128xbf16>, vector<8x128xbf16> -> vector<8x1024xbf16>
    %c88 = arith.constant 88 : index
    %c0_108 = arith.constant 0 : index
    %263 = vector.load %arg21[%c88, %c0_108] : memref<128x1024xbf16, #tpu.memory_space<vmem>>, vector<8x1024xbf16>
    tpu.vector_store %arg21[%c88, %c0_108], %262 {strides = array<i32>} : memref<128x1024xbf16, #tpu.memory_space<vmem>>, vector<8x1024xbf16>,
    %c1_109 = arith.constant 1 : index
    %c8_110 = arith.constant 8 : index
    %c0_111 = arith.constant 0 : index
    %c0_112 = arith.constant 0 : index
    %264 = vector.load %arg1[%c1_109, %c8_110, %c0_111, %c0_112] : memref<2x18x9x128xbf16, #tpu.memory_space<vmem>>, vector<1x4x9x128xbf16>
    %265 = vector.shape_cast %264 : vector<1x4x9x128xbf16> to vector<4x9x128xbf16>
    %266 = vector.extract_strided_slice %265 {offsets = [0, 0, 0], sizes = [1, 9, 128], strides = [1, 1, 1]} : vector<4x9x128xbf16> to vector<1x9x128xbf16>
    %267 = vector.shape_cast %266 : vector<1x9x128xbf16> to vector<9x128xbf16>
    %268 = vector.extract_strided_slice %267 {offsets = [0, 0], sizes = [8, 128], strides = [1, 1]} : vector<9x128xbf16> to vector<8x128xbf16>
    %269 = vector.extract_strided_slice %267 {offsets = [1, 0], sizes = [8, 128], strides = [1, 1]} : vector<9x128xbf16> to vector<8x128xbf16>
    %270 = vector.extract_strided_slice %265 {offsets = [1, 0, 0], sizes = [1, 9, 128], strides = [1, 1, 1]} : vector<4x9x128xbf16> to vector<1x9x128xbf16>
    %271 = vector.shape_cast %270 : vector<1x9x128xbf16> to vector<9x128xbf16>
    %272 = vector.extract_strided_slice %271 {offsets = [0, 0], sizes = [8, 128], strides = [1, 1]} : vector<9x128xbf16> to vector<8x128xbf16>
    %273 = vector.extract_strided_slice %271 {offsets = [1, 0], sizes = [8, 128], strides = [1, 1]} : vector<9x128xbf16> to vector<8x128xbf16>
    %274 = vector.extract_strided_slice %265 {offsets = [2, 0, 0], sizes = [1, 9, 128], strides = [1, 1, 1]} : vector<4x9x128xbf16> to vector<1x9x128xbf16>
    %275 = vector.shape_cast %274 : vector<1x9x128xbf16> to vector<9x128xbf16>
    %276 = vector.extract_strided_slice %275 {offsets = [0, 0], sizes = [8, 128], strides = [1, 1]} : vector<9x128xbf16> to vector<8x128xbf16>
    %277 = vector.extract_strided_slice %275 {offsets = [1, 0], sizes = [8, 128], strides = [1, 1]} : vector<9x128xbf16> to vector<8x128xbf16>
    %278 = vector.extract_strided_slice %265 {offsets = [3, 0, 0], sizes = [1, 9, 128], strides = [1, 1, 1]} : vector<4x9x128xbf16> to vector<1x9x128xbf16>
    %279 = vector.shape_cast %278 : vector<1x9x128xbf16> to vector<9x128xbf16>
    %280 = vector.extract_strided_slice %279 {offsets = [0, 0], sizes = [8, 128], strides = [1, 1]} : vector<9x128xbf16> to vector<8x128xbf16>
    %281 = vector.extract_strided_slice %279 {offsets = [1, 0], sizes = [8, 128], strides = [1, 1]} : vector<9x128xbf16> to vector<8x128xbf16>
    %282 = tpu.concatenate %268, %269, %272, %273, %276, %277, %280, %281 in 1 : vector<8x128xbf16>, vector<8x128xbf16>, vector<8x128xbf16>, vector<8x128xbf16>, vector<8x128xbf16>, vector<8x128xbf16>, vector<8x128xbf16>, vector<8x128xbf16> -> vector<8x1024xbf16>
    %c96 = arith.constant 96 : index
    %c0_113 = arith.constant 0 : index
    %283 = vector.load %arg21[%c96, %c0_113] : memref<128x1024xbf16, #tpu.memory_space<vmem>>, vector<8x1024xbf16>
    tpu.vector_store %arg21[%c96, %c0_113], %282 {strides = array<i32>} : memref<128x1024xbf16, #tpu.memory_space<vmem>>, vector<8x1024xbf16>,
    %c1_114 = arith.constant 1 : index
    %c10_115 = arith.constant 10 : index
    %c0_116 = arith.constant 0 : index
    %c0_117 = arith.constant 0 : index
    %284 = vector.load %arg1[%c1_114, %c10_115, %c0_116, %c0_117] : memref<2x18x9x128xbf16, #tpu.memory_space<vmem>>, vector<1x4x9x128xbf16>
    %285 = vector.shape_cast %284 : vector<1x4x9x128xbf16> to vector<4x9x128xbf16>
    %286 = vector.extract_strided_slice %285 {offsets = [0, 0, 0], sizes = [1, 9, 128], strides = [1, 1, 1]} : vector<4x9x128xbf16> to vector<1x9x128xbf16>
    %287 = vector.shape_cast %286 : vector<1x9x128xbf16> to vector<9x128xbf16>
    %288 = vector.extract_strided_slice %287 {offsets = [0, 0], sizes = [8, 128], strides = [1, 1]} : vector<9x128xbf16> to vector<8x128xbf16>
    %289 = vector.extract_strided_slice %287 {offsets = [1, 0], sizes = [8, 128], strides = [1, 1]} : vector<9x128xbf16> to vector<8x128xbf16>
    %290 = vector.extract_strided_slice %285 {offsets = [1, 0, 0], sizes = [1, 9, 128], strides = [1, 1, 1]} : vector<4x9x128xbf16> to vector<1x9x128xbf16>
    %291 = vector.shape_cast %290 : vector<1x9x128xbf16> to vector<9x128xbf16>
    %292 = vector.extract_strided_slice %291 {offsets = [0, 0], sizes = [8, 128], strides = [1, 1]} : vector<9x128xbf16> to vector<8x128xbf16>
    %293 = vector.extract_strided_slice %291 {offsets = [1, 0], sizes = [8, 128], strides = [1, 1]} : vector<9x128xbf16> to vector<8x128xbf16>
    %294 = vector.extract_strided_slice %285 {offsets = [2, 0, 0], sizes = [1, 9, 128], strides = [1, 1, 1]} : vector<4x9x128xbf16> to vector<1x9x128xbf16>
    %295 = vector.shape_cast %294 : vector<1x9x128xbf16> to vector<9x128xbf16>
    %296 = vector.extract_strided_slice %295 {offsets = [0, 0], sizes = [8, 128], strides = [1, 1]} : vector<9x128xbf16> to vector<8x128xbf16>
    %297 = vector.extract_strided_slice %295 {offsets = [1, 0], sizes = [8, 128], strides = [1, 1]} : vector<9x128xbf16> to vector<8x128xbf16>
    %298 = vector.extract_strided_slice %285 {offsets = [3, 0, 0], sizes = [1, 9, 128], strides = [1, 1, 1]} : vector<4x9x128xbf16> to vector<1x9x128xbf16>
    %299 = vector.shape_cast %298 : vector<1x9x128xbf16> to vector<9x128xbf16>
    %300 = vector.extract_strided_slice %299 {offsets = [0, 0], sizes = [8, 128], strides = [1, 1]} : vector<9x128xbf16> to vector<8x128xbf16>
    %301 = vector.extract_strided_slice %299 {offsets = [1, 0], sizes = [8, 128], strides = [1, 1]} : vector<9x128xbf16> to vector<8x128xbf16>
    %302 = tpu.concatenate %288, %289, %292, %293, %296, %297, %300, %301 in 1 : vector<8x128xbf16>, vector<8x128xbf16>, vector<8x128xbf16>, vector<8x128xbf16>, vector<8x128xbf16>, vector<8x128xbf16>, vector<8x128xbf16>, vector<8x128xbf16> -> vector<8x1024xbf16>
    %c104 = arith.constant 104 : index
    %c0_118 = arith.constant 0 : index
    %303 = vector.load %arg21[%c104, %c0_118] : memref<128x1024xbf16, #tpu.memory_space<vmem>>, vector<8x1024xbf16>
    tpu.vector_store %arg21[%c104, %c0_118], %302 {strides = array<i32>} : memref<128x1024xbf16, #tpu.memory_space<vmem>>, vector<8x1024xbf16>,
    %c1_119 = arith.constant 1 : index
    %c12_120 = arith.constant 12 : index
    %c0_121 = arith.constant 0 : index
    %c0_122 = arith.constant 0 : index
    %304 = vector.load %arg1[%c1_119, %c12_120, %c0_121, %c0_122] : memref<2x18x9x128xbf16, #tpu.memory_space<vmem>>, vector<1x4x9x128xbf16>
    %305 = vector.shape_cast %304 : vector<1x4x9x128xbf16> to vector<4x9x128xbf16>
    %306 = vector.extract_strided_slice %305 {offsets = [0, 0, 0], sizes = [1, 9, 128], strides = [1, 1, 1]} : vector<4x9x128xbf16> to vector<1x9x128xbf16>
    %307 = vector.shape_cast %306 : vector<1x9x128xbf16> to vector<9x128xbf16>
    %308 = vector.extract_strided_slice %307 {offsets = [0, 0], sizes = [8, 128], strides = [1, 1]} : vector<9x128xbf16> to vector<8x128xbf16>
    %309 = vector.extract_strided_slice %307 {offsets = [1, 0], sizes = [8, 128], strides = [1, 1]} : vector<9x128xbf16> to vector<8x128xbf16>
    %310 = vector.extract_strided_slice %305 {offsets = [1, 0, 0], sizes = [1, 9, 128], strides = [1, 1, 1]} : vector<4x9x128xbf16> to vector<1x9x128xbf16>
    %311 = vector.shape_cast %310 : vector<1x9x128xbf16> to vector<9x128xbf16>
    %312 = vector.extract_strided_slice %311 {offsets = [0, 0], sizes = [8, 128], strides = [1, 1]} : vector<9x128xbf16> to vector<8x128xbf16>
    %313 = vector.extract_strided_slice %311 {offsets = [1, 0], sizes = [8, 128], strides = [1, 1]} : vector<9x128xbf16> to vector<8x128xbf16>
    %314 = vector.extract_strided_slice %305 {offsets = [2, 0, 0], sizes = [1, 9, 128], strides = [1, 1, 1]} : vector<4x9x128xbf16> to vector<1x9x128xbf16>
    %315 = vector.shape_cast %314 : vector<1x9x128xbf16> to vector<9x128xbf16>
    %316 = vector.extract_strided_slice %315 {offsets = [0, 0], sizes = [8, 128], strides = [1, 1]} : vector<9x128xbf16> to vector<8x128xbf16>
    %317 = vector.extract_strided_slice %315 {offsets = [1, 0], sizes = [8, 128], strides = [1, 1]} : vector<9x128xbf16> to vector<8x128xbf16>
    %318 = vector.extract_strided_slice %305 {offsets = [3, 0, 0], sizes = [1, 9, 128], strides = [1, 1, 1]} : vector<4x9x128xbf16> to vector<1x9x128xbf16>
    %319 = vector.shape_cast %318 : vector<1x9x128xbf16> to vector<9x128xbf16>
    %320 = vector.extract_strided_slice %319 {offsets = [0, 0], sizes = [8, 128], strides = [1, 1]} : vector<9x128xbf16> to vector<8x128xbf16>
    %321 = vector.extract_strided_slice %319 {offsets = [1, 0], sizes = [8, 128], strides = [1, 1]} : vector<9x128xbf16> to vector<8x128xbf16>
    %322 = tpu.concatenate %308, %309, %312, %313, %316, %317, %320, %321 in 1 : vector<8x128xbf16>, vector<8x128xbf16>, vector<8x128xbf16>, vector<8x128xbf16>, vector<8x128xbf16>, vector<8x128xbf16>, vector<8x128xbf16>, vector<8x128xbf16> -> vector<8x1024xbf16>
    %c112 = arith.constant 112 : index
    %c0_123 = arith.constant 0 : index
    %323 = vector.load %arg21[%c112, %c0_123] : memref<128x1024xbf16, #tpu.memory_space<vmem>>, vector<8x1024xbf16>
    tpu.vector_store %arg21[%c112, %c0_123], %322 {strides = array<i32>} : memref<128x1024xbf16, #tpu.memory_space<vmem>>, vector<8x1024xbf16>,
    %c1_124 = arith.constant 1 : index
    %c14_125 = arith.constant 14 : index
    %c0_126 = arith.constant 0 : index
    %c0_127 = arith.constant 0 : index
    %324 = vector.load %arg1[%c1_124, %c14_125, %c0_126, %c0_127] : memref<2x18x9x128xbf16, #tpu.memory_space<vmem>>, vector<1x4x9x128xbf16>
    %325 = vector.shape_cast %324 : vector<1x4x9x128xbf16> to vector<4x9x128xbf16>
    %326 = vector.extract_strided_slice %325 {offsets = [0, 0, 0], sizes = [1, 9, 128], strides = [1, 1, 1]} : vector<4x9x128xbf16> to vector<1x9x128xbf16>
    %327 = vector.shape_cast %326 : vector<1x9x128xbf16> to vector<9x128xbf16>
    %328 = vector.extract_strided_slice %327 {offsets = [0, 0], sizes = [8, 128], strides = [1, 1]} : vector<9x128xbf16> to vector<8x128xbf16>
    %329 = vector.extract_strided_slice %327 {offsets = [1, 0], sizes = [8, 128], strides = [1, 1]} : vector<9x128xbf16> to vector<8x128xbf16>
    %330 = vector.extract_strided_slice %325 {offsets = [1, 0, 0], sizes = [1, 9, 128], strides = [1, 1, 1]} : vector<4x9x128xbf16> to vector<1x9x128xbf16>
    %331 = vector.shape_cast %330 : vector<1x9x128xbf16> to vector<9x128xbf16>
    %332 = vector.extract_strided_slice %331 {offsets = [0, 0], sizes = [8, 128], strides = [1, 1]} : vector<9x128xbf16> to vector<8x128xbf16>
    %333 = vector.extract_strided_slice %331 {offsets = [1, 0], sizes = [8, 128], strides = [1, 1]} : vector<9x128xbf16> to vector<8x128xbf16>
    %334 = vector.extract_strided_slice %325 {offsets = [2, 0, 0], sizes = [1, 9, 128], strides = [1, 1, 1]} : vector<4x9x128xbf16> to vector<1x9x128xbf16>
    %335 = vector.shape_cast %334 : vector<1x9x128xbf16> to vector<9x128xbf16>
    %336 = vector.extract_strided_slice %335 {offsets = [0, 0], sizes = [8, 128], strides = [1, 1]} : vector<9x128xbf16> to vector<8x128xbf16>
    %337 = vector.extract_strided_slice %335 {offsets = [1, 0], sizes = [8, 128], strides = [1, 1]} : vector<9x128xbf16> to vector<8x128xbf16>
    %338 = vector.extract_strided_slice %325 {offsets = [3, 0, 0], sizes = [1, 9, 128], strides = [1, 1, 1]} : vector<4x9x128xbf16> to vector<1x9x128xbf16>
    %339 = vector.shape_cast %338 : vector<1x9x128xbf16> to vector<9x128xbf16>
    %340 = vector.extract_strided_slice %339 {offsets = [0, 0], sizes = [8, 128], strides = [1, 1]} : vector<9x128xbf16> to vector<8x128xbf16>
    %341 = vector.extract_strided_slice %339 {offsets = [1, 0], sizes = [8, 128], strides = [1, 1]} : vector<9x128xbf16> to vector<8x128xbf16>
    %342 = tpu.concatenate %328, %329, %332, %333, %336, %337, %340, %341 in 1 : vector<8x128xbf16>, vector<8x128xbf16>, vector<8x128xbf16>, vector<8x128xbf16>, vector<8x128xbf16>, vector<8x128xbf16>, vector<8x128xbf16>, vector<8x128xbf16> -> vector<8x1024xbf16>
    %c120 = arith.constant 120 : index
    %c0_128 = arith.constant 0 : index
    %343 = vector.load %arg21[%c120, %c0_128] : memref<128x1024xbf16, #tpu.memory_space<vmem>>, vector<8x1024xbf16>
    tpu.vector_store %arg21[%c120, %c0_128], %342 {strides = array<i32>} : memref<128x1024xbf16, #tpu.memory_space<vmem>>, vector<8x1024xbf16>,
    %c0_129 = arith.constant 0 : index
    %c0_130 = arith.constant 0 : index
    %344 = vector.load %arg21[%c0_129, %c0_130] : memref<128x1024xbf16, #tpu.memory_space<vmem>>, vector<128x1024xbf16>
    %c0_131 = arith.constant 0 : index
    %c0_132 = arith.constant 0 : index
    %345 = vector.load %arg2[%c0_131, %c0_132] : memref<1024x64xbf16, #tpu.memory_space<vmem>>, vector<1024x64xbf16>
    %cst_133 = arith.constant dense<0.000000e+00> : vector<128x64xf32>
    %346 = tpu.matmul %344, %345, %cst_133 {dimension_numbers = #tpu.dot_dimension_numbers<[1], [0], [0], [1], [0, 0, 1, 1], [], []>} : vector<128x1024xbf16>, vector<1024x64xbf16>, vector<128x64xf32> -> vector<128x64xf32>
    %cst_134 = arith.constant dense<0.000000e+00> : vector<64xf32>
    %347 = vector.multi_reduction <add>, %346, %cst_134 [0] : vector<128x64xf32> to vector<64xf32>
    %348 = vector.shape_cast %347 : vector<64xf32> to vector<1x64xf32>
    %cst_135 = arith.constant 7.812500e-03 : f32
    %349 = vector.broadcast %cst_135 : f32 to vector<1x64xf32>
    %350 = arith.mulf %348, %349 : vector<1x64xf32>
    %351 = vector.broadcast %350 : vector<1x64xf32> to vector<128x64xf32>
    %352 = arith.subf %346, %351 : vector<128x64xf32>
    %353 = arith.mulf %352, %352 : vector<128x64xf32>
    %cst_136 = arith.constant dense<0.000000e+00> : vector<64xf32>
    %354 = vector.multi_reduction <add>, %353, %cst_136 [0] : vector<128x64xf32> to vector<64xf32>
    %355 = vector.shape_cast %354 : vector<64xf32> to vector<1x64xf32>
    %cst_137 = arith.constant 7.812500e-03 : f32
    %356 = vector.broadcast %cst_137 : f32 to vector<1x64xf32>
    %357 = arith.mulf %355, %356 : vector<1x64xf32>
    %c0_138 = arith.constant 0 : index
    %c0_139 = arith.constant 0 : index
    %358 = vector.load %arg3[%c0_138, %c0_139] : memref<1x64xf32, #tpu.memory_space<vmem>>, vector<1x64xf32>
    %cst_140 = arith.constant 9.99999974E-6 : f32
    %359 = vector.broadcast %cst_140 : f32 to vector<1x64xf32>
    %360 = arith.addf %357, %359 : vector<1x64xf32>
    %361 = math.rsqrt %360 : vector<1x64xf32>
    %362 = arith.mulf %358, %361 : vector<1x64xf32>
    %363 = vector.broadcast %362 : vector<1x64xf32> to vector<128x64xf32>
    %364 = arith.mulf %352, %363 : vector<128x64xf32>
    %c0_141 = arith.constant 0 : index
    %c0_142 = arith.constant 0 : index
    %365 = vector.load %arg4[%c0_141, %c0_142] : memref<1x64xf32, #tpu.memory_space<vmem>>, vector<1x64xf32>
    %366 = vector.broadcast %365 : vector<1x64xf32> to vector<128x64xf32>
    %367 = arith.addf %364, %366 : vector<128x64xf32>
    %cst_143 = arith.constant 0.000000e+00 : f32
    %368 = vector.broadcast %cst_143 : f32 to vector<128x64xf32>
    %369 = arith.cmpf oge, %367, %368 : vector<128x64xf32>
    %cst_144 = arith.constant 2.000000e-01 : f32
    %370 = vector.broadcast %cst_144 : f32 to vector<128x64xf32>
    %371 = arith.mulf %370, %367 : vector<128x64xf32>
    %372 = arith.select %369, %367, %371 : vector<128x64xi1>, vector<128x64xf32>
    %c0_145 = arith.constant 0 : index
    %c0_146 = arith.constant 0 : index
    %373 = vector.load %arg25[%c0_145, %c0_146] : memref<128x64xf32, #tpu.memory_space<vmem>>, vector<128x64xf32>
    tpu.vector_store %arg25[%c0_145, %c0_146], %372 {strides = array<i32>} : memref<128x64xf32, #tpu.memory_space<vmem>>, vector<128x64xf32>,
    %c0_147 = arith.constant 0 : index
    %c0_148 = arith.constant 0 : index
    %374 = tpu.strided_load %arg25[%c0_147, %c0_148] {strides = array<i32: 2, 1>} : memref<128x64xf32, #tpu.memory_space<vmem>>, vector<4x64xf32>
    %c1_149 = arith.constant 1 : index
    %c0_150 = arith.constant 0 : index
    %375 = tpu.strided_load %arg25[%c1_149, %c0_150] {strides = array<i32: 2, 1>} : memref<128x64xf32, #tpu.memory_space<vmem>>, vector<4x64xf32>
    %376 = tpu.concatenate %374, %375 in 1 : vector<4x64xf32>, vector<4x64xf32> -> vector<4x128xf32>
    %c0_151 = arith.constant 0 : index
    %c0_152 = arith.constant 0 : index
    %377 = vector.load %arg14[%c0_151, %c0_152] : memref<64x128xf32, #tpu.memory_space<vmem>>, vector<4x128xf32>
    tpu.vector_store %arg14[%c0_151, %c0_152], %376 {strides = array<i32>} : memref<64x128xf32, #tpu.memory_space<vmem>>, vector<4x128xf32>,
    %378 = arith.truncf %375 : vector<4x64xf32> to vector<4x64xbf16>
    %c0_153 = arith.constant 0 : index
    %c1_154 = arith.constant 1 : index
    %c1_155 = arith.constant 1 : index
    %c0_156 = arith.constant 0 : index
    %379 = vector.load %arg18[%c0_153, %c1_154, %c1_155, %c0_156] : memref<2x10x5x128xbf16, #tpu.memory_space<vmem>>, vector<1x1x4x64xbf16>
    %380 = vector.shape_cast %379 : vector<1x1x4x64xbf16> to vector<4x64xbf16>
    %381 = vector.shape_cast %378 : vector<4x64xbf16> to vector<1x1x4x64xbf16>
    tpu.vector_store %arg18[%c0_153, %c1_154, %c1_155, %c0_156], %381 {strides = array<i32>} : memref<2x10x5x128xbf16, #tpu.memory_space<vmem>>, vector<1x1x4x64xbf16>,
    %382 = arith.truncf %374 : vector<4x64xf32> to vector<4x64xbf16>
    %c0_157 = arith.constant 0 : index
    %c1_158 = arith.constant 1 : index
    %c0_159 = arith.constant 0 : index
    %c64_160 = arith.constant 64 : index
    %383 = vector.load %arg18[%c0_157, %c1_158, %c0_159, %c64_160] : memref<2x10x5x128xbf16, #tpu.memory_space<vmem>>, vector<1x1x4x64xbf16>
    %384 = vector.shape_cast %383 : vector<1x1x4x64xbf16> to vector<4x64xbf16>
    %385 = vector.shape_cast %382 : vector<4x64xbf16> to vector<1x1x4x64xbf16>
    tpu.vector_store %arg18[%c0_157, %c1_158, %c0_159, %c64_160], %385 {strides = array<i32>} : memref<2x10x5x128xbf16, #tpu.memory_space<vmem>>, vector<1x1x4x64xbf16>,
    %c8_161 = arith.constant 8 : index
    %c0_162 = arith.constant 0 : index
    %386 = tpu.strided_load %arg25[%c8_161, %c0_162] {strides = array<i32: 2, 1>} : memref<128x64xf32, #tpu.memory_space<vmem>>, vector<4x64xf32>
    %c9_163 = arith.constant 9 : index
    %c0_164 = arith.constant 0 : index
    %387 = tpu.strided_load %arg25[%c9_163, %c0_164] {strides = array<i32: 2, 1>} : memref<128x64xf32, #tpu.memory_space<vmem>>, vector<4x64xf32>
    %388 = tpu.concatenate %386, %387 in 1 : vector<4x64xf32>, vector<4x64xf32> -> vector<4x128xf32>
    %c4_165 = arith.constant 4 : index
    %c0_166 = arith.constant 0 : index
    %389 = vector.load %arg14[%c4_165, %c0_166] : memref<64x128xf32, #tpu.memory_space<vmem>>, vector<4x128xf32>
    tpu.vector_store %arg14[%c4_165, %c0_166], %388 {strides = array<i32>} : memref<64x128xf32, #tpu.memory_space<vmem>>, vector<4x128xf32>,
    %390 = arith.truncf %387 : vector<4x64xf32> to vector<4x64xbf16>
    %c0_167 = arith.constant 0 : index
    %c2_168 = arith.constant 2 : index
    %c1_169 = arith.constant 1 : index
    %c0_170 = arith.constant 0 : index
    %391 = vector.load %arg18[%c0_167, %c2_168, %c1_169, %c0_170] : memref<2x10x5x128xbf16, #tpu.memory_space<vmem>>, vector<1x1x4x64xbf16>
    %392 = vector.shape_cast %391 : vector<1x1x4x64xbf16> to vector<4x64xbf16>
    %393 = vector.shape_cast %390 : vector<4x64xbf16> to vector<1x1x4x64xbf16>
    tpu.vector_store %arg18[%c0_167, %c2_168, %c1_169, %c0_170], %393 {strides = array<i32>} : memref<2x10x5x128xbf16, #tpu.memory_space<vmem>>, vector<1x1x4x64xbf16>,
    %394 = arith.truncf %386 : vector<4x64xf32> to vector<4x64xbf16>
    %c0_171 = arith.constant 0 : index
    %c2_172 = arith.constant 2 : index
    %c0_173 = arith.constant 0 : index
    %c64_174 = arith.constant 64 : index
    %395 = vector.load %arg18[%c0_171, %c2_172, %c0_173, %c64_174] : memref<2x10x5x128xbf16, #tpu.memory_space<vmem>>, vector<1x1x4x64xbf16>
    %396 = vector.shape_cast %395 : vector<1x1x4x64xbf16> to vector<4x64xbf16>
    %397 = vector.shape_cast %394 : vector<4x64xbf16> to vector<1x1x4x64xbf16>
    tpu.vector_store %arg18[%c0_171, %c2_172, %c0_173, %c64_174], %397 {strides = array<i32>} : memref<2x10x5x128xbf16, #tpu.memory_space<vmem>>, vector<1x1x4x64xbf16>,
    %c16_175 = arith.constant 16 : index
    %c0_176 = arith.constant 0 : index
    %398 = tpu.strided_load %arg25[%c16_175, %c0_176] {strides = array<i32: 2, 1>} : memref<128x64xf32, #tpu.memory_space<vmem>>, vector<4x64xf32>
    %c17 = arith.constant 17 : index
    %c0_177 = arith.constant 0 : index
    %399 = tpu.strided_load %arg25[%c17, %c0_177] {strides = array<i32: 2, 1>} : memref<128x64xf32, #tpu.memory_space<vmem>>, vector<4x64xf32>
    %400 = tpu.concatenate %398, %399 in 1 : vector<4x64xf32>, vector<4x64xf32> -> vector<4x128xf32>
    %c8_178 = arith.constant 8 : index
    %c0_179 = arith.constant 0 : index
    %401 = vector.load %arg14[%c8_178, %c0_179] : memref<64x128xf32, #tpu.memory_space<vmem>>, vector<4x128xf32>
    tpu.vector_store %arg14[%c8_178, %c0_179], %400 {strides = array<i32>} : memref<64x128xf32, #tpu.memory_space<vmem>>, vector<4x128xf32>,
    %402 = arith.truncf %399 : vector<4x64xf32> to vector<4x64xbf16>
    %c0_180 = arith.constant 0 : index
    %c3_181 = arith.constant 3 : index
    %c1_182 = arith.constant 1 : index
    %c0_183 = arith.constant 0 : index
    %403 = vector.load %arg18[%c0_180, %c3_181, %c1_182, %c0_183] : memref<2x10x5x128xbf16, #tpu.memory_space<vmem>>, vector<1x1x4x64xbf16>
    %404 = vector.shape_cast %403 : vector<1x1x4x64xbf16> to vector<4x64xbf16>
    %405 = vector.shape_cast %402 : vector<4x64xbf16> to vector<1x1x4x64xbf16>
    tpu.vector_store %arg18[%c0_180, %c3_181, %c1_182, %c0_183], %405 {strides = array<i32>} : memref<2x10x5x128xbf16, #tpu.memory_space<vmem>>, vector<1x1x4x64xbf16>,
    %406 = arith.truncf %398 : vector<4x64xf32> to vector<4x64xbf16>
    %c0_184 = arith.constant 0 : index
    %c3_185 = arith.constant 3 : index
    %c0_186 = arith.constant 0 : index
    %c64_187 = arith.constant 64 : index
    %407 = vector.load %arg18[%c0_184, %c3_185, %c0_186, %c64_187] : memref<2x10x5x128xbf16, #tpu.memory_space<vmem>>, vector<1x1x4x64xbf16>
    %408 = vector.shape_cast %407 : vector<1x1x4x64xbf16> to vector<4x64xbf16>
    %409 = vector.shape_cast %406 : vector<4x64xbf16> to vector<1x1x4x64xbf16>
    tpu.vector_store %arg18[%c0_184, %c3_185, %c0_186, %c64_187], %409 {strides = array<i32>} : memref<2x10x5x128xbf16, #tpu.memory_space<vmem>>, vector<1x1x4x64xbf16>,
    %c24_188 = arith.constant 24 : index
    %c0_189 = arith.constant 0 : index
    %410 = tpu.strided_load %arg25[%c24_188, %c0_189] {strides = array<i32: 2, 1>} : memref<128x64xf32, #tpu.memory_space<vmem>>, vector<4x64xf32>
    %c25 = arith.constant 25 : index
    %c0_190 = arith.constant 0 : index
    %411 = tpu.strided_load %arg25[%c25, %c0_190] {strides = array<i32: 2, 1>} : memref<128x64xf32, #tpu.memory_space<vmem>>, vector<4x64xf32>
    %412 = tpu.concatenate %410, %411 in 1 : vector<4x64xf32>, vector<4x64xf32> -> vector<4x128xf32>
    %c12_191 = arith.constant 12 : index
    %c0_192 = arith.constant 0 : index
    %413 = vector.load %arg14[%c12_191, %c0_192] : memref<64x128xf32, #tpu.memory_space<vmem>>, vector<4x128xf32>
    tpu.vector_store %arg14[%c12_191, %c0_192], %412 {strides = array<i32>} : memref<64x128xf32, #tpu.memory_space<vmem>>, vector<4x128xf32>,
    %414 = arith.truncf %411 : vector<4x64xf32> to vector<4x64xbf16>
    %c0_193 = arith.constant 0 : index
    %c4_194 = arith.constant 4 : index
    %c1_195 = arith.constant 1 : index
    %c0_196 = arith.constant 0 : index
    %415 = vector.load %arg18[%c0_193, %c4_194, %c1_195, %c0_196] : memref<2x10x5x128xbf16, #tpu.memory_space<vmem>>, vector<1x1x4x64xbf16>
    %416 = vector.shape_cast %415 : vector<1x1x4x64xbf16> to vector<4x64xbf16>
    %417 = vector.shape_cast %414 : vector<4x64xbf16> to vector<1x1x4x64xbf16>
    tpu.vector_store %arg18[%c0_193, %c4_194, %c1_195, %c0_196], %417 {strides = array<i32>} : memref<2x10x5x128xbf16, #tpu.memory_space<vmem>>, vector<1x1x4x64xbf16>,
    %418 = arith.truncf %410 : vector<4x64xf32> to vector<4x64xbf16>
    %c0_197 = arith.constant 0 : index
    %c4_198 = arith.constant 4 : index
    %c0_199 = arith.constant 0 : index
    %c64_200 = arith.constant 64 : index
    %419 = vector.load %arg18[%c0_197, %c4_198, %c0_199, %c64_200] : memref<2x10x5x128xbf16, #tpu.memory_space<vmem>>, vector<1x1x4x64xbf16>
    %420 = vector.shape_cast %419 : vector<1x1x4x64xbf16> to vector<4x64xbf16>
    %421 = vector.shape_cast %418 : vector<4x64xbf16> to vector<1x1x4x64xbf16>
    tpu.vector_store %arg18[%c0_197, %c4_198, %c0_199, %c64_200], %421 {strides = array<i32>} : memref<2x10x5x128xbf16, #tpu.memory_space<vmem>>, vector<1x1x4x64xbf16>,
    %c32_201 = arith.constant 32 : index
    %c0_202 = arith.constant 0 : index
    %422 = tpu.strided_load %arg25[%c32_201, %c0_202] {strides = array<i32: 2, 1>} : memref<128x64xf32, #tpu.memory_space<vmem>>, vector<4x64xf32>
    %c33 = arith.constant 33 : index
    %c0_203 = arith.constant 0 : index
    %423 = tpu.strided_load %arg25[%c33, %c0_203] {strides = array<i32: 2, 1>} : memref<128x64xf32, #tpu.memory_space<vmem>>, vector<4x64xf32>
    %424 = tpu.concatenate %422, %423 in 1 : vector<4x64xf32>, vector<4x64xf32> -> vector<4x128xf32>
    %c16_204 = arith.constant 16 : index
    %c0_205 = arith.constant 0 : index
    %425 = vector.load %arg14[%c16_204, %c0_205] : memref<64x128xf32, #tpu.memory_space<vmem>>, vector<4x128xf32>
    tpu.vector_store %arg14[%c16_204, %c0_205], %424 {strides = array<i32>} : memref<64x128xf32, #tpu.memory_space<vmem>>, vector<4x128xf32>,
    %426 = arith.truncf %423 : vector<4x64xf32> to vector<4x64xbf16>
    %c0_206 = arith.constant 0 : index
    %c5_207 = arith.constant 5 : index
    %c1_208 = arith.constant 1 : index
    %c0_209 = arith.constant 0 : index
    %427 = vector.load %arg18[%c0_206, %c5_207, %c1_208, %c0_209] : memref<2x10x5x128xbf16, #tpu.memory_space<vmem>>, vector<1x1x4x64xbf16>
    %428 = vector.shape_cast %427 : vector<1x1x4x64xbf16> to vector<4x64xbf16>
    %429 = vector.shape_cast %426 : vector<4x64xbf16> to vector<1x1x4x64xbf16>
    tpu.vector_store %arg18[%c0_206, %c5_207, %c1_208, %c0_209], %429 {strides = array<i32>} : memref<2x10x5x128xbf16, #tpu.memory_space<vmem>>, vector<1x1x4x64xbf16>,
    %430 = arith.truncf %422 : vector<4x64xf32> to vector<4x64xbf16>
    %c0_210 = arith.constant 0 : index
    %c5_211 = arith.constant 5 : index
    %c0_212 = arith.constant 0 : index
    %c64_213 = arith.constant 64 : index
    %431 = vector.load %arg18[%c0_210, %c5_211, %c0_212, %c64_213] : memref<2x10x5x128xbf16, #tpu.memory_space<vmem>>, vector<1x1x4x64xbf16>
    %432 = vector.shape_cast %431 : vector<1x1x4x64xbf16> to vector<4x64xbf16>
    %433 = vector.shape_cast %430 : vector<4x64xbf16> to vector<1x1x4x64xbf16>
    tpu.vector_store %arg18[%c0_210, %c5_211, %c0_212, %c64_213], %433 {strides = array<i32>} : memref<2x10x5x128xbf16, #tpu.memory_space<vmem>>, vector<1x1x4x64xbf16>,
    %c40_214 = arith.constant 40 : index
    %c0_215 = arith.constant 0 : index
    %434 = tpu.strided_load %arg25[%c40_214, %c0_215] {strides = array<i32: 2, 1>} : memref<128x64xf32, #tpu.memory_space<vmem>>, vector<4x64xf32>
    %c41 = arith.constant 41 : index
    %c0_216 = arith.constant 0 : index
    %435 = tpu.strided_load %arg25[%c41, %c0_216] {strides = array<i32: 2, 1>} : memref<128x64xf32, #tpu.memory_space<vmem>>, vector<4x64xf32>
    %436 = tpu.concatenate %434, %435 in 1 : vector<4x64xf32>, vector<4x64xf32> -> vector<4x128xf32>
    %c20 = arith.constant 20 : index
    %c0_217 = arith.constant 0 : index
    %437 = vector.load %arg14[%c20, %c0_217] : memref<64x128xf32, #tpu.memory_space<vmem>>, vector<4x128xf32>
    tpu.vector_store %arg14[%c20, %c0_217], %436 {strides = array<i32>} : memref<64x128xf32, #tpu.memory_space<vmem>>, vector<4x128xf32>,
    %438 = arith.truncf %435 : vector<4x64xf32> to vector<4x64xbf16>
    %c0_218 = arith.constant 0 : index
    %c6_219 = arith.constant 6 : index
    %c1_220 = arith.constant 1 : index
    %c0_221 = arith.constant 0 : index
    %439 = vector.load %arg18[%c0_218, %c6_219, %c1_220, %c0_221] : memref<2x10x5x128xbf16, #tpu.memory_space<vmem>>, vector<1x1x4x64xbf16>
    %440 = vector.shape_cast %439 : vector<1x1x4x64xbf16> to vector<4x64xbf16>
    %441 = vector.shape_cast %438 : vector<4x64xbf16> to vector<1x1x4x64xbf16>
    tpu.vector_store %arg18[%c0_218, %c6_219, %c1_220, %c0_221], %441 {strides = array<i32>} : memref<2x10x5x128xbf16, #tpu.memory_space<vmem>>, vector<1x1x4x64xbf16>,
    %442 = arith.truncf %434 : vector<4x64xf32> to vector<4x64xbf16>
    %c0_222 = arith.constant 0 : index
    %c6_223 = arith.constant 6 : index
    %c0_224 = arith.constant 0 : index
    %c64_225 = arith.constant 64 : index
    %443 = vector.load %arg18[%c0_222, %c6_223, %c0_224, %c64_225] : memref<2x10x5x128xbf16, #tpu.memory_space<vmem>>, vector<1x1x4x64xbf16>
    %444 = vector.shape_cast %443 : vector<1x1x4x64xbf16> to vector<4x64xbf16>
    %445 = vector.shape_cast %442 : vector<4x64xbf16> to vector<1x1x4x64xbf16>
    tpu.vector_store %arg18[%c0_222, %c6_223, %c0_224, %c64_225], %445 {strides = array<i32>} : memref<2x10x5x128xbf16, #tpu.memory_space<vmem>>, vector<1x1x4x64xbf16>,
    %c48_226 = arith.constant 48 : index
    %c0_227 = arith.constant 0 : index
    %446 = tpu.strided_load %arg25[%c48_226, %c0_227] {strides = array<i32: 2, 1>} : memref<128x64xf32, #tpu.memory_space<vmem>>, vector<4x64xf32>
    %c49 = arith.constant 49 : index
    %c0_228 = arith.constant 0 : index
    %447 = tpu.strided_load %arg25[%c49, %c0_228] {strides = array<i32: 2, 1>} : memref<128x64xf32, #tpu.memory_space<vmem>>, vector<4x64xf32>
    %448 = tpu.concatenate %446, %447 in 1 : vector<4x64xf32>, vector<4x64xf32> -> vector<4x128xf32>
    %c24_229 = arith.constant 24 : index
    %c0_230 = arith.constant 0 : index
    %449 = vector.load %arg14[%c24_229, %c0_230] : memref<64x128xf32, #tpu.memory_space<vmem>>, vector<4x128xf32>
    tpu.vector_store %arg14[%c24_229, %c0_230], %448 {strides = array<i32>} : memref<64x128xf32, #tpu.memory_space<vmem>>, vector<4x128xf32>,
    %450 = arith.truncf %447 : vector<4x64xf32> to vector<4x64xbf16>
    %c0_231 = arith.constant 0 : index
    %c7 = arith.constant 7 : index
    %c1_232 = arith.constant 1 : index
    %c0_233 = arith.constant 0 : index
    %451 = vector.load %arg18[%c0_231, %c7, %c1_232, %c0_233] : memref<2x10x5x128xbf16, #tpu.memory_space<vmem>>, vector<1x1x4x64xbf16>
    %452 = vector.shape_cast %451 : vector<1x1x4x64xbf16> to vector<4x64xbf16>
    %453 = vector.shape_cast %450 : vector<4x64xbf16> to vector<1x1x4x64xbf16>
    tpu.vector_store %arg18[%c0_231, %c7, %c1_232, %c0_233], %453 {strides = array<i32>} : memref<2x10x5x128xbf16, #tpu.memory_space<vmem>>, vector<1x1x4x64xbf16>,
    %454 = arith.truncf %446 : vector<4x64xf32> to vector<4x64xbf16>
    %c0_234 = arith.constant 0 : index
    %c7_235 = arith.constant 7 : index
    %c0_236 = arith.constant 0 : index
    %c64_237 = arith.constant 64 : index
    %455 = vector.load %arg18[%c0_234, %c7_235, %c0_236, %c64_237] : memref<2x10x5x128xbf16, #tpu.memory_space<vmem>>, vector<1x1x4x64xbf16>
    %456 = vector.shape_cast %455 : vector<1x1x4x64xbf16> to vector<4x64xbf16>
    %457 = vector.shape_cast %454 : vector<4x64xbf16> to vector<1x1x4x64xbf16>
    tpu.vector_store %arg18[%c0_234, %c7_235, %c0_236, %c64_237], %457 {strides = array<i32>} : memref<2x10x5x128xbf16, #tpu.memory_space<vmem>>, vector<1x1x4x64xbf16>,
    %c56_238 = arith.constant 56 : index
    %c0_239 = arith.constant 0 : index
    %458 = tpu.strided_load %arg25[%c56_238, %c0_239] {strides = array<i32: 2, 1>} : memref<128x64xf32, #tpu.memory_space<vmem>>, vector<4x64xf32>
    %c57 = arith.constant 57 : index
    %c0_240 = arith.constant 0 : index
    %459 = tpu.strided_load %arg25[%c57, %c0_240] {strides = array<i32: 2, 1>} : memref<128x64xf32, #tpu.memory_space<vmem>>, vector<4x64xf32>
    %460 = tpu.concatenate %458, %459 in 1 : vector<4x64xf32>, vector<4x64xf32> -> vector<4x128xf32>
    %c28 = arith.constant 28 : index
    %c0_241 = arith.constant 0 : index
    %461 = vector.load %arg14[%c28, %c0_241] : memref<64x128xf32, #tpu.memory_space<vmem>>, vector<4x128xf32>
    tpu.vector_store %arg14[%c28, %c0_241], %460 {strides = array<i32>} : memref<64x128xf32, #tpu.memory_space<vmem>>, vector<4x128xf32>,
    %462 = arith.truncf %459 : vector<4x64xf32> to vector<4x64xbf16>
    %c0_242 = arith.constant 0 : index
    %c8_243 = arith.constant 8 : index
    %c1_244 = arith.constant 1 : index
    %c0_245 = arith.constant 0 : index
    %463 = vector.load %arg18[%c0_242, %c8_243, %c1_244, %c0_245] : memref<2x10x5x128xbf16, #tpu.memory_space<vmem>>, vector<1x1x4x64xbf16>
    %464 = vector.shape_cast %463 : vector<1x1x4x64xbf16> to vector<4x64xbf16>
    %465 = vector.shape_cast %462 : vector<4x64xbf16> to vector<1x1x4x64xbf16>
    tpu.vector_store %arg18[%c0_242, %c8_243, %c1_244, %c0_245], %465 {strides = array<i32>} : memref<2x10x5x128xbf16, #tpu.memory_space<vmem>>, vector<1x1x4x64xbf16>,
    %466 = arith.truncf %458 : vector<4x64xf32> to vector<4x64xbf16>
    %c0_246 = arith.constant 0 : index
    %c8_247 = arith.constant 8 : index
    %c0_248 = arith.constant 0 : index
    %c64_249 = arith.constant 64 : index
    %467 = vector.load %arg18[%c0_246, %c8_247, %c0_248, %c64_249] : memref<2x10x5x128xbf16, #tpu.memory_space<vmem>>, vector<1x1x4x64xbf16>
    %468 = vector.shape_cast %467 : vector<1x1x4x64xbf16> to vector<4x64xbf16>
    %469 = vector.shape_cast %466 : vector<4x64xbf16> to vector<1x1x4x64xbf16>
    tpu.vector_store %arg18[%c0_246, %c8_247, %c0_248, %c64_249], %469 {strides = array<i32>} : memref<2x10x5x128xbf16, #tpu.memory_space<vmem>>, vector<1x1x4x64xbf16>,
    %c64_250 = arith.constant 64 : index
    %c0_251 = arith.constant 0 : index
    %470 = tpu.strided_load %arg25[%c64_250, %c0_251] {strides = array<i32: 2, 1>} : memref<128x64xf32, #tpu.memory_space<vmem>>, vector<4x64xf32>
    %c65 = arith.constant 65 : index
    %c0_252 = arith.constant 0 : index
    %471 = tpu.strided_load %arg25[%c65, %c0_252] {strides = array<i32: 2, 1>} : memref<128x64xf32, #tpu.memory_space<vmem>>, vector<4x64xf32>
    %472 = tpu.concatenate %470, %471 in 1 : vector<4x64xf32>, vector<4x64xf32> -> vector<4x128xf32>
    %c32_253 = arith.constant 32 : index
    %c0_254 = arith.constant 0 : index
    %473 = vector.load %arg14[%c32_253, %c0_254] : memref<64x128xf32, #tpu.memory_space<vmem>>, vector<4x128xf32>
    tpu.vector_store %arg14[%c32_253, %c0_254], %472 {strides = array<i32>} : memref<64x128xf32, #tpu.memory_space<vmem>>, vector<4x128xf32>,
    %474 = arith.truncf %471 : vector<4x64xf32> to vector<4x64xbf16>
    %c1_255 = arith.constant 1 : index
    %c1_256 = arith.constant 1 : index
    %c1_257 = arith.constant 1 : index
    %c0_258 = arith.constant 0 : index
    %475 = vector.load %arg18[%c1_255, %c1_256, %c1_257, %c0_258] : memref<2x10x5x128xbf16, #tpu.memory_space<vmem>>, vector<1x1x4x64xbf16>
    %476 = vector.shape_cast %475 : vector<1x1x4x64xbf16> to vector<4x64xbf16>
    %477 = vector.shape_cast %474 : vector<4x64xbf16> to vector<1x1x4x64xbf16>
    tpu.vector_store %arg18[%c1_255, %c1_256, %c1_257, %c0_258], %477 {strides = array<i32>} : memref<2x10x5x128xbf16, #tpu.memory_space<vmem>>, vector<1x1x4x64xbf16>,
    %478 = arith.truncf %470 : vector<4x64xf32> to vector<4x64xbf16>
    %c1_259 = arith.constant 1 : index
    %c1_260 = arith.constant 1 : index
    %c0_261 = arith.constant 0 : index
    %c64_262 = arith.constant 64 : index
    %479 = vector.load %arg18[%c1_259, %c1_260, %c0_261, %c64_262] : memref<2x10x5x128xbf16, #tpu.memory_space<vmem>>, vector<1x1x4x64xbf16>
    %480 = vector.shape_cast %479 : vector<1x1x4x64xbf16> to vector<4x64xbf16>
    %481 = vector.shape_cast %478 : vector<4x64xbf16> to vector<1x1x4x64xbf16>
    tpu.vector_store %arg18[%c1_259, %c1_260, %c0_261, %c64_262], %481 {strides = array<i32>} : memref<2x10x5x128xbf16, #tpu.memory_space<vmem>>, vector<1x1x4x64xbf16>,
    %c72_263 = arith.constant 72 : index
    %c0_264 = arith.constant 0 : index
    %482 = tpu.strided_load %arg25[%c72_263, %c0_264] {strides = array<i32: 2, 1>} : memref<128x64xf32, #tpu.memory_space<vmem>>, vector<4x64xf32>
    %c73 = arith.constant 73 : index
    %c0_265 = arith.constant 0 : index
    %483 = tpu.strided_load %arg25[%c73, %c0_265] {strides = array<i32: 2, 1>} : memref<128x64xf32, #tpu.memory_space<vmem>>, vector<4x64xf32>
    %484 = tpu.concatenate %482, %483 in 1 : vector<4x64xf32>, vector<4x64xf32> -> vector<4x128xf32>
    %c36 = arith.constant 36 : index
    %c0_266 = arith.constant 0 : index
    %485 = vector.load %arg14[%c36, %c0_266] : memref<64x128xf32, #tpu.memory_space<vmem>>, vector<4x128xf32>
    tpu.vector_store %arg14[%c36, %c0_266], %484 {strides = array<i32>} : memref<64x128xf32, #tpu.memory_space<vmem>>, vector<4x128xf32>,
    %486 = arith.truncf %483 : vector<4x64xf32> to vector<4x64xbf16>
    %c1_267 = arith.constant 1 : index
    %c2_268 = arith.constant 2 : index
    %c1_269 = arith.constant 1 : index
    %c0_270 = arith.constant 0 : index
    %487 = vector.load %arg18[%c1_267, %c2_268, %c1_269, %c0_270] : memref<2x10x5x128xbf16, #tpu.memory_space<vmem>>, vector<1x1x4x64xbf16>
    %488 = vector.shape_cast %487 : vector<1x1x4x64xbf16> to vector<4x64xbf16>
    %489 = vector.shape_cast %486 : vector<4x64xbf16> to vector<1x1x4x64xbf16>
    tpu.vector_store %arg18[%c1_267, %c2_268, %c1_269, %c0_270], %489 {strides = array<i32>} : memref<2x10x5x128xbf16, #tpu.memory_space<vmem>>, vector<1x1x4x64xbf16>,
    %490 = arith.truncf %482 : vector<4x64xf32> to vector<4x64xbf16>
    %c1_271 = arith.constant 1 : index
    %c2_272 = arith.constant 2 : index
    %c0_273 = arith.constant 0 : index
    %c64_274 = arith.constant 64 : index
    %491 = vector.load %arg18[%c1_271, %c2_272, %c0_273, %c64_274] : memref<2x10x5x128xbf16, #tpu.memory_space<vmem>>, vector<1x1x4x64xbf16>
    %492 = vector.shape_cast %491 : vector<1x1x4x64xbf16> to vector<4x64xbf16>
    %493 = vector.shape_cast %490 : vector<4x64xbf16> to vector<1x1x4x64xbf16>
    tpu.vector_store %arg18[%c1_271, %c2_272, %c0_273, %c64_274], %493 {strides = array<i32>} : memref<2x10x5x128xbf16, #tpu.memory_space<vmem>>, vector<1x1x4x64xbf16>,
    %c80_275 = arith.constant 80 : index
    %c0_276 = arith.constant 0 : index
    %494 = tpu.strided_load %arg25[%c80_275, %c0_276] {strides = array<i32: 2, 1>} : memref<128x64xf32, #tpu.memory_space<vmem>>, vector<4x64xf32>
    %c81 = arith.constant 81 : index
    %c0_277 = arith.constant 0 : index
    %495 = tpu.strided_load %arg25[%c81, %c0_277] {strides = array<i32: 2, 1>} : memref<128x64xf32, #tpu.memory_space<vmem>>, vector<4x64xf32>
    %496 = tpu.concatenate %494, %495 in 1 : vector<4x64xf32>, vector<4x64xf32> -> vector<4x128xf32>
    %c40_278 = arith.constant 40 : index
    %c0_279 = arith.constant 0 : index
    %497 = vector.load %arg14[%c40_278, %c0_279] : memref<64x128xf32, #tpu.memory_space<vmem>>, vector<4x128xf32>
    tpu.vector_store %arg14[%c40_278, %c0_279], %496 {strides = array<i32>} : memref<64x128xf32, #tpu.memory_space<vmem>>, vector<4x128xf32>,
    %498 = arith.truncf %495 : vector<4x64xf32> to vector<4x64xbf16>
    %c1_280 = arith.constant 1 : index
    %c3_281 = arith.constant 3 : index
    %c1_282 = arith.constant 1 : index
    %c0_283 = arith.constant 0 : index
    %499 = vector.load %arg18[%c1_280, %c3_281, %c1_282, %c0_283] : memref<2x10x5x128xbf16, #tpu.memory_space<vmem>>, vector<1x1x4x64xbf16>
    %500 = vector.shape_cast %499 : vector<1x1x4x64xbf16> to vector<4x64xbf16>
    %501 = vector.shape_cast %498 : vector<4x64xbf16> to vector<1x1x4x64xbf16>
    tpu.vector_store %arg18[%c1_280, %c3_281, %c1_282, %c0_283], %501 {strides = array<i32>} : memref<2x10x5x128xbf16, #tpu.memory_space<vmem>>, vector<1x1x4x64xbf16>,
    %502 = arith.truncf %494 : vector<4x64xf32> to vector<4x64xbf16>
    %c1_284 = arith.constant 1 : index
    %c3_285 = arith.constant 3 : index
    %c0_286 = arith.constant 0 : index
    %c64_287 = arith.constant 64 : index
    %503 = vector.load %arg18[%c1_284, %c3_285, %c0_286, %c64_287] : memref<2x10x5x128xbf16, #tpu.memory_space<vmem>>, vector<1x1x4x64xbf16>
    %504 = vector.shape_cast %503 : vector<1x1x4x64xbf16> to vector<4x64xbf16>
    %505 = vector.shape_cast %502 : vector<4x64xbf16> to vector<1x1x4x64xbf16>
    tpu.vector_store %arg18[%c1_284, %c3_285, %c0_286, %c64_287], %505 {strides = array<i32>} : memref<2x10x5x128xbf16, #tpu.memory_space<vmem>>, vector<1x1x4x64xbf16>,
    %c88_288 = arith.constant 88 : index
    %c0_289 = arith.constant 0 : index
    %506 = tpu.strided_load %arg25[%c88_288, %c0_289] {strides = array<i32: 2, 1>} : memref<128x64xf32, #tpu.memory_space<vmem>>, vector<4x64xf32>
    %c89 = arith.constant 89 : index
    %c0_290 = arith.constant 0 : index
    %507 = tpu.strided_load %arg25[%c89, %c0_290] {strides = array<i32: 2, 1>} : memref<128x64xf32, #tpu.memory_space<vmem>>, vector<4x64xf32>
    %508 = tpu.concatenate %506, %507 in 1 : vector<4x64xf32>, vector<4x64xf32> -> vector<4x128xf32>
    %c44 = arith.constant 44 : index
    %c0_291 = arith.constant 0 : index
    %509 = vector.load %arg14[%c44, %c0_291] : memref<64x128xf32, #tpu.memory_space<vmem>>, vector<4x128xf32>
    tpu.vector_store %arg14[%c44, %c0_291], %508 {strides = array<i32>} : memref<64x128xf32, #tpu.memory_space<vmem>>, vector<4x128xf32>,
    %510 = arith.truncf %507 : vector<4x64xf32> to vector<4x64xbf16>
    %c1_292 = arith.constant 1 : index
    %c4_293 = arith.constant 4 : index
    %c1_294 = arith.constant 1 : index
    %c0_295 = arith.constant 0 : index
    %511 = vector.load %arg18[%c1_292, %c4_293, %c1_294, %c0_295] : memref<2x10x5x128xbf16, #tpu.memory_space<vmem>>, vector<1x1x4x64xbf16>
    %512 = vector.shape_cast %511 : vector<1x1x4x64xbf16> to vector<4x64xbf16>
    %513 = vector.shape_cast %510 : vector<4x64xbf16> to vector<1x1x4x64xbf16>
    tpu.vector_store %arg18[%c1_292, %c4_293, %c1_294, %c0_295], %513 {strides = array<i32>} : memref<2x10x5x128xbf16, #tpu.memory_space<vmem>>, vector<1x1x4x64xbf16>,
    %514 = arith.truncf %506 : vector<4x64xf32> to vector<4x64xbf16>
    %c1_296 = arith.constant 1 : index
    %c4_297 = arith.constant 4 : index
    %c0_298 = arith.constant 0 : index
    %c64_299 = arith.constant 64 : index
    %515 = vector.load %arg18[%c1_296, %c4_297, %c0_298, %c64_299] : memref<2x10x5x128xbf16, #tpu.memory_space<vmem>>, vector<1x1x4x64xbf16>
    %516 = vector.shape_cast %515 : vector<1x1x4x64xbf16> to vector<4x64xbf16>
    %517 = vector.shape_cast %514 : vector<4x64xbf16> to vector<1x1x4x64xbf16>
    tpu.vector_store %arg18[%c1_296, %c4_297, %c0_298, %c64_299], %517 {strides = array<i32>} : memref<2x10x5x128xbf16, #tpu.memory_space<vmem>>, vector<1x1x4x64xbf16>,
    %c96_300 = arith.constant 96 : index
    %c0_301 = arith.constant 0 : index
    %518 = tpu.strided_load %arg25[%c96_300, %c0_301] {strides = array<i32: 2, 1>} : memref<128x64xf32, #tpu.memory_space<vmem>>, vector<4x64xf32>
    %c97 = arith.constant 97 : index
    %c0_302 = arith.constant 0 : index
    %519 = tpu.strided_load %arg25[%c97, %c0_302] {strides = array<i32: 2, 1>} : memref<128x64xf32, #tpu.memory_space<vmem>>, vector<4x64xf32>
    %520 = tpu.concatenate %518, %519 in 1 : vector<4x64xf32>, vector<4x64xf32> -> vector<4x128xf32>
    %c48_303 = arith.constant 48 : index
    %c0_304 = arith.constant 0 : index
    %521 = vector.load %arg14[%c48_303, %c0_304] : memref<64x128xf32, #tpu.memory_space<vmem>>, vector<4x128xf32>
    tpu.vector_store %arg14[%c48_303, %c0_304], %520 {strides = array<i32>} : memref<64x128xf32, #tpu.memory_space<vmem>>, vector<4x128xf32>,
    %522 = arith.truncf %519 : vector<4x64xf32> to vector<4x64xbf16>
    %c1_305 = arith.constant 1 : index
    %c5_306 = arith.constant 5 : index
    %c1_307 = arith.constant 1 : index
    %c0_308 = arith.constant 0 : index
    %523 = vector.load %arg18[%c1_305, %c5_306, %c1_307, %c0_308] : memref<2x10x5x128xbf16, #tpu.memory_space<vmem>>, vector<1x1x4x64xbf16>
    %524 = vector.shape_cast %523 : vector<1x1x4x64xbf16> to vector<4x64xbf16>
    %525 = vector.shape_cast %522 : vector<4x64xbf16> to vector<1x1x4x64xbf16>
    tpu.vector_store %arg18[%c1_305, %c5_306, %c1_307, %c0_308], %525 {strides = array<i32>} : memref<2x10x5x128xbf16, #tpu.memory_space<vmem>>, vector<1x1x4x64xbf16>,
    %526 = arith.truncf %518 : vector<4x64xf32> to vector<4x64xbf16>
    %c1_309 = arith.constant 1 : index
    %c5_310 = arith.constant 5 : index
    %c0_311 = arith.constant 0 : index
    %c64_312 = arith.constant 64 : index
    %527 = vector.load %arg18[%c1_309, %c5_310, %c0_311, %c64_312] : memref<2x10x5x128xbf16, #tpu.memory_space<vmem>>, vector<1x1x4x64xbf16>
    %528 = vector.shape_cast %527 : vector<1x1x4x64xbf16> to vector<4x64xbf16>
    %529 = vector.shape_cast %526 : vector<4x64xbf16> to vector<1x1x4x64xbf16>
    tpu.vector_store %arg18[%c1_309, %c5_310, %c0_311, %c64_312], %529 {strides = array<i32>} : memref<2x10x5x128xbf16, #tpu.memory_space<vmem>>, vector<1x1x4x64xbf16>,
    %c104_313 = arith.constant 104 : index
    %c0_314 = arith.constant 0 : index
    %530 = tpu.strided_load %arg25[%c104_313, %c0_314] {strides = array<i32: 2, 1>} : memref<128x64xf32, #tpu.memory_space<vmem>>, vector<4x64xf32>
    %c105 = arith.constant 105 : index
    %c0_315 = arith.constant 0 : index
    %531 = tpu.strided_load %arg25[%c105, %c0_315] {strides = array<i32: 2, 1>} : memref<128x64xf32, #tpu.memory_space<vmem>>, vector<4x64xf32>
    %532 = tpu.concatenate %530, %531 in 1 : vector<4x64xf32>, vector<4x64xf32> -> vector<4x128xf32>
    %c52 = arith.constant 52 : index
    %c0_316 = arith.constant 0 : index
    %533 = vector.load %arg14[%c52, %c0_316] : memref<64x128xf32, #tpu.memory_space<vmem>>, vector<4x128xf32>
    tpu.vector_store %arg14[%c52, %c0_316], %532 {strides = array<i32>} : memref<64x128xf32, #tpu.memory_space<vmem>>, vector<4x128xf32>,
    %534 = arith.truncf %531 : vector<4x64xf32> to vector<4x64xbf16>
    %c1_317 = arith.constant 1 : index
    %c6_318 = arith.constant 6 : index
    %c1_319 = arith.constant 1 : index
    %c0_320 = arith.constant 0 : index
    %535 = vector.load %arg18[%c1_317, %c6_318, %c1_319, %c0_320] : memref<2x10x5x128xbf16, #tpu.memory_space<vmem>>, vector<1x1x4x64xbf16>
    %536 = vector.shape_cast %535 : vector<1x1x4x64xbf16> to vector<4x64xbf16>
    %537 = vector.shape_cast %534 : vector<4x64xbf16> to vector<1x1x4x64xbf16>
    tpu.vector_store %arg18[%c1_317, %c6_318, %c1_319, %c0_320], %537 {strides = array<i32>} : memref<2x10x5x128xbf16, #tpu.memory_space<vmem>>, vector<1x1x4x64xbf16>,
    %538 = arith.truncf %530 : vector<4x64xf32> to vector<4x64xbf16>
    %c1_321 = arith.constant 1 : index
    %c6_322 = arith.constant 6 : index
    %c0_323 = arith.constant 0 : index
    %c64_324 = arith.constant 64 : index
    %539 = vector.load %arg18[%c1_321, %c6_322, %c0_323, %c64_324] : memref<2x10x5x128xbf16, #tpu.memory_space<vmem>>, vector<1x1x4x64xbf16>
    %540 = vector.shape_cast %539 : vector<1x1x4x64xbf16> to vector<4x64xbf16>
    %541 = vector.shape_cast %538 : vector<4x64xbf16> to vector<1x1x4x64xbf16>
    tpu.vector_store %arg18[%c1_321, %c6_322, %c0_323, %c64_324], %541 {strides = array<i32>} : memref<2x10x5x128xbf16, #tpu.memory_space<vmem>>, vector<1x1x4x64xbf16>,
    %c112_325 = arith.constant 112 : index
    %c0_326 = arith.constant 0 : index
    %542 = tpu.strided_load %arg25[%c112_325, %c0_326] {strides = array<i32: 2, 1>} : memref<128x64xf32, #tpu.memory_space<vmem>>, vector<4x64xf32>
    %c113 = arith.constant 113 : index
    %c0_327 = arith.constant 0 : index
    %543 = tpu.strided_load %arg25[%c113, %c0_327] {strides = array<i32: 2, 1>} : memref<128x64xf32, #tpu.memory_space<vmem>>, vector<4x64xf32>
    %544 = tpu.concatenate %542, %543 in 1 : vector<4x64xf32>, vector<4x64xf32> -> vector<4x128xf32>
    %c56_328 = arith.constant 56 : index
    %c0_329 = arith.constant 0 : index
    %545 = vector.load %arg14[%c56_328, %c0_329] : memref<64x128xf32, #tpu.memory_space<vmem>>, vector<4x128xf32>
    tpu.vector_store %arg14[%c56_328, %c0_329], %544 {strides = array<i32>} : memref<64x128xf32, #tpu.memory_space<vmem>>, vector<4x128xf32>,
    %546 = arith.truncf %543 : vector<4x64xf32> to vector<4x64xbf16>
    %c1_330 = arith.constant 1 : index
    %c7_331 = arith.constant 7 : index
    %c1_332 = arith.constant 1 : index
    %c0_333 = arith.constant 0 : index
    %547 = vector.load %arg18[%c1_330, %c7_331, %c1_332, %c0_333] : memref<2x10x5x128xbf16, #tpu.memory_space<vmem>>, vector<1x1x4x64xbf16>
    %548 = vector.shape_cast %547 : vector<1x1x4x64xbf16> to vector<4x64xbf16>
    %549 = vector.shape_cast %546 : vector<4x64xbf16> to vector<1x1x4x64xbf16>
    tpu.vector_store %arg18[%c1_330, %c7_331, %c1_332, %c0_333], %549 {strides = array<i32>} : memref<2x10x5x128xbf16, #tpu.memory_space<vmem>>, vector<1x1x4x64xbf16>,
    %550 = arith.truncf %542 : vector<4x64xf32> to vector<4x64xbf16>
    %c1_334 = arith.constant 1 : index
    %c7_335 = arith.constant 7 : index
    %c0_336 = arith.constant 0 : index
    %c64_337 = arith.constant 64 : index
    %551 = vector.load %arg18[%c1_334, %c7_335, %c0_336, %c64_337] : memref<2x10x5x128xbf16, #tpu.memory_space<vmem>>, vector<1x1x4x64xbf16>
    %552 = vector.shape_cast %551 : vector<1x1x4x64xbf16> to vector<4x64xbf16>
    %553 = vector.shape_cast %550 : vector<4x64xbf16> to vector<1x1x4x64xbf16>
    tpu.vector_store %arg18[%c1_334, %c7_335, %c0_336, %c64_337], %553 {strides = array<i32>} : memref<2x10x5x128xbf16, #tpu.memory_space<vmem>>, vector<1x1x4x64xbf16>,
    %c120_338 = arith.constant 120 : index
    %c0_339 = arith.constant 0 : index
    %554 = tpu.strided_load %arg25[%c120_338, %c0_339] {strides = array<i32: 2, 1>} : memref<128x64xf32, #tpu.memory_space<vmem>>, vector<4x64xf32>
    %c121 = arith.constant 121 : index
    %c0_340 = arith.constant 0 : index
    %555 = tpu.strided_load %arg25[%c121, %c0_340] {strides = array<i32: 2, 1>} : memref<128x64xf32, #tpu.memory_space<vmem>>, vector<4x64xf32>
    %556 = tpu.concatenate %554, %555 in 1 : vector<4x64xf32>, vector<4x64xf32> -> vector<4x128xf32>
    %c60 = arith.constant 60 : index
    %c0_341 = arith.constant 0 : index
    %557 = vector.load %arg14[%c60, %c0_341] : memref<64x128xf32, #tpu.memory_space<vmem>>, vector<4x128xf32>
    tpu.vector_store %arg14[%c60, %c0_341], %556 {strides = array<i32>} : memref<64x128xf32, #tpu.memory_space<vmem>>, vector<4x128xf32>,
    %558 = arith.truncf %555 : vector<4x64xf32> to vector<4x64xbf16>
    %c1_342 = arith.constant 1 : index
    %c8_343 = arith.constant 8 : index
    %c1_344 = arith.constant 1 : index
    %c0_345 = arith.constant 0 : index
    %559 = vector.load %arg18[%c1_342, %c8_343, %c1_344, %c0_345] : memref<2x10x5x128xbf16, #tpu.memory_space<vmem>>, vector<1x1x4x64xbf16>
    %560 = vector.shape_cast %559 : vector<1x1x4x64xbf16> to vector<4x64xbf16>
    %561 = vector.shape_cast %558 : vector<4x64xbf16> to vector<1x1x4x64xbf16>
    tpu.vector_store %arg18[%c1_342, %c8_343, %c1_344, %c0_345], %561 {strides = array<i32>} : memref<2x10x5x128xbf16, #tpu.memory_space<vmem>>, vector<1x1x4x64xbf16>,
    %562 = arith.truncf %554 : vector<4x64xf32> to vector<4x64xbf16>
    %c1_346 = arith.constant 1 : index
    %c8_347 = arith.constant 8 : index
    %c0_348 = arith.constant 0 : index
    %c64_349 = arith.constant 64 : index
    %563 = vector.load %arg18[%c1_346, %c8_347, %c0_348, %c64_349] : memref<2x10x5x128xbf16, #tpu.memory_space<vmem>>, vector<1x1x4x64xbf16>
    %564 = vector.shape_cast %563 : vector<1x1x4x64xbf16> to vector<4x64xbf16>
    %565 = vector.shape_cast %562 : vector<4x64xbf16> to vector<1x1x4x64xbf16>
    tpu.vector_store %arg18[%c1_346, %c8_347, %c0_348, %c64_349], %565 {strides = array<i32>} : memref<2x10x5x128xbf16, #tpu.memory_space<vmem>>, vector<1x1x4x64xbf16>,
    %c0_350 = arith.constant 0 : index
    %c0_351 = arith.constant 0 : index
    %c0_352 = arith.constant 0 : index
    %c0_353 = arith.constant 0 : index
    %566 = vector.load %arg18[%c0_350, %c0_351, %c0_352, %c0_353] : memref<2x10x5x128xbf16, #tpu.memory_space<vmem>>, vector<1x4x5x128xbf16>
    %567 = vector.shape_cast %566 : vector<1x4x5x128xbf16> to vector<4x5x128xbf16>
    %568 = vector.extract_strided_slice %567 {offsets = [0, 0, 0], sizes = [1, 5, 128], strides = [1, 1, 1]} : vector<4x5x128xbf16> to vector<1x5x128xbf16>
    %569 = vector.shape_cast %568 : vector<1x5x128xbf16> to vector<5x128xbf16>
    %570 = vector.extract_strided_slice %569 {offsets = [0, 0], sizes = [4, 128], strides = [1, 1]} : vector<5x128xbf16> to vector<4x128xbf16>
    %571 = vector.extract_strided_slice %569 {offsets = [1, 0], sizes = [4, 128], strides = [1, 1]} : vector<5x128xbf16> to vector<4x128xbf16>
    %572 = vector.extract_strided_slice %567 {offsets = [1, 0, 0], sizes = [1, 5, 128], strides = [1, 1, 1]} : vector<4x5x128xbf16> to vector<1x5x128xbf16>
    %573 = vector.shape_cast %572 : vector<1x5x128xbf16> to vector<5x128xbf16>
    %574 = vector.extract_strided_slice %573 {offsets = [0, 0], sizes = [4, 128], strides = [1, 1]} : vector<5x128xbf16> to vector<4x128xbf16>
    %575 = vector.extract_strided_slice %573 {offsets = [1, 0], sizes = [4, 128], strides = [1, 1]} : vector<5x128xbf16> to vector<4x128xbf16>
    %576 = vector.extract_strided_slice %567 {offsets = [2, 0, 0], sizes = [1, 5, 128], strides = [1, 1, 1]} : vector<4x5x128xbf16> to vector<1x5x128xbf16>
    %577 = vector.shape_cast %576 : vector<1x5x128xbf16> to vector<5x128xbf16>
    %578 = vector.extract_strided_slice %577 {offsets = [0, 0], sizes = [4, 128], strides = [1, 1]} : vector<5x128xbf16> to vector<4x128xbf16>
    %579 = vector.extract_strided_slice %577 {offsets = [1, 0], sizes = [4, 128], strides = [1, 1]} : vector<5x128xbf16> to vector<4x128xbf16>
    %580 = vector.extract_strided_slice %567 {offsets = [3, 0, 0], sizes = [1, 5, 128], strides = [1, 1, 1]} : vector<4x5x128xbf16> to vector<1x5x128xbf16>
    %581 = vector.shape_cast %580 : vector<1x5x128xbf16> to vector<5x128xbf16>
    %582 = vector.extract_strided_slice %581 {offsets = [0, 0], sizes = [4, 128], strides = [1, 1]} : vector<5x128xbf16> to vector<4x128xbf16>
    %583 = vector.extract_strided_slice %581 {offsets = [1, 0], sizes = [4, 128], strides = [1, 1]} : vector<5x128xbf16> to vector<4x128xbf16>
    %584 = tpu.concatenate %570, %571, %574, %575, %578, %579, %582, %583 in 1 : vector<4x128xbf16>, vector<4x128xbf16>, vector<4x128xbf16>, vector<4x128xbf16>, vector<4x128xbf16>, vector<4x128xbf16>, vector<4x128xbf16>, vector<4x128xbf16> -> vector<4x1024xbf16>
    %c0_354 = arith.constant 0 : index
    %c0_355 = arith.constant 0 : index
    %585 = vector.load %arg22[%c0_354, %c0_355] : memref<32x1024xbf16, #tpu.memory_space<vmem>>, vector<4x1024xbf16>
    tpu.vector_store %arg22[%c0_354, %c0_355], %584 {strides = array<i32>} : memref<32x1024xbf16, #tpu.memory_space<vmem>>, vector<4x1024xbf16>,
    %c0_356 = arith.constant 0 : index
    %c2_357 = arith.constant 2 : index
    %c0_358 = arith.constant 0 : index
    %c0_359 = arith.constant 0 : index
    %586 = vector.load %arg18[%c0_356, %c2_357, %c0_358, %c0_359] : memref<2x10x5x128xbf16, #tpu.memory_space<vmem>>, vector<1x4x5x128xbf16>
    %587 = vector.shape_cast %586 : vector<1x4x5x128xbf16> to vector<4x5x128xbf16>
    %588 = vector.extract_strided_slice %587 {offsets = [0, 0, 0], sizes = [1, 5, 128], strides = [1, 1, 1]} : vector<4x5x128xbf16> to vector<1x5x128xbf16>
    %589 = vector.shape_cast %588 : vector<1x5x128xbf16> to vector<5x128xbf16>
    %590 = vector.extract_strided_slice %589 {offsets = [0, 0], sizes = [4, 128], strides = [1, 1]} : vector<5x128xbf16> to vector<4x128xbf16>
    %591 = vector.extract_strided_slice %589 {offsets = [1, 0], sizes = [4, 128], strides = [1, 1]} : vector<5x128xbf16> to vector<4x128xbf16>
    %592 = vector.extract_strided_slice %587 {offsets = [1, 0, 0], sizes = [1, 5, 128], strides = [1, 1, 1]} : vector<4x5x128xbf16> to vector<1x5x128xbf16>
    %593 = vector.shape_cast %592 : vector<1x5x128xbf16> to vector<5x128xbf16>
    %594 = vector.extract_strided_slice %593 {offsets = [0, 0], sizes = [4, 128], strides = [1, 1]} : vector<5x128xbf16> to vector<4x128xbf16>
    %595 = vector.extract_strided_slice %593 {offsets = [1, 0], sizes = [4, 128], strides = [1, 1]} : vector<5x128xbf16> to vector<4x128xbf16>
    %596 = vector.extract_strided_slice %587 {offsets = [2, 0, 0], sizes = [1, 5, 128], strides = [1, 1, 1]} : vector<4x5x128xbf16> to vector<1x5x128xbf16>
    %597 = vector.shape_cast %596 : vector<1x5x128xbf16> to vector<5x128xbf16>
    %598 = vector.extract_strided_slice %597 {offsets = [0, 0], sizes = [4, 128], strides = [1, 1]} : vector<5x128xbf16> to vector<4x128xbf16>
    %599 = vector.extract_strided_slice %597 {offsets = [1, 0], sizes = [4, 128], strides = [1, 1]} : vector<5x128xbf16> to vector<4x128xbf16>
    %600 = vector.extract_strided_slice %587 {offsets = [3, 0, 0], sizes = [1, 5, 128], strides = [1, 1, 1]} : vector<4x5x128xbf16> to vector<1x5x128xbf16>
    %601 = vector.shape_cast %600 : vector<1x5x128xbf16> to vector<5x128xbf16>
    %602 = vector.extract_strided_slice %601 {offsets = [0, 0], sizes = [4, 128], strides = [1, 1]} : vector<5x128xbf16> to vector<4x128xbf16>
    %603 = vector.extract_strided_slice %601 {offsets = [1, 0], sizes = [4, 128], strides = [1, 1]} : vector<5x128xbf16> to vector<4x128xbf16>
    %604 = tpu.concatenate %590, %591, %594, %595, %598, %599, %602, %603 in 1 : vector<4x128xbf16>, vector<4x128xbf16>, vector<4x128xbf16>, vector<4x128xbf16>, vector<4x128xbf16>, vector<4x128xbf16>, vector<4x128xbf16>, vector<4x128xbf16> -> vector<4x1024xbf16>
    %c4_360 = arith.constant 4 : index
    %c0_361 = arith.constant 0 : index
    %605 = vector.load %arg22[%c4_360, %c0_361] : memref<32x1024xbf16, #tpu.memory_space<vmem>>, vector<4x1024xbf16>
    tpu.vector_store %arg22[%c4_360, %c0_361], %604 {strides = array<i32>} : memref<32x1024xbf16, #tpu.memory_space<vmem>>, vector<4x1024xbf16>,
    %c0_362 = arith.constant 0 : index
    %c4_363 = arith.constant 4 : index
    %c0_364 = arith.constant 0 : index
    %c0_365 = arith.constant 0 : index
    %606 = vector.load %arg18[%c0_362, %c4_363, %c0_364, %c0_365] : memref<2x10x5x128xbf16, #tpu.memory_space<vmem>>, vector<1x4x5x128xbf16>
    %607 = vector.shape_cast %606 : vector<1x4x5x128xbf16> to vector<4x5x128xbf16>
    %608 = vector.extract_strided_slice %607 {offsets = [0, 0, 0], sizes = [1, 5, 128], strides = [1, 1, 1]} : vector<4x5x128xbf16> to vector<1x5x128xbf16>
    %609 = vector.shape_cast %608 : vector<1x5x128xbf16> to vector<5x128xbf16>
    %610 = vector.extract_strided_slice %609 {offsets = [0, 0], sizes = [4, 128], strides = [1, 1]} : vector<5x128xbf16> to vector<4x128xbf16>
    %611 = vector.extract_strided_slice %609 {offsets = [1, 0], sizes = [4, 128], strides = [1, 1]} : vector<5x128xbf16> to vector<4x128xbf16>
    %612 = vector.extract_strided_slice %607 {offsets = [1, 0, 0], sizes = [1, 5, 128], strides = [1, 1, 1]} : vector<4x5x128xbf16> to vector<1x5x128xbf16>
    %613 = vector.shape_cast %612 : vector<1x5x128xbf16> to vector<5x128xbf16>
    %614 = vector.extract_strided_slice %613 {offsets = [0, 0], sizes = [4, 128], strides = [1, 1]} : vector<5x128xbf16> to vector<4x128xbf16>
    %615 = vector.extract_strided_slice %613 {offsets = [1, 0], sizes = [4, 128], strides = [1, 1]} : vector<5x128xbf16> to vector<4x128xbf16>
    %616 = vector.extract_strided_slice %607 {offsets = [2, 0, 0], sizes = [1, 5, 128], strides = [1, 1, 1]} : vector<4x5x128xbf16> to vector<1x5x128xbf16>
    %617 = vector.shape_cast %616 : vector<1x5x128xbf16> to vector<5x128xbf16>
    %618 = vector.extract_strided_slice %617 {offsets = [0, 0], sizes = [4, 128], strides = [1, 1]} : vector<5x128xbf16> to vector<4x128xbf16>
    %619 = vector.extract_strided_slice %617 {offsets = [1, 0], sizes = [4, 128], strides = [1, 1]} : vector<5x128xbf16> to vector<4x128xbf16>
    %620 = vector.extract_strided_slice %607 {offsets = [3, 0, 0], sizes = [1, 5, 128], strides = [1, 1, 1]} : vector<4x5x128xbf16> to vector<1x5x128xbf16>
    %621 = vector.shape_cast %620 : vector<1x5x128xbf16> to vector<5x128xbf16>
    %622 = vector.extract_strided_slice %621 {offsets = [0, 0], sizes = [4, 128], strides = [1, 1]} : vector<5x128xbf16> to vector<4x128xbf16>
    %623 = vector.extract_strided_slice %621 {offsets = [1, 0], sizes = [4, 128], strides = [1, 1]} : vector<5x128xbf16> to vector<4x128xbf16>
    %624 = tpu.concatenate %610, %611, %614, %615, %618, %619, %622, %623 in 1 : vector<4x128xbf16>, vector<4x128xbf16>, vector<4x128xbf16>, vector<4x128xbf16>, vector<4x128xbf16>, vector<4x128xbf16>, vector<4x128xbf16>, vector<4x128xbf16> -> vector<4x1024xbf16>
    %c8_366 = arith.constant 8 : index
    %c0_367 = arith.constant 0 : index
    %625 = vector.load %arg22[%c8_366, %c0_367] : memref<32x1024xbf16, #tpu.memory_space<vmem>>, vector<4x1024xbf16>
    tpu.vector_store %arg22[%c8_366, %c0_367], %624 {strides = array<i32>} : memref<32x1024xbf16, #tpu.memory_space<vmem>>, vector<4x1024xbf16>,
    %c0_368 = arith.constant 0 : index
    %c6_369 = arith.constant 6 : index
    %c0_370 = arith.constant 0 : index
    %c0_371 = arith.constant 0 : index
    %626 = vector.load %arg18[%c0_368, %c6_369, %c0_370, %c0_371] : memref<2x10x5x128xbf16, #tpu.memory_space<vmem>>, vector<1x4x5x128xbf16>
    %627 = vector.shape_cast %626 : vector<1x4x5x128xbf16> to vector<4x5x128xbf16>
    %628 = vector.extract_strided_slice %627 {offsets = [0, 0, 0], sizes = [1, 5, 128], strides = [1, 1, 1]} : vector<4x5x128xbf16> to vector<1x5x128xbf16>
    %629 = vector.shape_cast %628 : vector<1x5x128xbf16> to vector<5x128xbf16>
    %630 = vector.extract_strided_slice %629 {offsets = [0, 0], sizes = [4, 128], strides = [1, 1]} : vector<5x128xbf16> to vector<4x128xbf16>
    %631 = vector.extract_strided_slice %629 {offsets = [1, 0], sizes = [4, 128], strides = [1, 1]} : vector<5x128xbf16> to vector<4x128xbf16>
    %632 = vector.extract_strided_slice %627 {offsets = [1, 0, 0], sizes = [1, 5, 128], strides = [1, 1, 1]} : vector<4x5x128xbf16> to vector<1x5x128xbf16>
    %633 = vector.shape_cast %632 : vector<1x5x128xbf16> to vector<5x128xbf16>
    %634 = vector.extract_strided_slice %633 {offsets = [0, 0], sizes = [4, 128], strides = [1, 1]} : vector<5x128xbf16> to vector<4x128xbf16>
    %635 = vector.extract_strided_slice %633 {offsets = [1, 0], sizes = [4, 128], strides = [1, 1]} : vector<5x128xbf16> to vector<4x128xbf16>
    %636 = vector.extract_strided_slice %627 {offsets = [2, 0, 0], sizes = [1, 5, 128], strides = [1, 1, 1]} : vector<4x5x128xbf16> to vector<1x5x128xbf16>
    %637 = vector.shape_cast %636 : vector<1x5x128xbf16> to vector<5x128xbf16>
    %638 = vector.extract_strided_slice %637 {offsets = [0, 0], sizes = [4, 128], strides = [1, 1]} : vector<5x128xbf16> to vector<4x128xbf16>
    %639 = vector.extract_strided_slice %637 {offsets = [1, 0], sizes = [4, 128], strides = [1, 1]} : vector<5x128xbf16> to vector<4x128xbf16>
    %640 = vector.extract_strided_slice %627 {offsets = [3, 0, 0], sizes = [1, 5, 128], strides = [1, 1, 1]} : vector<4x5x128xbf16> to vector<1x5x128xbf16>
    %641 = vector.shape_cast %640 : vector<1x5x128xbf16> to vector<5x128xbf16>
    %642 = vector.extract_strided_slice %641 {offsets = [0, 0], sizes = [4, 128], strides = [1, 1]} : vector<5x128xbf16> to vector<4x128xbf16>
    %643 = vector.extract_strided_slice %641 {offsets = [1, 0], sizes = [4, 128], strides = [1, 1]} : vector<5x128xbf16> to vector<4x128xbf16>
    %644 = tpu.concatenate %630, %631, %634, %635, %638, %639, %642, %643 in 1 : vector<4x128xbf16>, vector<4x128xbf16>, vector<4x128xbf16>, vector<4x128xbf16>, vector<4x128xbf16>, vector<4x128xbf16>, vector<4x128xbf16>, vector<4x128xbf16> -> vector<4x1024xbf16>
    %c12_372 = arith.constant 12 : index
    %c0_373 = arith.constant 0 : index
    %645 = vector.load %arg22[%c12_372, %c0_373] : memref<32x1024xbf16, #tpu.memory_space<vmem>>, vector<4x1024xbf16>
    tpu.vector_store %arg22[%c12_372, %c0_373], %644 {strides = array<i32>} : memref<32x1024xbf16, #tpu.memory_space<vmem>>, vector<4x1024xbf16>,
    %c1_374 = arith.constant 1 : index
    %c0_375 = arith.constant 0 : index
    %c0_376 = arith.constant 0 : index
    %c0_377 = arith.constant 0 : index
    %646 = vector.load %arg18[%c1_374, %c0_375, %c0_376, %c0_377] : memref<2x10x5x128xbf16, #tpu.memory_space<vmem>>, vector<1x4x5x128xbf16>
    %647 = vector.shape_cast %646 : vector<1x4x5x128xbf16> to vector<4x5x128xbf16>
    %648 = vector.extract_strided_slice %647 {offsets = [0, 0, 0], sizes = [1, 5, 128], strides = [1, 1, 1]} : vector<4x5x128xbf16> to vector<1x5x128xbf16>
    %649 = vector.shape_cast %648 : vector<1x5x128xbf16> to vector<5x128xbf16>
    %650 = vector.extract_strided_slice %649 {offsets = [0, 0], sizes = [4, 128], strides = [1, 1]} : vector<5x128xbf16> to vector<4x128xbf16>
    %651 = vector.extract_strided_slice %649 {offsets = [1, 0], sizes = [4, 128], strides = [1, 1]} : vector<5x128xbf16> to vector<4x128xbf16>
    %652 = vector.extract_strided_slice %647 {offsets = [1, 0, 0], sizes = [1, 5, 128], strides = [1, 1, 1]} : vector<4x5x128xbf16> to vector<1x5x128xbf16>
    %653 = vector.shape_cast %652 : vector<1x5x128xbf16> to vector<5x128xbf16>
    %654 = vector.extract_strided_slice %653 {offsets = [0, 0], sizes = [4, 128], strides = [1, 1]} : vector<5x128xbf16> to vector<4x128xbf16>
    %655 = vector.extract_strided_slice %653 {offsets = [1, 0], sizes = [4, 128], strides = [1, 1]} : vector<5x128xbf16> to vector<4x128xbf16>
    %656 = vector.extract_strided_slice %647 {offsets = [2, 0, 0], sizes = [1, 5, 128], strides = [1, 1, 1]} : vector<4x5x128xbf16> to vector<1x5x128xbf16>
    %657 = vector.shape_cast %656 : vector<1x5x128xbf16> to vector<5x128xbf16>
    %658 = vector.extract_strided_slice %657 {offsets = [0, 0], sizes = [4, 128], strides = [1, 1]} : vector<5x128xbf16> to vector<4x128xbf16>
    %659 = vector.extract_strided_slice %657 {offsets = [1, 0], sizes = [4, 128], strides = [1, 1]} : vector<5x128xbf16> to vector<4x128xbf16>
    %660 = vector.extract_strided_slice %647 {offsets = [3, 0, 0], sizes = [1, 5, 128], strides = [1, 1, 1]} : vector<4x5x128xbf16> to vector<1x5x128xbf16>
    %661 = vector.shape_cast %660 : vector<1x5x128xbf16> to vector<5x128xbf16>
    %662 = vector.extract_strided_slice %661 {offsets = [0, 0], sizes = [4, 128], strides = [1, 1]} : vector<5x128xbf16> to vector<4x128xbf16>
    %663 = vector.extract_strided_slice %661 {offsets = [1, 0], sizes = [4, 128], strides = [1, 1]} : vector<5x128xbf16> to vector<4x128xbf16>
    %664 = tpu.concatenate %650, %651, %654, %655, %658, %659, %662, %663 in 1 : vector<4x128xbf16>, vector<4x128xbf16>, vector<4x128xbf16>, vector<4x128xbf16>, vector<4x128xbf16>, vector<4x128xbf16>, vector<4x128xbf16>, vector<4x128xbf16> -> vector<4x1024xbf16>
    %c16_378 = arith.constant 16 : index
    %c0_379 = arith.constant 0 : index
    %665 = vector.load %arg22[%c16_378, %c0_379] : memref<32x1024xbf16, #tpu.memory_space<vmem>>, vector<4x1024xbf16>
    tpu.vector_store %arg22[%c16_378, %c0_379], %664 {strides = array<i32>} : memref<32x1024xbf16, #tpu.memory_space<vmem>>, vector<4x1024xbf16>,
    %c1_380 = arith.constant 1 : index
    %c2_381 = arith.constant 2 : index
    %c0_382 = arith.constant 0 : index
    %c0_383 = arith.constant 0 : index
    %666 = vector.load %arg18[%c1_380, %c2_381, %c0_382, %c0_383] : memref<2x10x5x128xbf16, #tpu.memory_space<vmem>>, vector<1x4x5x128xbf16>
    %667 = vector.shape_cast %666 : vector<1x4x5x128xbf16> to vector<4x5x128xbf16>
    %668 = vector.extract_strided_slice %667 {offsets = [0, 0, 0], sizes = [1, 5, 128], strides = [1, 1, 1]} : vector<4x5x128xbf16> to vector<1x5x128xbf16>
    %669 = vector.shape_cast %668 : vector<1x5x128xbf16> to vector<5x128xbf16>
    %670 = vector.extract_strided_slice %669 {offsets = [0, 0], sizes = [4, 128], strides = [1, 1]} : vector<5x128xbf16> to vector<4x128xbf16>
    %671 = vector.extract_strided_slice %669 {offsets = [1, 0], sizes = [4, 128], strides = [1, 1]} : vector<5x128xbf16> to vector<4x128xbf16>
    %672 = vector.extract_strided_slice %667 {offsets = [1, 0, 0], sizes = [1, 5, 128], strides = [1, 1, 1]} : vector<4x5x128xbf16> to vector<1x5x128xbf16>
    %673 = vector.shape_cast %672 : vector<1x5x128xbf16> to vector<5x128xbf16>
    %674 = vector.extract_strided_slice %673 {offsets = [0, 0], sizes = [4, 128], strides = [1, 1]} : vector<5x128xbf16> to vector<4x128xbf16>
    %675 = vector.extract_strided_slice %673 {offsets = [1, 0], sizes = [4, 128], strides = [1, 1]} : vector<5x128xbf16> to vector<4x128xbf16>
    %676 = vector.extract_strided_slice %667 {offsets = [2, 0, 0], sizes = [1, 5, 128], strides = [1, 1, 1]} : vector<4x5x128xbf16> to vector<1x5x128xbf16>
    %677 = vector.shape_cast %676 : vector<1x5x128xbf16> to vector<5x128xbf16>
    %678 = vector.extract_strided_slice %677 {offsets = [0, 0], sizes = [4, 128], strides = [1, 1]} : vector<5x128xbf16> to vector<4x128xbf16>
    %679 = vector.extract_strided_slice %677 {offsets = [1, 0], sizes = [4, 128], strides = [1, 1]} : vector<5x128xbf16> to vector<4x128xbf16>
    %680 = vector.extract_strided_slice %667 {offsets = [3, 0, 0], sizes = [1, 5, 128], strides = [1, 1, 1]} : vector<4x5x128xbf16> to vector<1x5x128xbf16>
    %681 = vector.shape_cast %680 : vector<1x5x128xbf16> to vector<5x128xbf16>
    %682 = vector.extract_strided_slice %681 {offsets = [0, 0], sizes = [4, 128], strides = [1, 1]} : vector<5x128xbf16> to vector<4x128xbf16>
    %683 = vector.extract_strided_slice %681 {offsets = [1, 0], sizes = [4, 128], strides = [1, 1]} : vector<5x128xbf16> to vector<4x128xbf16>
    %684 = tpu.concatenate %670, %671, %674, %675, %678, %679, %682, %683 in 1 : vector<4x128xbf16>, vector<4x128xbf16>, vector<4x128xbf16>, vector<4x128xbf16>, vector<4x128xbf16>, vector<4x128xbf16>, vector<4x128xbf16>, vector<4x128xbf16> -> vector<4x1024xbf16>
    %c20_384 = arith.constant 20 : index
    %c0_385 = arith.constant 0 : index
    %685 = vector.load %arg22[%c20_384, %c0_385] : memref<32x1024xbf16, #tpu.memory_space<vmem>>, vector<4x1024xbf16>
    tpu.vector_store %arg22[%c20_384, %c0_385], %684 {strides = array<i32>} : memref<32x1024xbf16, #tpu.memory_space<vmem>>, vector<4x1024xbf16>,
    %c1_386 = arith.constant 1 : index
    %c4_387 = arith.constant 4 : index
    %c0_388 = arith.constant 0 : index
    %c0_389 = arith.constant 0 : index
    %686 = vector.load %arg18[%c1_386, %c4_387, %c0_388, %c0_389] : memref<2x10x5x128xbf16, #tpu.memory_space<vmem>>, vector<1x4x5x128xbf16>
    %687 = vector.shape_cast %686 : vector<1x4x5x128xbf16> to vector<4x5x128xbf16>
    %688 = vector.extract_strided_slice %687 {offsets = [0, 0, 0], sizes = [1, 5, 128], strides = [1, 1, 1]} : vector<4x5x128xbf16> to vector<1x5x128xbf16>
    %689 = vector.shape_cast %688 : vector<1x5x128xbf16> to vector<5x128xbf16>
    %690 = vector.extract_strided_slice %689 {offsets = [0, 0], sizes = [4, 128], strides = [1, 1]} : vector<5x128xbf16> to vector<4x128xbf16>
    %691 = vector.extract_strided_slice %689 {offsets = [1, 0], sizes = [4, 128], strides = [1, 1]} : vector<5x128xbf16> to vector<4x128xbf16>
    %692 = vector.extract_strided_slice %687 {offsets = [1, 0, 0], sizes = [1, 5, 128], strides = [1, 1, 1]} : vector<4x5x128xbf16> to vector<1x5x128xbf16>
    %693 = vector.shape_cast %692 : vector<1x5x128xbf16> to vector<5x128xbf16>
    %694 = vector.extract_strided_slice %693 {offsets = [0, 0], sizes = [4, 128], strides = [1, 1]} : vector<5x128xbf16> to vector<4x128xbf16>
    %695 = vector.extract_strided_slice %693 {offsets = [1, 0], sizes = [4, 128], strides = [1, 1]} : vector<5x128xbf16> to vector<4x128xbf16>
    %696 = vector.extract_strided_slice %687 {offsets = [2, 0, 0], sizes = [1, 5, 128], strides = [1, 1, 1]} : vector<4x5x128xbf16> to vector<1x5x128xbf16>
    %697 = vector.shape_cast %696 : vector<1x5x128xbf16> to vector<5x128xbf16>
    %698 = vector.extract_strided_slice %697 {offsets = [0, 0], sizes = [4, 128], strides = [1, 1]} : vector<5x128xbf16> to vector<4x128xbf16>
    %699 = vector.extract_strided_slice %697 {offsets = [1, 0], sizes = [4, 128], strides = [1, 1]} : vector<5x128xbf16> to vector<4x128xbf16>
    %700 = vector.extract_strided_slice %687 {offsets = [3, 0, 0], sizes = [1, 5, 128], strides = [1, 1, 1]} : vector<4x5x128xbf16> to vector<1x5x128xbf16>
    %701 = vector.shape_cast %700 : vector<1x5x128xbf16> to vector<5x128xbf16>
    %702 = vector.extract_strided_slice %701 {offsets = [0, 0], sizes = [4, 128], strides = [1, 1]} : vector<5x128xbf16> to vector<4x128xbf16>
    %703 = vector.extract_strided_slice %701 {offsets = [1, 0], sizes = [4, 128], strides = [1, 1]} : vector<5x128xbf16> to vector<4x128xbf16>
    %704 = tpu.concatenate %690, %691, %694, %695, %698, %699, %702, %703 in 1 : vector<4x128xbf16>, vector<4x128xbf16>, vector<4x128xbf16>, vector<4x128xbf16>, vector<4x128xbf16>, vector<4x128xbf16>, vector<4x128xbf16>, vector<4x128xbf16> -> vector<4x1024xbf16>
    %c24_390 = arith.constant 24 : index
    %c0_391 = arith.constant 0 : index
    %705 = vector.load %arg22[%c24_390, %c0_391] : memref<32x1024xbf16, #tpu.memory_space<vmem>>, vector<4x1024xbf16>
    tpu.vector_store %arg22[%c24_390, %c0_391], %704 {strides = array<i32>} : memref<32x1024xbf16, #tpu.memory_space<vmem>>, vector<4x1024xbf16>,
    %c1_392 = arith.constant 1 : index
    %c6_393 = arith.constant 6 : index
    %c0_394 = arith.constant 0 : index
    %c0_395 = arith.constant 0 : index
    %706 = vector.load %arg18[%c1_392, %c6_393, %c0_394, %c0_395] : memref<2x10x5x128xbf16, #tpu.memory_space<vmem>>, vector<1x4x5x128xbf16>
    %707 = vector.shape_cast %706 : vector<1x4x5x128xbf16> to vector<4x5x128xbf16>
    %708 = vector.extract_strided_slice %707 {offsets = [0, 0, 0], sizes = [1, 5, 128], strides = [1, 1, 1]} : vector<4x5x128xbf16> to vector<1x5x128xbf16>
    %709 = vector.shape_cast %708 : vector<1x5x128xbf16> to vector<5x128xbf16>
    %710 = vector.extract_strided_slice %709 {offsets = [0, 0], sizes = [4, 128], strides = [1, 1]} : vector<5x128xbf16> to vector<4x128xbf16>
    %711 = vector.extract_strided_slice %709 {offsets = [1, 0], sizes = [4, 128], strides = [1, 1]} : vector<5x128xbf16> to vector<4x128xbf16>
    %712 = vector.extract_strided_slice %707 {offsets = [1, 0, 0], sizes = [1, 5, 128], strides = [1, 1, 1]} : vector<4x5x128xbf16> to vector<1x5x128xbf16>
    %713 = vector.shape_cast %712 : vector<1x5x128xbf16> to vector<5x128xbf16>
    %714 = vector.extract_strided_slice %713 {offsets = [0, 0], sizes = [4, 128], strides = [1, 1]} : vector<5x128xbf16> to vector<4x128xbf16>
    %715 = vector.extract_strided_slice %713 {offsets = [1, 0], sizes = [4, 128], strides = [1, 1]} : vector<5x128xbf16> to vector<4x128xbf16>
    %716 = vector.extract_strided_slice %707 {offsets = [2, 0, 0], sizes = [1, 5, 128], strides = [1, 1, 1]} : vector<4x5x128xbf16> to vector<1x5x128xbf16>
    %717 = vector.shape_cast %716 : vector<1x5x128xbf16> to vector<5x128xbf16>
    %718 = vector.extract_strided_slice %717 {offsets = [0, 0], sizes = [4, 128], strides = [1, 1]} : vector<5x128xbf16> to vector<4x128xbf16>
    %719 = vector.extract_strided_slice %717 {offsets = [1, 0], sizes = [4, 128], strides = [1, 1]} : vector<5x128xbf16> to vector<4x128xbf16>
    %720 = vector.extract_strided_slice %707 {offsets = [3, 0, 0], sizes = [1, 5, 128], strides = [1, 1, 1]} : vector<4x5x128xbf16> to vector<1x5x128xbf16>
    %721 = vector.shape_cast %720 : vector<1x5x128xbf16> to vector<5x128xbf16>
    %722 = vector.extract_strided_slice %721 {offsets = [0, 0], sizes = [4, 128], strides = [1, 1]} : vector<5x128xbf16> to vector<4x128xbf16>
    %723 = vector.extract_strided_slice %721 {offsets = [1, 0], sizes = [4, 128], strides = [1, 1]} : vector<5x128xbf16> to vector<4x128xbf16>
    %724 = tpu.concatenate %710, %711, %714, %715, %718, %719, %722, %723 in 1 : vector<4x128xbf16>, vector<4x128xbf16>, vector<4x128xbf16>, vector<4x128xbf16>, vector<4x128xbf16>, vector<4x128xbf16>, vector<4x128xbf16>, vector<4x128xbf16> -> vector<4x1024xbf16>
    %c28_396 = arith.constant 28 : index
    %c0_397 = arith.constant 0 : index
    %725 = vector.load %arg22[%c28_396, %c0_397] : memref<32x1024xbf16, #tpu.memory_space<vmem>>, vector<4x1024xbf16>
    tpu.vector_store %arg22[%c28_396, %c0_397], %724 {strides = array<i32>} : memref<32x1024xbf16, #tpu.memory_space<vmem>>, vector<4x1024xbf16>,
    %c0_398 = arith.constant 0 : index
    %c0_399 = arith.constant 0 : index
    %726 = vector.load %arg22[%c0_398, %c0_399] : memref<32x1024xbf16, #tpu.memory_space<vmem>>, vector<32x1024xbf16>
    %c0_400 = arith.constant 0 : index
    %c0_401 = arith.constant 0 : index
    %727 = vector.load %arg5[%c0_400, %c0_401] : memref<1024x64xbf16, #tpu.memory_space<vmem>>, vector<1024x64xbf16>
    %cst_402 = arith.constant dense<0.000000e+00> : vector<32x64xf32>
    %728 = tpu.matmul %726, %727, %cst_402 {dimension_numbers = #tpu.dot_dimension_numbers<[1], [0], [0], [1], [0, 0, 1, 1], [], []>} : vector<32x1024xbf16>, vector<1024x64xbf16>, vector<32x64xf32> -> vector<32x64xf32>
    %cst_403 = arith.constant dense<0.000000e+00> : vector<64xf32>
    %729 = vector.multi_reduction <add>, %728, %cst_403 [0] : vector<32x64xf32> to vector<64xf32>
    %730 = vector.shape_cast %729 : vector<64xf32> to vector<1x64xf32>
    %cst_404 = arith.constant 3.125000e-02 : f32
    %731 = vector.broadcast %cst_404 : f32 to vector<1x64xf32>
    %732 = arith.mulf %730, %731 : vector<1x64xf32>
    %733 = vector.broadcast %732 : vector<1x64xf32> to vector<32x64xf32>
    %734 = arith.subf %728, %733 : vector<32x64xf32>
    %735 = arith.mulf %734, %734 : vector<32x64xf32>
    %cst_405 = arith.constant dense<0.000000e+00> : vector<64xf32>
    %736 = vector.multi_reduction <add>, %735, %cst_405 [0] : vector<32x64xf32> to vector<64xf32>
    %737 = vector.shape_cast %736 : vector<64xf32> to vector<1x64xf32>
    %cst_406 = arith.constant 3.125000e-02 : f32
    %738 = vector.broadcast %cst_406 : f32 to vector<1x64xf32>
    %739 = arith.mulf %737, %738 : vector<1x64xf32>
    %c0_407 = arith.constant 0 : index
    %c0_408 = arith.constant 0 : index
    %740 = vector.load %arg6[%c0_407, %c0_408] : memref<1x64xf32, #tpu.memory_space<vmem>>, vector<1x64xf32>
    %cst_409 = arith.constant 9.99999974E-6 : f32
    %741 = vector.broadcast %cst_409 : f32 to vector<1x64xf32>
    %742 = arith.addf %739, %741 : vector<1x64xf32>
    %743 = math.rsqrt %742 : vector<1x64xf32>
    %744 = arith.mulf %740, %743 : vector<1x64xf32>
    %745 = vector.broadcast %744 : vector<1x64xf32> to vector<32x64xf32>
    %746 = arith.mulf %734, %745 : vector<32x64xf32>
    %c0_410 = arith.constant 0 : index
    %c0_411 = arith.constant 0 : index
    %747 = vector.load %arg7[%c0_410, %c0_411] : memref<1x64xf32, #tpu.memory_space<vmem>>, vector<1x64xf32>
    %748 = vector.broadcast %747 : vector<1x64xf32> to vector<32x64xf32>
    %749 = arith.addf %746, %748 : vector<32x64xf32>
    %cst_412 = arith.constant 0.000000e+00 : f32
    %750 = vector.broadcast %cst_412 : f32 to vector<32x64xf32>
    %751 = arith.cmpf oge, %749, %750 : vector<32x64xf32>
    %cst_413 = arith.constant 2.000000e-01 : f32
    %752 = vector.broadcast %cst_413 : f32 to vector<32x64xf32>
    %753 = arith.mulf %752, %749 : vector<32x64xf32>
    %754 = arith.select %751, %749, %753 : vector<32x64xi1>, vector<32x64xf32>
    %c0_414 = arith.constant 0 : index
    %c0_415 = arith.constant 0 : index
    %755 = vector.load %arg26[%c0_414, %c0_415] : memref<32x64xf32, #tpu.memory_space<vmem>>, vector<32x64xf32>
    tpu.vector_store %arg26[%c0_414, %c0_415], %754 {strides = array<i32>} : memref<32x64xf32, #tpu.memory_space<vmem>>, vector<32x64xf32>,
    %c0_416 = arith.constant 0 : index
    %c0_417 = arith.constant 0 : index
    %756 = tpu.strided_load %arg26[%c0_416, %c0_417] {strides = array<i32: 2, 1>} : memref<32x64xf32, #tpu.memory_space<vmem>>, vector<2x64xf32>
    %c1_418 = arith.constant 1 : index
    %c0_419 = arith.constant 0 : index
    %757 = tpu.strided_load %arg26[%c1_418, %c0_419] {strides = array<i32: 2, 1>} : memref<32x64xf32, #tpu.memory_space<vmem>>, vector<2x64xf32>
    %758 = tpu.concatenate %756, %757 in 1 : vector<2x64xf32>, vector<2x64xf32> -> vector<2x128xf32>
    %c0_420 = arith.constant 0 : index
    %c0_421 = arith.constant 0 : index
    %759 = vector.load %arg15[%c0_420, %c0_421] : memref<16x128xf32, #tpu.memory_space<vmem>>, vector<2x128xf32>
    tpu.vector_store %arg15[%c0_420, %c0_421], %758 {strides = array<i32>} : memref<16x128xf32, #tpu.memory_space<vmem>>, vector<2x128xf32>,
    %760 = arith.truncf %757 : vector<2x64xf32> to vector<2x64xbf16>
    %c0_422 = arith.constant 0 : index
    %c1_423 = arith.constant 1 : index
    %c1_424 = arith.constant 1 : index
    %c0_425 = arith.constant 0 : index
    %761 = vector.load %arg19[%c0_422, %c1_423, %c1_424, %c0_425] : memref<2x6x3x128xbf16, #tpu.memory_space<vmem>>, vector<1x1x2x64xbf16>
    %762 = vector.shape_cast %761 : vector<1x1x2x64xbf16> to vector<2x64xbf16>
    %763 = vector.shape_cast %760 : vector<2x64xbf16> to vector<1x1x2x64xbf16>
    tpu.vector_store %arg19[%c0_422, %c1_423, %c1_424, %c0_425], %763 {strides = array<i32>} : memref<2x6x3x128xbf16, #tpu.memory_space<vmem>>, vector<1x1x2x64xbf16>,
    %764 = arith.truncf %756 : vector<2x64xf32> to vector<2x64xbf16>
    %c0_426 = arith.constant 0 : index
    %c1_427 = arith.constant 1 : index
    %c0_428 = arith.constant 0 : index
    %c64_429 = arith.constant 64 : index
    %765 = vector.load %arg19[%c0_426, %c1_427, %c0_428, %c64_429] : memref<2x6x3x128xbf16, #tpu.memory_space<vmem>>, vector<1x1x2x64xbf16>
    %766 = vector.shape_cast %765 : vector<1x1x2x64xbf16> to vector<2x64xbf16>
    %767 = vector.shape_cast %764 : vector<2x64xbf16> to vector<1x1x2x64xbf16>
    tpu.vector_store %arg19[%c0_426, %c1_427, %c0_428, %c64_429], %767 {strides = array<i32>} : memref<2x6x3x128xbf16, #tpu.memory_space<vmem>>, vector<1x1x2x64xbf16>,
    %c4_430 = arith.constant 4 : index
    %c0_431 = arith.constant 0 : index
    %768 = tpu.strided_load %arg26[%c4_430, %c0_431] {strides = array<i32: 2, 1>} : memref<32x64xf32, #tpu.memory_space<vmem>>, vector<2x64xf32>
    %c5_432 = arith.constant 5 : index
    %c0_433 = arith.constant 0 : index
    %769 = tpu.strided_load %arg26[%c5_432, %c0_433] {strides = array<i32: 2, 1>} : memref<32x64xf32, #tpu.memory_space<vmem>>, vector<2x64xf32>
    %770 = tpu.concatenate %768, %769 in 1 : vector<2x64xf32>, vector<2x64xf32> -> vector<2x128xf32>
    %c2_434 = arith.constant 2 : index
    %c0_435 = arith.constant 0 : index
    %771 = vector.load %arg15[%c2_434, %c0_435] : memref<16x128xf32, #tpu.memory_space<vmem>>, vector<2x128xf32>
    tpu.vector_store %arg15[%c2_434, %c0_435], %770 {strides = array<i32>} : memref<16x128xf32, #tpu.memory_space<vmem>>, vector<2x128xf32>,
    %772 = arith.truncf %769 : vector<2x64xf32> to vector<2x64xbf16>
    %c0_436 = arith.constant 0 : index
    %c2_437 = arith.constant 2 : index
    %c1_438 = arith.constant 1 : index
    %c0_439 = arith.constant 0 : index
    %773 = vector.load %arg19[%c0_436, %c2_437, %c1_438, %c0_439] : memref<2x6x3x128xbf16, #tpu.memory_space<vmem>>, vector<1x1x2x64xbf16>
    %774 = vector.shape_cast %773 : vector<1x1x2x64xbf16> to vector<2x64xbf16>
    %775 = vector.shape_cast %772 : vector<2x64xbf16> to vector<1x1x2x64xbf16>
    tpu.vector_store %arg19[%c0_436, %c2_437, %c1_438, %c0_439], %775 {strides = array<i32>} : memref<2x6x3x128xbf16, #tpu.memory_space<vmem>>, vector<1x1x2x64xbf16>,
    %776 = arith.truncf %768 : vector<2x64xf32> to vector<2x64xbf16>
    %c0_440 = arith.constant 0 : index
    %c2_441 = arith.constant 2 : index
    %c0_442 = arith.constant 0 : index
    %c64_443 = arith.constant 64 : index
    %777 = vector.load %arg19[%c0_440, %c2_441, %c0_442, %c64_443] : memref<2x6x3x128xbf16, #tpu.memory_space<vmem>>, vector<1x1x2x64xbf16>
    %778 = vector.shape_cast %777 : vector<1x1x2x64xbf16> to vector<2x64xbf16>
    %779 = vector.shape_cast %776 : vector<2x64xbf16> to vector<1x1x2x64xbf16>
    tpu.vector_store %arg19[%c0_440, %c2_441, %c0_442, %c64_443], %779 {strides = array<i32>} : memref<2x6x3x128xbf16, #tpu.memory_space<vmem>>, vector<1x1x2x64xbf16>,
    %c8_444 = arith.constant 8 : index
    %c0_445 = arith.constant 0 : index
    %780 = tpu.strided_load %arg26[%c8_444, %c0_445] {strides = array<i32: 2, 1>} : memref<32x64xf32, #tpu.memory_space<vmem>>, vector<2x64xf32>
    %c9_446 = arith.constant 9 : index
    %c0_447 = arith.constant 0 : index
    %781 = tpu.strided_load %arg26[%c9_446, %c0_447] {strides = array<i32: 2, 1>} : memref<32x64xf32, #tpu.memory_space<vmem>>, vector<2x64xf32>
    %782 = tpu.concatenate %780, %781 in 1 : vector<2x64xf32>, vector<2x64xf32> -> vector<2x128xf32>
    %c4_448 = arith.constant 4 : index
    %c0_449 = arith.constant 0 : index
    %783 = vector.load %arg15[%c4_448, %c0_449] : memref<16x128xf32, #tpu.memory_space<vmem>>, vector<2x128xf32>
    tpu.vector_store %arg15[%c4_448, %c0_449], %782 {strides = array<i32>} : memref<16x128xf32, #tpu.memory_space<vmem>>, vector<2x128xf32>,
    %784 = arith.truncf %781 : vector<2x64xf32> to vector<2x64xbf16>
    %c0_450 = arith.constant 0 : index
    %c3_451 = arith.constant 3 : index
    %c1_452 = arith.constant 1 : index
    %c0_453 = arith.constant 0 : index
    %785 = vector.load %arg19[%c0_450, %c3_451, %c1_452, %c0_453] : memref<2x6x3x128xbf16, #tpu.memory_space<vmem>>, vector<1x1x2x64xbf16>
    %786 = vector.shape_cast %785 : vector<1x1x2x64xbf16> to vector<2x64xbf16>
    %787 = vector.shape_cast %784 : vector<2x64xbf16> to vector<1x1x2x64xbf16>
    tpu.vector_store %arg19[%c0_450, %c3_451, %c1_452, %c0_453], %787 {strides = array<i32>} : memref<2x6x3x128xbf16, #tpu.memory_space<vmem>>, vector<1x1x2x64xbf16>,
    %788 = arith.truncf %780 : vector<2x64xf32> to vector<2x64xbf16>
    %c0_454 = arith.constant 0 : index
    %c3_455 = arith.constant 3 : index
    %c0_456 = arith.constant 0 : index
    %c64_457 = arith.constant 64 : index
    %789 = vector.load %arg19[%c0_454, %c3_455, %c0_456, %c64_457] : memref<2x6x3x128xbf16, #tpu.memory_space<vmem>>, vector<1x1x2x64xbf16>
    %790 = vector.shape_cast %789 : vector<1x1x2x64xbf16> to vector<2x64xbf16>
    %791 = vector.shape_cast %788 : vector<2x64xbf16> to vector<1x1x2x64xbf16>
    tpu.vector_store %arg19[%c0_454, %c3_455, %c0_456, %c64_457], %791 {strides = array<i32>} : memref<2x6x3x128xbf16, #tpu.memory_space<vmem>>, vector<1x1x2x64xbf16>,
    %c12_458 = arith.constant 12 : index
    %c0_459 = arith.constant 0 : index
    %792 = tpu.strided_load %arg26[%c12_458, %c0_459] {strides = array<i32: 2, 1>} : memref<32x64xf32, #tpu.memory_space<vmem>>, vector<2x64xf32>
    %c13 = arith.constant 13 : index
    %c0_460 = arith.constant 0 : index
    %793 = tpu.strided_load %arg26[%c13, %c0_460] {strides = array<i32: 2, 1>} : memref<32x64xf32, #tpu.memory_space<vmem>>, vector<2x64xf32>
    %794 = tpu.concatenate %792, %793 in 1 : vector<2x64xf32>, vector<2x64xf32> -> vector<2x128xf32>
    %c6_461 = arith.constant 6 : index
    %c0_462 = arith.constant 0 : index
    %795 = vector.load %arg15[%c6_461, %c0_462] : memref<16x128xf32, #tpu.memory_space<vmem>>, vector<2x128xf32>
    tpu.vector_store %arg15[%c6_461, %c0_462], %794 {strides = array<i32>} : memref<16x128xf32, #tpu.memory_space<vmem>>, vector<2x128xf32>,
    %796 = arith.truncf %793 : vector<2x64xf32> to vector<2x64xbf16>
    %c0_463 = arith.constant 0 : index
    %c4_464 = arith.constant 4 : index
    %c1_465 = arith.constant 1 : index
    %c0_466 = arith.constant 0 : index
    %797 = vector.load %arg19[%c0_463, %c4_464, %c1_465, %c0_466] : memref<2x6x3x128xbf16, #tpu.memory_space<vmem>>, vector<1x1x2x64xbf16>
    %798 = vector.shape_cast %797 : vector<1x1x2x64xbf16> to vector<2x64xbf16>
    %799 = vector.shape_cast %796 : vector<2x64xbf16> to vector<1x1x2x64xbf16>
    tpu.vector_store %arg19[%c0_463, %c4_464, %c1_465, %c0_466], %799 {strides = array<i32>} : memref<2x6x3x128xbf16, #tpu.memory_space<vmem>>, vector<1x1x2x64xbf16>,
    %800 = arith.truncf %792 : vector<2x64xf32> to vector<2x64xbf16>
    %c0_467 = arith.constant 0 : index
    %c4_468 = arith.constant 4 : index
    %c0_469 = arith.constant 0 : index
    %c64_470 = arith.constant 64 : index
    %801 = vector.load %arg19[%c0_467, %c4_468, %c0_469, %c64_470] : memref<2x6x3x128xbf16, #tpu.memory_space<vmem>>, vector<1x1x2x64xbf16>
    %802 = vector.shape_cast %801 : vector<1x1x2x64xbf16> to vector<2x64xbf16>
    %803 = vector.shape_cast %800 : vector<2x64xbf16> to vector<1x1x2x64xbf16>
    tpu.vector_store %arg19[%c0_467, %c4_468, %c0_469, %c64_470], %803 {strides = array<i32>} : memref<2x6x3x128xbf16, #tpu.memory_space<vmem>>, vector<1x1x2x64xbf16>,
    %c16_471 = arith.constant 16 : index
    %c0_472 = arith.constant 0 : index
    %804 = tpu.strided_load %arg26[%c16_471, %c0_472] {strides = array<i32: 2, 1>} : memref<32x64xf32, #tpu.memory_space<vmem>>, vector<2x64xf32>
    %c17_473 = arith.constant 17 : index
    %c0_474 = arith.constant 0 : index
    %805 = tpu.strided_load %arg26[%c17_473, %c0_474] {strides = array<i32: 2, 1>} : memref<32x64xf32, #tpu.memory_space<vmem>>, vector<2x64xf32>
    %806 = tpu.concatenate %804, %805 in 1 : vector<2x64xf32>, vector<2x64xf32> -> vector<2x128xf32>
    %c8_475 = arith.constant 8 : index
    %c0_476 = arith.constant 0 : index
    %807 = vector.load %arg15[%c8_475, %c0_476] : memref<16x128xf32, #tpu.memory_space<vmem>>, vector<2x128xf32>
    tpu.vector_store %arg15[%c8_475, %c0_476], %806 {strides = array<i32>} : memref<16x128xf32, #tpu.memory_space<vmem>>, vector<2x128xf32>,
    %808 = arith.truncf %805 : vector<2x64xf32> to vector<2x64xbf16>
    %c1_477 = arith.constant 1 : index
    %c1_478 = arith.constant 1 : index
    %c1_479 = arith.constant 1 : index
    %c0_480 = arith.constant 0 : index
    %809 = vector.load %arg19[%c1_477, %c1_478, %c1_479, %c0_480] : memref<2x6x3x128xbf16, #tpu.memory_space<vmem>>, vector<1x1x2x64xbf16>
    %810 = vector.shape_cast %809 : vector<1x1x2x64xbf16> to vector<2x64xbf16>
    %811 = vector.shape_cast %808 : vector<2x64xbf16> to vector<1x1x2x64xbf16>
    tpu.vector_store %arg19[%c1_477, %c1_478, %c1_479, %c0_480], %811 {strides = array<i32>} : memref<2x6x3x128xbf16, #tpu.memory_space<vmem>>, vector<1x1x2x64xbf16>,
    %812 = arith.truncf %804 : vector<2x64xf32> to vector<2x64xbf16>
    %c1_481 = arith.constant 1 : index
    %c1_482 = arith.constant 1 : index
    %c0_483 = arith.constant 0 : index
    %c64_484 = arith.constant 64 : index
    %813 = vector.load %arg19[%c1_481, %c1_482, %c0_483, %c64_484] : memref<2x6x3x128xbf16, #tpu.memory_space<vmem>>, vector<1x1x2x64xbf16>
    %814 = vector.shape_cast %813 : vector<1x1x2x64xbf16> to vector<2x64xbf16>
    %815 = vector.shape_cast %812 : vector<2x64xbf16> to vector<1x1x2x64xbf16>
    tpu.vector_store %arg19[%c1_481, %c1_482, %c0_483, %c64_484], %815 {strides = array<i32>} : memref<2x6x3x128xbf16, #tpu.memory_space<vmem>>, vector<1x1x2x64xbf16>,
    %c20_485 = arith.constant 20 : index
    %c0_486 = arith.constant 0 : index
    %816 = tpu.strided_load %arg26[%c20_485, %c0_486] {strides = array<i32: 2, 1>} : memref<32x64xf32, #tpu.memory_space<vmem>>, vector<2x64xf32>
    %c21 = arith.constant 21 : index
    %c0_487 = arith.constant 0 : index
    %817 = tpu.strided_load %arg26[%c21, %c0_487] {strides = array<i32: 2, 1>} : memref<32x64xf32, #tpu.memory_space<vmem>>, vector<2x64xf32>
    %818 = tpu.concatenate %816, %817 in 1 : vector<2x64xf32>, vector<2x64xf32> -> vector<2x128xf32>
    %c10_488 = arith.constant 10 : index
    %c0_489 = arith.constant 0 : index
    %819 = vector.load %arg15[%c10_488, %c0_489] : memref<16x128xf32, #tpu.memory_space<vmem>>, vector<2x128xf32>
    tpu.vector_store %arg15[%c10_488, %c0_489], %818 {strides = array<i32>} : memref<16x128xf32, #tpu.memory_space<vmem>>, vector<2x128xf32>,
    %820 = arith.truncf %817 : vector<2x64xf32> to vector<2x64xbf16>
    %c1_490 = arith.constant 1 : index
    %c2_491 = arith.constant 2 : index
    %c1_492 = arith.constant 1 : index
    %c0_493 = arith.constant 0 : index
    %821 = vector.load %arg19[%c1_490, %c2_491, %c1_492, %c0_493] : memref<2x6x3x128xbf16, #tpu.memory_space<vmem>>, vector<1x1x2x64xbf16>
    %822 = vector.shape_cast %821 : vector<1x1x2x64xbf16> to vector<2x64xbf16>
    %823 = vector.shape_cast %820 : vector<2x64xbf16> to vector<1x1x2x64xbf16>
    tpu.vector_store %arg19[%c1_490, %c2_491, %c1_492, %c0_493], %823 {strides = array<i32>} : memref<2x6x3x128xbf16, #tpu.memory_space<vmem>>, vector<1x1x2x64xbf16>,
    %824 = arith.truncf %816 : vector<2x64xf32> to vector<2x64xbf16>
    %c1_494 = arith.constant 1 : index
    %c2_495 = arith.constant 2 : index
    %c0_496 = arith.constant 0 : index
    %c64_497 = arith.constant 64 : index
    %825 = vector.load %arg19[%c1_494, %c2_495, %c0_496, %c64_497] : memref<2x6x3x128xbf16, #tpu.memory_space<vmem>>, vector<1x1x2x64xbf16>
    %826 = vector.shape_cast %825 : vector<1x1x2x64xbf16> to vector<2x64xbf16>
    %827 = vector.shape_cast %824 : vector<2x64xbf16> to vector<1x1x2x64xbf16>
    tpu.vector_store %arg19[%c1_494, %c2_495, %c0_496, %c64_497], %827 {strides = array<i32>} : memref<2x6x3x128xbf16, #tpu.memory_space<vmem>>, vector<1x1x2x64xbf16>,
    %c24_498 = arith.constant 24 : index
    %c0_499 = arith.constant 0 : index
    %828 = tpu.strided_load %arg26[%c24_498, %c0_499] {strides = array<i32: 2, 1>} : memref<32x64xf32, #tpu.memory_space<vmem>>, vector<2x64xf32>
    %c25_500 = arith.constant 25 : index
    %c0_501 = arith.constant 0 : index
    %829 = tpu.strided_load %arg26[%c25_500, %c0_501] {strides = array<i32: 2, 1>} : memref<32x64xf32, #tpu.memory_space<vmem>>, vector<2x64xf32>
    %830 = tpu.concatenate %828, %829 in 1 : vector<2x64xf32>, vector<2x64xf32> -> vector<2x128xf32>
    %c12_502 = arith.constant 12 : index
    %c0_503 = arith.constant 0 : index
    %831 = vector.load %arg15[%c12_502, %c0_503] : memref<16x128xf32, #tpu.memory_space<vmem>>, vector<2x128xf32>
    tpu.vector_store %arg15[%c12_502, %c0_503], %830 {strides = array<i32>} : memref<16x128xf32, #tpu.memory_space<vmem>>, vector<2x128xf32>,
    %832 = arith.truncf %829 : vector<2x64xf32> to vector<2x64xbf16>
    %c1_504 = arith.constant 1 : index
    %c3_505 = arith.constant 3 : index
    %c1_506 = arith.constant 1 : index
    %c0_507 = arith.constant 0 : index
    %833 = vector.load %arg19[%c1_504, %c3_505, %c1_506, %c0_507] : memref<2x6x3x128xbf16, #tpu.memory_space<vmem>>, vector<1x1x2x64xbf16>
    %834 = vector.shape_cast %833 : vector<1x1x2x64xbf16> to vector<2x64xbf16>
    %835 = vector.shape_cast %832 : vector<2x64xbf16> to vector<1x1x2x64xbf16>
    tpu.vector_store %arg19[%c1_504, %c3_505, %c1_506, %c0_507], %835 {strides = array<i32>} : memref<2x6x3x128xbf16, #tpu.memory_space<vmem>>, vector<1x1x2x64xbf16>,
    %836 = arith.truncf %828 : vector<2x64xf32> to vector<2x64xbf16>
    %c1_508 = arith.constant 1 : index
    %c3_509 = arith.constant 3 : index
    %c0_510 = arith.constant 0 : index
    %c64_511 = arith.constant 64 : index
    %837 = vector.load %arg19[%c1_508, %c3_509, %c0_510, %c64_511] : memref<2x6x3x128xbf16, #tpu.memory_space<vmem>>, vector<1x1x2x64xbf16>
    %838 = vector.shape_cast %837 : vector<1x1x2x64xbf16> to vector<2x64xbf16>
    %839 = vector.shape_cast %836 : vector<2x64xbf16> to vector<1x1x2x64xbf16>
    tpu.vector_store %arg19[%c1_508, %c3_509, %c0_510, %c64_511], %839 {strides = array<i32>} : memref<2x6x3x128xbf16, #tpu.memory_space<vmem>>, vector<1x1x2x64xbf16>,
    %c28_512 = arith.constant 28 : index
    %c0_513 = arith.constant 0 : index
    %840 = tpu.strided_load %arg26[%c28_512, %c0_513] {strides = array<i32: 2, 1>} : memref<32x64xf32, #tpu.memory_space<vmem>>, vector<2x64xf32>
    %c29 = arith.constant 29 : index
    %c0_514 = arith.constant 0 : index
    %841 = tpu.strided_load %arg26[%c29, %c0_514] {strides = array<i32: 2, 1>} : memref<32x64xf32, #tpu.memory_space<vmem>>, vector<2x64xf32>
    %842 = tpu.concatenate %840, %841 in 1 : vector<2x64xf32>, vector<2x64xf32> -> vector<2x128xf32>
    %c14_515 = arith.constant 14 : index
    %c0_516 = arith.constant 0 : index
    %843 = vector.load %arg15[%c14_515, %c0_516] : memref<16x128xf32, #tpu.memory_space<vmem>>, vector<2x128xf32>
    tpu.vector_store %arg15[%c14_515, %c0_516], %842 {strides = array<i32>} : memref<16x128xf32, #tpu.memory_space<vmem>>, vector<2x128xf32>,
    %844 = arith.truncf %841 : vector<2x64xf32> to vector<2x64xbf16>
    %c1_517 = arith.constant 1 : index
    %c4_518 = arith.constant 4 : index
    %c1_519 = arith.constant 1 : index
    %c0_520 = arith.constant 0 : index
    %845 = vector.load %arg19[%c1_517, %c4_518, %c1_519, %c0_520] : memref<2x6x3x128xbf16, #tpu.memory_space<vmem>>, vector<1x1x2x64xbf16>
    %846 = vector.shape_cast %845 : vector<1x1x2x64xbf16> to vector<2x64xbf16>
    %847 = vector.shape_cast %844 : vector<2x64xbf16> to vector<1x1x2x64xbf16>
    tpu.vector_store %arg19[%c1_517, %c4_518, %c1_519, %c0_520], %847 {strides = array<i32>} : memref<2x6x3x128xbf16, #tpu.memory_space<vmem>>, vector<1x1x2x64xbf16>,
    %848 = arith.truncf %840 : vector<2x64xf32> to vector<2x64xbf16>
    %c1_521 = arith.constant 1 : index
    %c4_522 = arith.constant 4 : index
    %c0_523 = arith.constant 0 : index
    %c64_524 = arith.constant 64 : index
    %849 = vector.load %arg19[%c1_521, %c4_522, %c0_523, %c64_524] : memref<2x6x3x128xbf16, #tpu.memory_space<vmem>>, vector<1x1x2x64xbf16>
    %850 = vector.shape_cast %849 : vector<1x1x2x64xbf16> to vector<2x64xbf16>
    %851 = vector.shape_cast %848 : vector<2x64xbf16> to vector<1x1x2x64xbf16>
    tpu.vector_store %arg19[%c1_521, %c4_522, %c0_523, %c64_524], %851 {strides = array<i32>} : memref<2x6x3x128xbf16, #tpu.memory_space<vmem>>, vector<1x1x2x64xbf16>,
    %c0_525 = arith.constant 0 : index
    %c0_526 = arith.constant 0 : index
    %c0_527 = arith.constant 0 : index
    %c0_528 = arith.constant 0 : index
    %852 = vector.load %arg19[%c0_525, %c0_526, %c0_527, %c0_528] : memref<2x6x3x128xbf16, #tpu.memory_space<vmem>>, vector<1x4x3x128xbf16>
    %853 = vector.shape_cast %852 : vector<1x4x3x128xbf16> to vector<4x3x128xbf16>
    %854 = vector.extract_strided_slice %853 {offsets = [0, 0, 0], sizes = [1, 3, 128], strides = [1, 1, 1]} : vector<4x3x128xbf16> to vector<1x3x128xbf16>
    %855 = vector.shape_cast %854 : vector<1x3x128xbf16> to vector<3x128xbf16>
    %856 = vector.extract_strided_slice %855 {offsets = [0, 0], sizes = [2, 128], strides = [1, 1]} : vector<3x128xbf16> to vector<2x128xbf16>
    %857 = vector.extract_strided_slice %855 {offsets = [1, 0], sizes = [2, 128], strides = [1, 1]} : vector<3x128xbf16> to vector<2x128xbf16>
    %858 = vector.extract_strided_slice %853 {offsets = [1, 0, 0], sizes = [1, 3, 128], strides = [1, 1, 1]} : vector<4x3x128xbf16> to vector<1x3x128xbf16>
    %859 = vector.shape_cast %858 : vector<1x3x128xbf16> to vector<3x128xbf16>
    %860 = vector.extract_strided_slice %859 {offsets = [0, 0], sizes = [2, 128], strides = [1, 1]} : vector<3x128xbf16> to vector<2x128xbf16>
    %861 = vector.extract_strided_slice %859 {offsets = [1, 0], sizes = [2, 128], strides = [1, 1]} : vector<3x128xbf16> to vector<2x128xbf16>
    %862 = vector.extract_strided_slice %853 {offsets = [2, 0, 0], sizes = [1, 3, 128], strides = [1, 1, 1]} : vector<4x3x128xbf16> to vector<1x3x128xbf16>
    %863 = vector.shape_cast %862 : vector<1x3x128xbf16> to vector<3x128xbf16>
    %864 = vector.extract_strided_slice %863 {offsets = [0, 0], sizes = [2, 128], strides = [1, 1]} : vector<3x128xbf16> to vector<2x128xbf16>
    %865 = vector.extract_strided_slice %863 {offsets = [1, 0], sizes = [2, 128], strides = [1, 1]} : vector<3x128xbf16> to vector<2x128xbf16>
    %866 = vector.extract_strided_slice %853 {offsets = [3, 0, 0], sizes = [1, 3, 128], strides = [1, 1, 1]} : vector<4x3x128xbf16> to vector<1x3x128xbf16>
    %867 = vector.shape_cast %866 : vector<1x3x128xbf16> to vector<3x128xbf16>
    %868 = vector.extract_strided_slice %867 {offsets = [0, 0], sizes = [2, 128], strides = [1, 1]} : vector<3x128xbf16> to vector<2x128xbf16>
    %869 = vector.extract_strided_slice %867 {offsets = [1, 0], sizes = [2, 128], strides = [1, 1]} : vector<3x128xbf16> to vector<2x128xbf16>
    %870 = tpu.concatenate %856, %857, %860, %861, %864, %865, %868, %869 in 1 : vector<2x128xbf16>, vector<2x128xbf16>, vector<2x128xbf16>, vector<2x128xbf16>, vector<2x128xbf16>, vector<2x128xbf16>, vector<2x128xbf16>, vector<2x128xbf16> -> vector<2x1024xbf16>
    %c0_529 = arith.constant 0 : index
    %c0_530 = arith.constant 0 : index
    %871 = vector.load %arg23[%c0_529, %c0_530] : memref<8x1024xbf16, #tpu.memory_space<vmem>>, vector<2x1024xbf16>
    tpu.vector_store %arg23[%c0_529, %c0_530], %870 {strides = array<i32>} : memref<8x1024xbf16, #tpu.memory_space<vmem>>, vector<2x1024xbf16>,
    %c0_531 = arith.constant 0 : index
    %c2_532 = arith.constant 2 : index
    %c0_533 = arith.constant 0 : index
    %c0_534 = arith.constant 0 : index
    %872 = vector.load %arg19[%c0_531, %c2_532, %c0_533, %c0_534] : memref<2x6x3x128xbf16, #tpu.memory_space<vmem>>, vector<1x4x3x128xbf16>
    %873 = vector.shape_cast %872 : vector<1x4x3x128xbf16> to vector<4x3x128xbf16>
    %874 = vector.extract_strided_slice %873 {offsets = [0, 0, 0], sizes = [1, 3, 128], strides = [1, 1, 1]} : vector<4x3x128xbf16> to vector<1x3x128xbf16>
    %875 = vector.shape_cast %874 : vector<1x3x128xbf16> to vector<3x128xbf16>
    %876 = vector.extract_strided_slice %875 {offsets = [0, 0], sizes = [2, 128], strides = [1, 1]} : vector<3x128xbf16> to vector<2x128xbf16>
    %877 = vector.extract_strided_slice %875 {offsets = [1, 0], sizes = [2, 128], strides = [1, 1]} : vector<3x128xbf16> to vector<2x128xbf16>
    %878 = vector.extract_strided_slice %873 {offsets = [1, 0, 0], sizes = [1, 3, 128], strides = [1, 1, 1]} : vector<4x3x128xbf16> to vector<1x3x128xbf16>
    %879 = vector.shape_cast %878 : vector<1x3x128xbf16> to vector<3x128xbf16>
    %880 = vector.extract_strided_slice %879 {offsets = [0, 0], sizes = [2, 128], strides = [1, 1]} : vector<3x128xbf16> to vector<2x128xbf16>
    %881 = vector.extract_strided_slice %879 {offsets = [1, 0], sizes = [2, 128], strides = [1, 1]} : vector<3x128xbf16> to vector<2x128xbf16>
    %882 = vector.extract_strided_slice %873 {offsets = [2, 0, 0], sizes = [1, 3, 128], strides = [1, 1, 1]} : vector<4x3x128xbf16> to vector<1x3x128xbf16>
    %883 = vector.shape_cast %882 : vector<1x3x128xbf16> to vector<3x128xbf16>
    %884 = vector.extract_strided_slice %883 {offsets = [0, 0], sizes = [2, 128], strides = [1, 1]} : vector<3x128xbf16> to vector<2x128xbf16>
    %885 = vector.extract_strided_slice %883 {offsets = [1, 0], sizes = [2, 128], strides = [1, 1]} : vector<3x128xbf16> to vector<2x128xbf16>
    %886 = vector.extract_strided_slice %873 {offsets = [3, 0, 0], sizes = [1, 3, 128], strides = [1, 1, 1]} : vector<4x3x128xbf16> to vector<1x3x128xbf16>
    %887 = vector.shape_cast %886 : vector<1x3x128xbf16> to vector<3x128xbf16>
    %888 = vector.extract_strided_slice %887 {offsets = [0, 0], sizes = [2, 128], strides = [1, 1]} : vector<3x128xbf16> to vector<2x128xbf16>
    %889 = vector.extract_strided_slice %887 {offsets = [1, 0], sizes = [2, 128], strides = [1, 1]} : vector<3x128xbf16> to vector<2x128xbf16>
    %890 = tpu.concatenate %876, %877, %880, %881, %884, %885, %888, %889 in 1 : vector<2x128xbf16>, vector<2x128xbf16>, vector<2x128xbf16>, vector<2x128xbf16>, vector<2x128xbf16>, vector<2x128xbf16>, vector<2x128xbf16>, vector<2x128xbf16> -> vector<2x1024xbf16>
    %c2_535 = arith.constant 2 : index
    %c0_536 = arith.constant 0 : index
    %891 = vector.load %arg23[%c2_535, %c0_536] : memref<8x1024xbf16, #tpu.memory_space<vmem>>, vector<2x1024xbf16>
    tpu.vector_store %arg23[%c2_535, %c0_536], %890 {strides = array<i32>} : memref<8x1024xbf16, #tpu.memory_space<vmem>>, vector<2x1024xbf16>,
    %c1_537 = arith.constant 1 : index
    %c0_538 = arith.constant 0 : index
    %c0_539 = arith.constant 0 : index
    %c0_540 = arith.constant 0 : index
    %892 = vector.load %arg19[%c1_537, %c0_538, %c0_539, %c0_540] : memref<2x6x3x128xbf16, #tpu.memory_space<vmem>>, vector<1x4x3x128xbf16>
    %893 = vector.shape_cast %892 : vector<1x4x3x128xbf16> to vector<4x3x128xbf16>
    %894 = vector.extract_strided_slice %893 {offsets = [0, 0, 0], sizes = [1, 3, 128], strides = [1, 1, 1]} : vector<4x3x128xbf16> to vector<1x3x128xbf16>
    %895 = vector.shape_cast %894 : vector<1x3x128xbf16> to vector<3x128xbf16>
    %896 = vector.extract_strided_slice %895 {offsets = [0, 0], sizes = [2, 128], strides = [1, 1]} : vector<3x128xbf16> to vector<2x128xbf16>
    %897 = vector.extract_strided_slice %895 {offsets = [1, 0], sizes = [2, 128], strides = [1, 1]} : vector<3x128xbf16> to vector<2x128xbf16>
    %898 = vector.extract_strided_slice %893 {offsets = [1, 0, 0], sizes = [1, 3, 128], strides = [1, 1, 1]} : vector<4x3x128xbf16> to vector<1x3x128xbf16>
    %899 = vector.shape_cast %898 : vector<1x3x128xbf16> to vector<3x128xbf16>
    %900 = vector.extract_strided_slice %899 {offsets = [0, 0], sizes = [2, 128], strides = [1, 1]} : vector<3x128xbf16> to vector<2x128xbf16>
    %901 = vector.extract_strided_slice %899 {offsets = [1, 0], sizes = [2, 128], strides = [1, 1]} : vector<3x128xbf16> to vector<2x128xbf16>
    %902 = vector.extract_strided_slice %893 {offsets = [2, 0, 0], sizes = [1, 3, 128], strides = [1, 1, 1]} : vector<4x3x128xbf16> to vector<1x3x128xbf16>
    %903 = vector.shape_cast %902 : vector<1x3x128xbf16> to vector<3x128xbf16>
    %904 = vector.extract_strided_slice %903 {offsets = [0, 0], sizes = [2, 128], strides = [1, 1]} : vector<3x128xbf16> to vector<2x128xbf16>
    %905 = vector.extract_strided_slice %903 {offsets = [1, 0], sizes = [2, 128], strides = [1, 1]} : vector<3x128xbf16> to vector<2x128xbf16>
    %906 = vector.extract_strided_slice %893 {offsets = [3, 0, 0], sizes = [1, 3, 128], strides = [1, 1, 1]} : vector<4x3x128xbf16> to vector<1x3x128xbf16>
    %907 = vector.shape_cast %906 : vector<1x3x128xbf16> to vector<3x128xbf16>
    %908 = vector.extract_strided_slice %907 {offsets = [0, 0], sizes = [2, 128], strides = [1, 1]} : vector<3x128xbf16> to vector<2x128xbf16>
    %909 = vector.extract_strided_slice %907 {offsets = [1, 0], sizes = [2, 128], strides = [1, 1]} : vector<3x128xbf16> to vector<2x128xbf16>
    %910 = tpu.concatenate %896, %897, %900, %901, %904, %905, %908, %909 in 1 : vector<2x128xbf16>, vector<2x128xbf16>, vector<2x128xbf16>, vector<2x128xbf16>, vector<2x128xbf16>, vector<2x128xbf16>, vector<2x128xbf16>, vector<2x128xbf16> -> vector<2x1024xbf16>
    %c4_541 = arith.constant 4 : index
    %c0_542 = arith.constant 0 : index
    %911 = vector.load %arg23[%c4_541, %c0_542] : memref<8x1024xbf16, #tpu.memory_space<vmem>>, vector<2x1024xbf16>
    tpu.vector_store %arg23[%c4_541, %c0_542], %910 {strides = array<i32>} : memref<8x1024xbf16, #tpu.memory_space<vmem>>, vector<2x1024xbf16>,
    %c1_543 = arith.constant 1 : index
    %c2_544 = arith.constant 2 : index
    %c0_545 = arith.constant 0 : index
    %c0_546 = arith.constant 0 : index
    %912 = vector.load %arg19[%c1_543, %c2_544, %c0_545, %c0_546] : memref<2x6x3x128xbf16, #tpu.memory_space<vmem>>, vector<1x4x3x128xbf16>
    %913 = vector.shape_cast %912 : vector<1x4x3x128xbf16> to vector<4x3x128xbf16>
    %914 = vector.extract_strided_slice %913 {offsets = [0, 0, 0], sizes = [1, 3, 128], strides = [1, 1, 1]} : vector<4x3x128xbf16> to vector<1x3x128xbf16>
    %915 = vector.shape_cast %914 : vector<1x3x128xbf16> to vector<3x128xbf16>
    %916 = vector.extract_strided_slice %915 {offsets = [0, 0], sizes = [2, 128], strides = [1, 1]} : vector<3x128xbf16> to vector<2x128xbf16>
    %917 = vector.extract_strided_slice %915 {offsets = [1, 0], sizes = [2, 128], strides = [1, 1]} : vector<3x128xbf16> to vector<2x128xbf16>
    %918 = vector.extract_strided_slice %913 {offsets = [1, 0, 0], sizes = [1, 3, 128], strides = [1, 1, 1]} : vector<4x3x128xbf16> to vector<1x3x128xbf16>
    %919 = vector.shape_cast %918 : vector<1x3x128xbf16> to vector<3x128xbf16>
    %920 = vector.extract_strided_slice %919 {offsets = [0, 0], sizes = [2, 128], strides = [1, 1]} : vector<3x128xbf16> to vector<2x128xbf16>
    %921 = vector.extract_strided_slice %919 {offsets = [1, 0], sizes = [2, 128], strides = [1, 1]} : vector<3x128xbf16> to vector<2x128xbf16>
    %922 = vector.extract_strided_slice %913 {offsets = [2, 0, 0], sizes = [1, 3, 128], strides = [1, 1, 1]} : vector<4x3x128xbf16> to vector<1x3x128xbf16>
    %923 = vector.shape_cast %922 : vector<1x3x128xbf16> to vector<3x128xbf16>
    %924 = vector.extract_strided_slice %923 {offsets = [0, 0], sizes = [2, 128], strides = [1, 1]} : vector<3x128xbf16> to vector<2x128xbf16>
    %925 = vector.extract_strided_slice %923 {offsets = [1, 0], sizes = [2, 128], strides = [1, 1]} : vector<3x128xbf16> to vector<2x128xbf16>
    %926 = vector.extract_strided_slice %913 {offsets = [3, 0, 0], sizes = [1, 3, 128], strides = [1, 1, 1]} : vector<4x3x128xbf16> to vector<1x3x128xbf16>
    %927 = vector.shape_cast %926 : vector<1x3x128xbf16> to vector<3x128xbf16>
    %928 = vector.extract_strided_slice %927 {offsets = [0, 0], sizes = [2, 128], strides = [1, 1]} : vector<3x128xbf16> to vector<2x128xbf16>
    %929 = vector.extract_strided_slice %927 {offsets = [1, 0], sizes = [2, 128], strides = [1, 1]} : vector<3x128xbf16> to vector<2x128xbf16>
    %930 = tpu.concatenate %916, %917, %920, %921, %924, %925, %928, %929 in 1 : vector<2x128xbf16>, vector<2x128xbf16>, vector<2x128xbf16>, vector<2x128xbf16>, vector<2x128xbf16>, vector<2x128xbf16>, vector<2x128xbf16>, vector<2x128xbf16> -> vector<2x1024xbf16>
    %c6_547 = arith.constant 6 : index
    %c0_548 = arith.constant 0 : index
    %931 = vector.load %arg23[%c6_547, %c0_548] : memref<8x1024xbf16, #tpu.memory_space<vmem>>, vector<2x1024xbf16>
    tpu.vector_store %arg23[%c6_547, %c0_548], %930 {strides = array<i32>} : memref<8x1024xbf16, #tpu.memory_space<vmem>>, vector<2x1024xbf16>,
    %c0_549 = arith.constant 0 : index
    %c0_550 = arith.constant 0 : index
    %932 = vector.load %arg23[%c0_549, %c0_550] : memref<8x1024xbf16, #tpu.memory_space<vmem>>, vector<8x1024xbf16>
    %c0_551 = arith.constant 0 : index
    %c0_552 = arith.constant 0 : index
    %933 = vector.load %arg8[%c0_551, %c0_552] : memref<1024x128xbf16, #tpu.memory_space<vmem>>, vector<1024x128xbf16>
    %cst_553 = arith.constant dense<0.000000e+00> : vector<8x128xf32>
    %934 = tpu.matmul %932, %933, %cst_553 {dimension_numbers = #tpu.dot_dimension_numbers<[1], [0], [0], [1], [0, 0, 1, 1], [], []>} : vector<8x1024xbf16>, vector<1024x128xbf16>, vector<8x128xf32> -> vector<8x128xf32>
    %cst_554 = arith.constant dense<0.000000e+00> : vector<128xf32>
    %935 = vector.multi_reduction <add>, %934, %cst_554 [0] : vector<8x128xf32> to vector<128xf32>
    %936 = vector.shape_cast %935 : vector<128xf32> to vector<1x128xf32>
    %cst_555 = arith.constant 1.250000e-01 : f32
    %937 = vector.broadcast %cst_555 : f32 to vector<1x128xf32>
    %938 = arith.mulf %936, %937 : vector<1x128xf32>
    %939 = vector.broadcast %938 : vector<1x128xf32> to vector<8x128xf32>
    %940 = arith.subf %934, %939 : vector<8x128xf32>
    %941 = arith.mulf %940, %940 : vector<8x128xf32>
    %cst_556 = arith.constant dense<0.000000e+00> : vector<128xf32>
    %942 = vector.multi_reduction <add>, %941, %cst_556 [0] : vector<8x128xf32> to vector<128xf32>
    %943 = vector.shape_cast %942 : vector<128xf32> to vector<1x128xf32>
    %cst_557 = arith.constant 1.250000e-01 : f32
    %944 = vector.broadcast %cst_557 : f32 to vector<1x128xf32>
    %945 = arith.mulf %943, %944 : vector<1x128xf32>
    %c0_558 = arith.constant 0 : index
    %c0_559 = arith.constant 0 : index
    %946 = vector.load %arg9[%c0_558, %c0_559] : memref<1x128xf32, #tpu.memory_space<vmem>>, vector<1x128xf32>
    %cst_560 = arith.constant 9.99999974E-6 : f32
    %947 = vector.broadcast %cst_560 : f32 to vector<1x128xf32>
    %948 = arith.addf %945, %947 : vector<1x128xf32>
    %949 = math.rsqrt %948 : vector<1x128xf32>
    %950 = arith.mulf %946, %949 : vector<1x128xf32>
    %951 = vector.broadcast %950 : vector<1x128xf32> to vector<8x128xf32>
    %952 = arith.mulf %940, %951 : vector<8x128xf32>
    %c0_561 = arith.constant 0 : index
    %c0_562 = arith.constant 0 : index
    %953 = vector.load %arg10[%c0_561, %c0_562] : memref<1x128xf32, #tpu.memory_space<vmem>>, vector<1x128xf32>
    %954 = vector.broadcast %953 : vector<1x128xf32> to vector<8x128xf32>
    %955 = arith.addf %952, %954 : vector<8x128xf32>
    %cst_563 = arith.constant 0.000000e+00 : f32
    %956 = vector.broadcast %cst_563 : f32 to vector<8x128xf32>
    %957 = arith.cmpf oge, %955, %956 : vector<8x128xf32>
    %cst_564 = arith.constant 2.000000e-01 : f32
    %958 = vector.broadcast %cst_564 : f32 to vector<8x128xf32>
    %959 = arith.mulf %958, %955 : vector<8x128xf32>
    %960 = arith.select %957, %955, %959 : vector<8x128xi1>, vector<8x128xf32>
    %c0_565 = arith.constant 0 : index
    %c0_566 = arith.constant 0 : index
    %961 = vector.load %arg27[%c0_565, %c0_566] : memref<8x128xf32, #tpu.memory_space<vmem>>, vector<8x128xf32>
    tpu.vector_store %arg27[%c0_565, %c0_566], %960 {strides = array<i32>} : memref<8x128xf32, #tpu.memory_space<vmem>>, vector<8x128xf32>,
    %c0_567 = arith.constant 0 : index
    %c0_568 = arith.constant 0 : index
    %962 = vector.load %arg27[%c0_567, %c0_568] : memref<8x128xf32, #tpu.memory_space<vmem>>, vector<1x128xf32>
    %c1_569 = arith.constant 1 : index
    %c0_570 = arith.constant 0 : index
    %963 = vector.load %arg27[%c1_569, %c0_570] : memref<8x128xf32, #tpu.memory_space<vmem>>, vector<1x128xf32>
    %964 = tpu.concatenate %962, %963 in 1 : vector<1x128xf32>, vector<1x128xf32> -> vector<1x256xf32>
    %c0_571 = arith.constant 0 : index
    %c0_572 = arith.constant 0 : index
    %965 = vector.load %arg16[%c0_571, %c0_572] : memref<4x256xf32, #tpu.memory_space<vmem>>, vector<1x256xf32>
    tpu.vector_store %arg16[%c0_571, %c0_572], %964 {strides = array<i32>} : memref<4x256xf32, #tpu.memory_space<vmem>>, vector<1x256xf32>,
    %966 = arith.truncf %963 : vector<1x128xf32> to vector<1x128xbf16>
    %c0_573 = arith.constant 0 : index
    %c1_574 = arith.constant 1 : index
    %c1_575 = arith.constant 1 : index
    %c0_576 = arith.constant 0 : index
    %967 = vector.load %arg20[%c0_573, %c1_574, %c1_575, %c0_576] : memref<2x4x2x256xbf16, #tpu.memory_space<vmem>>, vector<1x1x1x128xbf16>
    %968 = vector.shape_cast %967 : vector<1x1x1x128xbf16> to vector<1x128xbf16>
    %969 = vector.shape_cast %966 : vector<1x128xbf16> to vector<1x1x1x128xbf16>
    tpu.vector_store %arg20[%c0_573, %c1_574, %c1_575, %c0_576], %969 {strides = array<i32>} : memref<2x4x2x256xbf16, #tpu.memory_space<vmem>>, vector<1x1x1x128xbf16>,
    %970 = arith.truncf %962 : vector<1x128xf32> to vector<1x128xbf16>
    %c0_577 = arith.constant 0 : index
    %c1_578 = arith.constant 1 : index
    %c0_579 = arith.constant 0 : index
    %c128 = arith.constant 128 : index
    %971 = vector.load %arg20[%c0_577, %c1_578, %c0_579, %c128] : memref<2x4x2x256xbf16, #tpu.memory_space<vmem>>, vector<1x1x1x128xbf16>
    %972 = vector.shape_cast %971 : vector<1x1x1x128xbf16> to vector<1x128xbf16>
    %973 = vector.shape_cast %970 : vector<1x128xbf16> to vector<1x1x1x128xbf16>
    tpu.vector_store %arg20[%c0_577, %c1_578, %c0_579, %c128], %973 {strides = array<i32>} : memref<2x4x2x256xbf16, #tpu.memory_space<vmem>>, vector<1x1x1x128xbf16>,
    %c2_580 = arith.constant 2 : index
    %c0_581 = arith.constant 0 : index
    %974 = vector.load %arg27[%c2_580, %c0_581] : memref<8x128xf32, #tpu.memory_space<vmem>>, vector<1x128xf32>
    %c3_582 = arith.constant 3 : index
    %c0_583 = arith.constant 0 : index
    %975 = vector.load %arg27[%c3_582, %c0_583] : memref<8x128xf32, #tpu.memory_space<vmem>>, vector<1x128xf32>
    %976 = tpu.concatenate %974, %975 in 1 : vector<1x128xf32>, vector<1x128xf32> -> vector<1x256xf32>
    %c1_584 = arith.constant 1 : index
    %c0_585 = arith.constant 0 : index
    %977 = vector.load %arg16[%c1_584, %c0_585] : memref<4x256xf32, #tpu.memory_space<vmem>>, vector<1x256xf32>
    tpu.vector_store %arg16[%c1_584, %c0_585], %976 {strides = array<i32>} : memref<4x256xf32, #tpu.memory_space<vmem>>, vector<1x256xf32>,
    %978 = arith.truncf %975 : vector<1x128xf32> to vector<1x128xbf16>
    %c0_586 = arith.constant 0 : index
    %c2_587 = arith.constant 2 : index
    %c1_588 = arith.constant 1 : index
    %c0_589 = arith.constant 0 : index
    %979 = vector.load %arg20[%c0_586, %c2_587, %c1_588, %c0_589] : memref<2x4x2x256xbf16, #tpu.memory_space<vmem>>, vector<1x1x1x128xbf16>
    %980 = vector.shape_cast %979 : vector<1x1x1x128xbf16> to vector<1x128xbf16>
    %981 = vector.shape_cast %978 : vector<1x128xbf16> to vector<1x1x1x128xbf16>
    tpu.vector_store %arg20[%c0_586, %c2_587, %c1_588, %c0_589], %981 {strides = array<i32>} : memref<2x4x2x256xbf16, #tpu.memory_space<vmem>>, vector<1x1x1x128xbf16>,
    %982 = arith.truncf %974 : vector<1x128xf32> to vector<1x128xbf16>
    %c0_590 = arith.constant 0 : index
    %c2_591 = arith.constant 2 : index
    %c0_592 = arith.constant 0 : index
    %c128_593 = arith.constant 128 : index
    %983 = vector.load %arg20[%c0_590, %c2_591, %c0_592, %c128_593] : memref<2x4x2x256xbf16, #tpu.memory_space<vmem>>, vector<1x1x1x128xbf16>
    %984 = vector.shape_cast %983 : vector<1x1x1x128xbf16> to vector<1x128xbf16>
    %985 = vector.shape_cast %982 : vector<1x128xbf16> to vector<1x1x1x128xbf16>
    tpu.vector_store %arg20[%c0_590, %c2_591, %c0_592, %c128_593], %985 {strides = array<i32>} : memref<2x4x2x256xbf16, #tpu.memory_space<vmem>>, vector<1x1x1x128xbf16>,
    %c4_594 = arith.constant 4 : index
    %c0_595 = arith.constant 0 : index
    %986 = vector.load %arg27[%c4_594, %c0_595] : memref<8x128xf32, #tpu.memory_space<vmem>>, vector<1x128xf32>
    %c5_596 = arith.constant 5 : index
    %c0_597 = arith.constant 0 : index
    %987 = vector.load %arg27[%c5_596, %c0_597] : memref<8x128xf32, #tpu.memory_space<vmem>>, vector<1x128xf32>
    %988 = tpu.concatenate %986, %987 in 1 : vector<1x128xf32>, vector<1x128xf32> -> vector<1x256xf32>
    %c2_598 = arith.constant 2 : index
    %c0_599 = arith.constant 0 : index
    %989 = vector.load %arg16[%c2_598, %c0_599] : memref<4x256xf32, #tpu.memory_space<vmem>>, vector<1x256xf32>
    tpu.vector_store %arg16[%c2_598, %c0_599], %988 {strides = array<i32>} : memref<4x256xf32, #tpu.memory_space<vmem>>, vector<1x256xf32>,
    %990 = arith.truncf %987 : vector<1x128xf32> to vector<1x128xbf16>
    %c1_600 = arith.constant 1 : index
    %c1_601 = arith.constant 1 : index
    %c1_602 = arith.constant 1 : index
    %c0_603 = arith.constant 0 : index
    %991 = vector.load %arg20[%c1_600, %c1_601, %c1_602, %c0_603] : memref<2x4x2x256xbf16, #tpu.memory_space<vmem>>, vector<1x1x1x128xbf16>
    %992 = vector.shape_cast %991 : vector<1x1x1x128xbf16> to vector<1x128xbf16>
    %993 = vector.shape_cast %990 : vector<1x128xbf16> to vector<1x1x1x128xbf16>
    tpu.vector_store %arg20[%c1_600, %c1_601, %c1_602, %c0_603], %993 {strides = array<i32>} : memref<2x4x2x256xbf16, #tpu.memory_space<vmem>>, vector<1x1x1x128xbf16>,
    %994 = arith.truncf %986 : vector<1x128xf32> to vector<1x128xbf16>
    %c1_604 = arith.constant 1 : index
    %c1_605 = arith.constant 1 : index
    %c0_606 = arith.constant 0 : index
    %c128_607 = arith.constant 128 : index
    %995 = vector.load %arg20[%c1_604, %c1_605, %c0_606, %c128_607] : memref<2x4x2x256xbf16, #tpu.memory_space<vmem>>, vector<1x1x1x128xbf16>
    %996 = vector.shape_cast %995 : vector<1x1x1x128xbf16> to vector<1x128xbf16>
    %997 = vector.shape_cast %994 : vector<1x128xbf16> to vector<1x1x1x128xbf16>
    tpu.vector_store %arg20[%c1_604, %c1_605, %c0_606, %c128_607], %997 {strides = array<i32>} : memref<2x4x2x256xbf16, #tpu.memory_space<vmem>>, vector<1x1x1x128xbf16>,
    %c6_608 = arith.constant 6 : index
    %c0_609 = arith.constant 0 : index
    %998 = vector.load %arg27[%c6_608, %c0_609] : memref<8x128xf32, #tpu.memory_space<vmem>>, vector<1x128xf32>
    %c7_610 = arith.constant 7 : index
    %c0_611 = arith.constant 0 : index
    %999 = vector.load %arg27[%c7_610, %c0_611] : memref<8x128xf32, #tpu.memory_space<vmem>>, vector<1x128xf32>
    %1000 = tpu.concatenate %998, %999 in 1 : vector<1x128xf32>, vector<1x128xf32> -> vector<1x256xf32>
    %c3_612 = arith.constant 3 : index
    %c0_613 = arith.constant 0 : index
    %1001 = vector.load %arg16[%c3_612, %c0_613] : memref<4x256xf32, #tpu.memory_space<vmem>>, vector<1x256xf32>
    tpu.vector_store %arg16[%c3_612, %c0_613], %1000 {strides = array<i32>} : memref<4x256xf32, #tpu.memory_space<vmem>>, vector<1x256xf32>,
    %1002 = arith.truncf %999 : vector<1x128xf32> to vector<1x128xbf16>
    %c1_614 = arith.constant 1 : index
    %c2_615 = arith.constant 2 : index
    %c1_616 = arith.constant 1 : index
    %c0_617 = arith.constant 0 : index
    %1003 = vector.load %arg20[%c1_614, %c2_615, %c1_616, %c0_617] : memref<2x4x2x256xbf16, #tpu.memory_space<vmem>>, vector<1x1x1x128xbf16>
    %1004 = vector.shape_cast %1003 : vector<1x1x1x128xbf16> to vector<1x128xbf16>
    %1005 = vector.shape_cast %1002 : vector<1x128xbf16> to vector<1x1x1x128xbf16>
    tpu.vector_store %arg20[%c1_614, %c2_615, %c1_616, %c0_617], %1005 {strides = array<i32>} : memref<2x4x2x256xbf16, #tpu.memory_space<vmem>>, vector<1x1x1x128xbf16>,
    %1006 = arith.truncf %998 : vector<1x128xf32> to vector<1x128xbf16>
    %c1_618 = arith.constant 1 : index
    %c2_619 = arith.constant 2 : index
    %c0_620 = arith.constant 0 : index
    %c128_621 = arith.constant 128 : index
    %1007 = vector.load %arg20[%c1_618, %c2_619, %c0_620, %c128_621] : memref<2x4x2x256xbf16, #tpu.memory_space<vmem>>, vector<1x1x1x128xbf16>
    %1008 = vector.shape_cast %1007 : vector<1x1x1x128xbf16> to vector<1x128xbf16>
    %1009 = vector.shape_cast %1006 : vector<1x128xbf16> to vector<1x1x1x128xbf16>
    tpu.vector_store %arg20[%c1_618, %c2_619, %c0_620, %c128_621], %1009 {strides = array<i32>} : memref<2x4x2x256xbf16, #tpu.memory_space<vmem>>, vector<1x1x1x128xbf16>,
    %c0_622 = arith.constant 0 : index
    %c0_623 = arith.constant 0 : index
    %c0_624 = arith.constant 0 : index
    %c0_625 = arith.constant 0 : index
    %1010 = vector.load %arg20[%c0_622, %c0_623, %c0_624, %c0_625] : memref<2x4x2x256xbf16, #tpu.memory_space<vmem>>, vector<1x4x2x256xbf16>
    %1011 = vector.shape_cast %1010 : vector<1x4x2x256xbf16> to vector<4x2x256xbf16>
    %1012 = vector.extract_strided_slice %1011 {offsets = [0, 0, 0], sizes = [1, 2, 256], strides = [1, 1, 1]} : vector<4x2x256xbf16> to vector<1x2x256xbf16>
    %1013 = vector.shape_cast %1012 : vector<1x2x256xbf16> to vector<2x256xbf16>
    %1014 = vector.extract_strided_slice %1013 {offsets = [0, 0], sizes = [1, 256], strides = [1, 1]} : vector<2x256xbf16> to vector<1x256xbf16>
    %1015 = vector.extract_strided_slice %1013 {offsets = [1, 0], sizes = [1, 256], strides = [1, 1]} : vector<2x256xbf16> to vector<1x256xbf16>
    %1016 = vector.extract_strided_slice %1011 {offsets = [1, 0, 0], sizes = [1, 2, 256], strides = [1, 1, 1]} : vector<4x2x256xbf16> to vector<1x2x256xbf16>
    %1017 = vector.shape_cast %1016 : vector<1x2x256xbf16> to vector<2x256xbf16>
    %1018 = vector.extract_strided_slice %1017 {offsets = [0, 0], sizes = [1, 256], strides = [1, 1]} : vector<2x256xbf16> to vector<1x256xbf16>
    %1019 = vector.extract_strided_slice %1017 {offsets = [1, 0], sizes = [1, 256], strides = [1, 1]} : vector<2x256xbf16> to vector<1x256xbf16>
    %1020 = vector.extract_strided_slice %1011 {offsets = [2, 0, 0], sizes = [1, 2, 256], strides = [1, 1, 1]} : vector<4x2x256xbf16> to vector<1x2x256xbf16>
    %1021 = vector.shape_cast %1020 : vector<1x2x256xbf16> to vector<2x256xbf16>
    %1022 = vector.extract_strided_slice %1021 {offsets = [0, 0], sizes = [1, 256], strides = [1, 1]} : vector<2x256xbf16> to vector<1x256xbf16>
    %1023 = vector.extract_strided_slice %1021 {offsets = [1, 0], sizes = [1, 256], strides = [1, 1]} : vector<2x256xbf16> to vector<1x256xbf16>
    %1024 = vector.extract_strided_slice %1011 {offsets = [3, 0, 0], sizes = [1, 2, 256], strides = [1, 1, 1]} : vector<4x2x256xbf16> to vector<1x2x256xbf16>
    %1025 = vector.shape_cast %1024 : vector<1x2x256xbf16> to vector<2x256xbf16>
    %1026 = vector.extract_strided_slice %1025 {offsets = [0, 0], sizes = [1, 256], strides = [1, 1]} : vector<2x256xbf16> to vector<1x256xbf16>
    %1027 = vector.extract_strided_slice %1025 {offsets = [1, 0], sizes = [1, 256], strides = [1, 1]} : vector<2x256xbf16> to vector<1x256xbf16>
    %1028 = tpu.concatenate %1014, %1015, %1018, %1019, %1022, %1023, %1026, %1027 in 1 : vector<1x256xbf16>, vector<1x256xbf16>, vector<1x256xbf16>, vector<1x256xbf16>, vector<1x256xbf16>, vector<1x256xbf16>, vector<1x256xbf16>, vector<1x256xbf16> -> vector<1x2048xbf16>
    %c0_626 = arith.constant 0 : index
    %c0_627 = arith.constant 0 : index
    %1029 = vector.load %arg24[%c0_626, %c0_627] : memref<2x2048xbf16, #tpu.memory_space<vmem>>, vector<1x2048xbf16>
    tpu.vector_store %arg24[%c0_626, %c0_627], %1028 {strides = array<i32>} : memref<2x2048xbf16, #tpu.memory_space<vmem>>, vector<1x2048xbf16>,
    %c1_628 = arith.constant 1 : index
    %c0_629 = arith.constant 0 : index
    %c0_630 = arith.constant 0 : index
    %c0_631 = arith.constant 0 : index
    %1030 = vector.load %arg20[%c1_628, %c0_629, %c0_630, %c0_631] : memref<2x4x2x256xbf16, #tpu.memory_space<vmem>>, vector<1x4x2x256xbf16>
    %1031 = vector.shape_cast %1030 : vector<1x4x2x256xbf16> to vector<4x2x256xbf16>
    %1032 = vector.extract_strided_slice %1031 {offsets = [0, 0, 0], sizes = [1, 2, 256], strides = [1, 1, 1]} : vector<4x2x256xbf16> to vector<1x2x256xbf16>
    %1033 = vector.shape_cast %1032 : vector<1x2x256xbf16> to vector<2x256xbf16>
    %1034 = vector.extract_strided_slice %1033 {offsets = [0, 0], sizes = [1, 256], strides = [1, 1]} : vector<2x256xbf16> to vector<1x256xbf16>
    %1035 = vector.extract_strided_slice %1033 {offsets = [1, 0], sizes = [1, 256], strides = [1, 1]} : vector<2x256xbf16> to vector<1x256xbf16>
    %1036 = vector.extract_strided_slice %1031 {offsets = [1, 0, 0], sizes = [1, 2, 256], strides = [1, 1, 1]} : vector<4x2x256xbf16> to vector<1x2x256xbf16>
    %1037 = vector.shape_cast %1036 : vector<1x2x256xbf16> to vector<2x256xbf16>
    %1038 = vector.extract_strided_slice %1037 {offsets = [0, 0], sizes = [1, 256], strides = [1, 1]} : vector<2x256xbf16> to vector<1x256xbf16>
    %1039 = vector.extract_strided_slice %1037 {offsets = [1, 0], sizes = [1, 256], strides = [1, 1]} : vector<2x256xbf16> to vector<1x256xbf16>
    %1040 = vector.extract_strided_slice %1031 {offsets = [2, 0, 0], sizes = [1, 2, 256], strides = [1, 1, 1]} : vector<4x2x256xbf16> to vector<1x2x256xbf16>
    %1041 = vector.shape_cast %1040 : vector<1x2x256xbf16> to vector<2x256xbf16>
    %1042 = vector.extract_strided_slice %1041 {offsets = [0, 0], sizes = [1, 256], strides = [1, 1]} : vector<2x256xbf16> to vector<1x256xbf16>
    %1043 = vector.extract_strided_slice %1041 {offsets = [1, 0], sizes = [1, 256], strides = [1, 1]} : vector<2x256xbf16> to vector<1x256xbf16>
    %1044 = vector.extract_strided_slice %1031 {offsets = [3, 0, 0], sizes = [1, 2, 256], strides = [1, 1, 1]} : vector<4x2x256xbf16> to vector<1x2x256xbf16>
    %1045 = vector.shape_cast %1044 : vector<1x2x256xbf16> to vector<2x256xbf16>
    %1046 = vector.extract_strided_slice %1045 {offsets = [0, 0], sizes = [1, 256], strides = [1, 1]} : vector<2x256xbf16> to vector<1x256xbf16>
    %1047 = vector.extract_strided_slice %1045 {offsets = [1, 0], sizes = [1, 256], strides = [1, 1]} : vector<2x256xbf16> to vector<1x256xbf16>
    %1048 = tpu.concatenate %1034, %1035, %1038, %1039, %1042, %1043, %1046, %1047 in 1 : vector<1x256xbf16>, vector<1x256xbf16>, vector<1x256xbf16>, vector<1x256xbf16>, vector<1x256xbf16>, vector<1x256xbf16>, vector<1x256xbf16>, vector<1x256xbf16> -> vector<1x2048xbf16>
    %c1_632 = arith.constant 1 : index
    %c0_633 = arith.constant 0 : index
    %1049 = vector.load %arg24[%c1_632, %c0_633] : memref<2x2048xbf16, #tpu.memory_space<vmem>>, vector<1x2048xbf16>
    tpu.vector_store %arg24[%c1_632, %c0_633], %1048 {strides = array<i32>} : memref<2x2048xbf16, #tpu.memory_space<vmem>>, vector<1x2048xbf16>,
    %c0_634 = arith.constant 0 : index
    %c0_635 = arith.constant 0 : index
    %1050 = vector.load %arg24[%c0_634, %c0_635] : memref<2x2048xbf16, #tpu.memory_space<vmem>>, vector<2x2048xbf16>
    %c0_636 = arith.constant 0 : index
    %c0_637 = arith.constant 0 : index
    %1051 = vector.load %arg11[%c0_636, %c0_637] : memref<2048x256xbf16, #tpu.memory_space<vmem>>, vector<2048x256xbf16>
    %cst_638 = arith.constant dense<0.000000e+00> : vector<2x256xf32>
    %1052 = tpu.matmul %1050, %1051, %cst_638 {dimension_numbers = #tpu.dot_dimension_numbers<[1], [0], [0], [1], [0, 0, 1, 1], [], []>} : vector<2x2048xbf16>, vector<2048x256xbf16>, vector<2x256xf32> -> vector<2x256xf32>
    %cst_639 = arith.constant dense<0.000000e+00> : vector<256xf32>
    %1053 = vector.multi_reduction <add>, %1052, %cst_639 [0] : vector<2x256xf32> to vector<256xf32>
    %1054 = vector.shape_cast %1053 : vector<256xf32> to vector<1x256xf32>
    %cst_640 = arith.constant 5.000000e-01 : f32
    %1055 = vector.broadcast %cst_640 : f32 to vector<1x256xf32>
    %1056 = arith.mulf %1054, %1055 : vector<1x256xf32>
    %1057 = vector.broadcast %1056 : vector<1x256xf32> to vector<2x256xf32>
    %1058 = arith.subf %1052, %1057 : vector<2x256xf32>
    %1059 = arith.mulf %1058, %1058 : vector<2x256xf32>
    %cst_641 = arith.constant dense<0.000000e+00> : vector<256xf32>
    %1060 = vector.multi_reduction <add>, %1059, %cst_641 [0] : vector<2x256xf32> to vector<256xf32>
    %1061 = vector.shape_cast %1060 : vector<256xf32> to vector<1x256xf32>
    %cst_642 = arith.constant 5.000000e-01 : f32
    %1062 = vector.broadcast %cst_642 : f32 to vector<1x256xf32>
    %1063 = arith.mulf %1061, %1062 : vector<1x256xf32>
    %c0_643 = arith.constant 0 : index
    %c0_644 = arith.constant 0 : index
    %1064 = vector.load %arg12[%c0_643, %c0_644] : memref<1x256xf32, #tpu.memory_space<vmem>>, vector<1x256xf32>
    %cst_645 = arith.constant 9.99999974E-6 : f32
    %1065 = vector.broadcast %cst_645 : f32 to vector<1x256xf32>
    %1066 = arith.addf %1063, %1065 : vector<1x256xf32>
    %1067 = math.rsqrt %1066 : vector<1x256xf32>
    %1068 = arith.mulf %1064, %1067 : vector<1x256xf32>
    %1069 = vector.broadcast %1068 : vector<1x256xf32> to vector<2x256xf32>
    %1070 = arith.mulf %1058, %1069 : vector<2x256xf32>
    %c0_646 = arith.constant 0 : index
    %c0_647 = arith.constant 0 : index
    %1071 = vector.load %arg13[%c0_646, %c0_647] : memref<1x256xf32, #tpu.memory_space<vmem>>, vector<1x256xf32>
    %1072 = vector.broadcast %1071 : vector<1x256xf32> to vector<2x256xf32>
    %1073 = arith.addf %1070, %1072 : vector<2x256xf32>
    %cst_648 = arith.constant 0.000000e+00 : f32
    %1074 = vector.broadcast %cst_648 : f32 to vector<2x256xf32>
    %1075 = arith.cmpf oge, %1073, %1074 : vector<2x256xf32>
    %cst_649 = arith.constant 2.000000e-01 : f32
    %1076 = vector.broadcast %cst_649 : f32 to vector<2x256xf32>
    %1077 = arith.mulf %1076, %1073 : vector<2x256xf32>
    %1078 = arith.select %1075, %1073, %1077 : vector<2x256xi1>, vector<2x256xf32>
    %c0_650 = arith.constant 0 : index
    %c0_651 = arith.constant 0 : index
    %1079 = vector.load %arg17[%c0_650, %c0_651] : memref<2x256xf32, #tpu.memory_space<vmem>>, vector<2x256xf32>
    tpu.vector_store %arg17[%c0_650, %c0_651], %1078 {strides = array<i32>} : memref<2x256xf32, #tpu.memory_space<vmem>>, vector<2x256xf32>,
    return
  }
  func.func @transform_0(%arg0: i32) -> (i32, i32, i32, i32) {
    %c0_i32 = arith.constant 0 : i32
    %c0_i32_0 = arith.constant 0 : i32
    %c0_i32_1 = arith.constant 0 : i32
    %c0_i32_2 = arith.constant 0 : i32
    %c0_i32_3 = arith.constant 0 : i32
    return %c0_i32, %c0_i32_0, %c0_i32_1, %c0_i32_2 : i32, i32, i32, i32
  }
  func.func @transform_1(%arg0: i32) -> (i32, i32) {
    %c0_i32 = arith.constant 0 : i32
    %c0_i32_0 = arith.constant 0 : i32
    %c0_i32_1 = arith.constant 0 : i32
    return %c0_i32, %c0_i32_0 : i32, i32
  }
  func.func @transform_2(%arg0: i32) -> (i32, i32) {
    %c0_i32 = arith.constant 0 : i32
    %c0_i32_0 = arith.constant 0 : i32
    %c0_i32_1 = arith.constant 0 : i32
    return %c0_i32, %c0_i32_0 : i32, i32
  }
  func.func @transform_3(%arg0: i32) -> (i32, i32) {
    %c0_i32 = arith.constant 0 : i32
    %c0_i32_0 = arith.constant 0 : i32
    %c0_i32_1 = arith.constant 0 : i32
    return %c0_i32, %c0_i32_0 : i32, i32
  }
  func.func @transform_4(%arg0: i32) -> (i32, i32) {
    %c0_i32 = arith.constant 0 : i32
    %c0_i32_0 = arith.constant 0 : i32
    %c0_i32_1 = arith.constant 0 : i32
    return %c0_i32, %c0_i32_0 : i32, i32
  }
  func.func @transform_5(%arg0: i32) -> (i32, i32) {
    %c0_i32 = arith.constant 0 : i32
    %c0_i32_0 = arith.constant 0 : i32
    %c0_i32_1 = arith.constant 0 : i32
    return %c0_i32, %c0_i32_0 : i32, i32
  }
  func.func @transform_6(%arg0: i32) -> (i32, i32) {
    %c0_i32 = arith.constant 0 : i32
    %c0_i32_0 = arith.constant 0 : i32
    %c0_i32_1 = arith.constant 0 : i32
    return %c0_i32, %c0_i32_0 : i32, i32
  }
  func.func @transform_7(%arg0: i32) -> (i32, i32) {
    %c0_i32 = arith.constant 0 : i32
    %c0_i32_0 = arith.constant 0 : i32
    %c0_i32_1 = arith.constant 0 : i32
    return %c0_i32, %c0_i32_0 : i32, i32
  }
  func.func @transform_8(%arg0: i32) -> (i32, i32) {
    %c0_i32 = arith.constant 0 : i32
    %c0_i32_0 = arith.constant 0 : i32
    %c0_i32_1 = arith.constant 0 : i32
    return %c0_i32, %c0_i32_0 : i32, i32
  }
  func.func @transform_9(%arg0: i32) -> (i32, i32) {
    %c0_i32 = arith.constant 0 : i32
    %c0_i32_0 = arith.constant 0 : i32
    %c0_i32_1 = arith.constant 0 : i32
    return %c0_i32, %c0_i32_0 : i32, i32
  }
  func.func @transform_10(%arg0: i32) -> (i32, i32) {
    %c0_i32 = arith.constant 0 : i32
    %c0_i32_0 = arith.constant 0 : i32
    %c0_i32_1 = arith.constant 0 : i32
    return %c0_i32, %c0_i32_0 : i32, i32
  }
  func.func @transform_11(%arg0: i32) -> (i32, i32) {
    %c0_i32 = arith.constant 0 : i32
    %c0_i32_0 = arith.constant 0 : i32
    %c0_i32_1 = arith.constant 0 : i32
    return %c0_i32, %c0_i32_0 : i32, i32
  }
  func.func @transform_12(%arg0: i32) -> (i32, i32) {
    %c0_i32 = arith.constant 0 : i32
    %c0_i32_0 = arith.constant 0 : i32
    %c0_i32_1 = arith.constant 0 : i32
    return %c0_i32, %c0_i32_0 : i32, i32
  }
  func.func @transform_13(%arg0: i32) -> (i32, i32) {
    %c0_i32 = arith.constant 0 : i32
    %c0_i32_0 = arith.constant 0 : i32
    %c0_i32_1 = arith.constant 0 : i32
    return %c0_i32, %c0_i32_0 : i32, i32
  }
  func.func @transform_14(%arg0: i32) -> (i32, i32) {
    %c0_i32 = arith.constant 0 : i32
    %c0_i32_0 = arith.constant 0 : i32
    %c0_i32_1 = arith.constant 0 : i32
    return %c0_i32, %c0_i32_0 : i32, i32
  }
  func.func @transform_15(%arg0: i32) -> (i32, i32) {
    %c0_i32 = arith.constant 0 : i32
    %c0_i32_0 = arith.constant 0 : i32
    %c0_i32_1 = arith.constant 0 : i32
    return %c0_i32, %c0_i32_0 : i32, i32
  }
  func.func @transform_16(%arg0: i32) -> (i32, i32) {
    %c0_i32 = arith.constant 0 : i32
    %c0_i32_0 = arith.constant 0 : i32
    %c0_i32_1 = arith.constant 0 : i32
    return %c0_i32, %c0_i32_0 : i32, i32
  }
}

</mosaic_0001>

<bundles_post_ra>
// kernel: critic_blocks_forward.1
= control target key start
LH: loop header
LB: loop body
LE: loop exit
PB: predicated region body
PF: predicated region fallthrough
CT: control target
= control target key end

     0   :  { %s13139_s0 = inlined_call_operand.hbm [shape: bf16[2,18,9,128], index: 0, kind: input, shape index: {}]   ;;  %s13140_s1 = inlined_call_operand.hbm [shape: bf16[1024,64], index: 1, kind: input, shape index: {}]   ;;  %s13141_s2 = inlined_call_operand.hbm [shape: f32[1,64], index: 2, kind: input, shape index: {}]   ;;  %s13142_s3 = inlined_call_operand.hbm [shape: f32[1,64], index: 3, kind: input, shape index: {}]   ;;  %s13143_s4 = inlined_call_operand.hbm [shape: bf16[1024,64], index: 4, kind: input, shape index: {}]   ;;  %s13144_s5 = inlined_call_operand.hbm [shape: f32[1,64], index: 5, kind: input, shape index: {}]   ;;  %s13145_s6 = inlined_call_operand.hbm [shape: f32[1,64], index: 6, kind: input, shape index: {}]   ;;  %s13146_s7 = inlined_call_operand.hbm [shape: bf16[1024,128], index: 7, kind: input, shape index: {}]   ;;  %s13147_s8 = inlined_call_operand.hbm [shape: f32[1,128], index: 8, kind: input, shape index: {}]   ;;  %s13148_s9 = inlined_call_operand.hbm [shape: f32[1,128], index: 9, kind: input, shape index: {}]   ;;  %s13149_s10 = inlined_call_operand.hbm [shape: bf16[2048,256], index: 10, kind: input, shape index: {}]   ;;  %s13150_s11 = inlined_call_operand.hbm [shape: f32[1,256], index: 11, kind: input, shape index: {}]   ;;  %s13151_s12 = inlined_call_operand.hbm [shape: f32[1,256], index: 12, kind: input, shape index: {}]   ;;  %s13152_s13 = inlined_call_operand.hbm [shape: f32[64,128], index: 13, kind: output, shape index: {0}]   ;;  %s13153_s14 = inlined_call_operand.hbm [shape: f32[16,128], index: 14, kind: output, shape index: {1}]   ;;  %s13154_s15 = inlined_call_operand.hbm [shape: f32[4,256], index: 15, kind: output, shape index: {2}]   ;;  %s13155_s16 = inlined_call_operand.hbm [shape: f32[2,256], index: 16, kind: output, shape index: {3}]  }
   0x1   :  { %13159 = sst [smem:[#allocation49_spill]] %s13139_s0 }
   0x2   :  { %22 = vsyncpa [#allocation13], 0 }
   0x3   :  { %23 = vsyncpa [#allocation16], 0 }
   0x4   :  { %24 = vsyncpa [#allocation19], 0 }
   0x5   :  { %25 = vsyncpa [#allocation22], 0 }
   0x6   :  { %26 = vsyncpa [#allocation25], 0 }
   0x7   :  { %27 = vsyncpa [#allocation28], 0 }
   0x8   :  { %28 = vsyncpa [#allocation31], 0 }
   0x9   :  { %29 = vsyncpa [#allocation14], 0 }
   0xa   :  { %30 = vsyncpa [#allocation35], 0 }
   0xb   :  { %31 = vsyncpa [#allocation38], 0  ;;  %s11299_s21 = smov [#allocation15]   ;;  %s11300_s23 = smov [#allocation18]  }
   0xc   :  { %s49_s22 = sshll.u32 %s11299_s21, 4  ;;  %s72_s24 = sshll.u32 %s11300_s23, 4  ;;  %s50_s22 = int_to_ptr.vmem [resolvable:$true] %s49_s22  ;;  %s11408_s24 = int_to_ptr.vmem [resolvable:$true] %s72_s24 }
   0xd   :  { %s10905_s27 = scalar_lea.hbm %s13140_s1, 8192 }
   0xe   :  { %p10906_p0 = scmp.ne.s32.totalorder %s13140_s1, %s10905_s27  ;;  %p10909_p1 = scmp.lt.u32.totalorder %s10905_s27, %s13140_s1 }
  0x10   :  { %p10911_p2 = pnand %p10909_p1, %p10906_p0 }
  0x12   :  { %10914 = shalt.err (!%p10911_p2)
}
  0x13   :  { %s10915_s17 = scalar_lea.vmem %s50_s22, 8192  ;;  %p10920_p4 = scmp.lt.s32.totalorder %s50_s22, %s50_s22 }
  0x14   :  { %p10916_p3 = scmp.ne.s32.totalorder %s50_s22, %s10915_s17  ;;  %p10921_p5 = scmp.lt.s32.totalorder %s10915_s17, %s10915_s17 }
  0x16   :  { %p10922_p6 = por %p10921_p5, %p10920_p4 }
  0x18   :  { %p10923_p7 = pnand %p10922_p6, %p10916_p3 }
  0x1a   :  { %10926 = shalt.err (!%p10923_p7)
}
  0x1b   :  { %s11301_s18 = smov 64   ;;  %s11302_s19 = smov 4  }
  0x1c   :  { %55 = dma.hbm_to_vmem [thread:$0]  %s13140_s1, 8192, %s50_s22, [#allocation16], %s11301_s18, %s11301_s18, %s11302_s19  }
  0x1d   :  { %s10927_s26 = scalar_lea.hbm %s13142_s3, 16 }
  0x1e   :  { %p10928_p8 = scmp.ne.s32.totalorder %s13142_s3, %s10927_s26  ;;  %p10931_p9 = scmp.lt.u32.totalorder %s10927_s26, %s13142_s3 }
  0x20   :  { %p10933_p10 = pnand %p10931_p9, %p10928_p8 }
  0x22   :  { %10936 = shalt.err (!%p10933_p10)
}
  0x23   :  { %s10937_s0 = scalar_lea.vmem %s11408_s24, 16  ;;  %s10941_s1 = scalar_lea.vmem %s11408_s24, 32 }
  0x24   :  { %p10938_p11 = scmp.ne.s32.totalorder %s11408_s24, %s10937_s0  ;;  %p10942_p12 = scmp.lt.s32.totalorder %s11408_s24, %s11408_s24 }
  0x25   :  { %p10943_p13 = scmp.lt.s32.totalorder %s10941_s1, %s10937_s0 }
  0x27   :  { %p10944_p0 = por %p10943_p13, %p10942_p12 }
  0x29   :  { %p10945_p1 = pnand %p10944_p0, %p10938_p11 }
  0x2b   :  { %10948 = shalt.err (!%p10945_p1)
}
  0x2c   :  { %75 = dma.hbm_to_vmem [thread:$0]  %s13142_s3, 16, %s11408_s24, [#allocation19]  }
  0x2d   :  { %s11303_s20 = smov [#allocation21]   ;;  %s11304_s23 = smov [#allocation24]  }
  0x2e   :  { %s94_s21 = sshll.u32 %s11303_s20, 4  ;;  %s113_s25 = sshll.u32 %s11304_s23, 4  ;;  %s95_s21 = int_to_ptr.vmem [resolvable:$true] %s94_s21  ;;  %s11443_s25 = int_to_ptr.vmem [resolvable:$true] %s113_s25 }
  0x2f   :  { %s10949_s28 = scalar_lea.hbm %s13144_s5, 16 }
  0x30   :  { %p10950_p2 = scmp.ne.s32.totalorder %s13144_s5, %s10949_s28  ;;  %p10953_p3 = scmp.lt.u32.totalorder %s10949_s28, %s13144_s5 }
  0x32   :  { %p10955_p4 = pnand %p10953_p3, %p10950_p2 }
  0x34   :  { %10958 = shalt.err (!%p10955_p4)
}
  0x35   :  { %s10959_s3 = scalar_lea.vmem %s95_s21, 16  ;;  %s10963_s24 = scalar_lea.vmem %s95_s21, 32 }
  0x36   :  { %p10960_p5 = scmp.ne.s32.totalorder %s95_s21, %s10959_s3  ;;  %p10964_p6 = scmp.lt.s32.totalorder %s95_s21, %s95_s21 }
  0x37   :  { %p10965_p7 = scmp.lt.s32.totalorder %s10963_s24, %s10959_s3 }
  0x39   :  { %p10966_p8 = por %p10965_p7, %p10964_p6 }
  0x3b   :  { %p10967_p9 = pnand %p10966_p8, %p10960_p5 }
  0x3d   :  { %10970 = shalt.err (!%p10967_p9)
}
  0x3e   :  { %97 = dma.hbm_to_vmem [thread:$0]  %s13144_s5, 16, %s95_s21, [#allocation22]  }
  0x3f   :  { %s10971_s26 = scalar_lea.hbm %s13146_s7, 8192 }
  0x40   :  { %p10972_p10 = scmp.ne.s32.totalorder %s13146_s7, %s10971_s26  ;;  %p10975_p11 = scmp.lt.u32.totalorder %s10971_s26, %s13146_s7 }
  0x42   :  { %p10977_p12 = pnand %p10975_p11, %p10972_p10 }
  0x44   :  { %10980 = shalt.err (!%p10977_p12)
}
  0x45   :  { %s10981_s0 = scalar_lea.vmem %s11443_s25, 8192  ;;  %p10986_p0 = scmp.lt.s32.totalorder %s11443_s25, %s11443_s25 }
  0x46   :  { %p10982_p13 = scmp.ne.s32.totalorder %s11443_s25, %s10981_s0  ;;  %p10987_p1 = scmp.lt.s32.totalorder %s10981_s0, %s10981_s0 }
  0x48   :  { %p10988_p2 = por %p10987_p1, %p10986_p0 }
  0x4a   :  { %p10989_p3 = pnand %p10988_p2, %p10982_p13 }
  0x4c   :  { %10992 = shalt.err (!%p10989_p3)
}
  0x4d   :  { %119 = dma.hbm_to_vmem [thread:$0]  %s13146_s7, 8192, %s11443_s25, [#allocation25], %s11301_s18, %s11301_s18, %s11302_s19  }
  0x4e   :  { %s11305_s1 = smov [#allocation27]   ;;  %s11306_s24 = smov [#allocation30]  }
  0x4f   :  { %s136_s3 = sshll.u32 %s11305_s1, 4  ;;  %s158_s22 = sshll.u32 %s11306_s24, 4  ;;  %s137_s3 = int_to_ptr.vmem [resolvable:$true] %s136_s3  ;;  %s159_s22 = int_to_ptr.vmem [resolvable:$true] %s158_s22 }
  0x50   :  { %s10993_s23 = scalar_lea.hbm %s13148_s9, 16 }
  0x51   :  { %p10994_p4 = scmp.ne.s32.totalorder %s13148_s9, %s10993_s23  ;;  %p10997_p5 = scmp.lt.u32.totalorder %s10993_s23, %s13148_s9 }
  0x53   :  { %p10999_p6 = pnand %p10997_p5, %p10994_p4 }
  0x55   :  { %11002 = shalt.err (!%p10999_p6)
}
  0x56   :  { %s11003_s7 = scalar_lea.vmem %s137_s3, 16  ;;  %s11007_s25 = scalar_lea.vmem %s137_s3, 32 }
  0x57   :  { %p11004_p7 = scmp.ne.s32.totalorder %s137_s3, %s11003_s7  ;;  %p11008_p8 = scmp.lt.s32.totalorder %s137_s3, %s137_s3 }
  0x58   :  { %p11009_p9 = scmp.lt.s32.totalorder %s11007_s25, %s11003_s7 }
  0x5a   :  { %p11010_p10 = por %p11009_p9, %p11008_p8 }
  0x5c   :  { %p11011_p11 = pnand %p11010_p10, %p11004_p7 }
  0x5e   :  { %11014 = shalt.err (!%p11011_p11)
}
  0x5f   :  { %139 = dma.hbm_to_vmem [thread:$0]  %s13148_s9, 16, %s137_s3, [#allocation28]  }
  0x60   :  { %s11015_s1 = scalar_lea.hbm %s13150_s11, 32 }
  0x61   :  { %p11016_p12 = scmp.ne.s32.totalorder %s13150_s11, %s11015_s1  ;;  %p11019_p13 = scmp.lt.u32.totalorder %s11015_s1, %s13150_s11 }
  0x63   :  { %p11021_p0 = pnand %p11019_p13, %p11016_p12 }
  0x65   :  { %11024 = shalt.err (!%p11021_p0)
}
  0x66   :  { %s11025_s26 = scalar_lea.vmem %s159_s22, 32  ;;  %p11030_p2 = scmp.lt.s32.totalorder %s159_s22, %s159_s22 }
  0x67   :  { %p11026_p1 = scmp.ne.s32.totalorder %s159_s22, %s11025_s26  ;;  %p11031_p3 = scmp.lt.s32.totalorder %s11025_s26, %s11025_s26 }
  0x69   :  { %p11032_p4 = por %p11031_p3, %p11030_p2 }
  0x6b   :  { %p11033_p5 = pnand %p11032_p4, %p11026_p1 }
  0x6d   :  { %11036 = shalt.err (!%p11033_p5)
}
  0x6e   :  { %161 = dma.hbm_to_vmem [thread:$0]  %s13150_s11, 32, %s159_s22, [#allocation31]  }
  0x6f   :  { %s11307_s27 = smov [#allocation12]   ;;  %s11308_s29 = smov [#allocation17]  }
  0x70   :  { %s37_s28 = sshll.u32 %s11307_s27, 4  ;;  %s62_s7 = sshll.u32 %s11308_s29, 4  ;;  %s38_s28 = int_to_ptr.vmem [resolvable:$true] %s37_s28  ;;  %s63_s7 = int_to_ptr.vmem [resolvable:$true] %s62_s7 }
  0x71   :  { %s13160_s0 = sld [smem:[#allocation49_spill]] }
  0x77   :  { %s11037_s5 = scalar_lea.hbm %s13160_s0, 4608 }
  0x78   :  { %p11038_p6 = scmp.ne.s32.totalorder %s13160_s0, %s11037_s5  ;;  %p11041_p7 = scmp.lt.u32.totalorder %s11037_s5, %s13160_s0 }
  0x7a   :  { %p11043_p8 = pnand %p11041_p7, %p11038_p6 }
  0x7c   :  { %11046 = shalt.err (!%p11043_p8)
}
  0x7d   :  { %s11047_s11 = scalar_lea.vmem %s38_s28, 4608  ;;  %p11052_p10 = scmp.lt.s32.totalorder %s38_s28, %s38_s28 }
  0x7e   :  { %p11048_p9 = scmp.ne.s32.totalorder %s38_s28, %s11047_s11  ;;  %p11053_p11 = scmp.lt.s32.totalorder %s11047_s11, %s11047_s11 }
  0x80   :  { %p11054_p12 = por %p11053_p11, %p11052_p10 }
  0x82   :  { %p11055_p13 = pnand %p11054_p12, %p11048_p9 }
  0x84   :  { %11058 = shalt.err (!%p11055_p13)
}
  0x85   :  { %43 = dma.hbm_to_vmem [thread:$0]  %s13160_s0, 4608, %s38_s28, [#allocation13], %s11301_s18, %s11301_s18, %s11302_s19  }
  0x86   :  { %s11059_s9 = scalar_lea.hbm %s13141_s2, 16 }
  0x87   :  { %p11060_p0 = scmp.ne.s32.totalorder %s13141_s2, %s11059_s9  ;;  %p11063_p1 = scmp.lt.u32.totalorder %s11059_s9, %s13141_s2 }
  0x89   :  { %p11065_p2 = pnand %p11063_p1, %p11060_p0 }
  0x8b   :  { %11068 = shalt.err (!%p11065_p2)
}
  0x8c   :  { %s11069_s30 = scalar_lea.vmem %s63_s7, 16  ;;  %s11073_s5 = scalar_lea.vmem %s63_s7, 32 }
  0x8d   :  { %p11070_p3 = scmp.ne.s32.totalorder %s63_s7, %s11069_s30  ;;  %p11074_p4 = scmp.lt.s32.totalorder %s63_s7, %s63_s7 }
  0x8e   :  { %p11075_p5 = scmp.lt.s32.totalorder %s11073_s5, %s11069_s30 }
  0x90   :  { %p11076_p6 = por %p11075_p5, %p11074_p4 }
  0x92   :  { %p11077_p7 = pnand %p11076_p6, %p11070_p3 }
  0x94   :  { %11080 = shalt.err (!%p11077_p7)
}
  0x95   :  { %65 = dma.hbm_to_vmem [thread:$0]  %s13141_s2, 16, %s63_s7, [#allocation16]  }
  0x96   :  { %s11309_s21 = smov [#allocation20]   ;;  %s11310_s24 = smov [#allocation23]  }
  0x97   :  { %s81_s1 = sshll.u32 %s11309_s21, 4  ;;  %s104_s17 = sshll.u32 %s11310_s24, 4  ;;  %s82_s1 = int_to_ptr.vmem [resolvable:$true] %s81_s1  ;;  %s105_s17 = int_to_ptr.vmem [resolvable:$true] %s104_s17 }
  0x98   :  { %s11081_s20 = scalar_lea.hbm %s13143_s4, 8192 }
  0x99   :  { %p11082_p8 = scmp.ne.s32.totalorder %s13143_s4, %s11081_s20  ;;  %p11085_p9 = scmp.lt.u32.totalorder %s11081_s20, %s13143_s4 }
  0x9b   :  { %p11087_p10 = pnand %p11085_p9, %p11082_p8 }
  0x9d   :  { %11090 = shalt.err (!%p11087_p10)
}
  0x9e   :  { %s11091_s2 = scalar_lea.vmem %s82_s1, 8192  ;;  %p11096_p12 = scmp.lt.s32.totalorder %s82_s1, %s82_s1 }
  0x9f   :  { %p11092_p11 = scmp.ne.s32.totalorder %s82_s1, %s11091_s2  ;;  %p11097_p13 = scmp.lt.s32.totalorder %s11091_s2, %s11091_s2 }
  0xa1   :  { %p11098_p0 = por %p11097_p13, %p11096_p12 }
  0xa3   :  { %p11099_p1 = pnand %p11098_p0, %p11092_p11 }
  0xa5   :  { %11102 = shalt.err (!%p11099_p1)
}
  0xa6   :  { %87 = dma.hbm_to_vmem [thread:$0]  %s13143_s4, 8192, %s82_s1, [#allocation19], %s11301_s18, %s11301_s18, %s11302_s19  }
  0xa7   :  { %s11103_s30 = scalar_lea.hbm %s13145_s6, 16 }
  0xa8   :  { %p11104_p2 = scmp.ne.s32.totalorder %s13145_s6, %s11103_s30  ;;  %p11107_p3 = scmp.lt.u32.totalorder %s11103_s30, %s13145_s6 }
  0xaa   :  { %p11109_p4 = pnand %p11107_p3, %p11104_p2 }
  0xac   :  { %11112 = shalt.err (!%p11109_p4)
}
  0xad   :  { %s11113_s24 = scalar_lea.vmem %s105_s17, 16  ;;  %s11117_s11 = scalar_lea.vmem %s105_s17, 32 }
  0xae   :  { %p11114_p5 = scmp.ne.s32.totalorder %s105_s17, %s11113_s24  ;;  %p11118_p6 = scmp.lt.s32.totalorder %s105_s17, %s105_s17 }
  0xaf   :  { %p11119_p7 = scmp.lt.s32.totalorder %s11117_s11, %s11113_s24 }
  0xb1   :  { %p11120_p8 = por %p11119_p7, %p11118_p6 }
  0xb3   :  { %p11121_p9 = pnand %p11120_p8, %p11114_p5 }
  0xb5   :  { %11124 = shalt.err (!%p11121_p9)
}
  0xb6   :  { %107 = dma.hbm_to_vmem [thread:$0]  %s13145_s6, 16, %s105_s17, [#allocation22]  }
  0xb7   :  { %s11311_s1 = smov [#allocation26]   ;;  %s11312_s20 = smov [#allocation29]  }
  0xb8   :  { %s126_s22 = sshll.u32 %s11311_s1, 4  ;;  %s145_s23 = sshll.u32 %s11312_s20, 4  ;;  %s127_s22 = int_to_ptr.vmem [resolvable:$true] %s126_s22  ;;  %s11555_s23 = int_to_ptr.vmem [resolvable:$true] %s145_s23 }
  0xb9   :  { %s11125_s3 = scalar_lea.hbm %s13147_s8, 16 }
  0xba   :  { %p11126_p10 = scmp.ne.s32.totalorder %s13147_s8, %s11125_s3  ;;  %p11129_p11 = scmp.lt.u32.totalorder %s11125_s3, %s13147_s8 }
  0xbc   :  { %p11131_p12 = pnand %p11129_p11, %p11126_p10 }
  0xbe   :  { %11134 = shalt.err (!%p11131_p12)
}
  0xbf   :  { %s11135_s6 = scalar_lea.vmem %s127_s22, 16  ;;  %s11139_s17 = scalar_lea.vmem %s127_s22, 32 }
  0xc0   :  { %p11136_p13 = scmp.ne.s32.totalorder %s127_s22, %s11135_s6  ;;  %p11140_p0 = scmp.lt.s32.totalorder %s127_s22, %s127_s22 }
  0xc1   :  { %p11141_p1 = scmp.lt.s32.totalorder %s11139_s17, %s11135_s6 }
  0xc3   :  { %p11142_p2 = por %p11141_p1, %p11140_p0 }
  0xc5   :  { %p11143_p3 = pnand %p11142_p2, %p11136_p13 }
  0xc7   :  { %11146 = shalt.err (!%p11143_p3)
}
  0xc8   :  { %129 = dma.hbm_to_vmem [thread:$0]  %s13147_s8, 16, %s127_s22, [#allocation25]  }
  0xc9   :  { %s11147_s0 = scalar_lea.hbm %s13149_s10, 32768 }
  0xca   :  { %p11148_p4 = scmp.ne.s32.totalorder %s13149_s10, %s11147_s0  ;;  %p11151_p5 = scmp.lt.u32.totalorder %s11147_s0, %s13149_s10 }
  0xcc   :  { %p11153_p6 = pnand %p11151_p5, %p11148_p4 }
  0xce   :  { %11156 = shalt.err (!%p11153_p6)
}
  0xcf   :  { %s11157_s19 = scalar_lea.vmem %s11555_s23, 32768  ;;  %p11162_p8 = scmp.lt.s32.totalorder %s11555_s23, %s11555_s23 }
  0xd0   :  { %p11158_p7 = scmp.ne.s32.totalorder %s11555_s23, %s11157_s19  ;;  %p11163_p9 = scmp.lt.s32.totalorder %s11157_s19, %s11157_s19 }
  0xd2   :  { %p11164_p10 = por %p11163_p9, %p11162_p8 }
  0xd4   :  { %p11165_p11 = pnand %p11164_p10, %p11158_p7 }
  0xd6   :  { %11168 = shalt.err (!%p11165_p11)
}
  0xd7   :  { %s11313_s8 = smov 128   ;;  %s11314_s1 = smov 8  }
  0xd8   :  { %151 = dma.hbm_to_vmem [thread:$0]  %s13149_s10, 32768, %s11555_s23, [#allocation28], %s11313_s8, %s11313_s8, %s11314_s1  }
  0xd9   :  { %s11315_s26 = smov [#allocation32]   ;;  %s11169_s7 = scalar_lea.hbm %s13151_s12, 32 }
  0xda   :  { %s168_s9 = sshll.u32 %s11315_s26, 4  ;;  %p11170_p12 = scmp.ne.s32.totalorder %s13151_s12, %s11169_s7  ;;  %s169_s9 = int_to_ptr.vmem [resolvable:$true] %s168_s9 }
  0xdb   :  { %p11173_p13 = scmp.lt.u32.totalorder %s11169_s7, %s13151_s12 }
  0xdd   :  { %p11175_p0 = pnand %p11173_p13, %p11170_p12 }
  0xdf   :  { %11178 = shalt.err (!%p11175_p0)
}
  0xe0   :  { %s11179_s25 = scalar_lea.vmem %s169_s9, 32  ;;  %p11184_p2 = scmp.lt.s32.totalorder %s169_s9, %s169_s9 }
  0xe1   :  { %p11180_p1 = scmp.ne.s32.totalorder %s169_s9, %s11179_s25  ;;  %p11185_p3 = scmp.lt.s32.totalorder %s11179_s25, %s11179_s25 }
  0xe3   :  { %p11186_p4 = por %p11185_p3, %p11184_p2 }
  0xe5   :  { %p11187_p5 = pnand %p11186_p4, %p11180_p1 }
  0xe7   :  { %11190 = shalt.err (!%p11187_p5)
}
  0xe8   :  { %171 = dma.hbm_to_vmem [thread:$0]  %s13151_s12, 32, %s169_s9, [#allocation31]  }
  0xe9   :  { %11279 = dma.done.wait [#allocation13], 4608  }
  0xea   :  { %11280 = vsyncadd [#allocation13], 4294962688 }
  0xeb   :  { %11281 = dma.done.wait [#allocation16], 8208  }
  0xec   :  { %11282 = vsyncadd [#allocation16], 4294959088 }
  0xed   :  { %11283 = dma.done.wait [#allocation19], 8208  }
  0xee   :  { %11284 = vsyncadd [#allocation19], 4294959088 }
  0xef   :  { %11285 = dma.done.wait [#allocation22], 32  }
  0xf0   :  { %11286 = vsyncadd [#allocation22], 4294967264 }
  0xf1   :  { %11287 = dma.done.wait [#allocation25], 8208  }
  0xf2   :  { %11288 = vsyncadd [#allocation25], 4294959088 }
  0xf3   :  { %11289 = dma.done.wait [#allocation28], 32784  }
  0xf4   :  { %11290 = vsyncadd [#allocation28], 4294934512 }
  0xf5   :  { %11291 = dma.done.wait [#allocation31], 64  }
  0xf6   :  { %11292 = vsyncadd [#allocation31], 4294967232  ;;  %v10208_v0 = vld [vmem:[#allocation15 + $0x40] sm:$0xff]   ;;  %v10210_v2 = vld [vmem:[#allocation15 + $0x48] sm:$0xff]   ;;  %vm2665_vm0 = vcmask 523264   ;;  %vm228_vm2 = vcmask 1040384  }
  0xf7   :  { %v10209_v1 = vld [vmem:[#allocation15] sm:$0xff]   ;;  %9702 = vmatprep.subr.bf16.mxu1 %v10208_v0  ;;  %v10211_v3 = vld [vmem:[#allocation15 + $0x8] sm:$0xff]   ;;  %v10212_v4 = vld [vmem:[#allocation15 + $0x50] sm:$0xff]   ;;  %vm213_vm1 = vsmask.f32 2304  ;;  %vm291_vm4 = vcmask 1042434  }
  0xf8   :  { %9703 = vmatpush3.bf16.msra.mxu1 %v10209_v1  ;;  %v10213_v5 = vld [vmem:[#allocation15 + $0x10] sm:$0xff]   ;;  %v10214_v6 = vld [vmem:[#allocation15 + $0x58] sm:$0xff]   ;;  %v10216_v8 = vld [vmem:[#allocation15 + $0x60] sm:$0xff]   ;;  %vm229_vm3 = vsmask.f32 256  ;;  %s11319_s12 = smov [#allocation34]  }
  0xf9   :  { %9704 = vmatprep.subr.bf16.mxu1 %v10210_v2  ;;  %v10215_v7 = vld [vmem:[#allocation15 + $0x18] sm:$0xff]   ;;  %v10217_v9 = vld [vmem:[#allocation15 + $0x20] sm:$0xff]   ;;  %v10218_v10 = vld [vmem:[#allocation15 + $0x68] sm:$0xff]   ;;  %s11320_s30 = smov [#allocation33]  }
  0xfa   :  { %v502_v11 = vld [vmem:[#allocation12] sm:$0xf]  ;;  %v503_v12 = vld [vmem:[#allocation12 + $0x4] sm:$0x1]  ;;  %v571_v13 = vld [vmem:[#allocation12 + $0x10] sm:$0xf] }
  0xfb   :  { %v9058_v14 = vcombine.low %v502_v11, %v503_v12  ;;  %v572_v15 = vld [vmem:[#allocation12 + $0x14] sm:$0x1]  ;;  %562 = vst [vmem:[#allocation5] sm:$0xf] %v502_v11  ;;  %v627_v16 = vrot.slane %v571_v13, 4  ;;  %v10219_v18 = vld [vmem:[#allocation15 + $0x28] sm:$0xff]   ;;  %vm11774_vm5 = vmand %vm228_vm2, %vm229_vm3 }
  0xfc   :  { %9705 = vmatpush3.bf16.msra.mxu1 %v10211_v3  ;;  %v9062_v17 = vcombine.low %v571_v13, %v572_v15  ;;  %v10220_v19 = vld [vmem:[#allocation15 + $0x70] sm:$0xff]   ;;  %v652_v22 = vld [vmem:[#allocation12 + $0x20] sm:$0xf]  ;;  %v653_v25 = vld [vmem:[#allocation12 + $0x24] sm:$0x1]  ;;  %s8997_s5 = sshll.u32 %s11320_s30, 4  ;;  %s13067_s5 = int_to_ptr.vmem [resolvable:$true] %s8997_s5 }
  0xfd   :  { %9706 = vmatprep.subr.bf16.mxu1 %v10212_v4  ;;  %v516_v20 = vshrl.u32 %v9058_v14, 16  ;;  %v518_v21 = vshll.u32 %v9058_v14, 16  ;;  %643 = vst [vmem:[#allocation5] sm:$0xf0] %v627_v16  ;;  %v721_v26 = vld [vmem:[#allocation12 + $0x30] sm:$0xf]  ;;  %v9066_v29 = vcombine.low %v652_v22, %v653_v25  ;;  %vm11780_vm6 = vmand %vm291_vm4, %vm213_vm1 }
  0xfe   :  { %v585_v23 = vshrl.u32 %v9062_v17, 16  ;;  %v587_v24 = vshll.u32 %v9062_v17, 16  ;;  %712 = vst [vmem:[#allocation5 + $0x40] sm:$0xf] %v652_v22  ;;  %v10221_v27 = vld [vmem:[#allocation15 + $0x30] sm:$0xff]   ;;  %v777_v31 = vrot.slane %v721_v26, 4 }
  0xff   :  { %v520_v28 = vrot.slane %v518_v21, 1  ;;  %v722_v30 = vld [vmem:[#allocation12 + $0x34] sm:$0x1]  ;;  %v10222_v32 = vld [vmem:[#allocation15 + $0x78] sm:$0xff]   ;;  %v666_v36 = vshrl.u32 %v9066_v29, 16  ;;  %v668_v37 = vshll.u32 %v9066_v29, 16 }
 0x100   :  { %9707 = vmatpush3.bf16.msra.mxu1 %v10213_v5  ;;  %v589_v33 = vrot.slane %v587_v24, 1  ;;  %v9070_v34 = vcombine.low %v721_v26, %v722_v30  ;;  %793 = vst [vmem:[#allocation5 + $0x40] sm:$0xf0] %v777_v31  ;;  %v802_v38 = vld [vmem:[#allocation12 + $0x40] sm:$0xf]  ;;  %v10223_v48 = vld [vmem:[#allocation15 + $0x38] sm:$0xff]  }
 0x101   :  { %9708 = vmatprep.subr.bf16.mxu1 %v10214_v6  ;;  %v521_v35 = vor.u32 %v520_v28, %v516_v20  ;;  %v803_v42 = vld [vmem:[#allocation12 + $0x44] sm:$0x1]  ;;  %v871_v43 = vld [vmem:[#allocation12 + $0x50] sm:$0xf]  ;;  %862 = vst [vmem:[#allocation5 + $0x80] sm:$0xf] %v802_v38 }
 0x102   :  { %v590_v39 = vor.u32 %v589_v33, %v585_v23  ;;  %v735_v40 = vshrl.u32 %v9070_v34, 16  ;;  %v737_v41 = vshll.u32 %v9070_v34, 16  ;;  %v670_v44 = vrot.slane %v668_v37, 1  ;;  %v872_v46 = vld [vmem:[#allocation12 + $0x54] sm:$0x1]  ;;  %v10226_v55 = vld [vmem:[#allocation15 + $0xc0] sm:$0xff]  }
 0x103   :  { %563 = vst [vmem:[#allocation5 + $0x8] sm:$0xf] %v521_v35  ;;  %v9074_v45 = vcombine.low %v802_v38, %v803_v42  ;;  %v927_v47 = vrot.slane %v871_v43, 4  ;;  %v9078_v51 = vcombine.low %v871_v43, %v872_v46  ;;  %v952_v59 = vld [vmem:[#allocation12 + $0x60] sm:$0xf]  ;;  %v10230_v11 = vld [vmem:[#allocation15 + $0xc8] sm:$0xff]  }
 0x104   :  { %9709 = vmatpush3.bf16.msra.mxu1 %v10215_v7  ;;  %v628_v49 = vrot.slane %v590_v39, 4  ;;  %v739_v50 = vrot.slane %v737_v41, 1  ;;  %v671_v52 = vor.u32 %v670_v44, %v666_v36  ;;  %v953_v61 = vld [vmem:[#allocation12 + $0x64] sm:$0x1]  ;;  %v1021_v62 = vld [vmem:[#allocation12 + $0x70] sm:$0xf] }
 0x105   :  { %9710 = vmatprep.subr.bf16.mxu1 %v10216_v8  ;;  %v816_v53 = vshrl.u32 %v9074_v45, 16  ;;  %v818_v54 = vshll.u32 %v9074_v45, 16  ;;  %943 = vst [vmem:[#allocation5 + $0x80] sm:$0xf0] %v927_v47  ;;  %v885_v57 = vshrl.u32 %v9078_v51, 16  ;;  %v887_v58 = vshll.u32 %v9078_v51, 16 }
 0x106   :  { %644 = vst [vmem:[#allocation5 + $0x8] sm:$0xf0] %v628_v49  ;;  %v740_v56 = vor.u32 %v739_v50, %v735_v40  ;;  %713 = vst [vmem:[#allocation5 + $0x48] sm:$0xf] %v671_v52  ;;  %v9082_v1 = vcombine.low %v952_v59, %v953_v61  ;;  %v1022_v2 = vld [vmem:[#allocation12 + $0x74] sm:$0x1] }
 0x107   :  { %v820_v60 = vrot.slane %v818_v54, 1  ;;  %1012 = vst [vmem:[#allocation5 + $0xc0] sm:$0xf] %v952_v59  ;;  %v889_v0 = vrot.slane %v887_v58, 1  ;;  %v1077_v3 = vrot.slane %v1021_v62, 4  ;;  %v9086_v5 = vcombine.low %v1021_v62, %v1022_v2  ;;  %v10227_v6 = vld [vmem:[#allocation15 + $0x80] sm:$0xff]  }
 0x108   :  { %9711 = vmatpush3.bf16.msra.mxu1 %v10217_v9  ;;  %v778_v63 = vrot.slane %v740_v56, 4  ;;  %v966_v8 = vshrl.u32 %v9082_v1, 16  ;;  %v968_v9 = vshll.u32 %v9082_v1, 16  ;;  %v1103_v14 = vld [vmem:[#allocation12 + $0x94] sm:$0x1]  ;;  %v1701_v16 = vld [vmem:[#allocation5] sm:$0xff] }
 0x109   :  { %9712 = vmatprep.subr.bf16.mxu1 %v10218_v10  ;;  %v821_v4 = vor.u32 %v820_v60, %v816_v53  ;;  %v890_v7 = vor.u32 %v889_v0, %v885_v57  ;;  %1093 = vst [vmem:[#allocation5 + $0xc0] sm:$0xf0] %v1077_v3  ;;  %v1102_v10 = vld [vmem:[#allocation12 + $0x90] sm:$0xf]  ;;  %v1035_v12 = vshrl.u32 %v9086_v5, 16  ;;  %v1037_v13 = vshll.u32 %v9086_v5, 16 }
 0x10a   :  { %794 = vst [vmem:[#allocation5 + $0x48] sm:$0xf0] %v778_v63  ;;  %v1171_v15 = vld [vmem:[#allocation12 + $0xa0] sm:$0xf]  ;;  %1162 = vst [vmem:[#allocation5 + $0x100] sm:$0xf] %v1102_v10 }
 0x10b   :  { %863 = vst [vmem:[#allocation5 + $0x88] sm:$0xf] %v821_v4  ;;  %v928_v17 = vrot.slane %v890_v7, 4  ;;  %v1172_v20 = vld [vmem:[#allocation12 + $0xa4] sm:$0x1]  ;;  %v1227_v21 = vrot.slane %v1171_v15, 4 }
 0x10c   :  { %9713 = vmatpush3.bf16.msra.mxu1 %v10219_v18  ;;  %v970_v18 = vrot.slane %v968_v9, 1  ;;  %v1039_v23 = vrot.slane %v1037_v13, 1  ;;  %v9094_v24 = vcombine.low %v1171_v15, %v1172_v20  ;;  %v1252_v31 = vld [vmem:[#allocation12 + $0xb0] sm:$0xf]  ;;  %v1253_v34 = vld [vmem:[#allocation12 + $0xb4] sm:$0x1] }
 0x10d   :  { %9714 = vmatprep.subr.bf16.mxu1 %v10220_v19  ;;  %v9090_v19 = vcombine.low %v1102_v10, %v1103_v14  ;;  %v1702_v22 = vld [vmem:[#allocation5 + $0x8] sm:$0xff]  ;;  %944 = vst [vmem:[#allocation5 + $0x88] sm:$0xf0] %v928_v17  ;;  %1243 = vst [vmem:[#allocation5 + $0x100] sm:$0xf0] %v1227_v21  ;;  %v9098_v40 = vcombine.low %v1252_v31, %v1253_v34  ;;  %v1709_v42 = vld [vmem:[#allocation5 + $0x40] sm:$0xff] }
 0x10e   :  { %2309 = vmatprep.mubr.bf16.mxu1 %v1702_v22  ;;  %v971_v25 = vor.u32 %v970_v18, %v966_v8  ;;  %v1040_v28 = vor.u32 %v1039_v23, %v1035_v12  ;;  %v1185_v29 = vshrl.u32 %v9094_v24, 16  ;;  %v1187_v30 = vshll.u32 %v9094_v24, 16  ;;  %v1321_v35 = vld [vmem:[#allocation12 + $0xc0] sm:$0xf]  ;;  %1312 = vst [vmem:[#allocation5 + $0x140] sm:$0xf] %v1252_v31 }
 0x10f   :  { %v1116_v26 = vshrl.u32 %v9090_v19, 16  ;;  %v10234_v37 = vld [vmem:[#allocation15 + $0xd0] sm:$0xff]   ;;  %v1322_v41 = vld [vmem:[#allocation12 + $0xc4] sm:$0x1]  ;;  %v1377_v46 = vrot.slane %v1321_v35, 4  ;;  %v1268_v49 = vshll.u32 %v9098_v40, 16 }
 0x110   :  { %9715 = vmatpush3.bf16.msra.mxu1 %v10221_v27  ;;  %v1118_v27 = vshll.u32 %v9090_v19, 16  ;;  %1013 = vst [vmem:[#allocation5 + $0xc8] sm:$0xf] %v971_v25  ;;  %v1078_v38 = vrot.slane %v1040_v28, 4  ;;  %v1189_v39 = vrot.slane %v1187_v30, 1  ;;  %v10235_v43 = vld [vmem:[#allocation15 + $0x90] sm:$0xff]   ;;  %v9102_v45 = vcombine.low %v1321_v35, %v1322_v41 }
 0x111   :  { %9716 = vmatprep.subr.bf16.mxu1 %v10222_v32  ;;  %v10231_v32 = vld [vmem:[#allocation15 + $0x88] sm:$0xff]   ;;  %v1710_v36 = vld [vmem:[#allocation5 + $0x48] sm:$0xff]  ;;  %1393 = vst [vmem:[#allocation5 + $0x140] sm:$0xf0] %v1377_v46  ;;  %v1270_v57 = vrot.slane %v1268_v49, 1  ;;  %v10239_v63 = vld [vmem:[#allocation15 + $0x98] sm:$0xff]  }
 0x112   :  { %v1120_v33 = vrot.slane %v1118_v27, 1  ;;  %1094 = vst [vmem:[#allocation5 + $0xc8] sm:$0xf0] %v1078_v38  ;;  %v1190_v47 = vor.u32 %v1189_v39, %v1185_v29  ;;  %v1335_v50 = vshrl.u32 %v9102_v45, 16  ;;  %v1337_v51 = vshll.u32 %v9102_v45, 16  ;;  %v10243_v12 = vld [vmem:[#allocation15 + $0xa0] sm:$0xff]  }
 0x113   :  { %v1402_v52 = vld [vmem:[#allocation12 + $0xd0] sm:$0xf]  ;;  %v1403_v53 = vld [vmem:[#allocation12 + $0xd4] sm:$0x1]  ;;  %v1471_v59 = vld [vmem:[#allocation12 + $0xe0] sm:$0xf] }
 0x114   :  { %9717 = vmatpush3.bf16.msra.mxu1 %v10223_v48  ;;  %v1121_v44 = vor.u32 %v1120_v33, %v1116_v26  ;;  %v1266_v48 = vshrl.u32 %v9098_v40, 16  ;;  %v1718_v54 = vld [vmem:[#allocation5 + $0x88] sm:$0xff]  ;;  %v1228_v56 = vrot.slane %v1190_v47, 4  ;;  %v9106_v58 = vcombine.low %v1402_v52, %v1403_v53  ;;  %1462 = vst [vmem:[#allocation5 + $0x180] sm:$0xf] %v1402_v52  ;;  %v10246_v18 = vld [vmem:[#allocation15 + $0xe8] sm:$0xff]  }
 0x115   :  { %9766 = vmatprep.subr.bf16.mxu1 %v10226_v55  ;;  %v10238_v55 = vld [vmem:[#allocation15 + $0xd8] sm:$0xff]   ;;  %v1339_v60 = vrot.slane %v1337_v51, 1  ;;  %v1472_v61 = vld [vmem:[#allocation12 + $0xe4] sm:$0x1]  ;;  %v1527_v62 = vrot.slane %v1471_v59, 4  ;;  %v10250_v38 = vld [vmem:[#allocation15 + $0xf0] sm:$0xff]  }
 0x116   :  { %1163 = vst [vmem:[#allocation5 + $0x108] sm:$0xf] %v1121_v44  ;;  %1244 = vst [vmem:[#allocation5 + $0x108] sm:$0xf0] %v1228_v56  ;;  %v1271_v0 = vor.u32 %v1270_v57, %v1266_v48  ;;  %v1416_v1 = vshrl.u32 %v9106_v58, 16  ;;  %v1418_v2 = vshll.u32 %v9106_v58, 16  ;;  %v9110_v3 = vcombine.low %v1471_v59, %v1472_v61 }
 0x117   :  { %2310 = vmatmul.mubr.bf16.vlgmr.msra.gmra.mrb[0].mxu1 %v1701_v16  ;;  %v1340_v4 = vor.u32 %v1339_v60, %v1335_v50  ;;  %1543 = vst [vmem:[#allocation5 + $0x180] sm:$0xf0] %v1527_v62  ;;  %v1552_v5 = vld [vmem:[#allocation12 + $0xf0] sm:$0xf]  ;;  %v1553_v10 = vld [vmem:[#allocation12 + $0xf4] sm:$0x1] }
 0x118   :  { %9767 = vmatpush3.bf16.msra.mxu1 %v10227_v6  ;;  %2317 = vmatprep.mubr.bf16.mxu1 %v1710_v36  ;;  %v10242_v6 = vld [vmem:[#allocation15 + $0xe0] sm:$0xff]   ;;  %1313 = vst [vmem:[#allocation5 + $0x148] sm:$0xf] %v1271_v0  ;;  %v1420_v7 = vrot.slane %v1418_v2, 1  ;;  %v1485_v8 = vshrl.u32 %v9110_v3, 16  ;;  %v1487_v9 = vshll.u32 %v9110_v3, 16  ;;  %v9114_v14 = vcombine.low %v1552_v5, %v1553_v10 }
 0x119   :  { %9768 = vmatprep.subr.bf16.mxu1 %v10230_v11  ;;  %1612 = vst [vmem:[#allocation5 + $0x1c0] sm:$0xf] %v1552_v5  ;;  %v1717_v11 = vld [vmem:[#allocation5 + $0x80] sm:$0xff]  ;;  %v1378_v13 = vrot.slane %v1340_v4, 4  ;;  %v1621_v15 = vld [vmem:[#allocation12 + $0x100] sm:$0xf] }
 0x11a   :  { %v1622_v16 = vld [vmem:[#allocation12 + $0x104] sm:$0x1]  ;;  %v1726_v17 = vld [vmem:[#allocation5 + $0xc8] sm:$0xff]  ;;  %v1421_v19 = vor.u32 %v1420_v7, %v1416_v1  ;;  %v1489_v20 = vrot.slane %v1487_v9, 1  ;;  %v1677_v22 = vrot.slane %v1621_v15, 4  ;;  %v1566_v23 = vshrl.u32 %v9114_v14, 16 }
 0x11b   :  { %v9118_v21 = vcombine.low %v1621_v15, %v1622_v16  ;;  %1394 = vst [vmem:[#allocation5 + $0x148] sm:$0xf0] %v1378_v13  ;;  %v1568_v24 = vshll.u32 %v9114_v14, 16  ;;  %v504_v28 = vld [vmem:[#allocation12 + $0x8] sm:$0xf]  ;;  %v10251_v48 = vld [vmem:[#allocation15 + $0xb0] sm:$0xff]  }
 0x11c   :  { %9769 = vmatpush3.bf16.msra.mxu1 %v10231_v32  ;;  %1463 = vst [vmem:[#allocation5 + $0x188] sm:$0xf] %v1421_v19  ;;  %v1490_v25 = vor.u32 %v1489_v20, %v1485_v8  ;;  %1693 = vst [vmem:[#allocation5 + $0x1c0] sm:$0xf0] %v1677_v22  ;;  %v505_v30 = vld [vmem:[#allocation12 + $0xc] sm:$0x1] }
 0x11d   :  { %9770 = vmatprep.subr.bf16.mxu1 %v10234_v37  ;;  %v1635_v26 = vshrl.u32 %v9118_v21, 16  ;;  %v1637_v27 = vshll.u32 %v9118_v21, 16  ;;  %v1570_v29 = vrot.slane %v1568_v24, 1  ;;  %v573_v31 = vld [vmem:[#allocation12 + $0x18] sm:$0xf]  ;;  %v10247_v32 = vld [vmem:[#allocation15 + $0xa8] sm:$0xff]   ;;  %v9059_v35 = vcombine.low %v504_v28, %v505_v30 }
 0x11e   :  { %564 = vst [vmem:[#allocation5 + $0x10] sm:$0xf] %v504_v28  ;;  %v1528_v33 = vrot.slane %v1490_v25, 4  ;;  %v574_v36 = vld [vmem:[#allocation12 + $0x1c] sm:$0x1]  ;;  %v629_v37 = vrot.slane %v573_v31, 4 }
 0x11f   :  { %2318 = vmatmul.mubr.bf16.gmra.mrb[4].mxu1 %v1709_v42  ;;  %v1639_v34 = vrot.slane %v1637_v27, 1  ;;  %v1571_v39 = vor.u32 %v1570_v29, %v1566_v23  ;;  %v9063_v40 = vcombine.low %v573_v31, %v574_v36  ;;  %v529_v42 = vshrl.u32 %v9059_v35, 16  ;;  %v654_v46 = vld [vmem:[#allocation12 + $0x28] sm:$0xf]  ;;  %v655_v51 = vld [vmem:[#allocation12 + $0x2c] sm:$0x1] }
 0x120   :  { %2325 = vmatprep.mubr.bf16.mxu1 %v1718_v54  ;;  %9771 = vmatpush3.bf16.msra.mxu1 %v10235_v43  ;;  %1544 = vst [vmem:[#allocation5 + $0x188] sm:$0xf0] %v1528_v33  ;;  %v531_v43 = vshll.u32 %v9059_v35, 16  ;;  %645 = vst [vmem:[#allocation5 + $0x10] sm:$0xf0] %v629_v37  ;;  %v1725_v47 = vld [vmem:[#allocation5 + $0xc0] sm:$0xff]  ;;  %v9067_v54 = vcombine.low %v654_v46, %v655_v51 }
 0x121   :  { %9772 = vmatprep.subr.bf16.mxu1 %v10238_v55  ;;  %v1640_v41 = vor.u32 %v1639_v34, %v1635_v26  ;;  %1613 = vst [vmem:[#allocation5 + $0x1c8] sm:$0xf] %v1571_v39  ;;  %v597_v44 = vshrl.u32 %v9063_v40, 16  ;;  %v599_v45 = vshll.u32 %v9063_v40, 16  ;;  %714 = vst [vmem:[#allocation5 + $0x50] sm:$0xf] %v654_v46 }
 0x122   :  { %v533_v50 = vrot.slane %v531_v43, 1  ;;  %v10254_v52 = vld [vmem:[#allocation15 + $0xf8] sm:$0xff]   ;;  %v1734_v57 = vld [vmem:[#allocation5 + $0x108] sm:$0xff]  ;;  %v679_v62 = vshrl.u32 %v9067_v54, 16  ;;  %v804_v2 = vld [vmem:[#allocation12 + $0x48] sm:$0xf] }
 0x123   :  { %v1678_v49 = vrot.slane %v1640_v41, 4  ;;  %v601_v53 = vrot.slane %v599_v45, 1  ;;  %v723_v55 = vld [vmem:[#allocation12 + $0x38] sm:$0xf]  ;;  %v724_v56 = vld [vmem:[#allocation12 + $0x3c] sm:$0x1] }
 0x124   :  { %9773 = vmatpush3.bf16.msra.mxu1 %v10239_v63  ;;  %v534_v58 = vor.u32 %v533_v50, %v529_v42  ;;  %v9071_v59 = vcombine.low %v723_v55, %v724_v56  ;;  %v779_v60 = vrot.slane %v723_v55, 4  ;;  %v681_v63 = vshll.u32 %v9067_v54, 16  ;;  %v805_v3 = vld [vmem:[#allocation12 + $0x4c] sm:$0x1]  ;;  %v10255_v4 = vld [vmem:[#allocation15 + $0xb8] sm:$0xff]   ;;  %v1742_v24 = vld [vmem:[#allocation5 + $0x148] sm:$0xff] }
 0x125   :  { %9774 = vmatprep.subr.bf16.mxu1 %v10242_v6  ;;  %1694 = vst [vmem:[#allocation5 + $0x1c8] sm:$0xf0] %v1678_v49  ;;  %v602_v61 = vor.u32 %v601_v53, %v597_v44  ;;  %v10258_v6 = vld [vmem:[#allocation15 + $0x140] sm:$0xff]   ;;  %v9075_v8 = vcombine.low %v804_v2, %v805_v3  ;;  %v873_v9 = vld [vmem:[#allocation12 + $0x58] sm:$0xf]  ;;  %v1733_v19 = vld [vmem:[#allocation5 + $0x100] sm:$0xff] }
 0x126   :  { %565 = vst [vmem:[#allocation5 + $0x18] sm:$0xf] %v534_v58  ;;  %v747_v0 = vshrl.u32 %v9071_v59, 16  ;;  %v749_v1 = vshll.u32 %v9071_v59, 16  ;;  %795 = vst [vmem:[#allocation5 + $0x50] sm:$0xf0] %v779_v60 }
 0x127   :  { %2326 = vmatmul.mubr.bf16.gmra.mrb[8].mxu1 %v1717_v11  ;;  %v630_v5 = vrot.slane %v602_v61, 4  ;;  %v683_v7 = vrot.slane %v681_v63, 1  ;;  %864 = vst [vmem:[#allocation5 + $0x90] sm:$0xf] %v804_v2  ;;  %v874_v11 = vld [vmem:[#allocation12 + $0x5c] sm:$0x1] }
 0x128   :  { %2333 = vmatprep.mubr.bf16.mxu1 %v1726_v17  ;;  %9775 = vmatpush3.bf16.msra.mxu1 %v10243_v12  ;;  %v751_v10 = vrot.slane %v749_v1, 1  ;;  %v929_v12 = vrot.slane %v873_v9, 4  ;;  %v829_v14 = vshrl.u32 %v9075_v8, 16  ;;  %v831_v15 = vshll.u32 %v9075_v8, 16  ;;  %v955_v23 = vld [vmem:[#allocation12 + $0x6c] sm:$0x1] }
 0x129   :  { %9776 = vmatprep.subr.bf16.mxu1 %v10246_v18  ;;  %646 = vst [vmem:[#allocation5 + $0x18] sm:$0xf0] %v630_v5  ;;  %v684_v13 = vor.u32 %v683_v7, %v679_v62  ;;  %v9079_v16 = vcombine.low %v873_v9, %v874_v11  ;;  %v954_v18 = vld [vmem:[#allocation12 + $0x68] sm:$0xf]  ;;  %v1023_v27 = vld [vmem:[#allocation12 + $0x78] sm:$0xf] }
 0x12a   :  { %v752_v17 = vor.u32 %v751_v10, %v747_v0  ;;  %945 = vst [vmem:[#allocation5 + $0x90] sm:$0xf0] %v929_v12  ;;  %v833_v20 = vrot.slane %v831_v15, 1  ;;  %1014 = vst [vmem:[#allocation5 + $0xd0] sm:$0xf] %v954_v18  ;;  %v9083_v26 = vcombine.low %v954_v18, %v955_v23  ;;  %v1750_v53 = vld [vmem:[#allocation5 + $0x188] sm:$0xff] }
 0x12b   :  { %715 = vst [vmem:[#allocation5 + $0x58] sm:$0xf] %v684_v13  ;;  %v897_v21 = vshrl.u32 %v9079_v16, 16  ;;  %v899_v22 = vshll.u32 %v9079_v16, 16  ;;  %v1024_v28 = vld [vmem:[#allocation12 + $0x7c] sm:$0x1] }
 0x12c   :  { %9777 = vmatpush3.bf16.msra.mxu1 %v10247_v32  ;;  %v780_v25 = vrot.slane %v752_v17, 4  ;;  %v834_v29 = vor.u32 %v833_v20, %v829_v14  ;;  %v9087_v31 = vcombine.low %v1023_v27, %v1024_v28  ;;  %v1079_v32 = vrot.slane %v1023_v27, 4  ;;  %v1105_v40 = vld [vmem:[#allocation12 + $0x9c] sm:$0x1]  ;;  %v1173_v41 = vld [vmem:[#allocation12 + $0xa8] sm:$0xf] }
 0x12d   :  { %9778 = vmatprep.subr.bf16.mxu1 %v10250_v38  ;;  %v901_v30 = vrot.slane %v899_v22, 1  ;;  %v979_v33 = vshrl.u32 %v9083_v26, 16  ;;  %v981_v34 = vshll.u32 %v9083_v26, 16  ;;  %v1104_v38 = vld [vmem:[#allocation12 + $0x98] sm:$0xf]  ;;  %v1229_v46 = vrot.slane %v1173_v41, 4 }
 0x12e   :  { %796 = vst [vmem:[#allocation5 + $0x58] sm:$0xf0] %v780_v25  ;;  %865 = vst [vmem:[#allocation5 + $0x98] sm:$0xf] %v834_v29  ;;  %v1047_v36 = vshrl.u32 %v9087_v31, 16  ;;  %v1049_v37 = vshll.u32 %v9087_v31, 16  ;;  %v9091_v44 = vcombine.low %v1104_v38, %v1105_v40 }
 0x12f   :  { %2334 = vmatmul.mubr.bf16.gmra.mrb[12].mxu1 %v1725_v47  ;;  %v902_v35 = vor.u32 %v901_v30, %v897_v21  ;;  %1095 = vst [vmem:[#allocation5 + $0xd0] sm:$0xf0] %v1079_v32  ;;  %v983_v39 = vrot.slane %v981_v34, 1  ;;  %1164 = vst [vmem:[#allocation5 + $0x110] sm:$0xf] %v1104_v38  ;;  %v1741_v47 = vld [vmem:[#allocation5 + $0x140] sm:$0xff] }
 0x130   :  { %2341 = vmatprep.mubr.bf16.mxu1 %v1734_v57  ;;  %9779 = vmatpush3.bf16.msra.mxu1 %v10251_v48  ;;  %v1051_v43 = vrot.slane %v1049_v37, 1  ;;  %v1174_v45 = vld [vmem:[#allocation12 + $0xac] sm:$0x1]  ;;  %v1129_v51 = vshrl.u32 %v9091_v44, 16  ;;  %1245 = vst [vmem:[#allocation5 + $0x110] sm:$0xf0] %v1229_v46 }
 0x131   :  { %9780 = vmatprep.subr.bf16.mxu1 %v10254_v52  ;;  %v930_v42 = vrot.slane %v902_v35, 4  ;;  %v984_v48 = vor.u32 %v983_v39, %v979_v33  ;;  %v9095_v49 = vcombine.low %v1173_v41, %v1174_v45  ;;  %v1131_v52 = vshll.u32 %v9091_v44, 16  ;;  %v1254_v56 = vld [vmem:[#allocation12 + $0xb8] sm:$0xf]  ;;  %v1255_v59 = vld [vmem:[#allocation12 + $0xbc] sm:$0x1] }
 0x132   :  { %v1052_v50 = vor.u32 %v1051_v43, %v1047_v36  ;;  %1314 = vst [vmem:[#allocation5 + $0x150] sm:$0xf] %v1254_v56  ;;  %v9099_v61 = vcombine.low %v1254_v56, %v1255_v59  ;;  %v1323_v62 = vld [vmem:[#allocation12 + $0xc8] sm:$0xf]  ;;  %v1324_v63 = vld [vmem:[#allocation12 + $0xcc] sm:$0x1] }
 0x133   :  { %946 = vst [vmem:[#allocation5 + $0x98] sm:$0xf0] %v930_v42  ;;  %1015 = vst [vmem:[#allocation5 + $0xd8] sm:$0xf] %v984_v48  ;;  %v1197_v54 = vshrl.u32 %v9095_v49, 16  ;;  %v1199_v55 = vshll.u32 %v9095_v49, 16  ;;  %v9103_v1 = vcombine.low %v1323_v62, %v1324_v63 }
 0x134   :  { %9781 = vmatpush3.bf16.msra.mxu1 %v10255_v4  ;;  %v1080_v57 = vrot.slane %v1052_v50, 4  ;;  %v1133_v58 = vrot.slane %v1131_v52, 1  ;;  %v1379_v2 = vrot.slane %v1323_v62, 4  ;;  %v1279_v4 = vshrl.u32 %v9099_v61, 16  ;;  %v1404_v8 = vld [vmem:[#allocation12 + $0xd8] sm:$0xf] }
 0x135   :  { %9830 = vmatprep.subr.bf16.mxu1 %v10258_v6  ;;  %v1201_v60 = vrot.slane %v1199_v55, 1  ;;  %v1281_v5 = vshll.u32 %v9099_v61, 16  ;;  %v1347_v6 = vshrl.u32 %v9103_v1, 16  ;;  %v1349_v7 = vshll.u32 %v9103_v1, 16  ;;  %v1405_v9 = vld [vmem:[#allocation12 + $0xdc] sm:$0x1] }
 0x136   :  { %1096 = vst [vmem:[#allocation5 + $0xd8] sm:$0xf0] %v1080_v57  ;;  %v1134_v0 = vor.u32 %v1133_v58, %v1129_v51  ;;  %1395 = vst [vmem:[#allocation5 + $0x150] sm:$0xf0] %v1379_v2  ;;  %v1749_v10 = vld [vmem:[#allocation5 + $0x180] sm:$0xff]  ;;  %v1758_v11 = vld [vmem:[#allocation5 + $0x1c8] sm:$0xff]  ;;  %v9107_v14 = vcombine.low %v1404_v8, %v1405_v9 }
 0x137   :  { %2342 = vmatmul.mubr.bf16.gmra.mrb[16].mxu1 %v1733_v19  ;;  %v1202_v3 = vor.u32 %v1201_v60, %v1197_v54  ;;  %v1283_v13 = vrot.slane %v1281_v5, 1  ;;  %v1473_v15 = vld [vmem:[#allocation12 + $0xe8] sm:$0xf]  ;;  %1464 = vst [vmem:[#allocation5 + $0x190] sm:$0xf] %v1404_v8  ;;  %v1351_v16 = vrot.slane %v1349_v7, 1 }
 0x138   :  { %2349 = vmatprep.mubr.bf16.mxu1 %v1742_v24  ;;  %1165 = vst [vmem:[#allocation5 + $0x118] sm:$0xf] %v1134_v0  ;;  %v1474_v17 = vld [vmem:[#allocation12 + $0xec] sm:$0x1]  ;;  %v1529_v18 = vrot.slane %v1473_v15, 4  ;;  %v1429_v20 = vshrl.u32 %v9107_v14, 16 }
 0x139   :  { %v1230_v12 = vrot.slane %v1202_v3, 4  ;;  %v1284_v19 = vor.u32 %v1283_v13, %v1279_v4  ;;  %v1431_v21 = vshll.u32 %v9107_v14, 16  ;;  %v9111_v22 = vcombine.low %v1473_v15, %v1474_v17  ;;  %v1554_v24 = vld [vmem:[#allocation12 + $0xf8] sm:$0xf]  ;;  %v1555_v28 = vld [vmem:[#allocation12 + $0xfc] sm:$0x1] }
 0x13a   :  { %v1352_v23 = vor.u32 %v1351_v16, %v1347_v6  ;;  %1545 = vst [vmem:[#allocation5 + $0x190] sm:$0xf0] %v1529_v18  ;;  %1614 = vst [vmem:[#allocation5 + $0x1d0] sm:$0xf] %v1554_v24  ;;  %v9115_v30 = vcombine.low %v1554_v24, %v1555_v28  ;;  %v1623_v31 = vld [vmem:[#allocation12 + $0x108] sm:$0xf] }
 0x13b   :  { %1246 = vst [vmem:[#allocation5 + $0x118] sm:$0xf0] %v1230_v12  ;;  %1315 = vst [vmem:[#allocation5 + $0x158] sm:$0xf] %v1284_v19  ;;  %v1433_v25 = vrot.slane %v1431_v21, 1  ;;  %v1497_v26 = vshrl.u32 %v9111_v22, 16 }
 0x13c   :  { %v1499_v27 = vshll.u32 %v9111_v22, 16  ;;  %v1380_v29 = vrot.slane %v1352_v23, 4  ;;  %v1624_v32 = vld [vmem:[#allocation12 + $0x10c] sm:$0x1]  ;;  %v1679_v36 = vrot.slane %v1623_v31, 4  ;;  %v1579_v37 = vshrl.u32 %v9115_v30, 16 }
 0x13d   :  { %v1434_v33 = vor.u32 %v1433_v25, %v1429_v20  ;;  %v9119_v35 = vcombine.low %v1623_v31, %v1624_v32  ;;  %v1581_v38 = vshll.u32 %v9115_v30, 16  ;;  %v506_v42 = vld [vmem:[#allocation12 + $0x10] sm:$0xf]  ;;  %v1757_v43 = vld [vmem:[#allocation5 + $0x1c0] sm:$0xff]  ;;  %v507_v45 = vld [vmem:[#allocation12 + $0x14] sm:$0x1] }
 0x13e   :  { %v1501_v34 = vrot.slane %v1499_v27, 1  ;;  %1396 = vst [vmem:[#allocation5 + $0x158] sm:$0xf0] %v1380_v29  ;;  %1695 = vst [vmem:[#allocation5 + $0x1d0] sm:$0xf0] %v1679_v36  ;;  %v9060_v50 = vcombine.low %v506_v42, %v507_v45  ;;  %v1703_v0 = vld [vmem:[#allocation5 + $0x10] sm:$0xff] }
 0x13f   :  { %2350 = vmatmul.mubr.bf16.gmra.mrb[20].mxu1 %v1741_v47  ;;  %1465 = vst [vmem:[#allocation5 + $0x198] sm:$0xf] %v1434_v33  ;;  %v1647_v40 = vshrl.u32 %v9119_v35, 16  ;;  %v1649_v41 = vshll.u32 %v9119_v35, 16  ;;  %v1583_v44 = vrot.slane %v1581_v38, 1  ;;  %v1704_v47 = vld [vmem:[#allocation5 + $0x18] sm:$0xff] }
 0x140   :  { %2357 = vmatprep.mubr.bf16.mxu1 %v1750_v53  ;;  %v1502_v39 = vor.u32 %v1501_v34, %v1497_v26  ;;  %v575_v46 = vld [vmem:[#allocation12 + $0x20] sm:$0xf]  ;;  %566 = vst [vmem:[#allocation5 + $0x20] sm:$0xf] %v506_v42  ;;  %v576_v51 = vld [vmem:[#allocation12 + $0x24] sm:$0x1] }
 0x141   :  { %v1651_v49 = vrot.slane %v1649_v41, 1  ;;  %v631_v52 = vrot.slane %v575_v46, 4  ;;  %v1584_v53 = vor.u32 %v1583_v44, %v1579_v37  ;;  %v9064_v54 = vcombine.low %v575_v46, %v576_v51  ;;  %v656_v60 = vld [vmem:[#allocation12 + $0x30] sm:$0xf]  ;;  %v657_v63 = vld [vmem:[#allocation12 + $0x34] sm:$0x1] }
 0x142   :  { %v1530_v48 = vrot.slane %v1502_v39, 4  ;;  %v542_v56 = vshrl.u32 %v9060_v50, 16  ;;  %v544_v57 = vshll.u32 %v9060_v50, 16  ;;  %716 = vst [vmem:[#allocation5 + $0x60] sm:$0xf] %v656_v60  ;;  %v10259_v1 = vld [vmem:[#allocation15 + $0x100] sm:$0xff]   ;;  %v9068_v3 = vcombine.low %v656_v60, %v657_v63 }
 0x143   :  { %v1652_v55 = vor.u32 %v1651_v49, %v1647_v40  ;;  %647 = vst [vmem:[#allocation5 + $0x20] sm:$0xf0] %v631_v52  ;;  %1615 = vst [vmem:[#allocation5 + $0x1d8] sm:$0xf] %v1584_v53  ;;  %v609_v58 = vshrl.u32 %v9064_v54, 16  ;;  %v611_v59 = vshll.u32 %v9064_v54, 16 }
 0x144   :  { %1546 = vst [vmem:[#allocation5 + $0x198] sm:$0xf0] %v1530_v48  ;;  %v546_v62 = vrot.slane %v544_v57, 1  ;;  %v725_v4 = vld [vmem:[#allocation12 + $0x40] sm:$0xf]  ;;  %v10262_v7 = vld [vmem:[#allocation15 + $0x148] sm:$0xff]  }
 0x145   :  { %v1680_v61 = vrot.slane %v1652_v55, 4  ;;  %v613_v2 = vrot.slane %v611_v59, 1  ;;  %v726_v5 = vld [vmem:[#allocation12 + $0x44] sm:$0x1]  ;;  %v692_v12 = vshrl.u32 %v9068_v3, 16  ;;  %v694_v13 = vshll.u32 %v9068_v3, 16 }
 0x146   :  { %v1712_v6 = vld [vmem:[#allocation5 + $0x58] sm:$0xff]  ;;  %v547_v8 = vor.u32 %v546_v62, %v542_v56  ;;  %v9072_v9 = vcombine.low %v725_v4, %v726_v5  ;;  %v806_v16 = vld [vmem:[#allocation12 + $0x50] sm:$0xf]  ;;  %v807_v17 = vld [vmem:[#allocation12 + $0x54] sm:$0x1] }
 0x147   :  { %2358 = vmatmul.mubr.bf16.gmra.mrb[24].mxu1 %v1749_v10  ;;  %1696 = vst [vmem:[#allocation5 + $0x1d8] sm:$0xf0] %v1680_v61  ;;  %v781_v10 = vrot.slane %v725_v4, 4  ;;  %v10263_v18 = vld [vmem:[#allocation15 + $0x108] sm:$0xff]   ;;  %v696_v20 = vrot.slane %v694_v13, 1  ;;  %v9076_v21 = vcombine.low %v806_v16, %v807_v17  ;;  %v10266_v30 = vld [vmem:[#allocation15 + $0x150] sm:$0xff]  }
 0x148   :  { %2365 = vmatprep.mubr.bf16.mxu1 %v1758_v11  ;;  %v614_v11 = vor.u32 %v613_v2, %v609_v58  ;;  %567 = vst [vmem:[#allocation5 + $0x28] sm:$0xf] %v547_v8  ;;  %v759_v14 = vshrl.u32 %v9072_v9, 16  ;;  %v761_v15 = vshll.u32 %v9072_v9, 16  ;;  %v875_v22 = vld [vmem:[#allocation12 + $0x60] sm:$0xf] }
 0x149   :  { %797 = vst [vmem:[#allocation5 + $0x60] sm:$0xf0] %v781_v10  ;;  %866 = vst [vmem:[#allocation5 + $0xa0] sm:$0xf] %v806_v16  ;;  %v876_v24 = vld [vmem:[#allocation12 + $0x64] sm:$0x1]  ;;  %v697_v26 = vor.u32 %v696_v20, %v692_v12 }
 0x14a   :  { %v632_v19 = vrot.slane %v614_v11, 4  ;;  %v763_v23 = vrot.slane %v761_v15, 1  ;;  %v931_v25 = vrot.slane %v875_v22, 4  ;;  %v842_v27 = vshrl.u32 %v9076_v21, 16  ;;  %v956_v32 = vld [vmem:[#allocation12 + $0x70] sm:$0xf] }
 0x14b   :  { %v844_v28 = vshll.u32 %v9076_v21, 16  ;;  %v9080_v29 = vcombine.low %v875_v22, %v876_v24  ;;  %v10267_v33 = vld [vmem:[#allocation15 + $0x110] sm:$0xff]   ;;  %717 = vst [vmem:[#allocation5 + $0x68] sm:$0xf] %v697_v26  ;;  %1016 = vst [vmem:[#allocation5 + $0xe0] sm:$0xf] %v956_v32 }
 0x14c   :  { %648 = vst [vmem:[#allocation5 + $0x28] sm:$0xf0] %v632_v19  ;;  %v764_v31 = vor.u32 %v763_v23, %v759_v14  ;;  %947 = vst [vmem:[#allocation5 + $0xa0] sm:$0xf0] %v931_v25  ;;  %v957_v37 = vld [vmem:[#allocation12 + $0x74] sm:$0x1] }
 0x14d   :  { %v846_v34 = vrot.slane %v844_v28, 1  ;;  %v909_v35 = vshrl.u32 %v9080_v29, 16  ;;  %v911_v36 = vshll.u32 %v9080_v29, 16  ;;  %v10270_v38 = vld [vmem:[#allocation15 + $0x158] sm:$0xff]   ;;  %v9084_v40 = vcombine.low %v956_v32, %v957_v37  ;;  %v1025_v41 = vld [vmem:[#allocation12 + $0x80] sm:$0xf] }
 0x14e   :  { %v782_v39 = vrot.slane %v764_v31, 4  ;;  %v1026_v42 = vld [vmem:[#allocation12 + $0x84] sm:$0x1]  ;;  %v1081_v48 = vrot.slane %v1025_v41, 4  ;;  %v1106_v54 = vld [vmem:[#allocation12 + $0xa0] sm:$0xf] }
 0x14f   :  { %2366 = vmatmul.mubr.bf16.gmra.mrb[28].mxu1 %v1757_v43  ;;  %v1711_v43 = vld [vmem:[#allocation5 + $0x50] sm:$0xff]  ;;  %v1720_v44 = vld [vmem:[#allocation5 + $0x98] sm:$0xff]  ;;  %v847_v45 = vor.u32 %v846_v34, %v842_v27  ;;  %v913_v46 = vrot.slane %v911_v36, 1  ;;  %v992_v49 = vshrl.u32 %v9084_v40, 16  ;;  %v994_v50 = vshll.u32 %v9084_v40, 16  ;;  %v10278_v11 = vld [vmem:[#allocation15 + $0x168] sm:$0xff]  }
 0x150   :  { %2406 = vmatprep.mubr.bf16.mxu1 %v1704_v47  ;;  %v9088_v47 = vcombine.low %v1025_v41, %v1026_v42  ;;  %798 = vst [vmem:[#allocation5 + $0x68] sm:$0xf0] %v782_v39  ;;  %1097 = vst [vmem:[#allocation5 + $0xe0] sm:$0xf0] %v1081_v48  ;;  %v1107_v56 = vld [vmem:[#allocation12 + $0xa4] sm:$0x1] }
 0x151   :  { %867 = vst [vmem:[#allocation5 + $0xa8] sm:$0xf] %v847_v45  ;;  %v914_v51 = vor.u32 %v913_v46, %v909_v35  ;;  %v996_v55 = vrot.slane %v994_v50, 1  ;;  %v1175_v57 = vld [vmem:[#allocation12 + $0xb0] sm:$0xf]  ;;  %v10271_v58 = vld [vmem:[#allocation15 + $0x118] sm:$0xff]   ;;  %v9092_v61 = vcombine.low %v1106_v54, %v1107_v56 }
 0x152   :  { %v1059_v52 = vshrl.u32 %v9088_v47, 16  ;;  %v1061_v53 = vshll.u32 %v9088_v47, 16  ;;  %1166 = vst [vmem:[#allocation5 + $0x120] sm:$0xf] %v1106_v54  ;;  %v1176_v62 = vld [vmem:[#allocation12 + $0xb4] sm:$0x1] }
 0x153   :  { %v932_v59 = vrot.slane %v914_v51, 4  ;;  %v1231_v63 = vrot.slane %v1175_v57, 4  ;;  %v9096_v2 = vcombine.low %v1175_v57, %v1176_v62  ;;  %v1142_v4 = vshrl.u32 %v9092_v61, 16  ;;  %v1256_v9 = vld [vmem:[#allocation12 + $0xc0] sm:$0xf]  ;;  %v10279_v20 = vld [vmem:[#allocation15 + $0x128] sm:$0xff]  }
 0x154   :  { %v1063_v60 = vrot.slane %v1061_v53, 1  ;;  %v1144_v5 = vshll.u32 %v9092_v61, 16  ;;  %v10275_v10 = vld [vmem:[#allocation15 + $0x120] sm:$0xff]   ;;  %1316 = vst [vmem:[#allocation5 + $0x160] sm:$0xf] %v1256_v9  ;;  %v10282_v31 = vld [vmem:[#allocation15 + $0x170] sm:$0xff]  }
 0x155   :  { %948 = vst [vmem:[#allocation5 + $0xa8] sm:$0xf0] %v932_v59  ;;  %1247 = vst [vmem:[#allocation5 + $0x120] sm:$0xf0] %v1231_v63  ;;  %v1211_v8 = vshll.u32 %v9096_v2, 16  ;;  %v1728_v15 = vld [vmem:[#allocation5 + $0xd8] sm:$0xff] }
 0x156   :  { %v1064_v3 = vor.u32 %v1063_v60, %v1059_v52  ;;  %v1146_v13 = vrot.slane %v1144_v5, 1  ;;  %v1257_v14 = vld [vmem:[#allocation12 + $0xc4] sm:$0x1]  ;;  %v1326_v19 = vld [vmem:[#allocation12 + $0xd4] sm:$0x1]  ;;  %v1727_v36 = vld [vmem:[#allocation5 + $0xd0] sm:$0xff] }
 0x157   :  { %2407 = vmatmul.mubr.bf16.vlgmr.msra.gmra.mrb[32].mxu1 %v1703_v0  ;;  %v10274_v0 = vld [vmem:[#allocation15 + $0x160] sm:$0xff]   ;;  %v1213_v16 = vrot.slane %v1211_v8, 1  ;;  %v9100_v17 = vcombine.low %v1256_v9, %v1257_v14  ;;  %v1475_v35 = vld [vmem:[#allocation12 + $0xf0] sm:$0xf]  ;;  %v1476_v39 = vld [vmem:[#allocation12 + $0xf4] sm:$0x1] }
 0x158   :  { %9831 = vmatpush3.bf16.msra.mxu1 %v10259_v1  ;;  %2414 = vmatprep.mubr.bf16.mxu1 %v1712_v6  ;;  %v997_v1 = vor.u32 %v996_v55, %v992_v49  ;;  %v1719_v6 = vld [vmem:[#allocation5 + $0x90] sm:$0xff]  ;;  %v1082_v12 = vrot.slane %v1064_v3, 4  ;;  %v1147_v21 = vor.u32 %v1146_v13, %v1142_v4  ;;  %v1406_v29 = vld [vmem:[#allocation12 + $0xe0] sm:$0xf]  ;;  %v10283_v37 = vld [vmem:[#allocation15 + $0x130] sm:$0xff]   ;;  %v1531_v40 = vrot.slane %v1475_v35, 4 }
 0x159   :  { %9832 = vmatprep.subr.bf16.mxu1 %v10262_v7  ;;  %v1209_v7 = vshrl.u32 %v9096_v2, 16  ;;  %v1292_v25 = vshrl.u32 %v9100_v17, 16  ;;  %v1294_v26 = vshll.u32 %v9100_v17, 16  ;;  %1466 = vst [vmem:[#allocation5 + $0x1a0] sm:$0xf] %v1406_v29  ;;  %v10286_v45 = vld [vmem:[#allocation15 + $0x178] sm:$0xff]  }
 0x15a   :  { %1017 = vst [vmem:[#allocation5 + $0xe8] sm:$0xf] %v997_v1  ;;  %1098 = vst [vmem:[#allocation5 + $0xe8] sm:$0xf0] %v1082_v12  ;;  %v1556_v47 = vld [vmem:[#allocation12 + $0x100] sm:$0xf] }
 0x15b   :  { %v1214_v24 = vor.u32 %v1213_v16, %v1209_v7  ;;  %1167 = vst [vmem:[#allocation5 + $0x128] sm:$0xf] %v1147_v21  ;;  %1547 = vst [vmem:[#allocation5 + $0x1a0] sm:$0xf0] %v1531_v40  ;;  %v1736_v48 = vld [vmem:[#allocation5 + $0x118] sm:$0xff]  ;;  %v10287_v57 = vld [vmem:[#allocation15 + $0x138] sm:$0xff]  }
 0x15c   :  { %9833 = vmatpush3.bf16.msra.mxu1 %v10263_v18  ;;  %v1325_v18 = vld [vmem:[#allocation12 + $0xd0] sm:$0xf]  ;;  %v1557_v52 = vld [vmem:[#allocation12 + $0x104] sm:$0x1]  ;;  %1616 = vst [vmem:[#allocation5 + $0x1e0] sm:$0xf] %v1556_v47 }
 0x15d   :  { %9834 = vmatprep.subr.bf16.mxu1 %v10266_v30  ;;  %v9104_v22 = vcombine.low %v1325_v18, %v1326_v19  ;;  %v1381_v23 = vrot.slane %v1325_v18, 4  ;;  %v1407_v30 = vld [vmem:[#allocation12 + $0xe4] sm:$0x1]  ;;  %v1232_v32 = vrot.slane %v1214_v24, 4  ;;  %v9116_v54 = vcombine.low %v1556_v47, %v1557_v52  ;;  %v1625_v55 = vld [vmem:[#allocation12 + $0x110] sm:$0xf] }
 0x15e   :  { %v9108_v34 = vcombine.low %v1406_v29, %v1407_v30  ;;  %v1626_v56 = vld [vmem:[#allocation12 + $0x114] sm:$0x1]  ;;  %v1681_v62 = vrot.slane %v1625_v55, 4  ;;  %v508_v4 = vld [vmem:[#allocation12 + $0x18] sm:$0xf]  ;;  %v1744_v9 = vld [vmem:[#allocation5 + $0x158] sm:$0xff] }
 0x15f   :  { %2415 = vmatmul.mubr.bf16.gmra.mrb[36].mxu1 %v1711_v43  ;;  %v1359_v27 = vshrl.u32 %v9104_v22, 16  ;;  %v1361_v28 = vshll.u32 %v9104_v22, 16  ;;  %1397 = vst [vmem:[#allocation5 + $0x160] sm:$0xf0] %v1381_v23  ;;  %1248 = vst [vmem:[#allocation5 + $0x128] sm:$0xf0] %v1232_v32  ;;  %v9120_v61 = vcombine.low %v1625_v55, %v1626_v56 }
 0x160   :  { %2422 = vmatprep.mubr.bf16.mxu1 %v1720_v44  ;;  %9835 = vmatpush3.bf16.msra.mxu1 %v10267_v33  ;;  %v1296_v33 = vrot.slane %v1294_v26, 1  ;;  %v1442_v42 = vshrl.u32 %v9108_v34, 16  ;;  %v1444_v43 = vshll.u32 %v9108_v34, 16  ;;  %v9112_v44 = vcombine.low %v1475_v35, %v1476_v39  ;;  %1697 = vst [vmem:[#allocation5 + $0x1e0] sm:$0xf0] %v1681_v62  ;;  %v1735_v5 = vld [vmem:[#allocation5 + $0x110] sm:$0xff] }
 0x161   :  { %9836 = vmatprep.subr.bf16.mxu1 %v10270_v38  ;;  %v1363_v38 = vrot.slane %v1361_v28, 1  ;;  %v1592_v63 = vshrl.u32 %v9116_v54, 16  ;;  %v1659_v2 = vshrl.u32 %v9120_v61, 16  ;;  %v1661_v3 = vshll.u32 %v9120_v61, 16  ;;  %v509_v7 = vld [vmem:[#allocation12 + $0x1c] sm:$0x1] }
 0x162   :  { %v1297_v41 = vor.u32 %v1296_v33, %v1292_v25  ;;  %v1446_v49 = vrot.slane %v1444_v43, 1  ;;  %v1509_v50 = vshrl.u32 %v9112_v44, 16  ;;  %v1511_v51 = vshll.u32 %v9112_v44, 16  ;;  %v577_v8 = vld [vmem:[#allocation12 + $0x28] sm:$0xf]  ;;  %v1743_v56 = vld [vmem:[#allocation5 + $0x150] sm:$0xff] }
 0x163   :  { %v1364_v46 = vor.u32 %v1363_v38, %v1359_v27  ;;  %568 = vst [vmem:[#allocation5 + $0x30] sm:$0xf] %v508_v4  ;;  %v9061_v12 = vcombine.low %v508_v4, %v509_v7  ;;  %v578_v13 = vld [vmem:[#allocation12 + $0x2c] sm:$0x1]  ;;  %v633_v14 = vrot.slane %v577_v8, 4 }
 0x164   :  { %9837 = vmatpush3.bf16.msra.mxu1 %v10271_v58  ;;  %1317 = vst [vmem:[#allocation5 + $0x168] sm:$0xf] %v1297_v41  ;;  %v10290_v58 = vld [vmem:[#allocation15 + $0x1c0] sm:$0xff]   ;;  %v1447_v59 = vor.u32 %v1446_v49, %v1442_v42  ;;  %v1513_v60 = vrot.slane %v1511_v51, 1  ;;  %v9065_v16 = vcombine.low %v577_v8, %v578_v13  ;;  %v658_v17 = vld [vmem:[#allocation12 + $0x38] sm:$0xf] }
 0x165   :  { %9838 = vmatprep.subr.bf16.mxu1 %v10274_v0  ;;  %v1382_v53 = vrot.slane %v1364_v46, 4  ;;  %v1594_v0 = vshll.u32 %v9116_v54, 16  ;;  %v659_v18 = vld [vmem:[#allocation12 + $0x3c] sm:$0x1]  ;;  %v727_v19 = vld [vmem:[#allocation12 + $0x48] sm:$0xf] }
 0x166   :  { %1467 = vst [vmem:[#allocation5 + $0x1a8] sm:$0xf] %v1447_v59  ;;  %v1514_v1 = vor.u32 %v1513_v60, %v1509_v50  ;;  %v555_v21 = vshrl.u32 %v9061_v12, 16  ;;  %v557_v22 = vshll.u32 %v9061_v12, 16  ;;  %649 = vst [vmem:[#allocation5 + $0x30] sm:$0xf0] %v633_v14  ;;  %v9069_v23 = vcombine.low %v658_v17, %v659_v18 }
 0x167   :  { %2423 = vmatmul.mubr.bf16.gmra.mrb[40].mxu1 %v1719_v6  ;;  %1398 = vst [vmem:[#allocation5 + $0x168] sm:$0xf0] %v1382_v53  ;;  %v1596_v6 = vrot.slane %v1594_v0, 1  ;;  %v728_v24 = vld [vmem:[#allocation12 + $0x4c] sm:$0x1]  ;;  %v621_v26 = vshrl.u32 %v9065_v16, 16 }
 0x168   :  { %2430 = vmatprep.mubr.bf16.mxu1 %v1728_v15  ;;  %9839 = vmatpush3.bf16.msra.mxu1 %v10275_v10  ;;  %v1532_v10 = vrot.slane %v1514_v1, 4  ;;  %718 = vst [vmem:[#allocation5 + $0x70] sm:$0xf] %v658_v17  ;;  %v808_v25 = vld [vmem:[#allocation12 + $0x58] sm:$0xf]  ;;  %v623_v27 = vshll.u32 %v9065_v16, 16  ;;  %v9073_v28 = vcombine.low %v727_v19, %v728_v24 }
 0x169   :  { %9840 = vmatprep.subr.bf16.mxu1 %v10278_v11  ;;  %v1663_v11 = vrot.slane %v1661_v3, 1  ;;  %v1597_v15 = vor.u32 %v1596_v6, %v1592_v63  ;;  %v783_v29 = vrot.slane %v727_v19, 4  ;;  %v809_v30 = vld [vmem:[#allocation12 + $0x5c] sm:$0x1]  ;;  %868 = vst [vmem:[#allocation5 + $0xb0] sm:$0xf] %v808_v25 }
 0x16a   :  { %1548 = vst [vmem:[#allocation5 + $0x1a8] sm:$0xf0] %v1532_v10  ;;  %v559_v32 = vrot.slane %v557_v22, 1  ;;  %v705_v33 = vshrl.u32 %v9069_v23, 16  ;;  %v707_v34 = vshll.u32 %v9069_v23, 16  ;;  %v625_v35 = vrot.slane %v623_v27, 1 }
 0x16b   :  { %1617 = vst [vmem:[#allocation5 + $0x1e8] sm:$0xf] %v1597_v15  ;;  %799 = vst [vmem:[#allocation5 + $0x70] sm:$0xf0] %v783_v29  ;;  %v9077_v38 = vcombine.low %v808_v25, %v809_v30  ;;  %v877_v39 = vld [vmem:[#allocation12 + $0x68] sm:$0xf] }
 0x16c   :  { %9841 = vmatpush3.bf16.msra.mxu1 %v10279_v20  ;;  %v1664_v20 = vor.u32 %v1663_v11, %v1659_v2  ;;  %v560_v40 = vor.u32 %v559_v32, %v555_v21  ;;  %v709_v41 = vrot.slane %v707_v34, 1  ;;  %v878_v42 = vld [vmem:[#allocation12 + $0x6c] sm:$0x1]  ;;  %v933_v43 = vrot.slane %v877_v39, 4  ;;  %v958_v44 = vld [vmem:[#allocation12 + $0x78] sm:$0xf] }
 0x16d   :  { %9842 = vmatprep.subr.bf16.mxu1 %v10282_v31  ;;  %v855_v47 = vshrl.u32 %v9077_v38, 16  ;;  %v959_v49 = vld [vmem:[#allocation12 + $0x7c] sm:$0x1]  ;;  %1018 = vst [vmem:[#allocation5 + $0xf0] sm:$0xf] %v958_v44  ;;  %v9081_v51 = vcombine.low %v877_v39, %v878_v42 }
 0x16e   :  { %v1682_v31 = vrot.slane %v1664_v20, 4  ;;  %569 = vst [vmem:[#allocation5 + $0x38] sm:$0xf] %v560_v40  ;;  %v710_v50 = vor.u32 %v709_v41, %v705_v33  ;;  %949 = vst [vmem:[#allocation5 + $0xb0] sm:$0xf0] %v933_v43  ;;  %v9085_v52 = vcombine.low %v958_v44, %v959_v49  ;;  %v1751_v24 = vld [vmem:[#allocation5 + $0x190] sm:$0xff] }
 0x16f   :  { %2431 = vmatmul.mubr.bf16.gmra.mrb[44].mxu1 %v1727_v36  ;;  %v771_v36 = vshrl.u32 %v9073_v28, 16  ;;  %v1027_v53 = vld [vmem:[#allocation12 + $0x88] sm:$0xf]  ;;  %v1028_v54 = vld [vmem:[#allocation12 + $0x8c] sm:$0x1]  ;;  %v921_v63 = vshrl.u32 %v9081_v51, 16 }
 0x170   :  { %2438 = vmatprep.mubr.bf16.mxu1 %v1736_v48  ;;  %9843 = vmatpush3.bf16.msra.mxu1 %v10283_v37  ;;  %v773_v37 = vshll.u32 %v9073_v28, 16  ;;  %1698 = vst [vmem:[#allocation5 + $0x1e8] sm:$0xf0] %v1682_v31  ;;  %v857_v48 = vshll.u32 %v9077_v38, 16  ;;  %v1108_v55 = vld [vmem:[#allocation12 + $0xa8] sm:$0xf]  ;;  %v9089_v61 = vcombine.low %v1027_v53, %v1028_v54 }
 0x171   :  { %9844 = vmatprep.subr.bf16.mxu1 %v10286_v45  ;;  %v626_v45 = vor.u32 %v625_v35, %v621_v26  ;;  %v1109_v62 = vld [vmem:[#allocation12 + $0xac] sm:$0x1]  ;;  %1168 = vst [vmem:[#allocation5 + $0x130] sm:$0xf] %v1108_v55  ;;  %719 = vst [vmem:[#allocation5 + $0x78] sm:$0xf] %v710_v50 }
 0x172   :  { %v775_v46 = vrot.slane %v773_v37, 1  ;;  %v859_v60 = vrot.slane %v857_v48, 1  ;;  %v923_v0 = vshll.u32 %v9081_v51, 16  ;;  %v1005_v1 = vshrl.u32 %v9085_v52, 16  ;;  %v1177_v3 = vld [vmem:[#allocation12 + $0xb8] sm:$0xf] }
 0x173   :  { %v1007_v2 = vshll.u32 %v9085_v52, 16  ;;  %v1071_v6 = vshrl.u32 %v9089_v61, 16  ;;  %v1073_v7 = vshll.u32 %v9089_v61, 16  ;;  %v1178_v8 = vld [vmem:[#allocation12 + $0xbc] sm:$0x1]  ;;  %v1083_v11 = vrot.slane %v1027_v53, 4 }
 0x174   :  { %9845 = vmatpush3.bf16.msra.mxu1 %v10287_v57  ;;  %v1752_v57 = vld [vmem:[#allocation5 + $0x198] sm:$0xff]  ;;  %v776_v59 = vor.u32 %v775_v46, %v771_v36  ;;  %v9093_v12 = vcombine.low %v1108_v55, %v1109_v62  ;;  %v1258_v13 = vld [vmem:[#allocation12 + $0xc8] sm:$0xf]  ;;  %v9097_v15 = vcombine.low %v1177_v3, %v1178_v8  ;;  %v1233_v16 = vrot.slane %v1177_v3, 4  ;;  %v1259_v17 = vld [vmem:[#allocation12 + $0xcc] sm:$0x1] }
 0x175   :  { %9894 = vmatprep.subr.bf16.mxu1 %v10290_v58  ;;  %v634_v58 = vrot.slane %v626_v45, 4  ;;  %v1009_v10 = vrot.slane %v1007_v2, 1  ;;  %v1075_v14 = vrot.slane %v1073_v7, 1  ;;  %1318 = vst [vmem:[#allocation5 + $0x170] sm:$0xf] %v1258_v13  ;;  %v9101_v28 = vcombine.low %v1258_v13, %v1259_v17  ;;  %v1760_v40 = vld [vmem:[#allocation5 + $0x1d8] sm:$0xff] }
 0x176   :  { %v784_v4 = vrot.slane %v776_v59, 4  ;;  %1099 = vst [vmem:[#allocation5 + $0xf0] sm:$0xf0] %v1083_v11  ;;  %v1155_v20 = vshrl.u32 %v9093_v12, 16  ;;  %v1157_v21 = vshll.u32 %v9093_v12, 16  ;;  %v1221_v26 = vshrl.u32 %v9097_v15, 16 }
 0x177   :  { %2439 = vmatmul.mubr.bf16.gmra.mrb[48].mxu1 %v1735_v5  ;;  %650 = vst [vmem:[#allocation5 + $0x38] sm:$0xf0] %v634_v58  ;;  %v860_v5 = vor.u32 %v859_v60, %v855_v47  ;;  %v1010_v19 = vor.u32 %v1009_v10, %v1005_v1  ;;  %v1327_v22 = vld [vmem:[#allocation12 + $0xd8] sm:$0xf]  ;;  %v1328_v23 = vld [vmem:[#allocation12 + $0xdc] sm:$0x1]  ;;  %v1076_v25 = vor.u32 %v1075_v14, %v1071_v6 }
 0x178   :  { %2446 = vmatprep.mubr.bf16.mxu1 %v1744_v9  ;;  %v925_v9 = vrot.slane %v923_v0, 1  ;;  %800 = vst [vmem:[#allocation5 + $0x78] sm:$0xf0] %v784_v4  ;;  %v1223_v27 = vshll.u32 %v9097_v15, 16  ;;  %1249 = vst [vmem:[#allocation5 + $0x130] sm:$0xf0] %v1233_v16  ;;  %v9105_v32 = vcombine.low %v1327_v22, %v1328_v23 }
 0x179   :  { %869 = vst [vmem:[#allocation5 + $0xb8] sm:$0xf] %v860_v5  ;;  %v1408_v29 = vld [vmem:[#allocation12 + $0xe8] sm:$0xf]  ;;  %1019 = vst [vmem:[#allocation5 + $0xf8] sm:$0xf] %v1010_v19 }
 0x17a   :  { %v926_v18 = vor.u32 %v925_v9, %v921_v63  ;;  %v1159_v31 = vrot.slane %v1157_v21, 1  ;;  %v1383_v33 = vrot.slane %v1327_v22, 4  ;;  %v1409_v34 = vld [vmem:[#allocation12 + $0xec] sm:$0x1]  ;;  %1468 = vst [vmem:[#allocation5 + $0x1b0] sm:$0xf] %v1408_v29 }
 0x17b   :  { %v1084_v35 = vrot.slane %v1076_v25, 4  ;;  %v1225_v36 = vrot.slane %v1223_v27, 1  ;;  %v1305_v37 = vshrl.u32 %v9101_v28, 16  ;;  %v1307_v38 = vshll.u32 %v9101_v28, 16  ;;  %v1477_v39 = vld [vmem:[#allocation12 + $0xf8] sm:$0xf] }
 0x17c   :  { %v934_v30 = vrot.slane %v926_v18, 4  ;;  %v1160_v41 = vor.u32 %v1159_v31, %v1155_v20  ;;  %v1371_v42 = vshrl.u32 %v9105_v32, 16  ;;  %v1373_v43 = vshll.u32 %v9105_v32, 16  ;;  %1399 = vst [vmem:[#allocation5 + $0x170] sm:$0xf0] %v1383_v33  ;;  %v1759_v8 = vld [vmem:[#allocation5 + $0x1d0] sm:$0xff] }
 0x17d   :  { %v9109_v44 = vcombine.low %v1408_v29, %v1409_v34  ;;  %v1478_v45 = vld [vmem:[#allocation12 + $0xfc] sm:$0x1]  ;;  %1100 = vst [vmem:[#allocation5 + $0xf8] sm:$0xf0] %v1084_v35  ;;  %v1226_v46 = vor.u32 %v1225_v36, %v1221_v26  ;;  %v1309_v47 = vrot.slane %v1307_v38, 1  ;;  %v1533_v49 = vrot.slane %v1477_v39, 4 }
 0x17e   :  { %950 = vst [vmem:[#allocation5 + $0xb8] sm:$0xf0] %v934_v30  ;;  %v9113_v48 = vcombine.low %v1477_v39, %v1478_v45  ;;  %v1558_v50 = vld [vmem:[#allocation12 + $0x108] sm:$0xf]  ;;  %v1559_v51 = vld [vmem:[#allocation12 + $0x10c] sm:$0x1] }
 0x17f   :  { %2447 = vmatmul.mubr.bf16.gmra.mrb[52].mxu1 %v1743_v56  ;;  %1169 = vst [vmem:[#allocation5 + $0x138] sm:$0xf] %v1160_v41  ;;  %v1375_v52 = vrot.slane %v1373_v43, 1  ;;  %v1455_v53 = vshrl.u32 %v9109_v44, 16  ;;  %v1457_v54 = vshll.u32 %v9109_v44, 16  ;;  %v9117_v55 = vcombine.low %v1558_v50, %v1559_v51  ;;  %v1706_v12 = vld [vmem:[#allocation5 + $0x28] sm:$0xff] }
 0x180   :  { %2454 = vmatprep.mubr.bf16.mxu1 %v1752_v57  ;;  %v1627_v56 = vld [vmem:[#allocation12 + $0x118] sm:$0xf]  ;;  %1618 = vst [vmem:[#allocation5 + $0x1f0] sm:$0xf] %v1558_v50  ;;  %v1234_v57 = vrot.slane %v1226_v46, 4  ;;  %v1310_v58 = vor.u32 %v1309_v47, %v1305_v37  ;;  %v1521_v59 = vshrl.u32 %v9113_v48, 16 }
 0x181   :  { %v1523_v60 = vshll.u32 %v9113_v48, 16  ;;  %1549 = vst [vmem:[#allocation5 + $0x1b0] sm:$0xf0] %v1533_v49  ;;  %v1628_v61 = vld [vmem:[#allocation12 + $0x11c] sm:$0x1]  ;;  %v1376_v62 = vor.u32 %v1375_v52, %v1371_v42  ;;  %v1459_v63 = vrot.slane %v1457_v54, 1 }
 0x182   :  { %v1605_v0 = vshrl.u32 %v9117_v55, 16  ;;  %v1607_v1 = vshll.u32 %v9117_v55, 16  ;;  %1250 = vst [vmem:[#allocation5 + $0x138] sm:$0xf0] %v1234_v57  ;;  %1319 = vst [vmem:[#allocation5 + $0x178] sm:$0xf] %v1310_v58  ;;  %v9121_v3 = vcombine.low %v1627_v56, %v1628_v61 }
 0x183   :  { %v1525_v2 = vrot.slane %v1523_v60, 1  ;;  %v1683_v4 = vrot.slane %v1627_v56, 4  ;;  %v1384_v5 = vrot.slane %v1376_v62, 4  ;;  %v1460_v6 = vor.u32 %v1459_v63, %v1455_v53  ;;  %v10291_v17 = vld [vmem:[#allocation15 + $0x180] sm:$0xff]   ;;  %v1705_v19 = vld [vmem:[#allocation5 + $0x20] sm:$0xff]  ;;  %v1714_v21 = vld [vmem:[#allocation5 + $0x68] sm:$0xff] }
 0x184   :  { %v1609_v7 = vrot.slane %v1607_v1, 1  ;;  %v1671_v10 = vshrl.u32 %v9121_v3, 16  ;;  %v1673_v11 = vshll.u32 %v9121_v3, 16  ;;  %v10294_v20 = vld [vmem:[#allocation15 + $0x1c8] sm:$0xff]   ;;  %v10298_v23 = vld [vmem:[#allocation15 + $0x1d0] sm:$0xff]   ;;  %v10302_v27 = vld [vmem:[#allocation15 + $0x1d8] sm:$0xff]  }
 0x185   :  { %v1526_v9 = vor.u32 %v1525_v2, %v1521_v59  ;;  %1699 = vst [vmem:[#allocation5 + $0x1f0] sm:$0xf0] %v1683_v4  ;;  %1400 = vst [vmem:[#allocation5 + $0x178] sm:$0xf0] %v1384_v5  ;;  %v10295_v22 = vld [vmem:[#allocation15 + $0x188] sm:$0xff]   ;;  %v10299_v25 = vld [vmem:[#allocation15 + $0x190] sm:$0xff]  }
 0x186   :  { %1469 = vst [vmem:[#allocation5 + $0x1b8] sm:$0xf] %v1460_v6  ;;  %v1610_v13 = vor.u32 %v1609_v7, %v1605_v0  ;;  %v1675_v15 = vrot.slane %v1673_v11, 1  ;;  %v1722_v26 = vld [vmem:[#allocation5 + $0xa8] sm:$0xff]  ;;  %v10303_v28 = vld [vmem:[#allocation15 + $0x198] sm:$0xff]   ;;  %v10306_v29 = vld [vmem:[#allocation15 + $0x1e0] sm:$0xff]  }
 0x187   :  { %2455 = vmatmul.mubr.bf16.gmra.mrb[56].mxu1 %v1751_v24  ;;  %v1534_v14 = vrot.slane %v1526_v9, 4  ;;  %v1713_v24 = vld [vmem:[#allocation5 + $0x60] sm:$0xff]  ;;  %v10307_v31 = vld [vmem:[#allocation15 + $0x1a0] sm:$0xff]   ;;  %v1730_v32 = vld [vmem:[#allocation5 + $0xe8] sm:$0xff] }
 0x188   :  { %2462 = vmatprep.mubr.bf16.mxu1 %v1760_v40  ;;  %1619 = vst [vmem:[#allocation5 + $0x1f8] sm:$0xf] %v1610_v13  ;;  %v1676_v16 = vor.u32 %v1675_v15, %v1671_v10  ;;  %v1721_v30 = vld [vmem:[#allocation5 + $0xa0] sm:$0xff]  ;;  %v10314_v35 = vld [vmem:[#allocation15 + $0x1f0] sm:$0xff]   ;;  %v10318_v39 = vld [vmem:[#allocation15 + $0x1f8] sm:$0xff]  }
 0x189   :  { %1550 = vst [vmem:[#allocation5 + $0x1b8] sm:$0xf0] %v1534_v14  ;;  %v10310_v33 = vld [vmem:[#allocation15 + $0x1e8] sm:$0xff]   ;;  %v10315_v37 = vld [vmem:[#allocation15 + $0x1b0] sm:$0xff]   ;;  %v10319_v40 = vld [vmem:[#allocation15 + $0x1b8] sm:$0xff]  }
 0x18a   :  { %v1684_v18 = vrot.slane %v1676_v16, 4  ;;  %v10311_v34 = vld [vmem:[#allocation15 + $0x1a8] sm:$0xff]   ;;  %v1738_v38 = vld [vmem:[#allocation5 + $0x128] sm:$0xff]  ;;  %v1708_v48 = vld [vmem:[#allocation5 + $0x38] sm:$0xff] }
 0x18b   :  { %v1729_v36 = vld [vmem:[#allocation5 + $0xe0] sm:$0xff]  ;;  %v1746_v42 = vld [vmem:[#allocation5 + $0x168] sm:$0xff]  ;;  %v1707_v49 = vld [vmem:[#allocation5 + $0x30] sm:$0xff] }
 0x18c   :  { %1700 = vst [vmem:[#allocation5 + $0x1f8] sm:$0xf0] %v1684_v18  ;;  %v1737_v41 = vld [vmem:[#allocation5 + $0x120] sm:$0xff]  ;;  %v1754_v44 = vld [vmem:[#allocation5 + $0x1a8] sm:$0xff]  ;;  %v1716_v50 = vld [vmem:[#allocation5 + $0x78] sm:$0xff] }
 0x18d   :  { %v1745_v43 = vld [vmem:[#allocation5 + $0x160] sm:$0xff]  ;;  %v1762_v46 = vld [vmem:[#allocation5 + $0x1e8] sm:$0xff]  ;;  %v1715_v51 = vld [vmem:[#allocation5 + $0x70] sm:$0xff] }
 0x18e   :  { %v1753_v45 = vld [vmem:[#allocation5 + $0x1a0] sm:$0xff]  ;;  %v1724_v52 = vld [vmem:[#allocation5 + $0xb8] sm:$0xff]  ;;  %v1723_v53 = vld [vmem:[#allocation5 + $0xb0] sm:$0xff] }
 0x18f   :  { %2463 = vmatmul.mubr.bf16.gmra.mrb[60].mxu1 %v1759_v8  ;;  %v1761_v47 = vld [vmem:[#allocation5 + $0x1e0] sm:$0xff]  ;;  %v1732_v54 = vld [vmem:[#allocation5 + $0xf8] sm:$0xff]  ;;  %v1731_v56 = vld [vmem:[#allocation5 + $0xf0] sm:$0xff] }
 0x190   :  { %2503 = vmatprep.mubr.bf16.mxu1 %v1706_v12  ;;  %v1740_v58 = vld [vmem:[#allocation5 + $0x138] sm:$0xff]  ;;  %v1739_v0 = vld [vmem:[#allocation5 + $0x130] sm:$0xff] }
 0x191   :  { %v1748_v2 = vld [vmem:[#allocation5 + $0x178] sm:$0xff]  ;;  %v1747_v8 = vld [vmem:[#allocation5 + $0x170] sm:$0xff] }
 0x192   :  { %v1756_v10 = vld [vmem:[#allocation5 + $0x1b8] sm:$0xff]  ;;  %v1755_v16 = vld [vmem:[#allocation5 + $0x1b0] sm:$0xff] }
 0x193   :  { %v1764_v18 = vld [vmem:[#allocation5 + $0x1f8] sm:$0xff] }
 0x197   :  { %2504 = vmatmul.mubr.bf16.vlgmr.msra.gmra.mrb[64].mxu1 %v1705_v19 }
 0x198   :  { %9895 = vmatpush3.bf16.msra.mxu1 %v10291_v17  ;;  %2511 = vmatprep.mubr.bf16.mxu1 %v1714_v21 }
 0x199   :  { %9896 = vmatprep.subr.bf16.mxu1 %v10294_v20 }
 0x19c   :  { %9897 = vmatpush3.bf16.msra.mxu1 %v10295_v22 }
 0x19d   :  { %9898 = vmatprep.subr.bf16.mxu1 %v10298_v23 }
 0x19f   :  { %2512 = vmatmul.mubr.bf16.gmra.mrb[68].mxu1 %v1713_v24  ;;  %v1763_v24 = vld [vmem:[#allocation5 + $0x1f0] sm:$0xff] }
 0x1a0   :  { %2519 = vmatprep.mubr.bf16.mxu1 %v1722_v26  ;;  %9899 = vmatpush3.bf16.msra.mxu1 %v10299_v25 }
 0x1a1   :  { %9900 = vmatprep.subr.bf16.mxu1 %v10302_v27 }
 0x1a4   :  { %9901 = vmatpush3.bf16.msra.mxu1 %v10303_v28 }
 0x1a5   :  { %9902 = vmatprep.subr.bf16.mxu1 %v10306_v29 }
 0x1a7   :  { %2520 = vmatmul.mubr.bf16.gmra.mrb[72].mxu1 %v1721_v30 }
 0x1a8   :  { %2527 = vmatprep.mubr.bf16.mxu1 %v1730_v32  ;;  %9903 = vmatpush3.bf16.msra.mxu1 %v10307_v31 }
 0x1a9   :  { %9904 = vmatprep.subr.bf16.mxu1 %v10310_v33 }
 0x1ac   :  { %9905 = vmatpush3.bf16.msra.mxu1 %v10311_v34 }
 0x1ad   :  { %9906 = vmatprep.subr.bf16.mxu1 %v10314_v35 }
 0x1af   :  { %2528 = vmatmul.mubr.bf16.gmra.mrb[76].mxu1 %v1729_v36 }
 0x1b0   :  { %2535 = vmatprep.mubr.bf16.mxu1 %v1738_v38  ;;  %9907 = vmatpush3.bf16.msra.mxu1 %v10315_v37 }
 0x1b1   :  { %9908 = vmatprep.subr.bf16.mxu1 %v10318_v39 }
 0x1b4   :  { %9909 = vmatpush3.bf16.msra.mxu1 %v10319_v40 }
 0x1b7   :  { %2536 = vmatmul.mubr.bf16.gmra.mrb[80].mxu1 %v1737_v41 }
 0x1b8   :  { %2543 = vmatprep.mubr.bf16.mxu1 %v1746_v42 }
 0x1bf   :  { %2544 = vmatmul.mubr.bf16.gmra.mrb[84].mxu1 %v1745_v43 }
 0x1c0   :  { %2551 = vmatprep.mubr.bf16.mxu1 %v1754_v44 }
 0x1c7   :  { %2552 = vmatmul.mubr.bf16.gmra.mrb[88].mxu1 %v1753_v45 }
 0x1c8   :  { %2559 = vmatprep.mubr.bf16.mxu1 %v1762_v46 }
 0x1cf   :  { %2560 = vmatmul.mubr.bf16.gmra.mrb[92].mxu1 %v1761_v47 }
 0x1d0   :  { %2600 = vmatprep.mubr.bf16.mxu1 %v1708_v48 }
 0x1d7   :  { %2601 = vmatmul.mubr.bf16.vlgmr.msra.gmra.mrb[96].mxu1 %v1707_v49 }
 0x1d8   :  { %2608 = vmatprep.mubr.bf16.mxu1 %v1716_v50 }
 0x1df   :  { %2609 = vmatmul.mubr.bf16.gmra.mrb[100].mxu1 %v1715_v51 }
 0x1e0   :  { %2616 = vmatprep.mubr.bf16.mxu1 %v1724_v52 }
 0x1e7   :  { %2617 = vmatmul.mubr.bf16.gmra.mrb[104].mxu1 %v1723_v53 }
 0x1e8   :  { %2624 = vmatprep.mubr.bf16.mxu1 %v1732_v54 }
 0x1ea   :  { %v9718_v55 = vpop.f32.mrb[0].mxu1 }
 0x1eb   :  { %v9719_v57 = vpop.f32.mrb[1].mxu1 }
 0x1ec   :  { %v11601_v59 = vadd.f32 %v9719_v57, %v9718_v55  ;;  %v9721_v60 = vpop.f32.mrb[2].mxu1 }
 0x1ed   :  { %v9722_v61 = vpop.f32.mrb[3].mxu1 }
 0x1ee   :  { %v11603_v62 = vadd.f32 %v9722_v61, %v9721_v60 }
 0x1ef   :  { %2625 = vmatmul.mubr.bf16.gmra.mrb[108].mxu1 %v1731_v56 }
 0x1f0   :  { %2632 = vmatprep.mubr.bf16.mxu1 %v1740_v58 }
 0x1f2   :  { %v9724_v63 = vpop.f32.mrb[4].mxu1 }
 0x1f3   :  { %v9725_v1 = vpop.f32.mrb[5].mxu1 }
 0x1f4   :  { %v11605_v3 = vadd.f32 %v9725_v1, %v9724_v63  ;;  %v9727_v4 = vpop.f32.mrb[6].mxu1 }
 0x1f5   :  { %v9728_v5 = vpop.f32.mrb[7].mxu1 }
 0x1f6   :  { %v11607_v6 = vadd.f32 %v9728_v5, %v9727_v4 }
 0x1f7   :  { %2633 = vmatmul.mubr.bf16.gmra.mrb[112].mxu1 %v1739_v0 }
 0x1f8   :  { %2640 = vmatprep.mubr.bf16.mxu1 %v1748_v2 }
 0x1fa   :  { %v9730_v7 = vpop.f32.mrb[8].mxu1 }
 0x1fb   :  { %v9731_v9 = vpop.f32.mrb[9].mxu1 }
 0x1fc   :  { %v11609_v11 = vadd.f32 %v9731_v9, %v9730_v7  ;;  %v9733_v12 = vpop.f32.mrb[10].mxu1 }
 0x1fd   :  { %v9734_v13 = vpop.f32.mrb[11].mxu1 }
 0x1fe   :  { %v9735_v14 = vadd.f32 %v9734_v13, %v9733_v12 }
 0x1ff   :  { %2641 = vmatmul.mubr.bf16.gmra.mrb[116].mxu1 %v1747_v8 }
 0x200   :  { %2648 = vmatprep.mubr.bf16.mxu1 %v1756_v10 }
 0x202   :  { %v9736_v15 = vpop.f32.mrb[12].mxu1 }
 0x203   :  { %v9737_v17 = vpop.f32.mrb[13].mxu1 }
 0x204   :  { %v9738_v19 = vadd.f32 %v9737_v17, %v9736_v15  ;;  %v9739_v20 = vpop.f32.mrb[14].mxu1 }
 0x205   :  { %v9740_v21 = vpop.f32.mrb[15].mxu1 }
 0x206   :  { %v9741_v22 = vadd.f32 %v9740_v21, %v9739_v20 }
 0x207   :  { %2649 = vmatmul.mubr.bf16.gmra.mrb[120].mxu1 %v1755_v16 }
 0x208   :  { %2656 = vmatprep.mubr.bf16.mxu1 %v1764_v18 }
 0x20a   :  { %v9742_v23 = vpop.f32.mrb[16].mxu1 }
 0x20b   :  { %v9743_v25 = vpop.f32.mrb[17].mxu1 }
 0x20c   :  { %v9744_v26 = vadd.f32 %v9743_v25, %v9742_v23  ;;  %v9745_v27 = vpop.f32.mrb[18].mxu1 }
 0x20d   :  { %v9746_v28 = vpop.f32.mrb[19].mxu1 }
 0x20e   :  { %v9747_v29 = vadd.f32 %v9746_v28, %v9745_v27 }
 0x20f   :  { %2657 = vmatmul.mubr.bf16.gmra.mrb[124].mxu1 %v1763_v24 }
 0x212   :  { %v9748_v30 = vpop.f32.mrb[20].mxu1 }
 0x213   :  { %v9749_v31 = vpop.f32.mrb[21].mxu1 }
 0x214   :  { %v9750_v32 = vadd.f32 %v9749_v31, %v9748_v30  ;;  %v9751_v33 = vpop.f32.mrb[22].mxu1 }
 0x215   :  { %v9752_v34 = vpop.f32.mrb[23].mxu1 }
 0x216   :  { %v9753_v35 = vadd.f32 %v9752_v34, %v9751_v33 }
 0x21a   :  { %v9754_v36 = vpop.f32.mrb[24].mxu1 }
 0x21b   :  { %v9755_v37 = vpop.f32.mrb[25].mxu1 }
 0x21c   :  { %v11611_v38 = vadd.f32 %v9755_v37, %v9754_v36  ;;  %v9757_v39 = vpop.f32.mrb[26].mxu1 }
 0x21d   :  { %v9758_v40 = vpop.f32.mrb[27].mxu1 }
 0x21e   :  { %v9759_v41 = vadd.f32 %v9758_v40, %v9757_v39 }
 0x222   :  { %v9760_v42 = vpop.f32.mrb[28].mxu1 }
 0x223   :  { %v9761_v43 = vpop.f32.mrb[29].mxu1 }
 0x224   :  { %v11613_v44 = vadd.f32 %v9761_v43, %v9760_v42  ;;  %v9763_v45 = vpop.f32.mrb[30].mxu1 }
 0x225   :  { %v9764_v46 = vpop.f32.mrb[31].mxu1 }
 0x226   :  { %v11615_v47 = vadd.f32 %v9764_v46, %v9763_v45 }
 0x22a   :  { %v9782_v48 = vpop.f32.mrb[32].mxu1 }
 0x22b   :  { %v9783_v49 = vpop.f32.mrb[33].mxu1 }
 0x22c   :  { %v9784_v50 = vadd.f32 %v9783_v49, %v9782_v48  ;;  %v9785_v51 = vpop.f32.mrb[34].mxu1 }
 0x22d   :  { %v9786_v52 = vpop.f32.mrb[35].mxu1 }
 0x22e   :  { %v11618_v53 = vadd.f32 %v9784_v50, %v11601_v59  ;;  %v9787_v54 = vadd.f32 %v9786_v52, %v9785_v51 }
 0x230   :  { %v11621_v55 = vadd.f32 %v9787_v54, %v11603_v62 }
 0x232   :  { %v9788_v56 = vpop.f32.mrb[36].mxu1 }
 0x233   :  { %v9789_v57 = vpop.f32.mrb[37].mxu1 }
 0x234   :  { %v9790_v58 = vadd.f32 %v9789_v57, %v9788_v56  ;;  %v9791_v60 = vpop.f32.mrb[38].mxu1 }
 0x235   :  { %v9792_v61 = vpop.f32.mrb[39].mxu1 }
 0x236   :  { %v11624_v63 = vadd.f32 %v9790_v58, %v11605_v3  ;;  %v9793_v0 = vadd.f32 %v9792_v61, %v9791_v60 }
 0x238   :  { %v11627_v1 = vadd.f32 %v9793_v0, %v11607_v6 }
 0x23a   :  { %v9794_v2 = vpop.f32.mrb[40].mxu1 }
 0x23b   :  { %v9795_v4 = vpop.f32.mrb[41].mxu1 }
 0x23c   :  { %v9796_v59 = vadd.f32 %v9795_v4, %v9794_v2  ;;  %v9797_v5 = vpop.f32.mrb[42].mxu1 }
 0x23d   :  { %v9798_v7 = vpop.f32.mrb[43].mxu1 }
 0x23e   :  { %v11630_v62 = vadd.f32 %v9796_v59, %v11609_v11  ;;  %v9799_v8 = vadd.f32 %v9798_v7, %v9797_v5 }
 0x240   :  { %v11632_v9 = vadd.f32 %v9799_v8, %v9735_v14 }
 0x242   :  { %v9800_v10 = vpop.f32.mrb[44].mxu1 }
 0x243   :  { %v9801_v12 = vpop.f32.mrb[45].mxu1 }
 0x244   :  { %v9802_v13 = vadd.f32 %v9801_v12, %v9800_v10  ;;  %v9803_v3 = vpop.f32.mrb[46].mxu1 }
 0x245   :  { %v9804_v15 = vpop.f32.mrb[47].mxu1 }
 0x246   :  { %v11634_v16 = vadd.f32 %v9802_v13, %v9738_v19  ;;  %v9805_v6 = vadd.f32 %v9804_v15, %v9803_v3 }
 0x248   :  { %v11636_v17 = vadd.f32 %v9805_v6, %v9741_v22 }
 0x24a   :  { %v9806_v18 = vpop.f32.mrb[48].mxu1 }
 0x24b   :  { %v9807_v20 = vpop.f32.mrb[49].mxu1 }
 0x24c   :  { %v9808_v21 = vadd.f32 %v9807_v20, %v9806_v18  ;;  %v9809_v23 = vpop.f32.mrb[50].mxu1 }
 0x24d   :  { %v9810_v24 = vpop.f32.mrb[51].mxu1 }
 0x24e   :  { %v11638_v11 = vadd.f32 %v9808_v21, %v9744_v26  ;;  %v9811_v25 = vadd.f32 %v9810_v24, %v9809_v23 }
 0x250   :  { %v11640_v14 = vadd.f32 %v9811_v25, %v9747_v29 }
 0x252   :  { %v9812_v27 = vpop.f32.mrb[52].mxu1 }
 0x253   :  { %v9813_v28 = vpop.f32.mrb[53].mxu1 }
 0x254   :  { %v9814_v30 = vadd.f32 %v9813_v28, %v9812_v27  ;;  %v9815_v31 = vpop.f32.mrb[54].mxu1 }
 0x255   :  { %v9816_v33 = vpop.f32.mrb[55].mxu1 }
 0x256   :  { %v11642_v19 = vadd.f32 %v9814_v30, %v9750_v32  ;;  %v9817_v34 = vadd.f32 %v9816_v33, %v9815_v31 }
 0x258   :  { %v11644_v22 = vadd.f32 %v9817_v34, %v9753_v35 }
 0x25a   :  { %v9818_v36 = vpop.f32.mrb[56].mxu1 }
 0x25b   :  { %v9819_v37 = vpop.f32.mrb[57].mxu1 }
 0x25c   :  { %v9820_v39 = vadd.f32 %v9819_v37, %v9818_v36  ;;  %v9821_v40 = vpop.f32.mrb[58].mxu1 }
 0x25d   :  { %v9822_v42 = vpop.f32.mrb[59].mxu1 }
 0x25e   :  { %v11647_v26 = vadd.f32 %v9820_v39, %v11611_v38  ;;  %v9823_v29 = vadd.f32 %v9822_v42, %v9821_v40 }
 0x260   :  { %v11649_v43 = vadd.f32 %v9823_v29, %v9759_v41 }
 0x262   :  { %v9824_v45 = vpop.f32.mrb[60].mxu1 }
 0x263   :  { %v9825_v46 = vpop.f32.mrb[61].mxu1 }
 0x264   :  { %v9826_v48 = vadd.f32 %v9825_v46, %v9824_v45  ;;  %v9827_v49 = vpop.f32.mrb[62].mxu1 }
 0x265   :  { %v9828_v32 = vpop.f32.mrb[63].mxu1 }
 0x266   :  { %v11652_v50 = vadd.f32 %v9826_v48, %v11613_v44  ;;  %v9829_v35 = vadd.f32 %v9828_v32, %v9827_v49 }
 0x268   :  { %v11655_v51 = vadd.f32 %v9829_v35, %v11615_v47 }
 0x26a   :  { %v9846_v52 = vpop.f32.mrb[64].mxu1 }
 0x26b   :  { %v9847_v54 = vpop.f32.mrb[65].mxu1 }
 0x26c   :  { %v9848_v56 = vadd.f32 %v9847_v54, %v9846_v52  ;;  %v9849_v38 = vpop.f32.mrb[66].mxu1 }
 0x26d   :  { %v9850_v57 = vpop.f32.mrb[67].mxu1 }
 0x26e   :  { %v11658_v41 = vadd.f32 %v9848_v56, %v11618_v53  ;;  %v9851_v58 = vadd.f32 %v9850_v57, %v9849_v38 }
 0x270   :  { %v11661_v60 = vadd.f32 %v9851_v58, %v11621_v55 }
 0x272   :  { %v9852_v61 = vpop.f32.mrb[68].mxu1 }
 0x273   :  { %v9853_v0 = vpop.f32.mrb[69].mxu1 }
 0x274   :  { %v9854_v44 = vadd.f32 %v9853_v0, %v9852_v61  ;;  %v9855_v2 = vpop.f32.mrb[70].mxu1 }
 0x275   :  { %v9856_v4 = vpop.f32.mrb[71].mxu1 }
 0x276   :  { %v11664_v47 = vadd.f32 %v9854_v44, %v11624_v63  ;;  %v9857_v59 = vadd.f32 %v9856_v4, %v9855_v2 }
 0x278   :  { %v11667_v5 = vadd.f32 %v9857_v59, %v11627_v1 }
 0x27a   :  { %v9858_v7 = vpop.f32.mrb[72].mxu1 }
 0x27b   :  { %v9859_v8 = vpop.f32.mrb[73].mxu1 }
 0x27c   :  { %v9860_v53 = vadd.f32 %v9859_v8, %v9858_v7  ;;  %v9861_v10 = vpop.f32.mrb[74].mxu1 }
 0x27d   :  { %v9862_v12 = vpop.f32.mrb[75].mxu1 }
 0x27e   :  { %v11670_v55 = vadd.f32 %v9860_v53, %v11630_v62  ;;  %v9863_v13 = vadd.f32 %v9862_v12, %v9861_v10 }
 0x280   :  { %v11673_v3 = vadd.f32 %v9863_v13, %v11632_v9 }
 0x282   :  { %v9864_v15 = vpop.f32.mrb[76].mxu1 }
 0x283   :  { %v9865_v6 = vpop.f32.mrb[77].mxu1 }
 0x284   :  { %v9866_v63 = vadd.f32 %v9865_v6, %v9864_v15  ;;  %v9867_v18 = vpop.f32.mrb[78].mxu1 }
 0x285   :  { %v9868_v20 = vpop.f32.mrb[79].mxu1 }
 0x286   :  { %v11676_v1 = vadd.f32 %v9866_v63, %v11634_v16  ;;  %v9869_v21 = vadd.f32 %v9868_v20, %v9867_v18 }
 0x288   :  { %v11679_v23 = vadd.f32 %v9869_v21, %v11636_v17 }
 0x28a   :  { %v9870_v24 = vpop.f32.mrb[80].mxu1 }
 0x28b   :  { %v9871_v25 = vpop.f32.mrb[81].mxu1 }
 0x28c   :  { %v9872_v62 = vadd.f32 %v9871_v25, %v9870_v24  ;;  %v9873_v27 = vpop.f32.mrb[82].mxu1 }
 0x28d   :  { %v9874_v28 = vpop.f32.mrb[83].mxu1 }
 0x28e   :  { %v11682_v9 = vadd.f32 %v9872_v62, %v11638_v11  ;;  %v9875_v30 = vadd.f32 %v9874_v28, %v9873_v27 }
 0x290   :  { %v11685_v31 = vadd.f32 %v9875_v30, %v11640_v14 }
 0x292   :  { %v9876_v33 = vpop.f32.mrb[84].mxu1 }
 0x293   :  { %v9877_v34 = vpop.f32.mrb[85].mxu1 }
 0x294   :  { %v9878_v16 = vadd.f32 %v9877_v34, %v9876_v33  ;;  %v9879_v36 = vpop.f32.mrb[86].mxu1 }
 0x295   :  { %v9880_v37 = vpop.f32.mrb[87].mxu1 }
 0x296   :  { %v11688_v17 = vadd.f32 %v9878_v16, %v11642_v19  ;;  %v9881_v39 = vadd.f32 %v9880_v37, %v9879_v36 }
 0x298   :  { %v11691_v40 = vadd.f32 %v9881_v39, %v11644_v22 }
 0x29a   :  { %v9882_v42 = vpop.f32.mrb[88].mxu1 }
 0x29b   :  { %v9883_v29 = vpop.f32.mrb[89].mxu1 }
 0x29c   :  { %v9884_v11 = vadd.f32 %v9883_v29, %v9882_v42  ;;  %v9885_v45 = vpop.f32.mrb[90].mxu1 }
 0x29d   :  { %v9886_v46 = vpop.f32.mrb[91].mxu1 }
 0x29e   :  { %v11694_v14 = vadd.f32 %v9884_v11, %v11647_v26  ;;  %v9887_v48 = vadd.f32 %v9886_v46, %v9885_v45 }
 0x2a0   :  { %v11697_v49 = vadd.f32 %v9887_v48, %v11649_v43 }
 0x2a2   :  { %v9888_v32 = vpop.f32.mrb[92].mxu1 }
 0x2a3   :  { %v9889_v35 = vpop.f32.mrb[93].mxu1 }
 0x2a4   :  { %v9890_v19 = vadd.f32 %v9889_v35, %v9888_v32  ;;  %v9891_v52 = vpop.f32.mrb[94].mxu1 }
 0x2a5   :  { %v9892_v54 = vpop.f32.mrb[95].mxu1 }
 0x2a6   :  { %v11700_v22 = vadd.f32 %v9890_v19, %v11652_v50  ;;  %v9893_v56 = vadd.f32 %v9892_v54, %v9891_v52 }
 0x2a8   :  { %v11703_v38 = vadd.f32 %v9893_v56, %v11655_v51 }
 0x2aa   :  { %v9910_v57 = vpop.f32.mrb[96].mxu1 }
 0x2ab   :  { %v9911_v58 = vpop.f32.mrb[97].mxu1 }
 0x2ac   :  { %v9912_v26 = vadd.f32 %v9911_v58, %v9910_v57  ;;  %v9913_v61 = vpop.f32.mrb[98].mxu1 }
 0x2ad   :  { %v9914_v0 = vpop.f32.mrb[99].mxu1 }
 0x2ae   :  { %v11706_v43 = vadd.f32 %v9912_v26, %v11658_v41  ;;  %v9915_v44 = vadd.f32 %v9914_v0, %v9913_v61 }
 0x2b0   :  { %v11709_v2 = vadd.f32 %v9915_v44, %v11661_v60  ;;  %v2666_v50 = vsel %vm2665_vm0, %v11706_v43, 0.0 }
 0x2b2   :  { %v2667_v51 = vsel %vm2665_vm0, %v11709_v2, 0.0  ;;  %v9916_v4 = vpop.f32.mrb[100].mxu1 }
 0x2b3   :  { %v2668_v59 = vadd.f32 %v2667_v51, %v2666_v50  ;;  %v9917_v7 = vpop.f32.mrb[101].mxu1 }
 0x2b4   :  { %v9918_v8 = vadd.f32 %v9917_v7, %v9916_v4  ;;  %v9919_v53 = vpop.f32.mrb[102].mxu1 }
 0x2b5   :  { %v9920_v10 = vpop.f32.mrb[103].mxu1 }
 0x2b6   :  { %v11716_v41 = vadd.f32 %v9918_v8, %v11664_v47  ;;  %v9921_v12 = vadd.f32 %v9920_v10, %v9919_v53 }
 0x2b8   :  { %v2669_v60 = vsel %vm2665_vm0, %v11716_v41, 0.0  ;;  %v11721_v13 = vadd.f32 %v9921_v12, %v11667_v5 }
 0x2b9   :  { %v2670_v15 = vadd.f32 %v2669_v60, %v2668_v59 }
 0x2ba   :  { %v2671_v6 = vsel %vm2665_vm0, %v11721_v13, 0.0  ;;  %v9922_v63 = vpop.f32.mrb[104].mxu1 }
 0x2bb   :  { %v2672_v18 = vadd.f32 %v2671_v6, %v2670_v15  ;;  %v9923_v20 = vpop.f32.mrb[105].mxu1 }
 0x2bc   :  { %v9924_v21 = vadd.f32 %v9923_v20, %v9922_v63  ;;  %v9925_v24 = vpop.f32.mrb[106].mxu1 }
 0x2bd   :  { %v9926_v25 = vpop.f32.mrb[107].mxu1 }
 0x2be   :  { %v11726_v47 = vadd.f32 %v9924_v21, %v11670_v55  ;;  %v9927_v62 = vadd.f32 %v9926_v25, %v9925_v24  ;;  %v311_v24 = vld [vmem:[#allocation2 + $0x18] sm:$0x4] }
 0x2c0   :  { %v2673_v27 = vsel %vm2665_vm0, %v11726_v47, 0.0  ;;  %v11731_v5 = vadd.f32 %v9927_v62, %v11673_v3  ;;  %v10602_v62 = vld [vmem:[#allocation29 + $0x340] ss:$8 sps:$4 sm:$0xff]  }
 0x2c1   :  { %v2674_v28 = vadd.f32 %v2673_v27, %v2672_v18 }
 0x2c2   :  { %v2675_v30 = vsel %vm2665_vm0, %v11731_v5, 0.0  ;;  %v9928_v33 = vpop.f32.mrb[108].mxu1 }
 0x2c3   :  { %v2676_v34 = vadd.f32 %v2675_v30, %v2674_v28  ;;  %v9929_v16 = vpop.f32.mrb[109].mxu1  ;;  %v299_v28 = vld [vmem:[#allocation2 + $0x8] sm:$0x4]  ;;  %v240_v30 = vld [vmem:[#allocation2 + $0xc] sm:$0x1] }
 0x2c4   :  { %v9930_v36 = vadd.f32 %v9929_v16, %v9928_v33  ;;  %v9931_v37 = vpop.f32.mrb[110].mxu1  ;;  %v312_v16 = vsel %vm11780_vm6, 0, %v311_v24 }
 0x2c5   :  { %v9932_v39 = vpop.f32.mrb[111].mxu1  ;;  %313 = vst [vmem:[#allocation2 + $0x18] sm:$0x4] %v312_v16 }
 0x2c6   :  { %v11736_v55 = vadd.f32 %v9930_v36, %v11676_v1  ;;  %v9933_v42 = vadd.f32 %v9932_v39, %v9931_v37  ;;  %v300_v36 = vsel %vm11780_vm6, 0, %v299_v28  ;;  %v241_v37 = vsel %vm11774_vm5, 0, %v240_v30  ;;  %v335_v28 = vld [vmem:[#allocation2 + $0x38] sm:$0x4] }
 0x2c7   :  { %301 = vst [vmem:[#allocation2 + $0x8] sm:$0x4] %v300_v36  ;;  %242 = vst [vmem:[#allocation2 + $0xc] sm:$0x1] %v241_v37  ;;  %v336_v30 = vsel %vm11780_vm6, 0, %v335_v28 }
 0x2c8   :  { %v2677_v29 = vsel %vm2665_vm0, %v11736_v55, 0.0  ;;  %v11741_v3 = vadd.f32 %v9933_v42, %v11679_v23  ;;  %337 = vst [vmem:[#allocation2 + $0x38] sm:$0x4] %v336_v30  ;;  %v338_v36 = vld [vmem:[#allocation2 + $0x3c] sm:$0x4] }
 0x2c9   :  { %v2678_v11 = vadd.f32 %v2677_v29, %v2676_v34  ;;  %v302_v29 = vld [vmem:[#allocation2 + $0xc] sm:$0x4]  ;;  %v339_v37 = vsel %vm11780_vm6, 0, %v338_v36 }
 0x2ca   :  { %v2679_v45 = vsel %vm2665_vm0, %v11741_v3, 0.0  ;;  %v9934_v46 = vpop.f32.mrb[112].mxu1  ;;  %340 = vst [vmem:[#allocation2 + $0x3c] sm:$0x4] %v339_v37 }
 0x2cb   :  { %v2680_v48 = vadd.f32 %v2679_v45, %v2678_v11  ;;  %v9935_v32 = vpop.f32.mrb[113].mxu1  ;;  %v243_v11 = vld [vmem:[#allocation2 + $0x10] sm:$0x1] }
 0x2cc   :  { %v9936_v35 = vadd.f32 %v9935_v32, %v9934_v46  ;;  %v9937_v19 = vpop.f32.mrb[114].mxu1  ;;  %v244_v32 = vsel %vm11774_vm5, 0, %v243_v11 }
 0x2cd   :  { %v9938_v52 = vpop.f32.mrb[115].mxu1  ;;  %245 = vst [vmem:[#allocation2 + $0x10] sm:$0x1] %v244_v32  ;;  %v282_v32 = vld [vmem:[#allocation2 + $0x44] sm:$0x1] }
 0x2ce   :  { %v11746_v1 = vadd.f32 %v9936_v35, %v11682_v9  ;;  %v9939_v54 = vadd.f32 %v9938_v52, %v9937_v19  ;;  %v305_v35 = vld [vmem:[#allocation2 + $0x10] sm:$0x4] }
 0x2cf   :  { %v306_v52 = vsel %vm11780_vm6, 0, %v305_v35 }
 0x2d0   :  { %v2681_v56 = vsel %vm2665_vm0, %v11746_v1, 0.0  ;;  %v11751_v23 = vadd.f32 %v9939_v54, %v11685_v31  ;;  %v252_v54 = vld [vmem:[#allocation2 + $0x1c] sm:$0x1]  ;;  %307 = vst [vmem:[#allocation2 + $0x10] sm:$0x4] %v306_v52 }
 0x2d1   :  { %v2682_v57 = vadd.f32 %v2681_v56, %v2680_v48  ;;  %v303_v48 = vsel %vm11780_vm6, 0, %v302_v29  ;;  %v314_v56 = vld [vmem:[#allocation2 + $0x1c] sm:$0x4] }
 0x2d2   :  { %v2683_v58 = vsel %vm2665_vm0, %v11751_v23, 0.0  ;;  %v9940_v26 = vpop.f32.mrb[116].mxu1  ;;  %304 = vst [vmem:[#allocation2 + $0xc] sm:$0x4] %v303_v48  ;;  %v326_v48 = vld [vmem:[#allocation2 + $0x2c] sm:$0x4] }
 0x2d3   :  { %v2684_v61 = vadd.f32 %v2683_v58, %v2682_v57  ;;  %v9941_v0 = vpop.f32.mrb[117].mxu1  ;;  %v327_v52 = vsel %vm11780_vm6, 0, %v326_v48 }
 0x2d4   :  { %v9942_v44 = vadd.f32 %v9941_v0, %v9940_v26  ;;  %v9943_v50 = vpop.f32.mrb[118].mxu1  ;;  %v253_v26 = vsel %vm11774_vm5, 0, %v252_v54  ;;  %v246_v0 = vld [vmem:[#allocation2 + $0x14] sm:$0x1]  ;;  %v283_v54 = vsel %vm11774_vm5, 0, %v282_v32 }
 0x2d5   :  { %v9944_v51 = vpop.f32.mrb[119].mxu1  ;;  %254 = vst [vmem:[#allocation2 + $0x1c] sm:$0x1] %v253_v26  ;;  %328 = vst [vmem:[#allocation2 + $0x2c] sm:$0x4] %v327_v52 }
 0x2d6   :  { %v11756_v9 = vadd.f32 %v9942_v44, %v11688_v17  ;;  %v9945_v4 = vadd.f32 %v9944_v51, %v9943_v50  ;;  %v308_v44 = vld [vmem:[#allocation2 + $0x14] sm:$0x4]  ;;  %v247_v50 = vsel %vm11774_vm5, 0, %v246_v0  ;;  %284 = vst [vmem:[#allocation2 + $0x44] sm:$0x1] %v283_v54 }
 0x2d7   :  { %v309_v51 = vsel %vm11780_vm6, 0, %v308_v44  ;;  %248 = vst [vmem:[#allocation2 + $0x14] sm:$0x1] %v247_v50  ;;  %v347_v44 = vld [vmem:[#allocation2 + $0x48] sm:$0x4] }
 0x2d8   :  { %v2685_v59 = vsel %vm2665_vm0, %v11756_v9, 0.0  ;;  %v11761_v31 = vadd.f32 %v9945_v4, %v11691_v40  ;;  %v249_v40 = vld [vmem:[#allocation2 + $0x18] sm:$0x1]  ;;  %310 = vst [vmem:[#allocation2 + $0x14] sm:$0x4] %v309_v51  ;;  %v348_v50 = vsel %vm11780_vm6, 0, %v347_v44 }
 0x2d9   :  { %v2686_v7 = vadd.f32 %v2685_v59, %v2684_v61  ;;  %v250_v27 = vsel %vm11774_vm5, 0, %v249_v40  ;;  %v315_v61 = vsel %vm11780_vm6, 0, %v314_v56  ;;  %v267_v59 = vld [vmem:[#allocation2 + $0x30] sm:$0x1]  ;;  %v279_v40 = vld [vmem:[#allocation2 + $0x40] sm:$0x1] }
 0x2da   :  { %v2687_v8 = vsel %vm2665_vm0, %v11761_v31, 0.0  ;;  %v9946_v53 = vpop.f32.mrb[120].mxu1  ;;  %251 = vst [vmem:[#allocation2 + $0x18] sm:$0x1] %v250_v27  ;;  %316 = vst [vmem:[#allocation2 + $0x1c] sm:$0x4] %v315_v61 }
 0x2db   :  { %v2688_v10 = vadd.f32 %v2687_v8, %v2686_v7  ;;  %v9947_v12 = vpop.f32.mrb[121].mxu1  ;;  %v329_v7 = vld [vmem:[#allocation2 + $0x30] sm:$0x4]  ;;  %v280_v24 = vsel %vm11774_vm5, 0, %v279_v40  ;;  %v344_v56 = vld [vmem:[#allocation2 + $0x44] sm:$0x4] }
 0x2dc   :  { %v9948_v60 = vadd.f32 %v9947_v12, %v9946_v53  ;;  %v9949_v15 = vpop.f32.mrb[122].mxu1  ;;  %v268_v53 = vsel %vm11774_vm5, 0, %v267_v59  ;;  %v234_v12 = vld [vmem:[#allocation2 + $0x4] sm:$0x1]  ;;  %281 = vst [vmem:[#allocation2 + $0x40] sm:$0x1] %v280_v24 }
 0x2dd   :  { %v9950_v6 = vpop.f32.mrb[123].mxu1  ;;  %269 = vst [vmem:[#allocation2 + $0x30] sm:$0x1] %v268_v53  ;;  %v345_v61 = vsel %vm11780_vm6, 0, %v344_v56  ;;  %v255_v51 = vld [vmem:[#allocation2 + $0x20] sm:$0x1] }
 0x2de   :  { %v11766_v17 = vadd.f32 %v9948_v60, %v11694_v14  ;;  %v9951_v63 = vadd.f32 %v9950_v6, %v9949_v15  ;;  %v237_v14 = vld [vmem:[#allocation2 + $0x8] sm:$0x1]  ;;  %v296_v60 = vld [vmem:[#allocation2 + $0x4] sm:$0x4]  ;;  %346 = vst [vmem:[#allocation2 + $0x44] sm:$0x4] %v345_v61 }
 0x2df   :  { %349 = vst [vmem:[#allocation2 + $0x48] sm:$0x4] %v348_v50  ;;  %v256_v59 = vsel %vm11774_vm5, 0, %v255_v51  ;;  %v10343_v40 = vld [vmem:[#allocation20 + $0x40] sm:$0xff]  }
 0x2e0   :  { %v2689_v18 = vsel %vm2665_vm0, %v11766_v17, 0.0  ;;  %v11771_v20 = vadd.f32 %v9951_v63, %v11697_v49  ;;  %v238_v49 = vsel %vm11774_vm5, 0, %v237_v14  ;;  %v297_v63 = vsel %vm11780_vm6, 0, %v296_v60  ;;  %257 = vst [vmem:[#allocation2 + $0x20] sm:$0x1] %v256_v59  ;;  %v10338_v60 = vld [vmem:[#allocation20 + $0xc8] sm:$0xff]   ;;  %9958 = vmatprep.subr.bf16.mxu0 %v10343_v40 }
 0x2e1   :  { %v2690_v25 = vadd.f32 %v2689_v18, %v2688_v10  ;;  %239 = vst [vmem:[#allocation2 + $0x8] sm:$0x1] %v238_v49  ;;  %v330_v10 = vsel %vm11780_vm6, 0, %v329_v7  ;;  %v341_v18 = vld [vmem:[#allocation2 + $0x40] sm:$0x4] }
 0x2e2   :  { %v2691_v33 = vsel %vm2665_vm0, %v11771_v20, 0.0  ;;  %v9952_v34 = vpop.f32.mrb[124].mxu1  ;;  %331 = vst [vmem:[#allocation2 + $0x30] sm:$0x4] %v330_v10  ;;  %298 = vst [vmem:[#allocation2 + $0x4] sm:$0x4] %v297_v63 }
 0x2e3   :  { %v2692_v39 = vadd.f32 %v2691_v33, %v2690_v25  ;;  %v9953_v42 = vpop.f32.mrb[125].mxu1  ;;  %v342_v14 = vsel %vm11780_vm6, 0, %v341_v18  ;;  %v273_v25 = vld [vmem:[#allocation2 + $0x38] sm:$0x1]  ;;  %v276_v33 = vld [vmem:[#allocation2 + $0x3c] sm:$0x1] }
 0x2e4   :  { %v9954_v45 = vadd.f32 %v9953_v42, %v9952_v34  ;;  %v9955_v46 = vpop.f32.mrb[126].mxu1  ;;  %343 = vst [vmem:[#allocation2 + $0x40] sm:$0x4] %v342_v14  ;;  %v274_v49 = vsel %vm11774_vm5, 0, %v273_v25  ;;  %v277_v16 = vsel %vm11774_vm5, 0, %v276_v33  ;;  %v10336_v10 = vld [vmem:[#allocation20 + $0xc0] sm:$0xff]  }
 0x2e5   :  { %v9956_v19 = vpop.f32.mrb[127].mxu1  ;;  %275 = vst [vmem:[#allocation2 + $0x38] sm:$0x1] %v274_v49  ;;  %278 = vst [vmem:[#allocation2 + $0x3c] sm:$0x1] %v277_v16  ;;  %9986 = vmatprep.subr.bf16.mxu1 %v10336_v10  ;;  %v10345_v14 = vld [vmem:[#allocation20] sm:$0xff]  }
 0x2e6   :  { %v11803_v57 = vadd.f32 %v9954_v45, %v11700_v22  ;;  %v9957_v58 = vadd.f32 %v9956_v19, %v9955_v46  ;;  %v332_v42 = vld [vmem:[#allocation2 + $0x34] sm:$0x4]  ;;  %v264_v46 = vld [vmem:[#allocation2 + $0x2c] sm:$0x1]  ;;  %v317_v7 = vld [vmem:[#allocation2 + $0x20] sm:$0x4]  ;;  %9959 = vmatpush3.bf16.msra.mxu0 %v10345_v14 }
 0x2e7   :  { %v333_v45 = vsel %vm11780_vm6, 0, %v332_v42  ;;  %v265_v19 = vsel %vm11774_vm5, 0, %v264_v46  ;;  %v10342_v49 = vld [vmem:[#allocation20 + $0xd8] sm:$0xff]  }
 0x2e8   :  { %v2693_v22 = vsel %vm2665_vm0, %v11803_v57, 0.0  ;;  %v11816_v4 = vadd.f32 %v9957_v58, %v11703_v38  ;;  %v235_v38 = vsel %vm11774_vm5, 0, %v234_v12  ;;  %334 = vst [vmem:[#allocation2 + $0x34] sm:$0x4] %v333_v45  ;;  %266 = vst [vmem:[#allocation2 + $0x2c] sm:$0x1] %v265_v19 }
 0x2e9   :  { %v2694_v8 = vadd.f32 %v2693_v22, %v2692_v39  ;;  %236 = vst [vmem:[#allocation2 + $0x4] sm:$0x1] %v235_v38  ;;  %v270_v39 = vld [vmem:[#allocation2 + $0x34] sm:$0x1]  ;;  %v285_v58 = vld [vmem:[#allocation2 + $0x48] sm:$0x1] }
 0x2ea   :  { %v2695_v15 = vsel %vm2665_vm0, %v11816_v4, 0.0  ;;  %v271_v11 = vsel %vm11774_vm5, 0, %v270_v39  ;;  %v286_v0 = vsel %vm11774_vm5, 0, %v285_v58  ;;  %v10337_v12 = vld [vmem:[#allocation20 + $0x80] sm:$0xff]   ;;  %v10344_v33 = vld [vmem:[#allocation20 + $0x98] sm:$0xff]  }
 0x2eb   :  { %v2696_v6 = vadd.f32 %v2695_v15, %v2694_v8  ;;  %272 = vst [vmem:[#allocation2 + $0x34] sm:$0x1] %v271_v11  ;;  %287 = vst [vmem:[#allocation2 + $0x48] sm:$0x1] %v286_v0  ;;  %v318_v8 = vsel %vm11780_vm6, 0, %v317_v7  ;;  %9987 = vmatpush3.bf16.msra.mxu1 %v10337_v12 }
 0x2ec   :  { %319 = vst [vmem:[#allocation2 + $0x20] sm:$0x4] %v318_v8  ;;  %9988 = vmatprep.subr.bf16.mxu1 %v10338_v60 }
 0x2ed   :  { %v2697_v27 = vrot.slane %v2696_v6, 4 }
 0x2ef   :  { %v2698_v34 = vadd.f32 %v2697_v27, %v2696_v6 }
 0x2f1   :  { %v2699_v29 = vrot.slane %v2698_v34, 2 }
 0x2f3   :  { %v2700_v35 = vadd.f32 %v2699_v29, %v2698_v34 }
 0x2f5   :  { %v2701_v26 = vrot.slane %v2700_v35, 1 }
 0x2f7   :  { %v2702_v22 = vadd.f32 %v2701_v26, %v2700_v35 }
 0x2f9   :  { %v2703_v53 = vmul.f32 0.0078125, %v2702_v22 }
 0x2fb   :  { %v11861_v15 = vsub.f32 %v11706_v43, %v2703_v53  ;;  %v11864_v38 = vsub.f32 %v11709_v2, %v2703_v53  ;;  %v11867_v6 = vsub.f32 %v11716_v41, %v2703_v53  ;;  %v11870_v63 = vsub.f32 %v11721_v13, %v2703_v53  ;;  %v10339_v41 = vld [vmem:[#allocation20 + $0x88] sm:$0xff]  }
 0x2fc   :  { %v11873_v18 = vsub.f32 %v11726_v47, %v2703_v53  ;;  %v11876_v24 = vsub.f32 %v11731_v5, %v2703_v53  ;;  %v11879_v43 = vsub.f32 %v11736_v55, %v2703_v53  ;;  %v11882_v2 = vsub.f32 %v11741_v3, %v2703_v53  ;;  %v10340_v55 = vld [vmem:[#allocation20 + $0xd0] sm:$0xff]   ;;  %9989 = vmatpush3.bf16.msra.mxu1 %v10339_v41 }
 0x2fd   :  { %v11885_v13 = vsub.f32 %v11746_v1, %v2703_v53  ;;  %v11888_v25 = vsub.f32 %v11751_v23, %v2703_v53  ;;  %v11891_v47 = vsub.f32 %v11756_v9, %v2703_v53  ;;  %v11894_v5 = vsub.f32 %v11761_v31, %v2703_v53  ;;  %9990 = vmatprep.subr.bf16.mxu1 %v10340_v55 }
 0x2fe   :  { %v11897_v3 = vsub.f32 %v11766_v17, %v2703_v53  ;;  %v11900_v27 = vsub.f32 %v11771_v20, %v2703_v53  ;;  %v11903_v1 = vsub.f32 %v11803_v57, %v2703_v53  ;;  %v11906_v23 = vsub.f32 %v11816_v4, %v2703_v53  ;;  %v10341_v17 = vld [vmem:[#allocation20 + $0x90] sm:$0xff]  }
 0x2ff   :  { %v2720_v9 = vmul.f32 %v11861_v15, %v11861_v15  ;;  %v2721_v31 = vmul.f32 %v11864_v38, %v11864_v38  ;;  %v2722_v20 = vmul.f32 %v11867_v6, %v11867_v6  ;;  %v2723_v57 = vmul.f32 %v11870_v63, %v11870_v63 }
 0x300   :  { %9991 = vmatpush3.bf16.msra.mxu1 %v10341_v17  ;;  %v2724_v34 = vmul.f32 %v11873_v18, %v11873_v18  ;;  %v2725_v37 = vmul.f32 %v11876_v24, %v11876_v24  ;;  %v2726_v29 = vmul.f32 %v11879_v43, %v11879_v43  ;;  %v2727_v46 = vmul.f32 %v11882_v2, %v11882_v2 }
 0x301   :  { %v2736_v4 = vsel %vm2665_vm0, %v2720_v9, 0.0  ;;  %v2737_v28 = vsel %vm2665_vm0, %v2721_v31, 0.0  ;;  %v2739_v16 = vsel %vm2665_vm0, %v2722_v20, 0.0  ;;  %9992 = vmatprep.subr.bf16.mxu1 %v10342_v49  ;;  %v2741_v39 = vsel %vm2665_vm0, %v2723_v57, 0.0 }
 0x302   :  { %v2738_v30 = vadd.f32 %v2737_v28, %v2736_v4  ;;  %v2743_v11 = vsel %vm2665_vm0, %v2724_v34, 0.0  ;;  %v2745_v48 = vsel %vm2665_vm0, %v2725_v37, 0.0  ;;  %v2728_v35 = vmul.f32 %v11885_v13, %v11885_v13 }
 0x303   :  { %v2747_v19 = vsel %vm2665_vm0, %v2726_v29, 0.0  ;;  %v2729_v54 = vmul.f32 %v11888_v25, %v11888_v25  ;;  %v2749_v56 = vsel %vm2665_vm0, %v2727_v46, 0.0  ;;  %v2730_v26 = vmul.f32 %v11891_v47, %v11891_v47 }
 0x304   :  { %v2740_v36 = vadd.f32 %v2739_v16, %v2738_v30  ;;  %9993 = vmatpush3.bf16.msra.mxu1 %v10344_v33  ;;  %v2751_v61 = vsel %vm2665_vm0, %v2728_v35, 0.0  ;;  %v2731_v44 = vmul.f32 %v11894_v5, %v11894_v5  ;;  %v2732_v22 = vmul.f32 %v11897_v3, %v11897_v3 }
 0x305   :  { %v2753_v50 = vsel %vm2665_vm0, %v2729_v54, 0.0  ;;  %v2755_v59 = vsel %vm2665_vm0, %v2730_v26, 0.0  ;;  %v2733_v8 = vmul.f32 %v11900_v27, %v11900_v27  ;;  %v2734_v12 = vmul.f32 %v11903_v1, %v11903_v1 }
 0x306   :  { %v2742_v42 = vadd.f32 %v2741_v39, %v2740_v36  ;;  %v2757_v53 = vsel %vm2665_vm0, %v2731_v44, 0.0  ;;  %v2759_v60 = vsel %vm2665_vm0, %v2732_v22, 0.0  ;;  %v2735_v41 = vmul.f32 %v11906_v23, %v11906_v23  ;;  %v2774_v39 = vld [vmem:[#allocation17] sm:$0x1] }
 0x307   :  { %v2761_v14 = vsel %vm2665_vm0, %v2733_v8, 0.0  ;;  %v2763_v9 = vsel %vm2665_vm0, %v2734_v12, 0.0  ;;  %v2779_v36 = vlaneseq }
 0x308   :  { %v2744_v45 = vadd.f32 %v2743_v11, %v2742_v42  ;;  %v2765_v17 = vsel %vm2665_vm0, %v2735_v41, 0.0 }
 0x309   :  { %v11957_v37 = vshrl.u32 %v2779_v36, 7 }
 0x30a   :  { %v2746_v32 = vadd.f32 %v2745_v48, %v2744_v45 }
 0x30b   :  { %v11960_v42 = vsub.s32 0, %v11957_v37 }
 0x30c   :  { %v2748_v52 = vadd.f32 %v2747_v19, %v2746_v32  ;;  %v11975_v19 = vld [vmem:[#allocation18] ss:$0 sm:$0xff] }
 0x30e   :  { %v2750_v58 = vadd.f32 %v2749_v56, %v2748_v52 }
 0x310   :  { %v2752_v0 = vadd.f32 %v2751_v61, %v2750_v58 }
 0x312   :  { %v2754_v51 = vadd.f32 %v2753_v50, %v2752_v0 }
 0x314   :  { %v2756_v7 = vadd.f32 %v2755_v59, %v2754_v51 }
 0x316   :  { %v2758_v10 = vadd.f32 %v2757_v53, %v2756_v7 }
 0x318   :  { %v2760_v40 = vadd.f32 %v2759_v60, %v2758_v10 }
 0x31a   :  { %v2762_v55 = vadd.f32 %v2761_v14, %v2760_v40 }
 0x31c   :  { %v2764_v31 = vadd.f32 %v2763_v9, %v2762_v55 }
 0x31e   :  { %v2766_v20 = vadd.f32 %v2765_v17, %v2764_v31 }
 0x320   :  { %v2767_v49 = vrot.slane %v2766_v20, 4 }
 0x322   :  { %v2768_v57 = vadd.f32 %v2767_v49, %v2766_v20 }
 0x324   :  { %v2769_v4 = vrot.slane %v2768_v57, 2 }
 0x326   :  { %v2770_v28 = vadd.f32 %v2769_v4, %v2768_v57 }
 0x328   :  { %v2771_v30 = vrot.slane %v2770_v28, 1 }
 0x32a   :  { %v2772_v33 = vadd.f32 %v2771_v30, %v2770_v28 }
 0x32c   :  { %v2773_v34 = vmul.f32 0.0078125, %v2772_v33 }
 0x32e   :  { %v2775_v16 = vadd.f32 1e-05, %v2773_v34 }
 0x330   :  { %10863 = vrsqrt.f32 %v2775_v16 }
 0x33a   :  { %v10864_v29 = vpop.eup %10863 }
 0x33b   :  { %v2777_v11 = vmul.f32 %v10864_v29, %v2774_v39 }
 0x33d   :  { %v11963_v45 = vrot.slane %v2777_v11, %v11960_v42 }
 0x33f   :  { %v2786_v46 = vmul.f32 %v11963_v45, %v11867_v6  ;;  %v11969_v48 = vmul.f32 %v11963_v45, %v11870_v63  ;;  %v2788_v32 = vmul.f32 %v11963_v45, %v11873_v18  ;;  %v2789_v35 = vmul.f32 %v11963_v45, %v11876_v24 }
 0x340   :  { %v2790_v52 = vmul.f32 %v11963_v45, %v11879_v43  ;;  %v2791_v54 = vmul.f32 %v11963_v45, %v11882_v2  ;;  %v2792_v6 = vmul.f32 %v11963_v45, %v11885_v13  ;;  %v2793_v63 = vmul.f32 %v11963_v45, %v11888_v25 }
 0x341   :  { %v2794_v18 = vmul.f32 %v11963_v45, %v11891_v47  ;;  %v2795_v24 = vmul.f32 %v11963_v45, %v11894_v5  ;;  %v2796_v56 = vmul.f32 %v11963_v45, %v11897_v3  ;;  %v2797_v43 = vmul.f32 %v11963_v45, %v11900_v27 }
 0x342   :  { %v2798_v2 = vmul.f32 %v11963_v45, %v11903_v1  ;;  %v2799_v13 = vmul.f32 %v11963_v45, %v11906_v23  ;;  %v11998_v25 = vadd.f32 %v11975_v19, %v2788_v32  ;;  %v2812_v47 = vadd.f32 %v11975_v19, %v2789_v35 }
 0x343   :  { %v2813_v58 = vadd.f32 %v11975_v19, %v2790_v52  ;;  %v12003_v5 = vadd.f32 %v11975_v19, %v2791_v54  ;;  %v12006_v3 = vadd.f32 %v11975_v19, %v2792_v6  ;;  %v2816_v27 = vadd.f32 %v11975_v19, %v2793_v63 }
 0x344   :  { %v2817_v1 = vadd.f32 %v11975_v19, %v2794_v18  ;;  %v2818_v26 = vadd.f32 %v11975_v19, %v2795_v24  ;;  %v2819_v23 = vadd.f32 %v11975_v19, %v2796_v56  ;;  %v2820_v61 = vadd.f32 %v11975_v19, %v2797_v43 }
 0x345   :  { %v2821_v0 = vadd.f32 %v11975_v19, %v2798_v2  ;;  %v2822_v44 = vadd.f32 %v11975_v19, %v2799_v13  ;;  %vm2831_vm7 = vcmp.ge.f32.partialorder %v12006_v3, 0.0  ;;  %vm2832_vm8 = vcmp.ge.f32.partialorder %v2816_v27, 0.0 }
 0x346   :  { %vm2833_vm9 = vcmp.ge.f32.partialorder %v2817_v1, 0.0  ;;  %vm2834_vm10 = vcmp.ge.f32.partialorder %v2818_v26, 0.0  ;;  %vm2835_vm11 = vcmp.ge.f32.partialorder %v2819_v23, 0.0  ;;  %vm2836_vm12 = vcmp.ge.f32.partialorder %v2820_v61, 0.0 }
 0x347   :  { %vm2837_vm13 = vcmp.ge.f32.partialorder %v2821_v0, 0.0  ;;  %vm2838_vm14 = vcmp.ge.f32.partialorder %v2822_v44, 0.0  ;;  %v2845_v50 = vmul.f32 0.2, %v2813_v58  ;;  %v2846_v51 = vmul.f32 0.2, %v12003_v5 }
 0x348   :  { %v2847_v22 = vmul.f32 0.2, %v12006_v3  ;;  %v2848_v59 = vmul.f32 0.2, %v2816_v27  ;;  %v2849_v7 = vmul.f32 0.2, %v2817_v1  ;;  %v2785_v8 = vmul.f32 %v11963_v45, %v11864_v38 }
 0x349   :  { %v2850_v53 = vmul.f32 0.2, %v2818_v26  ;;  %v2851_v10 = vmul.f32 0.2, %v2819_v23  ;;  %v2852_v12 = vmul.f32 0.2, %v2820_v61  ;;  %v2809_v60 = vadd.f32 %v11975_v19, %v2786_v46 }
 0x34a   :  { %v2853_v40 = vmul.f32 0.2, %v2821_v0  ;;  %v2854_v41 = vmul.f32 0.2, %v2822_v44  ;;  %v2864_v14 = vsel %vm2832_vm8, %v2816_v27, %v2848_v59  ;;  %v2865_v55 = vsel %vm2833_vm9, %v2817_v1, %v2849_v7  ;;  %v10346_v7 = vld [vmem:[#allocation20 + $0x48] sm:$0xff]  }
 0x34b   :  { %v2866_v9 = vsel %vm2834_vm10, %v2818_v26, %v2850_v53  ;;  %v2867_v31 = vsel %vm2835_vm11, %v2819_v23, %v2851_v10  ;;  %v2868_v17 = vsel %vm2836_vm12, %v2820_v61, %v2852_v12  ;;  %2880 = vst.msk [vmem:[#allocation9 + $0x48] sm:$0xff] %vm2665_vm0, %v2864_v14  ;;  %2881 = vst.msk [vmem:[#allocation9 + $0x50] sm:$0xff] %vm2665_vm0, %v2865_v55  ;;  %vm2828_vm15 = vcmp.ge.f32.partialorder %v2812_v47, 0.0  ;;  %v10348_v53 = vld [vmem:[#allocation20 + $0xe0] sm:$0xff]   ;;  %v10349_v55 = vld [vmem:[#allocation20 + $0x50] sm:$0xff]  }
 0x34c   :  { %v2869_v38 = vsel %vm2837_vm13, %v2821_v0, %v2853_v40  ;;  %v2870_v20 = vsel %vm2838_vm14, %v2822_v44, %v2854_v41  ;;  %2882 = vst.msk [vmem:[#allocation9 + $0x58] sm:$0xff] %vm2665_vm0, %v2866_v9  ;;  %2883 = vst.msk [vmem:[#allocation9 + $0x60] sm:$0xff] %vm2665_vm0, %v2867_v31  ;;  %v2844_v49 = vmul.f32 0.2, %v2812_v47  ;;  %v2808_v57 = vadd.f32 %v11975_v19, %v2785_v8  ;;  %v10347_v8 = vld [vmem:[#allocation20 + $0x8] sm:$0xff]  }
 0x34d   :  { %2884 = vst.msk [vmem:[#allocation9 + $0x68] sm:$0xff] %vm2665_vm0, %v2868_v17  ;;  %2885 = vst.msk [vmem:[#allocation9 + $0x70] sm:$0xff] %vm2665_vm0, %v2869_v38  ;;  %vm2825_vm3 = vcmp.ge.f32.partialorder %v2809_v60, 0.0  ;;  %v2841_v4 = vmul.f32 0.2, %v2809_v60  ;;  %v2810_v28 = vadd.f32 %v11975_v19, %v11969_v48  ;;  %vm2829_vm8 = vcmp.ge.f32.partialorder %v2813_v58, 0.0  ;;  %9960 = vmatprep.subr.bf16.mxu0 %v10346_v7  ;;  %9994 = vmatprep.subr.bf16.mxu1 %v10348_v53 }
 0x34e   :  { %2886 = vst.msk [vmem:[#allocation9 + $0x78] sm:$0xff] %vm2665_vm0, %v2870_v20  ;;  %v2860_v30 = vsel %vm2828_vm15, %v2812_v47, %v2844_v49  ;;  %vm2824_vm9 = vcmp.ge.f32.partialorder %v2808_v57, 0.0  ;;  %v2840_v33 = vmul.f32 0.2, %v2808_v57  ;;  %v2861_v34 = vsel %vm2829_vm8, %v2813_v58, %v2845_v50  ;;  %v3083_v40 = vld [vmem:[#allocation2 + $0x18] sm:$0x7]  ;;  %9961 = vmatpush3.bf16.msra.mxu0 %v10347_v8 }
 0x34f   :  { %2876 = vst.msk [vmem:[#allocation9 + $0x28] sm:$0xff] %vm2665_vm0, %v2860_v30  ;;  %v2857_v16 = vsel %vm2825_vm3, %v2809_v60, %v2841_v4  ;;  %vm2826_vm10 = vcmp.ge.f32.partialorder %v2810_v28, 0.0  ;;  %v2842_v39 = vmul.f32 0.2, %v2810_v28  ;;  %2877 = vst.msk [vmem:[#allocation9 + $0x30] sm:$0xff] %vm2665_vm0, %v2861_v34  ;;  %vm2827_vm11 = vcmp.ge.f32.partialorder %v11998_v25, 0.0  ;;  %9962 = vmatprep.subr.bf16.mxu0 %v10349_v55 }
 0x350   :  { %v2856_v29 = vsel %vm2824_vm9, %v2808_v57, %v2840_v33  ;;  %2873 = vst.msk [vmem:[#allocation9 + $0x10] sm:$0xff] %vm2665_vm0, %v2857_v16  ;;  %v2843_v11 = vmul.f32 0.2, %v11998_v25  ;;  %v2784_v46 = vmul.f32 %v11963_v45, %v11861_v15  ;;  %v2863_v48 = vsel %vm2831_vm7, %v12006_v3, %v2847_v22  ;;  %v2947_v38 = vld [vmem:[#allocation2 + $0x8] sm:$0x7]  ;;  %v10350_v57 = vld [vmem:[#allocation20 + $0xa0] sm:$0xff]  }
 0x351   :  { %2872 = vst.msk [vmem:[#allocation9 + $0x8] sm:$0xff] %vm2665_vm0, %v2856_v29  ;;  %v2858_v32 = vsel %vm2826_vm10, %v2810_v28, %v2842_v39  ;;  %2879 = vst.msk [vmem:[#allocation9 + $0x40] sm:$0xff] %vm2665_vm0, %v2863_v48  ;;  %vm2830_vm12 = vcmp.ge.f32.partialorder %v12003_v5, 0.0  ;;  %vm2909_vm13 = vcmask 518144   ;;  %vm2910_vm14 = vsmask.f32 2306  ;;  %9995 = vmatpush3.bf16.msra.mxu1 %v10350_v57 }
 0x352   :  { %2874 = vst.msk [vmem:[#allocation9 + $0x18] sm:$0xff] %vm2665_vm0, %v2858_v32  ;;  %v2859_v35 = vsel %vm2827_vm11, %v11998_v25, %v2843_v11  ;;  %v2807_v52 = vadd.f32 %v11975_v19, %v2784_v46  ;;  %v2862_v54 = vsel %vm2830_vm12, %v12003_v5, %v2846_v51  ;;  %v12057_v45 = vld [vmem:[#allocation9 + $0x48] ss:$2 sm:$0xf]  ;;  %vm12099_vm15 = vmand %vm2909_vm13, %vm2910_vm14  ;;  %v10351_v39 = vld [vmem:[#allocation20 + $0x10] sm:$0xff]   ;;  %vm212_vm3 = vcmask 1042432  }
 0x353   :  { %2875 = vst.msk [vmem:[#allocation9 + $0x20] sm:$0xff] %vm2665_vm0, %v2859_v35  ;;  %2878 = vst.msk [vmem:[#allocation9 + $0x38] sm:$0xff] %vm2665_vm0, %v2862_v54  ;;  %v12059_v6 = vld [vmem:[#allocation9 + $0x50] ss:$2 sm:$0xf]  ;;  %v9689_v61 = vpack.c.bf16 %v12057_v45, %v12057_v45  ;;  %v10352_v35 = vld [vmem:[#allocation20 + $0x58] sm:$0xff]   ;;  %9963 = vmatpush3.bf16.msra.mxu0 %v10351_v39 }
 0x354   :  { %vm2823_vm7 = vcmp.ge.f32.partialorder %v2807_v52, 0.0  ;;  %v2839_v15 = vmul.f32 0.2, %v2807_v52  ;;  %v12061_v24 = vld [vmem:[#allocation9 + $0x68] ss:$2 sm:$0xf]  ;;  %v9691_v0 = vpack.c.bf16 %v12059_v6, %v12059_v6  ;;  %9964 = vmatprep.subr.bf16.mxu0 %v10352_v35  ;;  %vm12122_vm8 = vmand %vm212_vm3, %vm213_vm1 }
 0x355   :  { %v12063_v56 = vld [vmem:[#allocation9 + $0x58] ss:$2 sm:$0xf]  ;;  %v12068_v2 = vld [vmem:[#allocation9 + $0x60] ss:$2 sm:$0xf]  ;;  %v9697_v51 = vpack.c.bf16 %v12061_v24, %v12061_v24 }
 0x356   :  { %v3061_v63 = vld [vmem:[#allocation9 + $0x28] ss:$2 sm:$0xf]  ;;  %v2855_v18 = vsel %vm2823_vm7, %v2807_v52, %v2839_v15  ;;  %v12065_v43 = vld [vmem:[#allocation9 + $0x30] ss:$2 sm:$0xf]  ;;  %v9693_v22 = vpack.c.bf16 %v12063_v56, %v12063_v56  ;;  %v9695_v12 = vpack.c.bf16 %v12068_v2, %v12068_v2 }
 0x357   :  { %v9681_v19 = vpack.c.bf16 %v3061_v63, %v3061_v63  ;;  %2871 = vst.msk [vmem:[#allocation9] sm:$0xff] %vm2665_vm0, %v2855_v18  ;;  %v12070_v13 = vld [vmem:[#allocation9 + $0x70] ss:$2 sm:$0xf]  ;;  %v9683_v10 = vpack.c.bf16 %v12065_v43, %v12065_v43  ;;  %v2981_v15 = vld [vmem:[#allocation2 + $0xc] sm:$0x7] }
 0x358   :  { %v3063_v25 = vld [vmem:[#allocation9 + $0x29] ss:$2 sm:$0xf]  ;;  %v2925_v47 = vld [vmem:[#allocation9 + $0x8] ss:$2 sm:$0xf]  ;;  %v9699_v60 = vpack.c.bf16 %v12070_v13, %v12070_v13 }
 0x359   :  { %v2959_v58 = vld [vmem:[#allocation9 + $0x10] ss:$2 sm:$0xf]  ;;  %v9680_v5 = vpack.c.bf16 %v3063_v25, %v3063_v25  ;;  %3090 = vrot.lane.b32.xlu1 %v9681_v19, %s11301_s18  ;;  %v9673_v3 = vpack.c.bf16 %v2925_v47, %v2925_v47  ;;  %v12073_v27 = vld [vmem:[#allocation9 + $0x40] ss:$2 sm:$0xf] }
 0x35a   :  { %v2927_v1 = vld [vmem:[#allocation9 + $0x9] ss:$2 sm:$0xf]  ;;  %v2993_v26 = vld [vmem:[#allocation9 + $0x18] ss:$2 sm:$0xf]  ;;  %v9675_v50 = vpack.c.bf16 %v2959_v58, %v2959_v58  ;;  %v9687_v28 = vpack.c.bf16 %v12073_v27, %v12073_v27 }
 0x35b   :  { %v12075_v23 = vld [vmem:[#allocation9 + $0x20] ss:$2 sm:$0xf]  ;;  %v9672_v44 = vpack.c.bf16 %v2927_v1, %v2927_v1  ;;  %2954 = vrot.lane.b32.xlu0 %v9673_v3, %s11301_s18  ;;  %v3075_v59 = vshrl.u32 %v9680_v5, 16  ;;  %v9677_v9 = vpack.c.bf16 %v2993_v26, %v2993_v26  ;;  %v3078_v17 = vshll.u32 %v9680_v5, 16 }
 0x35c   :  { %v2961_v14 = vld [vmem:[#allocation9 + $0x11] ss:$2 sm:$0xf]  ;;  %v2995_v49 = vld [vmem:[#allocation9 + $0x19] ss:$2 sm:$0xf]  ;;  %v9679_v29 = vpack.c.bf16 %v12075_v23, %v12075_v23 }
 0x35d   :  { %v2939_v41 = vshrl.u32 %v9672_v44, 16  ;;  %2988 = vrot.lane.b32.xlu1 %v9675_v50, %s11301_s18  ;;  %v3077_v31 = vrot.slane %v3075_v59, 7  ;;  %v9674_v20 = vpack.c.bf16 %v2961_v14, %v2961_v14  ;;  %v2942_v34 = vshll.u32 %v9672_v44, 16  ;;  %v3097_v32 = vld [vmem:[#allocation9 + $0x31] ss:$2 sm:$0xf] }
 0x35e   :  { %v12093_v4 = vld [vmem:[#allocation9] ss:$2 sm:$0xf]  ;;  %v9676_v16 = vpack.c.bf16 %v2995_v49, %v2995_v49  ;;  %v9682_v18 = vpack.c.bf16 %v3097_v32, %v3097_v32  ;;  %v3029_v19 = vld [vmem:[#allocation9 + $0x21] ss:$2 sm:$0xf] }
 0x35f   :  { %v2941_v33 = vrot.slane %v2939_v41, 7  ;;  %3022 = vrot.lane.b32.xlu0 %v9677_v9, %s11301_s18  ;;  %v9671_v11 = vpack.c.bf16 %v12093_v4, %v12093_v4  ;;  %v3080_v46 = vor.u32 %v3078_v17, %v3077_v31  ;;  %v2973_v48 = vshrl.u32 %v9674_v20, 16  ;;  %v3015_v58 = vld [vmem:[#allocation2 + $0x10] sm:$0x7]  ;;  %v3117_v8 = vld [vmem:[#allocation2 + $0x1c] sm:$0x7] }
 0x360   :  { %v2976_v54 = vshll.u32 %v9674_v20, 16  ;;  %v3007_v63 = vshrl.u32 %v9676_v16, 16  ;;  %v3010_v47 = vshll.u32 %v9676_v16, 16  ;;  %v9678_v5 = vpack.c.bf16 %v3029_v19, %v3029_v19  ;;  %v10353_v3 = vld [vmem:[#allocation20 + $0x18] sm:$0xff]   ;;  %v10355_v41 = vld [vmem:[#allocation20 + $0x60] sm:$0xff]   ;;  %v10356_v14 = vld [vmem:[#allocation20 + $0xa8] sm:$0xff]  }
 0x361   :  { %v2944_v52 = vor.u32 %v2942_v34, %v2941_v33  ;;  %3124 = vrot.lane.b32.xlu1 %v9683_v10, %s11301_s18  ;;  %v3084_v43 = vsel %vm12099_vm15, %v3080_v46, %v3083_v40  ;;  %v2975_v25 = vrot.slane %v2973_v48, 7  ;;  %v3199_v1 = vld [vmem:[#allocation9 + $0x49] ss:$2 sm:$0xf]  ;;  %v3109_v44 = vshrl.u32 %v9682_v18, 16  ;;  %v10354_v40 = vld [vmem:[#allocation20 + $0xe8] sm:$0xff]   ;;  %9965 = vmatpush3.bf16.msra.mxu0 %v10353_v3 }
 0x362   :  { %3085 = vst [vmem:[#allocation2 + $0x18] sm:$0x7] %v3084_v43  ;;  %v3009_v23 = vrot.slane %v3007_v63, 7  ;;  %v2889_v50 = vld [vmem:[#allocation9 + $0x1] ss:$2 sm:$0xf]  ;;  %v9688_v10 = vpack.c.bf16 %v3199_v1, %v3199_v1  ;;  %9996 = vmatprep.subr.bf16.mxu1 %v10354_v40  ;;  %9966 = vmatprep.subr.bf16.mxu0 %v10355_v41 }
 0x363   :  { %v2948_v26 = vsel %vm12099_vm15, %v2944_v52, %v2947_v38  ;;  %3056 = vrot.lane.b32.xlu0 %v9679_v29, %s11301_s18  ;;  %v2978_v59 = vor.u32 %v2976_v54, %v2975_v25  ;;  %v3112_v7 = vshll.u32 %v9682_v18, 16  ;;  %v3041_v53 = vshrl.u32 %v9678_v5, 16  ;;  %v3049_v17 = vld [vmem:[#allocation2 + $0x14] sm:$0x7]  ;;  %9997 = vmatpush3.bf16.msra.mxu1 %v10356_v14  ;;  %v215_v32 = vld [vmem:[#allocation2] sm:$0x7] }
 0x364   :  { %2949 = vst [vmem:[#allocation2 + $0x8] sm:$0x7] %v2948_v26  ;;  %v3012_v55 = vor.u32 %v3010_v47, %v3009_v23  ;;  %v3111_v9 = vrot.slane %v3109_v44, 7  ;;  %v3044_v31 = vshll.u32 %v9678_v5, 16  ;;  %v9670_v38 = vpack.c.bf16 %v2889_v50, %v2889_v50  ;;  %v10357_v48 = vld [vmem:[#allocation20 + $0x20] sm:$0xff]   ;;  %v10358_v18 = vld [vmem:[#allocation20 + $0x68] sm:$0xff]  }
 0x365   :  { %v3335_v20 = vld [vmem:[#allocation9 + $0x69] ss:$2 sm:$0xf]  ;;  %3226 = vrot.lane.b32.xlu1 %v9689_v61, %s11301_s18  ;;  %v2982_v49 = vsel %vm12099_vm15, %v2978_v59, %v2981_v15  ;;  %v3043_v57 = vrot.slane %v3041_v53, 7  ;;  %v3211_v4 = vshrl.u32 %v9688_v10, 16  ;;  %v3214_v33 = vshll.u32 %v9688_v10, 16  ;;  %9967 = vmatpush3.bf16.msra.mxu0 %v10357_v48 }
 0x366   :  { %v3267_v34 = vld [vmem:[#allocation9 + $0x59] ss:$2 sm:$0xf]  ;;  %2983 = vst [vmem:[#allocation2 + $0xc] sm:$0x7] %v2982_v49  ;;  %v3016_v39 = vsel %vm12099_vm15, %v3012_v55, %v3015_v58  ;;  %v3114_v45 = vor.u32 %v3112_v7, %v3111_v9  ;;  %v2901_v29 = vshrl.u32 %v9670_v38, 16  ;;  %v9696_v15 = vpack.c.bf16 %v3335_v20, %v3335_v20  ;;  %9968 = vmatprep.subr.bf16.mxu0 %v10358_v18 }
 0x367   :  { %v3219_v61 = vld [vmem:[#allocation2 + $0x30] sm:$0x7]  ;;  %v2904_v46 = vshll.u32 %v9670_v38, 16  ;;  %2919 = vrot.lane.b32.xlu0 %v9671_v11, %s11301_s18  ;;  %3017 = vst [vmem:[#allocation2 + $0x10] sm:$0x7] %v3016_v39  ;;  %v3046_v35 = vor.u32 %v3044_v31, %v3043_v57  ;;  %v3213_v52 = vrot.slane %v3211_v4, 7  ;;  %v9692_v63 = vpack.c.bf16 %v3267_v34, %v3267_v34 }
 0x368   :  { %v2912_v54 = vld [vmem:[#allocation2 + $0x4] sm:$0x7]  ;;  %v3301_v19 = vld [vmem:[#allocation9 + $0x61] ss:$2 sm:$0xf]  ;;  %v3118_v43 = vsel %vm12099_vm15, %v3114_v45, %v3117_v8  ;;  %v2903_v25 = vrot.slane %v2901_v29, 7 }
 0x369   :  { %v9694_v47 = vpack.c.bf16 %v3301_v19, %v3301_v19  ;;  %v3233_v58 = vld [vmem:[#allocation9 + $0x51] ss:$2 sm:$0xf]  ;;  %v216_v5 = vsel %vm12122_vm8, 0, %v215_v32  ;;  %3362 = vrot.lane.b32.xlu1 %v9697_v51, %s11301_s18  ;;  %3119 = vst [vmem:[#allocation2 + $0x1c] sm:$0x7] %v3118_v43  ;;  %v3050_v11 = vsel %vm12099_vm15, %v3046_v35, %v3049_v17  ;;  %v3216_v3 = vor.u32 %v3214_v33, %v3213_v52 }
 0x36a   :  { %v3347_v1 = vshrl.u32 %v9696_v15, 16  ;;  %v3350_v26 = vshll.u32 %v9696_v15, 16  ;;  %v3165_v23 = vld [vmem:[#allocation9 + $0x41] ss:$2 sm:$0xf]  ;;  %v2906_v44 = vor.u32 %v2904_v46, %v2903_v25  ;;  %v3279_v59 = vshrl.u32 %v9692_v63, 16 }
 0x36b   :  { %217 = vst [vmem:[#allocation2] sm:$0x7] %v216_v5  ;;  %3051 = vst [vmem:[#allocation2 + $0x14] sm:$0x7] %v3050_v11  ;;  %v3355_v50 = vld [vmem:[#allocation2 + $0x40] sm:$0x7]  ;;  %3294 = vrot.lane.b32.xlu0 %v9693_v22, %s11301_s18  ;;  %v3220_v51 = vsel %vm12099_vm15, %v3216_v3, %v3219_v61  ;;  %v9690_v14 = vpack.c.bf16 %v3233_v58, %v3233_v58  ;;  %v9686_v56 = vpack.c.bf16 %v3165_v23, %v3165_v23 }
 0x36c   :  { %v3282_v7 = vshll.u32 %v9692_v63, 16  ;;  %v10359_v8 = vld [vmem:[#allocation20 + $0x28] sm:$0xff]   ;;  %v3313_v53 = vshrl.u32 %v9694_v47, 16  ;;  %v10360_v10 = vld [vmem:[#allocation20 + $0xf0] sm:$0xff]   ;;  %v3349_v40 = vrot.slane %v3347_v1, 7  ;;  %v3316_v41 = vshll.u32 %v9694_v47, 16 }
 0x36d   :  { %v10362_v24 = vld [vmem:[#allocation20 + $0xb0] sm:$0xff]   ;;  %v3369_v9 = vld [vmem:[#allocation9 + $0x71] ss:$2 sm:$0xf]  ;;  %3221 = vst [vmem:[#allocation2 + $0x30] sm:$0x7] %v3220_v51  ;;  %v2913_v31 = vsel %vm12099_vm15, %v2906_v44, %v2912_v54  ;;  %9998 = vmatprep.subr.bf16.mxu1 %v10360_v10  ;;  %3328 = vrot.lane.b32.xlu1 %v9695_v12, %s11301_s18 }
 0x36e   :  { %v10361_v55 = vld [vmem:[#allocation20 + $0x70] sm:$0xff]   ;;  %v3281_v17 = vrot.slane %v3279_v59, 7  ;;  %v3287_v38 = vld [vmem:[#allocation2 + $0x38] sm:$0x7]  ;;  %v3315_v20 = vrot.slane %v3313_v53, 7  ;;  %v3352_v57 = vor.u32 %v3350_v26, %v3349_v40  ;;  %v3245_v4 = vshrl.u32 %v9690_v14, 16  ;;  %9999 = vmatpush3.bf16.msra.mxu1 %v10362_v24  ;;  %9969 = vmatpush3.bf16.msra.mxu0 %v10359_v8 }
 0x36f   :  { %v3321_v49 = vld [vmem:[#allocation2 + $0x3c] sm:$0x7]  ;;  %v12151_v22 = vld [vmem:[#allocation9 + $0x78] ss:$2 sm:$0xf]  ;;  %v3248_v33 = vshll.u32 %v9690_v14, 16  ;;  %v9698_v34 = vpack.c.bf16 %v3369_v9, %v3369_v9  ;;  %3260 = vrot.lane.b32.xlu0 %v9691_v0, %s11301_s18  ;;  %9970 = vmatprep.subr.bf16.mxu0 %v10361_v55 }
 0x370   :  { %2914 = vst [vmem:[#allocation2 + $0x4] sm:$0x7] %v2913_v31  ;;  %v3403_v39 = vld [vmem:[#allocation9 + $0x79] ss:$2 sm:$0xf]  ;;  %v3284_v45 = vor.u32 %v3282_v7, %v3281_v17  ;;  %v3318_v61 = vor.u32 %v3316_v41, %v3315_v20  ;;  %v3177_v48 = vshrl.u32 %v9686_v56, 16  ;;  %v3356_v2 = vsel %vm12099_vm15, %v3352_v57, %v3355_v50 }
 0x371   :  { %v3253_v29 = vld [vmem:[#allocation2 + $0x34] sm:$0x7]  ;;  %v10363_v46 = vld [vmem:[#allocation20 + $0x30] sm:$0xff]   ;;  %v3180_v32 = vshll.u32 %v9686_v56, 16  ;;  %v3247_v12 = vrot.slane %v3245_v4, 7  ;;  %v3381_v54 = vshrl.u32 %v9698_v34, 16  ;;  %v9700_v0 = vpack.c.bf16 %v3403_v39, %v3403_v39  ;;  %3192 = vrot.lane.b32.xlu1 %v9687_v28, %s11301_s18 }
 0x372   :  { %v3131_v35 = vld [vmem:[#allocation9 + $0x39] ss:$2 sm:$0xf]  ;;  %v3185_v52 = vld [vmem:[#allocation2 + $0x2c] sm:$0x7]  ;;  %v3384_v15 = vshll.u32 %v9698_v34, 16  ;;  %v3288_v19 = vsel %vm12099_vm15, %v3284_v45, %v3287_v38  ;;  %v3322_v43 = vsel %vm12099_vm15, %v3318_v61, %v3321_v49  ;;  %v9701_v50 = vpack.c.bf16 %v12151_v22, %v12151_v22  ;;  %9971 = vmatpush3.bf16.msra.mxu0 %v10363_v46 }
 0x373   :  { %v10364_v63 = vld [vmem:[#allocation20 + $0x78] sm:$0xff]   ;;  %v222_v18 = vld [vmem:[#allocation2 + $0x24] sm:$0x7]  ;;  %3357 = vst [vmem:[#allocation2 + $0x40] sm:$0x7] %v3356_v2  ;;  %v3179_v25 = vrot.slane %v3177_v48, 7  ;;  %v3250_v5 = vor.u32 %v3248_v33, %v3247_v12  ;;  %v9684_v3 = vpack.c.bf16 %v3131_v35, %v3131_v35  ;;  %3396 = vrot.lane.b32.xlu0 %v9699_v60, %s11301_s18 }
 0x374   :  { %v3389_v6 = vld [vmem:[#allocation2 + $0x44] sm:$0x7]  ;;  %v231_v47 = vld [vmem:[#allocation2] sm:$0x1]  ;;  %v293_v58 = vld [vmem:[#allocation2] sm:$0x4]  ;;  %9972 = vmatprep.subr.bf16.mxu0 %v10364_v63 }
 0x375   :  { %3289 = vst [vmem:[#allocation2 + $0x38] sm:$0x7] %v3288_v19  ;;  %3323 = vst [vmem:[#allocation2 + $0x3c] sm:$0x7] %v3322_v43  ;;  %v3383_v11 = vrot.slane %v3381_v54, 7  ;;  %v10366_v1 = vld [vmem:[#allocation20 + $0xf8] sm:$0xff]   ;;  %v3182_v7 = vor.u32 %v3180_v32, %v3179_v25  ;;  %v3254_v53 = vsel %vm12099_vm15, %v3250_v5, %v3253_v29  ;;  %3430 = vrot.lane.b32.xlu1 %v9701_v50, %s11301_s18 }
 0x376   :  { %v232_v26 = vsel %vm11774_vm5, 0, %v231_v47  ;;  %v10371_v23 = vld [vmem:[#allocation20 + $0xb8] sm:$0xff]   ;;  %v218_v44 = vld [vmem:[#allocation2 + $0x28] sm:$0x7]  ;;  %v3415_v27 = vshrl.u32 %v9700_v0, 16  ;;  %v294_v28 = vsel %vm11780_vm6, 0, %v293_v58  ;;  %10000 = vmatprep.subr.bf16.mxu1 %v10366_v1 }
 0x377   :  { %v3129_v59 = vld [vmem:[#allocation9 + $0x38] ss:$2 sm:$0xf]  ;;  %v10365_v8 = vld [vmem:[#allocation20 + $0x38] sm:$0xff]   ;;  %233 = vst [vmem:[#allocation2] sm:$0x1] %v232_v26  ;;  %v3386_v10 = vor.u32 %v3384_v15, %v3383_v11  ;;  %v3186_v14 = vsel %vm12099_vm15, %v3182_v7, %v3185_v52  ;;  %10001 = vmatpush3.bf16.msra.mxu1 %v10371_v23 }
 0x378   :  { %v3418_v24 = vshll.u32 %v9700_v0, 16  ;;  %v3143_v51 = vshrl.u32 %v9684_v3, 16  ;;  %295 = vst [vmem:[#allocation2] sm:$0x4] %v294_v28  ;;  %v10372_v40 = vld [vmem:[#allocation20 + $0x140] sm:$0xff]   ;;  %v3417_v55 = vrot.slane %v3415_v27, 7  ;;  %v9685_v9 = vpack.c.bf16 %v3129_v59, %v3129_v59  ;;  %9973 = vmatpush3.bf16.msra.mxu0 %v10365_v8 }
 0x379   :  { %v10376_v41 = vld [vmem:[#allocation20 + $0x1c0] sm:$0xff]   ;;  %3255 = vst [vmem:[#allocation2 + $0x34] sm:$0x7] %v3254_v53  ;;  %v219_v13 = vsel %vm12122_vm8, 0, %v218_v44  ;;  %v223_v60 = vsel %vm12122_vm8, 0, %v222_v18  ;;  %v3390_v31 = vsel %vm12099_vm15, %v3386_v10, %v3389_v6  ;;  %v3146_v20 = vshll.u32 %v9684_v3, 16  ;;  %10014 = vmatprep.subr.bf16.mxu0 %v10372_v40 }
 0x37a   :  { %3187 = vst [vmem:[#allocation2 + $0x2c] sm:$0x7] %v3186_v14  ;;  %v3423_v17 = vld [vmem:[#allocation2 + $0x48] sm:$0x7]  ;;  %v3145_v38 = vrot.slane %v3143_v51, 7  ;;  %v3420_v49 = vor.u32 %v3418_v24, %v3417_v55  ;;  %10042 = vmatprep.subr.bf16.mxu1 %v10376_v41  ;;  %3158 = vrot.lane.b32.xlu0 %v9685_v9, %s11301_s18  ;;  %vm2922_vm1 = vcmask 1041920  }
 0x37b   :  { %220 = vst [vmem:[#allocation2 + $0x28] sm:$0x7] %v219_v13  ;;  %224 = vst [vmem:[#allocation2 + $0x24] sm:$0x7] %v223_v60  ;;  %v3151_v56 = vld [vmem:[#allocation2 + $0x20] sm:$0x7] }
 0x37c   :  { %3391 = vst [vmem:[#allocation2 + $0x44] sm:$0x7] %v3390_v31  ;;  %v3148_v22 = vor.u32 %v3146_v20, %v3145_v38  ;;  %v3424_v57 = vsel %vm12099_vm15, %v3420_v49, %v3423_v17  ;;  %v225_v39 = vld [vmem:[#allocation2 + $0x4c] sm:$0x7]  ;;  %vm354_vm9 = vsmask.f32 1280 }
 0x37d   :  { %3425 = vst [vmem:[#allocation2 + $0x48] sm:$0x7] %v3424_v57  ;;  %v226_v29 = vsel %vm12122_vm8, 0, %v225_v39  ;;  %vm405_vm10 = vcmask 1041409   ;;  %vm4784_vm3 = vsmask.f32 1282 }
 0x37e   :  { %v3152_v4 = vsel %vm12099_vm15, %v3148_v22, %v3151_v56  ;;  %227 = vst [vmem:[#allocation2 + $0x4c] sm:$0x7] %v226_v29  ;;  %vm12327_vm11 = vmand %vm405_vm10, %vm354_vm9  ;;  %vm4783_vm15 = vcmask 517120  }
 0x37f   :  { %3153 = vst [vmem:[#allocation2 + $0x20] sm:$0x7] %v3152_v4  ;;  %v3434_v33 = vld [vmem:[#allocation2] sm:$0x7]  ;;  %vm12466_vm8 = vmand %vm4783_vm15, %vm4784_vm3  ;;  %vm6628_vm3 = vsmask.f32 3328 }
 0x380   :  { %v9219_v34 = vcombine.low %v3434_v33, %v3434_v33  ;;  %3482 = vst [vmem:[#allocation6] sm:$0x3] %v3434_v33 }
 0x382   :  { %v261_v45 = vld [vmem:[#allocation2 + $0x28] sm:$0x1]  ;;  %v323_v61 = vld [vmem:[#allocation2 + $0x28] sm:$0x4]  ;;  %v3442_v46 = vshrl.u32 %v9219_v34, 16  ;;  %v3444_v48 = vshll.u32 %v9219_v34, 16 }
 0x383   :  { %v262_v32 = vsel %vm11774_vm5, 0, %v261_v45  ;;  %v324_v35 = vsel %vm11780_vm6, 0, %v323_v61  ;;  %v258_v30 = vld [vmem:[#allocation2 + $0x24] sm:$0x1]  ;;  %v320_v52 = vld [vmem:[#allocation2 + $0x24] sm:$0x4] }
 0x384   :  { %263 = vst [vmem:[#allocation2 + $0x28] sm:$0x1] %v262_v32  ;;  %325 = vst [vmem:[#allocation2 + $0x28] sm:$0x4] %v324_v35  ;;  %v3446_v2 = vrot.slane %v3444_v48, 1  ;;  %v259_v12 = vsel %vm11774_vm5, 0, %v258_v30 }
 0x385   :  { %260 = vst [vmem:[#allocation2 + $0x24] sm:$0x1] %v259_v12  ;;  %v321_v16 = vsel %vm11780_vm6, 0, %v320_v52  ;;  %v288_v15 = vld [vmem:[#allocation2 + $0x4c] sm:$0x1] }
 0x386   :  { %v3447_v54 = vor.u32 %v3446_v2, %v3442_v46  ;;  %322 = vst [vmem:[#allocation2 + $0x24] sm:$0x4] %v321_v16  ;;  %v289_v18 = vsel %vm11774_vm5, 0, %v288_v15  ;;  %v350_v19 = vld [vmem:[#allocation2 + $0x4c] sm:$0x4] }
 0x387   :  { %290 = vst [vmem:[#allocation2 + $0x4c] sm:$0x1] %v289_v18  ;;  %v351_v25 = vsel %vm11780_vm6, 0, %v350_v19 }
 0x388   :  { %3483 = vst [vmem:[#allocation6 + $0x8] sm:$0x3] %v3447_v54  ;;  %352 = vst [vmem:[#allocation2 + $0x4c] sm:$0x4] %v351_v25 }
 0x38b   :  { %v3695_v63 = vld [vmem:[#allocation2 + $0x28] sm:$0x7] }
 0x38c   :  { %v9235_v43 = vcombine.low %v3695_v63, %v3695_v63  ;;  %3743 = vst [vmem:[#allocation6 + $0x40] sm:$0x3] %v3695_v63 }
 0x38d   :  { %v3629_v47 = vld [vmem:[#allocation2 + $0x24] sm:$0x7] }
 0x38e   :  { %v3703_v6 = vshrl.u32 %v9235_v43, 16  ;;  %v3705_v0 = vshll.u32 %v9235_v43, 16  ;;  %v9234_v58 = vcombine.low %v3629_v47, %v3629_v47  ;;  %v3676_v5 = vrot.slane %v3629_v47, 2 }
 0x38f   :  { %v3890_v44 = vld [vmem:[#allocation2 + $0x4c] sm:$0x7] }
 0x390   :  { %v3707_v11 = vrot.slane %v3705_v0, 1  ;;  %v3664_v3 = vshrl.u32 %v9234_v58, 16  ;;  %v3666_v1 = vshll.u32 %v9234_v58, 16  ;;  %3692 = vst [vmem:[#allocation6 + $0x30] sm:$0xc0] %v3676_v5  ;;  %v9250_v59 = vcombine.low %v3890_v44, %v3890_v44 }
 0x391   :  { %v3937_v7 = vrot.slane %v3890_v44, 2 }
 0x392   :  { %v3708_v26 = vor.u32 %v3707_v11, %v3703_v6  ;;  %v3668_v23 = vrot.slane %v3666_v1, 1  ;;  %v3925_v27 = vshrl.u32 %v9250_v59, 16  ;;  %v3927_v28 = vshll.u32 %v9250_v59, 16 }
 0x393   :  { %3953 = vst [vmem:[#allocation6 + $0x70] sm:$0xc0] %v3937_v7 }
 0x394   :  { %3744 = vst [vmem:[#allocation6 + $0x48] sm:$0x3] %v3708_v26  ;;  %v3669_v50 = vor.u32 %v3668_v23, %v3664_v3  ;;  %v3929_v53 = vrot.slane %v3927_v28, 1 }
 0x396   :  { %v3677_v8 = vrot.slane %v3669_v50, 2  ;;  %v3930_v10 = vor.u32 %v3929_v53, %v3925_v27 }
 0x398   :  { %3693 = vst [vmem:[#allocation6 + $0x38] sm:$0xc0] %v3677_v8  ;;  %v3938_v24 = vrot.slane %v3930_v10, 2 }
 0x39a   :  { %3954 = vst [vmem:[#allocation6 + $0x78] sm:$0xc0] %v3938_v24 }
 0x3cb   :  { %v3091_v51 = vpop.permute.xlu1 %3090 }
 0x3cc   :  { %3093 = vst.msk [vmem:[#allocation2 + $0x18] sm:$0x3] %vm2922_vm1, %v3091_v51 }
 0x3cd   :  { %v2955_v40 = vpop.permute.xlu0 %2954 }
 0x3ce   :  { %2957 = vst.msk [vmem:[#allocation2 + $0x8] sm:$0x3] %vm2922_vm1, %v2955_v40 }
 0x3cf   :  { %v2989_v41 = vpop.permute.xlu1 %2988 }
 0x3d0   :  { %2991 = vst.msk [vmem:[#allocation2 + $0xc] sm:$0x3] %vm2922_vm1, %v2989_v41 }
 0x3d1   :  { %v3023_v14 = vpop.permute.xlu0 %3022 }
 0x3d2   :  { %3025 = vst.msk [vmem:[#allocation2 + $0x10] sm:$0x3] %vm2922_vm1, %v3023_v14 }
 0x3d3   :  { %v3560_v55 = vld [vmem:[#allocation2 + $0x18] sm:$0x7]  ;;  %v3125_v13 = vpop.permute.xlu1 %3124 }
 0x3d4   :  { %v3626_v60 = vld [vmem:[#allocation2 + $0x18] sm:$0x7]  ;;  %3127 = vst.msk [vmem:[#allocation2 + $0x1c] sm:$0x3] %vm2922_vm1, %v3125_v13  ;;  %v3606_v17 = vrot.slane %v3560_v55, 4  ;;  %v12213_v39 = vcombine.low %v3560_v55, %v3560_v55 }
 0x3d5   :  { %v9231_v9 = vcombine.low %v3626_v60, %v3626_v60  ;;  %v3670_v31 = vrot.slane %v3626_v60, 2  ;;  %v3436_v38 = vld [vmem:[#allocation2 + $0x8] sm:$0x7]  ;;  %v3057_v20 = vpop.permute.xlu0 %3056 }
 0x3d6   :  { %v3490_v49 = vld [vmem:[#allocation2 + $0x8] sm:$0x7]  ;;  %3486 = vst [vmem:[#allocation6 + $0x20] sm:$0x3] %v3436_v38  ;;  %3059 = vst.msk [vmem:[#allocation2 + $0x14] sm:$0x3] %vm2922_vm1, %v3057_v20  ;;  %v12217_v18 = vcombine.low %v3436_v38, %v3436_v38 }
 0x3d7   :  { %v9223_v56 = vcombine.low %v3490_v49, %v3490_v49  ;;  %v3636_v22 = vshll.u32 %v9231_v9, 16  ;;  %v3534_v57 = vrot.slane %v3490_v49, 6  ;;  %3686 = vst [vmem:[#allocation6] sm:$0xc0] %v3670_v31  ;;  %3622 = vst [vmem:[#allocation6 + $0x20] sm:$0x30] %v3606_v17  ;;  %v3227_v34 = vpop.permute.xlu1 %3226 }
 0x3d8   :  { %v3437_v4 = vld [vmem:[#allocation2 + $0xc] sm:$0x7]  ;;  %3229 = vst.msk [vmem:[#allocation2 + $0x30] sm:$0x3] %vm2922_vm1, %v3227_v34  ;;  %v3634_v61 = vshrl.u32 %v9231_v9, 16  ;;  %v3586_v19 = vshrl.u32 %v12213_v39, 16 }
 0x3d9   :  { %v3491_v33 = vld [vmem:[#allocation2 + $0xc] sm:$0x7]  ;;  %3488 = vst [vmem:[#allocation6 + $0x30] sm:$0x3] %v3437_v4  ;;  %v3500_v45 = vshll.u32 %v9223_v56, 16  ;;  %v3638_v29 = vrot.slane %v3636_v22, 1  ;;  %v2920_v48 = vpop.permute.xlu0 %2919  ;;  %v12224_v10 = vcombine.low %v3437_v4, %v3437_v4 }
 0x3da   :  { %3550 = vst [vmem:[#allocation6] sm:$0xc] %v3534_v57  ;;  %v9224_v46 = vcombine.low %v3491_v33, %v3491_v33  ;;  %v3498_v32 = vshrl.u32 %v9223_v56, 16  ;;  %v3558_v35 = vld [vmem:[#allocation2 + $0x10] sm:$0x7]  ;;  %v3536_v30 = vrot.slane %v3491_v33, 6 }
 0x3db   :  { %2923 = vst.msk [vmem:[#allocation2 + $0x4] sm:$0x3] %vm2922_vm1, %v2920_v48  ;;  %v3502_v2 = vrot.slane %v3500_v45, 1  ;;  %v9227_v12 = vcombine.low %v3558_v35, %v3558_v35  ;;  %v3639_v52 = vor.u32 %v3638_v29, %v3634_v61  ;;  %v3602_v16 = vrot.slane %v3558_v35, 4  ;;  %v3627_v54 = vld [vmem:[#allocation2 + $0x1c] sm:$0x7]  ;;  %v3363_v15 = vpop.permute.xlu1 %3362 }
 0x3dc   :  { %v3510_v63 = vshll.u32 %v9224_v46, 16  ;;  %3552 = vst [vmem:[#allocation6 + $0x10] sm:$0xc] %v3536_v30  ;;  %3365 = vst.msk [vmem:[#allocation2 + $0x40] sm:$0x3] %vm2922_vm1, %v3363_v15  ;;  %v3508_v0 = vshrl.u32 %v9224_v46, 16  ;;  %v9232_v3 = vcombine.low %v3627_v54, %v3627_v54 }
 0x3dd   :  { %v3503_v43 = vor.u32 %v3502_v2, %v3498_v32  ;;  %v3568_v25 = vshll.u32 %v9227_v12, 16  ;;  %v3671_v6 = vrot.slane %v3639_v52, 2  ;;  %3618 = vst [vmem:[#allocation6] sm:$0x30] %v3602_v16  ;;  %v3559_v47 = vld [vmem:[#allocation2 + $0x14] sm:$0x7]  ;;  %v3295_v58 = vpop.permute.xlu0 %3294 }
 0x3de   :  { %v3566_v5 = vshrl.u32 %v9227_v12, 16  ;;  %v3512_v11 = vrot.slane %v3510_v63, 1  ;;  %v3672_v1 = vrot.slane %v3627_v54, 2  ;;  %v12221_v26 = vld [vmem:[#allocation2 + $0x10] sm:$0x7]  ;;  %v9228_v50 = vcombine.low %v3559_v47, %v3559_v47 }
 0x3df   :  { %3297 = vst.msk [vmem:[#allocation2 + $0x38] sm:$0x3] %vm2922_vm1, %v3295_v58  ;;  %v3535_v23 = vrot.slane %v3503_v43, 6  ;;  %v3570_v44 = vrot.slane %v3568_v25, 1  ;;  %3687 = vst [vmem:[#allocation6 + $0x8] sm:$0xc0] %v3671_v6  ;;  %v3329_v27 = vpop.permute.xlu1 %3328  ;;  %v12240_v29 = vcombine.low %v12221_v26, %v12221_v26 }
 0x3e0   :  { %v3604_v59 = vrot.slane %v3559_v47, 4  ;;  %v3697_v7 = vld [vmem:[#allocation2 + $0x30] sm:$0x7]  ;;  %v3513_v28 = vor.u32 %v3512_v11, %v3508_v0  ;;  %v3646_v53 = vshll.u32 %v9232_v3, 16  ;;  %3688 = vst [vmem:[#allocation6 + $0x10] sm:$0xc0] %v3672_v1 }
 0x3e1   :  { %v3751_v8 = vld [vmem:[#allocation2 + $0x30] sm:$0x7]  ;;  %v3588_v24 = vshll.u32 %v12213_v39, 16  ;;  %v12227_v51 = vld [vmem:[#allocation2 + $0x1c] sm:$0x7]  ;;  %v3571_v41 = vor.u32 %v3570_v44, %v3566_v5  ;;  %v3578_v14 = vshll.u32 %v9228_v50, 16  ;;  %v3261_v9 = vpop.permute.xlu0 %3260  ;;  %v12253_v1 = vcombine.low %v3697_v7, %v3697_v7 }
 0x3e2   :  { %v12229_v40 = vld [vmem:[#allocation2 + $0x14] sm:$0x7]  ;;  %3747 = vst [vmem:[#allocation6 + $0x60] sm:$0x3] %v3697_v7  ;;  %3331 = vst.msk [vmem:[#allocation2 + $0x3c] sm:$0x3] %vm2922_vm1, %v3329_v27  ;;  %v9239_v55 = vcombine.low %v3751_v8, %v3751_v8  ;;  %v12236_v61 = vcombine.low %v12227_v51, %v12227_v51 }
 0x3e3   :  { %3551 = vst [vmem:[#allocation6 + $0x8] sm:$0xc] %v3535_v23  ;;  %3620 = vst [vmem:[#allocation6 + $0x10] sm:$0x30] %v3604_v59  ;;  %v3464_v13 = vshrl.u32 %v12217_v18, 16  ;;  %v3537_v31 = vrot.slane %v3513_v28, 6  ;;  %v3193_v33 = vpop.permute.xlu1 %3192  ;;  %v12245_v35 = vcombine.low %v12229_v40, %v12229_v40 }
 0x3e4   :  { %v3435_v60 = vld [vmem:[#allocation2 + $0x4] sm:$0x7]  ;;  %v3644_v17 = vshrl.u32 %v9232_v3, 16  ;;  %v3648_v38 = vrot.slane %v3646_v53, 1  ;;  %v3795_v20 = vrot.slane %v3751_v8, 6  ;;  %v3603_v49 = vrot.slane %v3571_v41, 4 }
 0x3e5   :  { %3484 = vst [vmem:[#allocation6 + $0x10] sm:$0x3] %v3435_v60  ;;  %3263 = vst.msk [vmem:[#allocation2 + $0x34] sm:$0x3] %vm2922_vm1, %v3261_v9  ;;  %v9220_v56 = vcombine.low %v3435_v60, %v3435_v60  ;;  %v3576_v22 = vshrl.u32 %v9228_v50, 16  ;;  %v3580_v57 = vrot.slane %v3578_v14, 1  ;;  %v3397_v2 = vpop.permute.xlu0 %3396 }
 0x3e6   :  { %v3887_v4 = vld [vmem:[#allocation2 + $0x40] sm:$0x7]  ;;  %3553 = vst [vmem:[#allocation6 + $0x18] sm:$0xc] %v3537_v31  ;;  %v3649_v34 = vor.u32 %v3648_v38, %v3644_v17  ;;  %v3761_v45 = vshll.u32 %v9239_v55, 16  ;;  %v3759_v52 = vshrl.u32 %v9239_v55, 16 }
 0x3e7   :  { %3811 = vst [vmem:[#allocation6 + $0x40] sm:$0xc] %v3795_v20  ;;  %3195 = vst.msk [vmem:[#allocation2 + $0x2c] sm:$0x3] %vm2922_vm1, %v3193_v33  ;;  %v3455_v46 = vshll.u32 %v9220_v56, 16  ;;  %v3581_v48 = vor.u32 %v3580_v57, %v3576_v22  ;;  %v9247_v32 = vcombine.low %v3887_v4, %v3887_v4  ;;  %v3475_v54 = vshrl.u32 %v12224_v10, 16  ;;  %v3431_v58 = vpop.permute.xlu1 %3430 }
 0x3e8   :  { %3619 = vst [vmem:[#allocation6 + $0x8] sm:$0x30] %v3603_v49  ;;  %v3819_v30 = vld [vmem:[#allocation2 + $0x38] sm:$0x7]  ;;  %v3673_v12 = vrot.slane %v3649_v34, 2  ;;  %v3763_v16 = vrot.slane %v3761_v45, 1 }
 0x3e9   :  { %v12248_v15 = vld [vmem:[#allocation2 + $0x40] sm:$0x7]  ;;  %3399 = vst.msk [vmem:[#allocation2 + $0x44] sm:$0x3] %vm2922_vm1, %v3397_v2  ;;  %v3453_v63 = vshrl.u32 %v9220_v56, 16  ;;  %v3457_v43 = vrot.slane %v3455_v46, 1  ;;  %v9243_v6 = vcombine.low %v3819_v30, %v3819_v30 }
 0x3ea   :  { %v3605_v25 = vrot.slane %v3581_v48, 4  ;;  %v12251_v0 = vld [vmem:[#allocation2 + $0x38] sm:$0x7]  ;;  %v3820_v47 = vld [vmem:[#allocation2 + $0x3c] sm:$0x7]  ;;  %v3764_v5 = vor.u32 %v3763_v16, %v3759_v52  ;;  %v3897_v11 = vshll.u32 %v9247_v32, 16  ;;  %v12260_v7 = vcombine.low %v12248_v15, %v12248_v15 }
 0x3eb   :  { %3689 = vst [vmem:[#allocation6 + $0x18] sm:$0xc0] %v3673_v12  ;;  %v3863_v3 = vrot.slane %v3819_v30, 4  ;;  %v12255_v23 = vld [vmem:[#allocation2 + $0x3c] sm:$0x7]  ;;  %v3458_v44 = vor.u32 %v3457_v43, %v3453_v63  ;;  %v3829_v50 = vshll.u32 %v9243_v6, 16  ;;  %v9244_v55 = vcombine.low %v3820_v47, %v3820_v47 }
 0x3ec   :  { %3433 = vst.msk [vmem:[#allocation2 + $0x48] sm:$0x3] %vm2922_vm1, %v3431_v58  ;;  %3621 = vst [vmem:[#allocation6 + $0x18] sm:$0x30] %v3605_v25  ;;  %v3895_v59 = vshrl.u32 %v9247_v32, 16  ;;  %v3931_v8 = vrot.slane %v3887_v4, 2  ;;  %v3159_v53 = vpop.permute.xlu0 %3158  ;;  %v12265_v4 = vcombine.low %v12251_v0, %v12251_v0  ;;  %v12269_v33 = vcombine.low %v12255_v23, %v12255_v23 }
 0x3ed   :  { %v3698_v27 = vld [vmem:[#allocation2 + $0x34] sm:$0x7]  ;;  %v3796_v41 = vrot.slane %v3764_v5, 6  ;;  %v3827_v14 = vshrl.u32 %v9243_v6, 16  ;;  %3879 = vst [vmem:[#allocation6 + $0x40] sm:$0x30] %v3863_v3 }
 0x3ee   :  { %v3752_v28 = vld [vmem:[#allocation2 + $0x34] sm:$0x7]  ;;  %3749 = vst [vmem:[#allocation6 + $0x70] sm:$0x3] %v3698_v27  ;;  %3161 = vst.msk [vmem:[#allocation2 + $0x20] sm:$0x3] %vm2922_vm1, %v3159_v53  ;;  %v12271_v16 = vcombine.low %v3698_v27, %v3698_v27 }
 0x3ef   :  { %v10373_v60 = vld [vmem:[#allocation20 + $0x100] sm:$0xff]   ;;  %3485 = vst [vmem:[#allocation6 + $0x18] sm:$0x3] %v3458_v44  ;;  %v3831_v9 = vrot.slane %v3829_v50, 1  ;;  %v3899_v31 = vrot.slane %v3897_v11, 1  ;;  %v9240_v17 = vcombine.low %v3752_v28, %v3752_v28  ;;  %v3797_v38 = vrot.slane %v3752_v28, 6 }
 0x3f0   :  { %3947 = vst [vmem:[#allocation6 + $0x40] sm:$0xc0] %v3931_v8  ;;  %v3696_v20 = vld [vmem:[#allocation2 + $0x2c] sm:$0x7]  ;;  %v3956_v49 = vld [vmem:[#allocation6 + $0x8] sm:$0xff]  ;;  %v3839_v22 = vshll.u32 %v9244_v55, 16 }
 0x3f1   :  { %v10374_v56 = vld [vmem:[#allocation20 + $0x148] sm:$0xff]   ;;  %3812 = vst [vmem:[#allocation6 + $0x48] sm:$0xc] %v3796_v41  ;;  %v3865_v57 = vrot.slane %v3820_v47, 4  ;;  %3745 = vst [vmem:[#allocation6 + $0x50] sm:$0x3] %v3696_v20  ;;  %4515 = vmatprep.mubr.bf16.mxu0 %v3956_v49  ;;  %v3832_v45 = vor.u32 %v3831_v9, %v3827_v14  ;;  %v3900_v46 = vor.u32 %v3899_v31, %v3895_v59 }
 0x3f2   :  { %v3955_v34 = vld [vmem:[#allocation6] sm:$0xff]  ;;  %v9236_v48 = vcombine.low %v3696_v20, %v3696_v20  ;;  %v3837_v32 = vshrl.u32 %v9244_v55, 16  ;;  %3813 = vst [vmem:[#allocation6 + $0x50] sm:$0xc] %v3797_v38  ;;  %v3888_v30 = vld [vmem:[#allocation2 + $0x44] sm:$0x7] }
 0x3f3   :  { %4516 = vmatmul.mubr.bf16.vlgmr.msra.gmra.mrb[0].mxu0 %v3955_v34  ;;  %v3769_v2 = vshrl.u32 %v9240_v17, 16  ;;  %v3771_v12 = vshll.u32 %v9240_v17, 16  ;;  %v3841_v52 = vrot.slane %v3839_v22, 1  ;;  %3881 = vst [vmem:[#allocation6 + $0x50] sm:$0x30] %v3865_v57  ;;  %v10375_v63 = vld [vmem:[#allocation20 + $0x108] sm:$0xff]   ;;  %v9248_v44 = vcombine.low %v3888_v30, %v3888_v30 }
 0x3f4   :  { %10015 = vmatpush3.bf16.msra.mxu0 %v10373_v60  ;;  %v3864_v43 = vrot.slane %v3832_v45, 4  ;;  %v3932_v25 = vrot.slane %v3900_v46, 2  ;;  %v3714_v6 = vshrl.u32 %v9236_v48, 16  ;;  %v3716_v47 = vshll.u32 %v9236_v48, 16  ;;  %v12273_v58 = vld [vmem:[#allocation2 + $0x48] sm:$0x7] }
 0x3f5   :  { %10016 = vmatprep.subr.bf16.mxu0 %v10374_v56  ;;  %v10378_v5 = vld [vmem:[#allocation20 + $0x150] sm:$0xff]   ;;  %v3773_v11 = vrot.slane %v3771_v12, 1  ;;  %v3842_v3 = vor.u32 %v3841_v52, %v3837_v32  ;;  %v3933_v50 = vrot.slane %v3888_v30, 2  ;;  %v10377_v59 = vld [vmem:[#allocation20 + $0x180] sm:$0xff]   ;;  %v3477_v27 = vshll.u32 %v12224_v10, 16  ;;  %v10380_v14 = vld [vmem:[#allocation20 + $0x1c8] sm:$0xff]  }
 0x3f6   :  { %3880 = vst [vmem:[#allocation6 + $0x48] sm:$0x30] %v3864_v43  ;;  %3948 = vst [vmem:[#allocation6 + $0x48] sm:$0xc0] %v3932_v25  ;;  %v3718_v8 = vrot.slane %v3716_v47, 1  ;;  %v3528_v28 = vshrl.u32 %v12245_v35, 16  ;;  %v12280_v31 = vcombine.low %v12273_v58, %v12273_v58 }
 0x3f7   :  { %v3530_v53 = vshll.u32 %v12245_v35, 16  ;;  %v3958_v41 = vld [vmem:[#allocation6 + $0x18] sm:$0xff]  ;;  %v3774_v55 = vor.u32 %v3773_v11, %v3769_v2  ;;  %v3866_v60 = vrot.slane %v3842_v3, 4  ;;  %v3905_v9 = vshrl.u32 %v9248_v44, 16  ;;  %3949 = vst [vmem:[#allocation6 + $0x50] sm:$0xc0] %v3933_v50 }
 0x3f8   :  { %10017 = vmatpush3.bf16.msra.mxu0 %v10375_v63  ;;  %4564 = vmatprep.mubr.bf16.mxu1 %v3958_v41  ;;  %v3957_v17 = vld [vmem:[#allocation6 + $0x10] sm:$0xff]  ;;  %v3719_v49 = vor.u32 %v3718_v8, %v3714_v6  ;;  %v3907_v56 = vshll.u32 %v9248_v44, 16  ;;  %v3479_v22 = vrot.slane %v3477_v27, 1  ;;  %v3628_v35 = vld [vmem:[#allocation2 + $0x20] sm:$0x7]  ;;  %v3596_v45 = vshrl.u32 %v12236_v61, 16 }
 0x3f9   :  { %v10379_v38 = vld [vmem:[#allocation20 + $0x110] sm:$0xff]   ;;  %v10383_v20 = vld [vmem:[#allocation20 + $0x158] sm:$0xff]   ;;  %v3532_v57 = vrot.slane %v3530_v53, 1  ;;  %4565 = vmatmul.mubr.bf16.vlgmr.msra.gmra.mrb[128].mxu1 %v3957_v17  ;;  %10018 = vmatprep.subr.bf16.mxu0 %v10378_v5  ;;  %v3798_v34 = vrot.slane %v3774_v55, 6  ;;  %3882 = vst [vmem:[#allocation6 + $0x58] sm:$0x30] %v3866_v60  ;;  %v9233_v10 = vcombine.low %v3628_v35, %v3628_v35 }
 0x3fa   :  { %v3598_v46 = vshll.u32 %v12236_v61, 16  ;;  %v3466_v48 = vshll.u32 %v12217_v18, 16  ;;  %10043 = vmatpush3.bf16.msra.mxu1 %v10377_v59  ;;  %v10381_v32 = vld [vmem:[#allocation20 + $0x188] sm:$0xff]   ;;  %3746 = vst [vmem:[#allocation6 + $0x58] sm:$0x3] %v3719_v49  ;;  %v3909_v30 = vrot.slane %v3907_v56, 1  ;;  %v3480_v2 = vor.u32 %v3479_v22, %v3475_v54 }
 0x3fb   :  { %v3533_v12 = vor.u32 %v3532_v57, %v3528_v28  ;;  %v3518_v52 = vshrl.u32 %v12240_v29, 16  ;;  %10044 = vmatprep.subr.bf16.mxu1 %v10380_v14  ;;  %v10385_v63 = vld [vmem:[#allocation20 + $0x1d0] sm:$0xff]   ;;  %3814 = vst [vmem:[#allocation6 + $0x58] sm:$0xc] %v3798_v34  ;;  %v3520_v6 = vshll.u32 %v12240_v29, 16  ;;  %v3590_v61 = vrot.slane %v3588_v24, 1 }
 0x3fc   :  { %v3600_v43 = vrot.slane %v3598_v46, 1  ;;  %v3468_v25 = vrot.slane %v3466_v48, 1  ;;  %10019 = vmatpush3.bf16.msra.mxu0 %v10379_v38  ;;  %v10384_v47 = vld [vmem:[#allocation20 + $0x118] sm:$0xff]   ;;  %v3910_v5 = vor.u32 %v3909_v30, %v3905_v9  ;;  %3489 = vst [vmem:[#allocation6 + $0x38] sm:$0x3] %v3480_v2  ;;  %v3538_v54 = vrot.slane %v12221_v26, 6 }
 0x3fd   :  { %v3541_v11 = vrot.slane %v3533_v12, 6  ;;  %v3964_v3 = vld [vmem:[#allocation6 + $0x48] sm:$0xff]  ;;  %10020 = vmatprep.subr.bf16.mxu0 %v10383_v20  ;;  %v10387_v44 = vld [vmem:[#allocation20 + $0x160] sm:$0xff]   ;;  %v3522_v8 = vrot.slane %v3520_v6, 1  ;;  %v3591_v29 = vor.u32 %v3590_v61, %v3586_v19  ;;  %v3654_v53 = vshrl.u32 %v9233_v10, 16  ;;  %v10389_v14 = vld [vmem:[#allocation20 + $0x1d8] sm:$0xff]  }
 0x3fe   :  { %v3601_v50 = vor.u32 %v3600_v43, %v3596_v45  ;;  %v3469_v59 = vor.u32 %v3468_v25, %v3464_v13  ;;  %10045 = vmatpush3.bf16.msra.mxu1 %v10381_v32  ;;  %4523 = vmatprep.mubr.bf16.mxu0 %v3964_v3  ;;  %v3963_v24 = vld [vmem:[#allocation6 + $0x40] sm:$0xff]  ;;  %v10386_v27 = vld [vmem:[#allocation20 + $0x190] sm:$0xff]   ;;  %v3934_v28 = vrot.slane %v3910_v5, 2  ;;  %v3656_v41 = vshll.u32 %v9233_v10, 16  ;;  %3554 = vst [vmem:[#allocation6 + $0x20] sm:$0xc] %v3538_v54 }
 0x3ff   :  { %3557 = vst [vmem:[#allocation6 + $0x38] sm:$0xc] %v3541_v11  ;;  %v3674_v26 = vrot.slane %v3628_v35, 2  ;;  %4524 = vmatmul.mubr.bf16.gmra.mrb[4].mxu0 %v3963_v24  ;;  %10046 = vmatprep.subr.bf16.mxu1 %v10385_v63  ;;  %v3523_v18 = vor.u32 %v3522_v8, %v3518_v52  ;;  %v3607_v13 = vrot.slane %v3591_v29, 4  ;;  %v3725_v39 = vshrl.u32 %v12253_v1, 16  ;;  %v10388_v19 = vld [vmem:[#allocation20 + $0x120] sm:$0xff]  }
 0x400   :  { %v3609_v55 = vrot.slane %v3601_v50, 4  ;;  %3487 = vst [vmem:[#allocation6 + $0x28] sm:$0x3] %v3469_v59  ;;  %10021 = vmatpush3.bf16.msra.mxu0 %v10384_v47  ;;  %3950 = vst [vmem:[#allocation6 + $0x58] sm:$0xc0] %v3934_v28  ;;  %v3658_v60 = vrot.slane %v3656_v41, 1 }
 0x401   :  { %3690 = vst [vmem:[#allocation6 + $0x20] sm:$0xc0] %v3674_v26  ;;  %v3727_v9 = vshll.u32 %v12253_v1, 16  ;;  %v3779_v17 = vshrl.u32 %v12265_v4, 16  ;;  %v3781_v38 = vshll.u32 %v12265_v4, 16  ;;  %10022 = vmatprep.subr.bf16.mxu0 %v10387_v44  ;;  %v10391_v20 = vld [vmem:[#allocation20 + $0x168] sm:$0xff]  }
 0x402   :  { %3625 = vst [vmem:[#allocation6 + $0x38] sm:$0x30] %v3609_v55  ;;  %v3539_v49 = vrot.slane %v3523_v18, 6  ;;  %3623 = vst [vmem:[#allocation6 + $0x28] sm:$0x30] %v3607_v13  ;;  %v3847_v56 = vshrl.u32 %v12260_v7, 16  ;;  %10047 = vmatpush3.bf16.msra.mxu1 %v10386_v27  ;;  %v3659_v45 = vor.u32 %v3658_v60, %v3654_v53 }
 0x403   :  { %v3849_v22 = vshll.u32 %v12260_v7, 16  ;;  %v3915_v57 = vshrl.u32 %v12280_v31, 16  ;;  %v10390_v35 = vld [vmem:[#allocation20 + $0x198] sm:$0xff]   ;;  %v10393_v34 = vld [vmem:[#allocation20 + $0x1e0] sm:$0xff]   ;;  %v3729_v1 = vrot.slane %v3727_v9, 1  ;;  %v3783_v46 = vrot.slane %v3781_v38, 1  ;;  %10048 = vmatprep.subr.bf16.mxu1 %v10389_v14 }
 0x404   :  { %v3917_v48 = vshll.u32 %v12280_v31, 16  ;;  %v12304_v4 = vld [vmem:[#allocation2 + $0x44] sm:$0x7]  ;;  %3555 = vst [vmem:[#allocation6 + $0x28] sm:$0xc] %v3539_v49  ;;  %v3540_v30 = vrot.slane %v12229_v40, 6  ;;  %10023 = vmatpush3.bf16.msra.mxu0 %v10388_v19 }
 0x405   :  { %v3851_v32 = vrot.slane %v3849_v22, 1  ;;  %v3608_v2 = vrot.slane %v12227_v51, 4  ;;  %v3736_v7 = vshrl.u32 %v12271_v16, 16  ;;  %v10392_v12 = vld [vmem:[#allocation20 + $0x128] sm:$0xff]   ;;  %v3675_v52 = vrot.slane %v3659_v45, 2  ;;  %10024 = vmatprep.subr.bf16.mxu0 %v10391_v20  ;;  %v10396_v6 = vld [vmem:[#allocation20 + $0x170] sm:$0xff]  }
 0x406   :  { %v3730_v63 = vor.u32 %v3729_v1, %v3725_v39  ;;  %v3784_v43 = vor.u32 %v3783_v46, %v3779_v17  ;;  %v3919_v25 = vrot.slane %v3917_v48, 1  ;;  %3556 = vst [vmem:[#allocation6 + $0x30] sm:$0xc] %v3540_v30  ;;  %v3738_v61 = vshll.u32 %v12271_v16, 16  ;;  %10049 = vmatpush3.bf16.msra.mxu1 %v10390_v35  ;;  %v10395_v51 = vld [vmem:[#allocation20 + $0x1a0] sm:$0xff]   ;;  %v10398_v44 = vld [vmem:[#allocation20 + $0x1e8] sm:$0xff]  }
 0x407   :  { %v3852_v31 = vor.u32 %v3851_v32, %v3847_v56  ;;  %3624 = vst [vmem:[#allocation6 + $0x30] sm:$0x30] %v3608_v2  ;;  %v3789_v47 = vshrl.u32 %v12269_v33, 16  ;;  %v3791_v40 = vshll.u32 %v12269_v33, 16  ;;  %3691 = vst [vmem:[#allocation6 + $0x28] sm:$0xc0] %v3675_v52  ;;  %v9246_v10 = vcombine.low %v12304_v4, %v12304_v4  ;;  %10050 = vmatprep.subr.bf16.mxu1 %v10393_v34 }
 0x408   :  { %3748 = vst [vmem:[#allocation6 + $0x68] sm:$0x3] %v3730_v63  ;;  %v3800_v5 = vrot.slane %v3784_v43, 6  ;;  %v3920_v11 = vor.u32 %v3919_v25, %v3915_v57  ;;  %v3799_v54 = vrot.slane %v12251_v0, 6  ;;  %v3966_v3 = vld [vmem:[#allocation6 + $0x58] sm:$0xff]  ;;  %v3740_v16 = vrot.slane %v3738_v61, 1  ;;  %10025 = vmatpush3.bf16.msra.mxu0 %v10392_v12 }
 0x409   :  { %v3868_v50 = vrot.slane %v3852_v31, 4  ;;  %v3793_v59 = vrot.slane %v3791_v40, 1  ;;  %v3867_v8 = vrot.slane %v12248_v15, 4  ;;  %4572 = vmatprep.mubr.bf16.mxu1 %v3966_v3  ;;  %v3965_v33 = vld [vmem:[#allocation6 + $0x50] sm:$0xff]  ;;  %v3859_v27 = vshll.u32 %v9246_v10, 16  ;;  %v3962_v0 = vld [vmem:[#allocation6 + $0x38] sm:$0xff]  ;;  %10026 = vmatprep.subr.bf16.mxu0 %v10396_v6 }
 0x40a   :  { %v10397_v29 = vld [vmem:[#allocation20 + $0x130] sm:$0xff]   ;;  %3816 = vst [vmem:[#allocation6 + $0x68] sm:$0xc] %v3800_v5  ;;  %v3936_v24 = vrot.slane %v3920_v11, 2  ;;  %3815 = vst [vmem:[#allocation6 + $0x60] sm:$0xc] %v3799_v54  ;;  %4573 = vmatmul.mubr.bf16.gmra.mrb[132].mxu1 %v3965_v33  ;;  %v3741_v41 = vor.u32 %v3740_v16, %v3736_v7 }
 0x40b   :  { %v3935_v28 = vrot.slane %v12273_v58, 2  ;;  %v10400_v53 = vld [vmem:[#allocation20 + $0x178] sm:$0xff]   ;;  %3884 = vst [vmem:[#allocation6 + $0x68] sm:$0x30] %v3868_v50  ;;  %v3794_v26 = vor.u32 %v3793_v59, %v3789_v47  ;;  %3883 = vst [vmem:[#allocation6 + $0x60] sm:$0x30] %v3867_v8  ;;  %4662 = vmatprep.mubr.bf16.mxu1 %v3962_v0  ;;  %10051 = vmatpush3.bf16.msra.mxu1 %v10395_v51 }
 0x40c   :  { %v3801_v15 = vrot.slane %v12255_v23, 6  ;;  %v3869_v14 = vrot.slane %v12304_v4, 4  ;;  %v10399_v55 = vld [vmem:[#allocation20 + $0x1a8] sm:$0xff]   ;;  %3952 = vst [vmem:[#allocation6 + $0x68] sm:$0xc0] %v3936_v24  ;;  %v3857_v18 = vshrl.u32 %v9246_v10, 16  ;;  %10052 = vmatprep.subr.bf16.mxu1 %v10398_v44  ;;  %10027 = vmatpush3.bf16.msra.mxu0 %v10397_v29 }
 0x40d   :  { %v3861_v13 = vrot.slane %v3859_v27, 1  ;;  %3951 = vst [vmem:[#allocation6 + $0x60] sm:$0xc0] %v3935_v28  ;;  %v10402_v58 = vld [vmem:[#allocation20 + $0x1f0] sm:$0xff]   ;;  %3750 = vst [vmem:[#allocation6 + $0x78] sm:$0x3] %v3741_v41  ;;  %10028 = vmatprep.subr.bf16.mxu0 %v10400_v53 }
 0x40e   :  { %v3802_v39 = vrot.slane %v3794_v26, 6  ;;  %3817 = vst [vmem:[#allocation6 + $0x70] sm:$0xc] %v3801_v15  ;;  %3885 = vst [vmem:[#allocation6 + $0x70] sm:$0x30] %v3869_v14  ;;  %v10401_v19 = vld [vmem:[#allocation20 + $0x138] sm:$0xff]  }
 0x40f   :  { %v3862_v60 = vor.u32 %v3861_v13, %v3857_v18  ;;  %v3960_v9 = vld [vmem:[#allocation6 + $0x28] sm:$0xff]  ;;  %10053 = vmatpush3.bf16.msra.mxu1 %v10399_v55  ;;  %v10404_v38 = vld [vmem:[#allocation20 + $0x1f8] sm:$0xff]   ;;  %v3959_v20 = vld [vmem:[#allocation6 + $0x20] sm:$0xff]  ;;  %vm13157_vm1 = vcmask 1041408  }
 0x410   :  { %3818 = vst [vmem:[#allocation6 + $0x78] sm:$0xc] %v3802_v39  ;;  %4613 = vmatprep.mubr.bf16.mxu0 %v3960_v9  ;;  %v10403_v23 = vld [vmem:[#allocation20 + $0x1b0] sm:$0xff]   ;;  %10054 = vmatprep.subr.bf16.mxu1 %v10402_v58  ;;  %v10405_v49 = vld [vmem:[#allocation20 + $0x1b8] sm:$0xff]   ;;  %v375_v44 = vld [vmem:[#allocation3 + $0x4] sm:$0x1] }
 0x411   :  { %v3870_v17 = vrot.slane %v3862_v60, 4  ;;  %10029 = vmatpush3.bf16.msra.mxu0 %v10401_v19  ;;  %v3961_v22 = vld [vmem:[#allocation6 + $0x30] sm:$0xff]  ;;  %v372_v5 = vld [vmem:[#allocation3 + $0x2] sm:$0x1]  ;;  %v410_v54 = vld [vmem:[#allocation3 + $0x2] sm:$0x2] }
 0x412   :  { %v373_v11 = vsel %vm11774_vm5, 0, %v372_v5  ;;  %v411_v3 = vsel %vm12327_vm11, 0, %v410_v54  ;;  %v413_v50 = vld [vmem:[#allocation3 + $0x4] sm:$0x2]  ;;  %v378_v16 = vld [vmem:[#allocation3 + $0x6] sm:$0x1] }
 0x413   :  { %3886 = vst [vmem:[#allocation6 + $0x78] sm:$0x30] %v3870_v17  ;;  %10055 = vmatpush3.bf16.msra.mxu1 %v10403_v23  ;;  %v3968_v56 = vld [vmem:[#allocation6 + $0x68] sm:$0xff]  ;;  %374 = vst [vmem:[#allocation3 + $0x2] sm:$0x1] %v373_v11  ;;  %v376_v8 = vsel %vm11774_vm5, 0, %v375_v44 }
 0x414   :  { %4614 = vmatmul.mubr.bf16.vlgmr.msra.gmra.mrb[8].mxu0 %v3959_v20  ;;  %10056 = vmatprep.subr.bf16.mxu1 %v10404_v38  ;;  %v3967_v35 = vld [vmem:[#allocation6 + $0x60] sm:$0xff]  ;;  %412 = vst [vmem:[#allocation3 + $0x2] sm:$0x2] %v411_v3  ;;  %v414_v33 = vsel %vm12327_vm11, 0, %v413_v50  ;;  %v379_v29 = vsel %vm11774_vm5, 0, %v378_v16 }
 0x415   :  { %4621 = vmatprep.mubr.bf16.mxu0 %v3968_v56  ;;  %v3969_v34 = vld [vmem:[#allocation6 + $0x70] sm:$0xff]  ;;  %v416_v24 = vld [vmem:[#allocation3 + $0x6] sm:$0x2]  ;;  %377 = vst [vmem:[#allocation3 + $0x4] sm:$0x1] %v376_v8 }
 0x416   :  { %415 = vst [vmem:[#allocation3 + $0x4] sm:$0x2] %v414_v33  ;;  %380 = vst [vmem:[#allocation3 + $0x6] sm:$0x1] %v379_v29  ;;  %v417_v28 = vsel %vm12327_vm11, 0, %v416_v24 }
 0x417   :  { %10057 = vmatpush3.bf16.msra.mxu1 %v10405_v49  ;;  %418 = vst [vmem:[#allocation3 + $0x6] sm:$0x2] %v417_v28  ;;  %v381_v26 = vld [vmem:[#allocation3 + $0x8] sm:$0x1]  ;;  %v419_v15 = vld [vmem:[#allocation3 + $0x8] sm:$0x2] }
 0x418   :  { %v382_v18 = vsel %vm11774_vm5, 0, %v381_v26  ;;  %v420_v13 = vsel %vm12327_vm11, 0, %v419_v15  ;;  %v390_v58 = vld [vmem:[#allocation3 + $0xe] sm:$0x1]  ;;  %v428_v39 = vld [vmem:[#allocation3 + $0xe] sm:$0x2] }
 0x419   :  { %383 = vst [vmem:[#allocation3 + $0x8] sm:$0x1] %v382_v18  ;;  %421 = vst [vmem:[#allocation3 + $0x8] sm:$0x2] %v420_v13  ;;  %v391_v19 = vsel %vm11774_vm5, 0, %v390_v58  ;;  %v429_v60 = vsel %vm12327_vm11, 0, %v428_v39 }
 0x41a   :  { %4663 = vmatmul.mubr.bf16.vlgmr.msra.gmra.mrb[136].mxu1 %v3961_v22  ;;  %v3970_v57 = vld [vmem:[#allocation6 + $0x78] sm:$0xff]  ;;  %392 = vst [vmem:[#allocation3 + $0xe] sm:$0x1] %v391_v19  ;;  %430 = vst [vmem:[#allocation3 + $0xe] sm:$0x2] %v429_v60  ;;  %v10407_v60 = vld [vmem:[#allocation24 + $0x40] sm:$0xff]  }
 0x41b   :  { %4670 = vmatprep.mubr.bf16.mxu1 %v3970_v57  ;;  %v393_v23 = vld [vmem:[#allocation3 + $0x10] sm:$0x1]  ;;  %v431_v17 = vld [vmem:[#allocation3 + $0x10] sm:$0x2]  ;;  %v396_v38 = vld [vmem:[#allocation3 + $0x12] sm:$0x1]  ;;  %10070 = vmatprep.subr.bf16.mxu0 %v10407_v60 }
 0x41c   :  { %4622 = vmatmul.mubr.bf16.gmra.mrb[12].mxu0 %v3967_v35  ;;  %v394_v20 = vsel %vm11774_vm5, 0, %v393_v23  ;;  %v432_v49 = vsel %vm12327_vm11, 0, %v431_v17  ;;  %v397_v56 = vsel %vm11774_vm5, 0, %v396_v38  ;;  %v434_v22 = vld [vmem:[#allocation3 + $0x12] sm:$0x2] }
 0x41d   :  { %395 = vst [vmem:[#allocation3 + $0x10] sm:$0x1] %v394_v20  ;;  %433 = vst [vmem:[#allocation3 + $0x10] sm:$0x2] %v432_v49  ;;  %v399_v57 = vld [vmem:[#allocation3 + $0x14] sm:$0x1] }
 0x41e   :  { %398 = vst [vmem:[#allocation3 + $0x12] sm:$0x1] %v397_v56 }
 0x422   :  { %4671 = vmatmul.mubr.bf16.gmra.mrb[140].mxu1 %v3969_v34  ;;  %v435_v34 = vsel %vm12327_vm11, 0, %v434_v22 }
 0x423   :  { %436 = vst [vmem:[#allocation3 + $0x12] sm:$0x2] %v435_v34 }
 0x4c6   :  { %v9974_v45 = vpop.f32.mrb[0].mxu0 }
 0x4c7   :  { %v9975_v1 = vpop.f32.mrb[1].mxu0 }
 0x4c8   :  { %v9976_v46 = vadd.f32 %v9975_v1, %v9974_v45  ;;  %v9977_v48 = vpop.f32.mrb[2].mxu0  ;;  %v400_v45 = vsel %vm11774_vm5, 0, %v399_v57  ;;  %v437_v1 = vld [vmem:[#allocation3 + $0x14] sm:$0x2] }
 0x4c9   :  { %v9978_v4 = vpop.f32.mrb[3].mxu0  ;;  %401 = vst [vmem:[#allocation3 + $0x14] sm:$0x1] %v400_v45 }
 0x4ca   :  { %v9979_v32 = vadd.f32 %v9978_v4, %v9977_v48  ;;  %v438_v48 = vsel %vm12327_vm11, 0, %v437_v1 }
 0x4cb   :  { %439 = vst [vmem:[#allocation3 + $0x14] sm:$0x2] %v438_v48 }
 0x4cc   :  { %v10002_v30 = vpop.f32.mrb[128].mxu1 }
 0x4cd   :  { %v10003_v2 = vpop.f32.mrb[129].mxu1 }
 0x4ce   :  { %v10004_v7 = vadd.f32 %v10003_v2, %v10002_v30  ;;  %v10005_v12 = vpop.f32.mrb[130].mxu1 }
 0x4cf   :  { %v10006_v52 = vpop.f32.mrb[131].mxu1 }
 0x4d0   :  { %v12319_v63 = vadd.f32 %v10004_v7, %v9976_v46  ;;  %v10007_v43 = vadd.f32 %v10006_v52, %v10005_v12 }
 0x4d2   :  { %v12321_v25 = vadd.f32 %v10007_v43, %v9979_v32  ;;  %v9980_v6 = vpop.f32.mrb[4].mxu0 }
 0x4d3   :  { %v9981_v31 = vpop.f32.mrb[5].mxu0 }
 0x4d4   :  { %v9982_v61 = vadd.f32 %v9981_v31, %v9980_v6  ;;  %v9983_v47 = vpop.f32.mrb[6].mxu0 }
 0x4d5   :  { %v9984_v40 = vpop.f32.mrb[7].mxu0 }
 0x4d6   :  { %v9985_v51 = vadd.f32 %v9984_v40, %v9983_v47 }
 0x4dd   :  { %v10008_v59 = vpop.f32.mrb[132].mxu1 }
 0x4de   :  { %v10009_v27 = vpop.f32.mrb[133].mxu1 }
 0x4df   :  { %v10010_v0 = vadd.f32 %v10009_v27, %v10008_v59  ;;  %v10011_v53 = vpop.f32.mrb[134].mxu1 }
 0x4e0   :  { %v10012_v41 = vpop.f32.mrb[135].mxu1 }
 0x4e1   :  { %v4575_v14 = vadd.f32 %v10010_v0, %v9982_v61  ;;  %v10013_v55 = vadd.f32 %v10012_v41, %v10011_v53 }
 0x4e3   :  { %v4578_v9 = vadd.f32 %v10013_v55, %v9985_v51 }
 0x4e7   :  { %v10030_v35 = vpop.f32.mrb[8].mxu0 }
 0x4e8   :  { %v10031_v46 = vpop.f32.mrb[9].mxu0 }
 0x4e9   :  { %v10032_v4 = vadd.f32 %v10031_v46, %v10030_v35  ;;  %v10033_v32 = vpop.f32.mrb[10].mxu0 }
 0x4ea   :  { %v10034_v30 = vpop.f32.mrb[11].mxu0 }
 0x4eb   :  { %v4616_v2 = vadd.f32 %v10032_v4, %v12319_v63  ;;  %v10035_v7 = vadd.f32 %v10034_v30, %v10033_v32 }
 0x4ed   :  { %v4619_v12 = vadd.f32 %v10035_v7, %v12321_v25  ;;  %v10058_v52 = vpop.f32.mrb[136].mxu1 }
 0x4ee   :  { %v10059_v43 = vpop.f32.mrb[137].mxu1 }
 0x4ef   :  { %v10060_v6 = vadd.f32 %v10059_v43, %v10058_v52  ;;  %v10036_v31 = vpop.f32.mrb[12].mxu0  ;;  %v10061_v61 = vpop.f32.mrb[138].mxu1 }
 0x4f0   :  { %v10037_v47 = vpop.f32.mrb[13].mxu0  ;;  %v10062_v40 = vpop.f32.mrb[139].mxu1 }
 0x4f1   :  { %v4665_v51 = vadd.f32 %v10060_v6, %v4616_v2  ;;  %v10038_v5 = vadd.f32 %v10037_v47, %v10036_v31  ;;  %v10063_v11 = vadd.f32 %v10062_v40, %v10061_v61  ;;  %v10039_v54 = vpop.f32.mrb[14].mxu0  ;;  %v4715_v47 = vld [vmem:[#allocation21] sm:$0x1] }
 0x4f2   :  { %v10040_v3 = vpop.f32.mrb[15].mxu0 }
 0x4f3   :  { %v4624_v44 = vadd.f32 %v10038_v5, %v4575_v14  ;;  %v4668_v50 = vadd.f32 %v10063_v11, %v4619_v12  ;;  %v10041_v16 = vadd.f32 %v10040_v3, %v10039_v54  ;;  %v4679_v63 = vsel %vm2665_vm0, %v4665_v51, 0.0  ;;  %v9315_v11 = vld [vmem:[#allocation23] ss:$0 sm:$0xff] }
 0x4f5   :  { %v4680_v59 = vsel %vm2665_vm0, %v4668_v50, 0.0  ;;  %v4627_v25 = vadd.f32 %v10041_v16, %v4578_v9  ;;  %v10064_v8 = vpop.f32.mrb[140].mxu1  ;;  %v10408_v9 = vld [vmem:[#allocation24] sm:$0xff]  }
 0x4f6   :  { %v4681_v33 = vadd.f32 %v4680_v59, %v4679_v63  ;;  %v10065_v29 = vpop.f32.mrb[141].mxu1  ;;  %10071 = vmatpush3.bf16.msra.mxu0 %v10408_v9 }
 0x4f7   :  { %v10066_v24 = vadd.f32 %v10065_v29, %v10064_v8  ;;  %v10067_v27 = vpop.f32.mrb[142].mxu1 }
 0x4f8   :  { %v10068_v28 = vpop.f32.mrb[143].mxu1 }
 0x4f9   :  { %v4673_v0 = vadd.f32 %v10066_v24, %v4624_v44  ;;  %v10069_v53 = vadd.f32 %v10068_v28, %v10067_v27  ;;  %v11316_v24 = vmov 1983009808  }
 0x4fa   :  { %v4768_v27 = vunpack.c.l.s4 %v11316_v24  ;;  %v10415_v24 = vld [vmem:[#allocation24 + $0x58] sm:$0xff]  }
 0x4fb   :  { %v4682_v41 = vsel %vm2665_vm0, %v4673_v0, 0.0  ;;  %v4676_v26 = vadd.f32 %v10069_v53, %v4627_v25 }
 0x4fc   :  { %v4683_v15 = vadd.f32 %v4682_v41, %v4681_v33 }
 0x4fd   :  { %v4684_v14 = vsel %vm2665_vm0, %v4676_v26, 0.0 }
 0x4fe   :  { %v4685_v55 = vadd.f32 %v4684_v14, %v4683_v15  ;;  %v10410_v15 = vld [vmem:[#allocation24 + $0x8] sm:$0xff]  }
 0x500   :  { %v4686_v18 = vrot.slane %v4685_v55, 4 }
 0x502   :  { %v4687_v13 = vadd.f32 %v4686_v18, %v4685_v55  ;;  %v4769_v55 = vunpack.c.0.s8 %v4768_v27  ;;  %v10411_v18 = vld [vmem:[#allocation24 + $0x50] sm:$0xff]   ;;  %v10416_v27 = vld [vmem:[#allocation24 + $0xc8] sm:$0xff]  }
 0x504   :  { %v4688_v58 = vrot.slane %v4687_v13, 2 }
 0x506   :  { %v4689_v39 = vadd.f32 %v4688_v58, %v4687_v13  ;;  %v10412_v13 = vld [vmem:[#allocation24 + $0xc0] sm:$0xff]   ;;  %v10413_v58 = vld [vmem:[#allocation24 + $0x10] sm:$0xff]  }
 0x507   :  { %10092 = vmatprep.subr.bf16.mxu1 %v10412_v13 }
 0x508   :  { %v4690_v19 = vrot.slane %v4689_v39, 1 }
 0x50a   :  { %v4691_v23 = vadd.f32 %v4690_v19, %v4689_v39  ;;  %v10414_v39 = vld [vmem:[#allocation24 + $0x80] sm:$0xff]   ;;  %v12377_v19 = vsub.s32 %v4769_v55, %v11957_v37  ;;  %v10420_v55 = vld [vmem:[#allocation24 + $0xd0] sm:$0xff]  }
 0x50b   :  { %10093 = vmatpush3.bf16.msra.mxu1 %v10414_v39 }
 0x50c   :  { %v4692_v17 = vmul.f32 0.03125, %v4691_v23  ;;  %10094 = vmatprep.subr.bf16.mxu1 %v10416_v27 }
 0x50e   :  { %v4693_v38 = vsub.f32 %v4665_v51, %v4692_v17  ;;  %v4694_v20 = vsub.f32 %v4668_v50, %v4692_v17  ;;  %v4695_v49 = vsub.f32 %v4673_v0, %v4692_v17  ;;  %v4696_v56 = vsub.f32 %v4676_v26, %v4692_v17  ;;  %v10409_v26 = vld [vmem:[#allocation24 + $0x48] sm:$0xff]  }
 0x50f   :  { %10072 = vmatprep.subr.bf16.mxu0 %v10409_v26 }
 0x510   :  { %v4697_v22 = vmul.f32 %v4693_v38, %v4693_v38  ;;  %v4698_v57 = vmul.f32 %v4694_v20, %v4694_v20  ;;  %v4699_v35 = vmul.f32 %v4695_v49, %v4695_v49  ;;  %v4700_v34 = vmul.f32 %v4696_v56, %v4696_v56  ;;  %10073 = vmatpush3.bf16.msra.mxu0 %v10410_v15  ;;  %v10418_v15 = vld [vmem:[#allocation24 + $0x88] sm:$0xff]  }
 0x511   :  { %10074 = vmatprep.subr.bf16.mxu0 %v10411_v18  ;;  %v4786_v18 = vld [vmem:[#allocation3 + $0x2] sm:$0x3]  ;;  %10095 = vmatpush3.bf16.msra.mxu1 %v10418_v15 }
 0x512   :  { %v4701_v45 = vsel %vm2665_vm0, %v4697_v22, 0.0  ;;  %v4702_v1 = vsel %vm2665_vm0, %v4698_v57, 0.0  ;;  %v4704_v48 = vsel %vm2665_vm0, %v4699_v35, 0.0  ;;  %v4706_v32 = vsel %vm2665_vm0, %v4700_v34, 0.0  ;;  %10096 = vmatprep.subr.bf16.mxu1 %v10420_v55  ;;  %v10426_v55 = vld [vmem:[#allocation24 + $0x98] sm:$0xff]  }
 0x513   :  { %v4703_v46 = vadd.f32 %v4702_v1, %v4701_v45 }
 0x514   :  { %10075 = vmatpush3.bf16.msra.mxu0 %v10413_v58 }
 0x515   :  { %v4705_v4 = vadd.f32 %v4704_v48, %v4703_v46  ;;  %10076 = vmatprep.subr.bf16.mxu0 %v10415_v24 }
 0x517   :  { %v4707_v30 = vadd.f32 %v4706_v32, %v4705_v4 }
 0x519   :  { %v4708_v2 = vrot.slane %v4707_v30, 4 }
 0x51b   :  { %v4709_v7 = vadd.f32 %v4708_v2, %v4707_v30 }
 0x51d   :  { %v4710_v12 = vrot.slane %v4709_v7, 2 }
 0x51f   :  { %v4711_v52 = vadd.f32 %v4710_v12, %v4709_v7 }
 0x521   :  { %v4712_v43 = vrot.slane %v4711_v52, 1 }
 0x523   :  { %v4713_v6 = vadd.f32 %v4712_v43, %v4711_v52 }
 0x525   :  { %v4714_v31 = vmul.f32 0.03125, %v4713_v6 }
 0x527   :  { %v4716_v61 = vadd.f32 1e-05, %v4714_v31 }
 0x529   :  { %10865 = vrsqrt.f32 %v4716_v61 }
 0x533   :  { %v10866_v40 = vpop.eup %10865 }
 0x534   :  { %v4718_v51 = vmul.f32 %v10866_v40, %v4715_v47 }
 0x536   :  { %v4723_v5 = vrot.slane %v4718_v51, %v11960_v42 }
 0x538   :  { %v4725_v54 = vmul.f32 %v4723_v5, %v4693_v38  ;;  %v4726_v3 = vmul.f32 %v4723_v5, %v4694_v20  ;;  %v4727_v44 = vmul.f32 %v4723_v5, %v4695_v49  ;;  %v4728_v50 = vmul.f32 %v4723_v5, %v4696_v56 }
 0x53a   :  { %v4736_v16 = vadd.f32 %v9315_v11, %v4725_v54  ;;  %v4737_v63 = vadd.f32 %v9315_v11, %v4726_v3  ;;  %v4738_v59 = vadd.f32 %v9315_v11, %v4727_v44  ;;  %v4739_v25 = vadd.f32 %v9315_v11, %v4728_v50 }
 0x53c   :  { %vm4740_vm12 = vcmp.ge.f32.partialorder %v4736_v16, 0.0  ;;  %vm4741_vm7 = vcmp.ge.f32.partialorder %v4737_v63, 0.0  ;;  %vm4742_vm13 = vcmp.ge.f32.partialorder %v4738_v59, 0.0  ;;  %vm4743_vm14 = vcmp.ge.f32.partialorder %v4739_v25, 0.0 }
 0x53d   :  { %v4744_v8 = vmul.f32 0.2, %v4736_v16  ;;  %v4745_v33 = vmul.f32 0.2, %v4737_v63  ;;  %v4746_v29 = vmul.f32 0.2, %v4738_v59 }
 0x53e   :  { %v4747_v28 = vmul.f32 0.2, %v4739_v25 }
 0x53f   :  { %v4748_v0 = vsel %vm4740_vm12, %v4736_v16, %v4744_v8  ;;  %v4749_v53 = vsel %vm4741_vm7, %v4737_v63, %v4745_v33  ;;  %v4750_v41 = vsel %vm4742_vm13, %v4738_v59, %v4746_v29  ;;  %vm12494_vm12 = vmand %vm13157_vm1, %vm354_vm9  ;;  %vm4801_vm9 = vcmask 1040896  }
 0x540   :  { %v4751_v14 = vsel %vm4743_vm14, %v4739_v25, %v4747_v28  ;;  %4752 = vst.msk [vmem:[#allocation10] sm:$0xff] %vm2665_vm0, %v4748_v0  ;;  %4753 = vst.msk [vmem:[#allocation10 + $0x8] sm:$0xff] %vm2665_vm0, %v4749_v53  ;;  %v10417_v28 = vld [vmem:[#allocation24 + $0x18] sm:$0xff]   ;;  %vm475_vm7 = vsmask.f32 7942 }
 0x541   :  { %4754 = vst.msk [vmem:[#allocation10 + $0x10] sm:$0xff] %vm2665_vm0, %v4750_v41  ;;  %4755 = vst.msk [vmem:[#allocation10 + $0x18] sm:$0xff] %vm2665_vm0, %v4751_v14  ;;  %v10419_v14 = vld [vmem:[#allocation24 + $0x60] sm:$0xff]   ;;  %10077 = vmatpush3.bf16.msra.mxu0 %v10417_v28 }
 0x542   :  { %10078 = vmatprep.subr.bf16.mxu0 %v10419_v14  ;;  %v4919_v28 = vld [vmem:[#allocation3 + $0x8] sm:$0x3]  ;;  %v5007_v14 = vld [vmem:[#allocation3 + $0x10] sm:$0x3]  ;;  %vm476_vm14 = vmand %vm405_vm10, %vm475_vm7  ;;  %vm6627_vm10 = vcmask 1043459  }
 0x547   :  { %v12381_v9 = vld [vmem:[#allocation10 + $0x4] ss:$2 sm:$0x3]  ;;  %v12389_v20 = vld [vmem:[#allocation10 + $0x8] ss:$2 sm:$0x3] }
 0x548   :  { %v12379_v60 = vld [vmem:[#allocation10 + $0x14] ss:$2 sm:$0x3]  ;;  %v4834_v17 = vpack.c.bf16 %v12381_v9, %v12381_v9  ;;  %v12387_v38 = vld [vmem:[#allocation10 + $0x10] ss:$2 sm:$0x3]  ;;  %v4878_v56 = vpack.c.bf16 %v12389_v20, %v12389_v20 }
 0x549   :  { %v5010_v23 = vpack.c.bf16 %v12379_v60, %v12379_v60  ;;  %v4966_v49 = vpack.c.bf16 %v12387_v38, %v12387_v38  ;;  %v12395_v22 = vld [vmem:[#allocation10 + $0x18] ss:$2 sm:$0x3]  ;;  %v12397_v57 = vld [vmem:[#allocation10] ss:$2 sm:$0x3] }
 0x54a   :  { %v4842_v34 = vrot.slane %v4834_v17, %v12377_v19  ;;  %v5054_v45 = vpack.c.bf16 %v12395_v22, %v12395_v22  ;;  %v4789_v1 = vpack.c.bf16 %v12397_v57, %v12397_v57  ;;  %v12405_v46 = vld [vmem:[#allocation10 + $0xc] ss:$2 sm:$0x3]  ;;  %v12407_v48 = vld [vmem:[#allocation10 + $0x1c] ss:$2 sm:$0x3]  ;;  %v4886_v32 = vrot.slane %v4878_v56, %v12377_v19 }
 0x54b   :  { %v5018_v35 = vrot.slane %v5010_v23, %v12377_v19  ;;  %v4974_v4 = vrot.slane %v4966_v49, %v12377_v19  ;;  %v4922_v30 = vpack.c.bf16 %v12405_v46, %v12405_v46  ;;  %v5098_v2 = vpack.c.bf16 %v12407_v48, %v12407_v48  ;;  %v12415_v7 = vld [vmem:[#allocation10 + $0x1] ss:$2 sm:$0x3]  ;;  %v12417_v12 = vld [vmem:[#allocation10 + $0x5] ss:$2 sm:$0x3] }
 0x54c   :  { %4843 = vrot.lane.b32.xlu0 %v4842_v34, %s11301_s18  ;;  %v5062_v52 = vrot.slane %v5054_v45, %v12377_v19  ;;  %v4797_v43 = vrot.slane %v4789_v1, %v12377_v19  ;;  %v4765_v6 = vpack.c.bf16 %v12415_v7, %v12415_v7  ;;  %v12425_v31 = vld [vmem:[#allocation10 + $0x9] ss:$2 sm:$0x3]  ;;  %v12427_v61 = vld [vmem:[#allocation10 + $0xd] ss:$2 sm:$0x3]  ;;  %v4813_v51 = vpack.c.bf16 %v12417_v12, %v12417_v12 }
 0x54d   :  { %5019 = vrot.lane.b32.xlu1 %v5018_v35, %s11301_s18  ;;  %v12430_v47 = vrot.slane %v4922_v30, %v12377_v19  ;;  %v12433_v40 = vrot.slane %v5098_v2, %v12377_v19  ;;  %v4857_v5 = vpack.c.bf16 %v12425_v31, %v12425_v31  ;;  %v12439_v11 = vld [vmem:[#allocation10 + $0x11] ss:$2 sm:$0x3]  ;;  %v12441_v54 = vld [vmem:[#allocation10 + $0x15] ss:$2 sm:$0x3]  ;;  %v4901_v44 = vpack.c.bf16 %v12427_v61, %v12427_v61 }
 0x54e   :  { %v4773_v3 = vrot.slane %v4765_v6, %v12377_v19  ;;  %v4945_v50 = vpack.c.bf16 %v12439_v11, %v12439_v11  ;;  %v4989_v16 = vpack.c.bf16 %v12441_v54, %v12441_v54  ;;  %v12450_v63 = vld [vmem:[#allocation10 + $0x19] ss:$2 sm:$0x3]  ;;  %v12452_v59 = vld [vmem:[#allocation10 + $0x1d] ss:$2 sm:$0x3]  ;;  %v4821_v25 = vrot.slane %v4813_v51, %v12377_v19 }
 0x54f   :  { %v4865_v8 = vrot.slane %v4857_v5, %v12377_v19  ;;  %v5033_v33 = vpack.c.bf16 %v12450_v63, %v12450_v63  ;;  %v5077_v29 = vpack.c.bf16 %v12452_v59, %v12452_v59  ;;  %v4909_v41 = vrot.slane %v4901_v44, %v12377_v19  ;;  %v10421_v34 = vld [vmem:[#allocation24 + $0x20] sm:$0xff]   ;;  %v10422_v45 = vld [vmem:[#allocation24 + $0x90] sm:$0xff]   ;;  %v10423_v6 = vld [vmem:[#allocation24 + $0x68] sm:$0xff]  }
 0x550   :  { %4887 = vrot.lane.b32.xlu0 %v4886_v32, %s11301_s18  ;;  %v4775_v0 = vshrl.u32 %v4773_v3, 16  ;;  %v4778_v53 = vshll.u32 %v4773_v3, 16  ;;  %v4953_v26 = vrot.slane %v4945_v50, %v12377_v19  ;;  %v4823_v13 = vshrl.u32 %v4821_v25, 16  ;;  %v10424_v51 = vld [vmem:[#allocation24 + $0xd8] sm:$0xff]   ;;  %10079 = vmatpush3.bf16.msra.mxu0 %v10421_v34 }
 0x551   :  { %4975 = vrot.lane.b32.xlu1 %v4974_v4, %s11301_s18  ;;  %v4826_v58 = vshll.u32 %v4821_v25, 16  ;;  %v4867_v39 = vshrl.u32 %v4865_v8, 16  ;;  %v4870_v23 = vshll.u32 %v4865_v8, 16  ;;  %v4911_v49 = vshrl.u32 %v4909_v41, 16  ;;  %v4831_v3 = vld [vmem:[#allocation3 + $0x4] sm:$0x3]  ;;  %10097 = vmatpush3.bf16.msra.mxu1 %v10422_v45 }
 0x552   :  { %v4777_v17 = vrot.slane %v4775_v0, 7  ;;  %v4914_v56 = vshll.u32 %v4909_v41, 16  ;;  %v4955_v35 = vshrl.u32 %v4953_v26, 16  ;;  %v4825_v4 = vrot.slane %v4823_v13, 7  ;;  %v4875_v44 = vld [vmem:[#allocation3 + $0x6] sm:$0x3]  ;;  %10080 = vmatprep.subr.bf16.mxu0 %v10423_v6  ;;  %10098 = vmatprep.subr.bf16.mxu1 %v10424_v51 }
 0x553   :  { %v4869_v32 = vrot.slane %v4867_v39, 7  ;;  %v4958_v30 = vshll.u32 %v4953_v26, 16  ;;  %v4997_v2 = vrot.slane %v4989_v16, %v12377_v19  ;;  %v4913_v50 = vrot.slane %v4911_v49, 7  ;;  %v4963_v0 = vld [vmem:[#allocation3 + $0xe] sm:$0x3]  ;;  %v10429_v6 = vld [vmem:[#allocation24 + $0x30] sm:$0xff]  }
 0x554   :  { %5063 = vrot.lane.b32.xlu0 %v5062_v52, %s11301_s18  ;;  %v4780_v5 = vor.u32 %v4778_v53, %v4777_v17  ;;  %v4957_v25 = vrot.slane %v4955_v35, 7  ;;  %v5041_v8 = vrot.slane %v5033_v33, %v12377_v19  ;;  %v4828_v24 = vor.u32 %v4826_v58, %v4825_v4  ;;  %v10425_v53 = vld [vmem:[#allocation24 + $0x28] sm:$0xff]   ;;  %v10428_v17 = vld [vmem:[#allocation24 + $0xe0] sm:$0xff]   ;;  %v356_v45 = vld [vmem:[#allocation3] sm:$0x3] }
 0x555   :  { %4798 = vrot.lane.b32.xlu1 %v4797_v43, %s11301_s18  ;;  %v4872_v27 = vor.u32 %v4870_v23, %v4869_v32  ;;  %v4999_v16 = vshrl.u32 %v4997_v2, 16  ;;  %v5002_v41 = vshll.u32 %v4997_v2, 16  ;;  %v4916_v15 = vor.u32 %v4914_v56, %v4913_v50  ;;  %v5051_v23 = vld [vmem:[#allocation3 + $0x12] sm:$0x3]  ;;  %v359_v4 = vld [vmem:[#allocation3 + $0xc] sm:$0x3]  ;;  %10081 = vmatpush3.bf16.msra.mxu0 %v10425_v53 }
 0x556   :  { %v4787_v26 = vsel %vm12466_vm8, %v4780_v5, %v4786_v18  ;;  %v4960_v52 = vor.u32 %v4958_v30, %v4957_v25  ;;  %v5043_v43 = vshrl.u32 %v5041_v8, 16  ;;  %v4832_v33 = vsel %vm12466_vm8, %v4828_v24, %v4831_v3  ;;  %v10427_v18 = vld [vmem:[#allocation24 + $0x70] sm:$0xff]   ;;  %v366_v32 = vld [vmem:[#allocation3 + $0x16] sm:$0x3]  ;;  %10099 = vmatpush3.bf16.msra.mxu1 %v10426_v55  ;;  %v10430_v51 = vld [vmem:[#allocation24 + $0xa0] sm:$0xff]  }
 0x557   :  { %4788 = vst [vmem:[#allocation3 + $0x2] sm:$0x3] %v4787_v26  ;;  %v4876_v13 = vsel %vm12466_vm8, %v4872_v27, %v4875_v44  ;;  %v5001_v58 = vrot.slane %v4999_v16, 7  ;;  %v5046_v39 = vshll.u32 %v5041_v8, 16  ;;  %4833 = vst [vmem:[#allocation3 + $0x4] sm:$0x3] %v4832_v33  ;;  %v4920_v49 = vsel %vm12466_vm8, %v4916_v15, %v4919_v28  ;;  %10082 = vmatprep.subr.bf16.mxu0 %v10427_v18 }
 0x558   :  { %4931 = vrot.lane.b32.xlu0 %v12430_v47, %s11301_s18  ;;  %4877 = vst [vmem:[#allocation3 + $0x6] sm:$0x3] %v4876_v13  ;;  %v4964_v56 = vsel %vm12466_vm8, %v4960_v52, %v4963_v0  ;;  %v5045_v35 = vrot.slane %v5043_v43, 7  ;;  %v5085_v34 = vrot.slane %v5077_v29, %v12377_v19  ;;  %4921 = vst [vmem:[#allocation3 + $0x8] sm:$0x3] %v4920_v49  ;;  %10100 = vmatprep.subr.bf16.mxu1 %v10428_v17  ;;  %v10431_v3 = vld [vmem:[#allocation24 + $0x78] sm:$0xff]  }
 0x559   :  { %5107 = vrot.lane.b32.xlu1 %v12433_v40, %s11301_s18  ;;  %4965 = vst [vmem:[#allocation3 + $0xe] sm:$0x3] %v4964_v56  ;;  %v5004_v47 = vor.u32 %v5002_v41, %v5001_v58  ;;  %v363_v40 = vld [vmem:[#allocation3 + $0xa] sm:$0x3]  ;;  %v10432_v44 = vld [vmem:[#allocation24 + $0xe8] sm:$0xff]   ;;  %v357_v50 = vsel %vm12494_vm12, 0, %v356_v45  ;;  %10083 = vmatpush3.bf16.msra.mxu0 %v10429_v6 }
 0x55a   :  { %v5048_v30 = vor.u32 %v5046_v39, %v5045_v35  ;;  %v5087_v2 = vshrl.u32 %v5085_v34, 16  ;;  %v360_v25 = vsel %vm12494_vm12, 0, %v359_v4  ;;  %v364_v8 = vsel %vm12494_vm12, 0, %v363_v40  ;;  %358 = vst [vmem:[#allocation3] sm:$0x3] %v357_v50  ;;  %10101 = vmatpush3.bf16.msra.mxu1 %v10430_v51  ;;  %10084 = vmatprep.subr.bf16.mxu0 %v10431_v3  ;;  %v10437_v26 = vld [vmem:[#allocation24 + $0xf0] sm:$0xff]  }
 0x55b   :  { %v5008_v29 = vsel %vm12466_vm8, %v5004_v47, %v5007_v14  ;;  %v5090_v28 = vshll.u32 %v5085_v34, 16  ;;  %361 = vst [vmem:[#allocation3 + $0xc] sm:$0x3] %v360_v25  ;;  %365 = vst [vmem:[#allocation3 + $0xa] sm:$0x3] %v364_v8  ;;  %v367_v0 = vsel %vm12494_vm12, 0, %v366_v32  ;;  %10102 = vmatprep.subr.bf16.mxu1 %v10432_v44 }
 0x55c   :  { %4760 = vrot.lane.b32.xlu0 %v12415_v7, %s11301_s18  ;;  %5009 = vst [vmem:[#allocation3 + $0x10] sm:$0x3] %v5008_v29  ;;  %v5052_v24 = vsel %vm12466_vm8, %v5048_v30, %v5051_v23  ;;  %v5089_v27 = vrot.slane %v5087_v2, 7  ;;  %v5095_v16 = vld [vmem:[#allocation3 + $0x14] sm:$0x3]  ;;  %v10433_v7 = vld [vmem:[#allocation24 + $0x38] sm:$0xff]  }
 0x55d   :  { %4808 = vrot.lane.b32.xlu1 %v12417_v12, %s11301_s18  ;;  %5053 = vst [vmem:[#allocation3 + $0x12] sm:$0x3] %v5052_v24  ;;  %368 = vst [vmem:[#allocation3 + $0x16] sm:$0x3] %v367_v0  ;;  %v10434_v12 = vld [vmem:[#allocation24 + $0xa8] sm:$0xff]   ;;  %v10438_v15 = vld [vmem:[#allocation24 + $0x140] sm:$0xff]   ;;  %10085 = vmatpush3.bf16.msra.mxu0 %v10433_v7 }
 0x55e   :  { %v5092_v41 = vor.u32 %v5090_v28, %v5089_v27  ;;  %10103 = vmatpush3.bf16.msra.mxu1 %v10434_v12  ;;  %v10439_v14 = vld [vmem:[#allocation24 + $0xb0] sm:$0xff]   ;;  %v10441_v43 = vld [vmem:[#allocation24 + $0xf8] sm:$0xff]   ;;  %10114 = vmatprep.subr.bf16.mxu0 %v10438_v15  ;;  %v10448_v34 = vld [vmem:[#allocation24 + $0x1c0] sm:$0xff]   ;;  %vm6880_vm12 = vsmask.f32 7946 }
 0x55f   :  { %10104 = vmatprep.subr.bf16.mxu1 %v10437_v26  ;;  %v10873_v45 = vld [vmem:[#allocation9 + $0x1] ss:$2 sm:$0xf]  ;;  %v10874_v4 = vld [vmem:[#allocation9 + $0x9] ss:$2 sm:$0xf] }
 0x560   :  { %4852 = vrot.lane.b32.xlu0 %v12425_v31, %s11301_s18  ;;  %v5096_v52 = vsel %vm12466_vm8, %v5092_v41, %v5095_v16  ;;  %v10875_v51 = vld [vmem:[#allocation9 + $0x11] ss:$2 sm:$0xf]  ;;  %v10876_v5 = vld [vmem:[#allocation9 + $0x19] ss:$2 sm:$0xf] }
 0x561   :  { %4896 = vrot.lane.b32.xlu1 %v12427_v61, %s11301_s18  ;;  %5097 = vst [vmem:[#allocation3 + $0x14] sm:$0x3] %v5096_v52  ;;  %v369_v53 = vld [vmem:[#allocation3] sm:$0x1]  ;;  %v407_v33 = vld [vmem:[#allocation3] sm:$0x2] }
 0x562   :  { %v387_v55 = vld [vmem:[#allocation3 + $0xc] sm:$0x1]  ;;  %v370_v31 = vsel %vm11774_vm5, 0, %v369_v53  ;;  %v408_v1 = vsel %vm12327_vm11, 0, %v407_v33  ;;  %v425_v13 = vld [vmem:[#allocation3 + $0xc] sm:$0x2]  ;;  %10105 = vmatpush3.bf16.msra.mxu1 %v10439_v14 }
 0x563   :  { %v388_v61 = vsel %vm11774_vm5, 0, %v387_v55  ;;  %371 = vst [vmem:[#allocation3] sm:$0x1] %v370_v31  ;;  %409 = vst [vmem:[#allocation3] sm:$0x2] %v408_v1  ;;  %v426_v58 = vsel %vm12327_vm11, 0, %v425_v13  ;;  %10106 = vmatprep.subr.bf16.mxu1 %v10441_v43 }
 0x564   :  { %4940 = vrot.lane.b32.xlu0 %v12439_v11, %s11301_s18  ;;  %389 = vst [vmem:[#allocation3 + $0xc] sm:$0x1] %v388_v61  ;;  %v10443_v11 = vld [vmem:[#allocation24 + $0xb8] sm:$0xff]   ;;  %v384_v39 = vld [vmem:[#allocation3 + $0xa] sm:$0x1]  ;;  %vm12759_vm8 = vcmp.lt.s32.totalorder %v2779_v36, 256 }
 0x565   :  { %4984 = vrot.lane.b32.xlu1 %v12441_v54, %s11301_s18  ;;  %v402_v23 = vld [vmem:[#allocation3 + $0x16] sm:$0x1]  ;;  %427 = vst [vmem:[#allocation3 + $0xc] sm:$0x2] %v426_v58  ;;  %v385_v54 = vsel %vm11774_vm5, 0, %v384_v39 }
 0x566   :  { %v403_v18 = vsel %vm11774_vm5, 0, %v402_v23  ;;  %v422_v17 = vld [vmem:[#allocation3 + $0xa] sm:$0x2]  ;;  %v440_v49 = vld [vmem:[#allocation3 + $0x16] sm:$0x2]  ;;  %10107 = vmatpush3.bf16.msra.mxu1 %v10443_v11 }
 0x567   :  { %386 = vst [vmem:[#allocation3 + $0xa] sm:$0x1] %v385_v54  ;;  %404 = vst [vmem:[#allocation3 + $0x16] sm:$0x1] %v403_v18  ;;  %v423_v56 = vsel %vm12327_vm11, 0, %v422_v17  ;;  %v441_v35 = vsel %vm12327_vm11, 0, %v440_v49  ;;  %10136 = vmatprep.subr.bf16.mxu1 %v10448_v34 }
 0x568   :  { %5028 = vrot.lane.b32.xlu0 %v12450_v63, %s11301_s18  ;;  %424 = vst [vmem:[#allocation3 + $0xa] sm:$0x2] %v423_v56  ;;  %442 = vst [vmem:[#allocation3 + $0x16] sm:$0x2] %v441_v35 }
 0x569   :  { %5072 = vrot.lane.b32.xlu1 %v12452_v59, %s11301_s18  ;;  %v10877_v41 = vld [vmem:[#allocation9 + $0x21] ss:$2 sm:$0xf]  ;;  %v10878_v7 = vld [vmem:[#allocation9 + $0x29] ss:$2 sm:$0xf] }
 0x56a   :  { %v5111_v47 = vld [vmem:[#allocation3] sm:$0x3]  ;;  %v10879_v55 = vld [vmem:[#allocation9 + $0x31] ss:$2 sm:$0xf] }
 0x56b   :  { %v5122_v40 = vrot.slane %v5111_v47, %v12377_v19  ;;  %v10880_v33 = vld [vmem:[#allocation9 + $0x39] ss:$2 sm:$0xf]  ;;  %v10881_v11 = vld [vmem:[#allocation9 + $0x41] ss:$2 sm:$0xf] }
 0x56c   :  { %2891 = vrot.lane.b32.xlu0 %v10873_v45, %s11301_s18  ;;  %v5284_v32 = vld [vmem:[#allocation3 + $0xc] sm:$0x3]  ;;  %v10882_v39 = vld [vmem:[#allocation9 + $0x49] ss:$2 sm:$0xf] }
 0x56d   :  { %2929 = vrot.lane.b32.xlu1 %v10874_v4, %s11301_s18  ;;  %v5295_v63 = vrot.slane %v5284_v32, %v12377_v19  ;;  %v5124_v30 = vshrl.u32 %v5122_v40, 16  ;;  %v5126_v2 = vshll.u32 %v5122_v40, 16  ;;  %v10883_v23 = vld [vmem:[#allocation9 + $0x51] ss:$2 sm:$0xf] }
 0x56e   :  { %v10884_v54 = vld [vmem:[#allocation9 + $0x59] ss:$2 sm:$0xf]  ;;  %v10885_v18 = vld [vmem:[#allocation9 + $0x61] ss:$2 sm:$0xf] }
 0x56f   :  { %v5198_v59 = vld [vmem:[#allocation3 + $0xa] sm:$0x3]  ;;  %v5375_v6 = vld [vmem:[#allocation3 + $0x16] sm:$0x3]  ;;  %v5297_v29 = vshrl.u32 %v5295_v63, 16  ;;  %v5299_v3 = vshll.u32 %v5295_v63, 16 }
 0x570   :  { %2963 = vrot.lane.b32.xlu0 %v10875_v51, %s11301_s18  ;;  %v5251_v44 = vrot.slane %v5198_v59, %v12377_v19  ;;  %v5428_v50 = vrot.slane %v5375_v6, %v12377_v19  ;;  %v5128_v25 = vrot.slane %v5126_v2, 1  ;;  %v10886_v17 = vld [vmem:[#allocation9 + $0x69] ss:$2 sm:$0xf] }
 0x571   :  { %2997 = vrot.lane.b32.xlu1 %v10876_v5, %s11301_s18  ;;  %v5301_v8 = vrot.slane %v5299_v3, 1  ;;  %v10887_v49 = vld [vmem:[#allocation9 + $0x71] ss:$2 sm:$0xf] }
 0x572   :  { %v5253_v24 = vshrl.u32 %v5251_v44, 16  ;;  %v5255_v27 = vshll.u32 %v5251_v44, 16  ;;  %v5129_v28 = vor.u32 %v5128_v25, %v5124_v30  ;;  %v5430_v0 = vshrl.u32 %v5428_v50, 16  ;;  %v10888_v56 = vld [vmem:[#allocation9 + $0x79] ss:$2 sm:$0xf] }
 0x573   :  { %v5432_v16 = vshll.u32 %v5428_v50, 16  ;;  %v5302_v12 = vor.u32 %v5301_v8, %v5297_v29 }
 0x574   :  { %3031 = vrot.lane.b32.xlu0 %v10877_v41, %s11301_s18  ;;  %v5257_v26 = vrot.slane %v5255_v27, 1  ;;  %v9316_v15 = vcombine.low %v5111_v47, %v5129_v28 }
 0x575   :  { %3065 = vrot.lane.b32.xlu1 %v10878_v7, %s11301_s18  ;;  %v5434_v52 = vrot.slane %v5432_v16, 1  ;;  %v9324_v14 = vcombine.low %v5284_v32, %v5302_v12 }
 0x576   :  { %v5258_v43 = vor.u32 %v5257_v26, %v5253_v24  ;;  %5191 = vst [vmem:[#allocation7] sm:$0x11] %v9316_v15 }
 0x577   :  { %v5435_v53 = vor.u32 %v5434_v52, %v5430_v0  ;;  %v5360_v31 = vrot.slane %v9324_v14, 6 }
 0x578   :  { %3099 = vrot.lane.b32.xlu0 %v10879_v55, %s11301_s18  ;;  %v9323_v61 = vcombine.low %v5198_v59, %v5258_v43 }
 0x579   :  { %3133 = vrot.lane.b32.xlu1 %v10880_v33, %s11301_s18  ;;  %v9331_v1 = vcombine.low %v5375_v6, %v5435_v53  ;;  %5368 = vst [vmem:[#allocation7] sm:$0x44] %v5360_v31 }
 0x57a   :  { %v5274_v13 = vrot.slane %v9323_v61, 7 }
 0x57b   :  { %v5451_v58 = vrot.slane %v9331_v1, 5 }
 0x57c   :  { %3167 = vrot.lane.b32.xlu0 %v10881_v11, %s11301_s18  ;;  %5282 = vst [vmem:[#allocation7 + $0x18] sm:$0x22] %v5274_v13 }
 0x57d   :  { %3201 = vrot.lane.b32.xlu1 %v10882_v39, %s11301_s18  ;;  %5459 = vst [vmem:[#allocation7 + $0x18] sm:$0x88] %v5451_v58 }
 0x580   :  { %3235 = vrot.lane.b32.xlu0 %v10883_v23, %s11301_s18 }
 0x581   :  { %3269 = vrot.lane.b32.xlu1 %v10884_v54, %s11301_s18 }
 0x584   :  { %3303 = vrot.lane.b32.xlu0 %v10885_v18, %s11301_s18 }
 0x585   :  { %3337 = vrot.lane.b32.xlu1 %v10886_v17, %s11301_s18 }
 0x588   :  { %3371 = vrot.lane.b32.xlu0 %v10887_v49, %s11301_s18 }
 0x589   :  { %3405 = vrot.lane.b32.xlu1 %v10888_v56, %s11301_s18  ;;  %s9009_s18 = sshll.u32 %s11319_s12, 4  ;;  %s9010_s18 = int_to_ptr.vmem [resolvable:$true] %s9009_s18 }
 0x58a   :  { %s11191_s28 = scalar_lea.vmem %s9010_s18, 256  ;;  %p11196_p7 = scmp.lt.s32.totalorder %s9010_s18, %s9010_s18 }
 0x58b   :  { %p11192_p6 = scmp.ne.s32.totalorder %s9010_s18, %s11191_s28  ;;  %p11197_p8 = scmp.lt.s32.totalorder %s11191_s28, %s11191_s28 }
 0x58d   :  { %p11198_p9 = por %p11197_p8, %p11196_p7 }
 0x58f   :  { %p11199_p10 = pnand %p11198_p9, %p11192_p6 }
 0x5be   :  { %v4844_v34 = vpop.permute.xlu0 %4843 }
 0x5bf   :  { %v5020_v35 = vpop.permute.xlu1 %5019  ;;  %4846 = vst.msk [vmem:[#allocation3 + $0x4] sm:$0x1] %vm4801_vm9, %v4844_v34 }
 0x5c0   :  { %5022 = vst.msk [vmem:[#allocation3 + $0x10] sm:$0x1] %vm4801_vm9, %v5020_v35 }
 0x5c2   :  { %v4888_v4 = vpop.permute.xlu0 %4887 }
 0x5c3   :  { %v4976_v45 = vpop.permute.xlu1 %4975  ;;  %4890 = vst.msk [vmem:[#allocation3 + $0x6] sm:$0x1] %vm4801_vm9, %v4888_v4 }
 0x5c4   :  { %4978 = vst.msk [vmem:[#allocation3 + $0xe] sm:$0x1] %vm4801_vm9, %v4976_v45 }
 0x5c6   :  { %v5064_v47 = vpop.permute.xlu0 %5063  ;;  %v5195_v32 = vld [vmem:[#allocation3 + $0x4] sm:$0x3] }
 0x5c7   :  { %v4799_v40 = vpop.permute.xlu1 %4798  ;;  %v5372_v63 = vld [vmem:[#allocation3 + $0x10] sm:$0x3]  ;;  %v12568_v30 = vld [vmem:[#allocation3 + $0x4] sm:$0x3]  ;;  %5066 = vst.msk [vmem:[#allocation3 + $0x12] sm:$0x1] %vm4801_vm9, %v5064_v47  ;;  %v5206_v2 = vrot.slane %v5195_v32, %v12377_v19 }
 0x5c8   :  { %4802 = vst.msk [vmem:[#allocation3 + $0x2] sm:$0x1] %vm4801_vm9, %v4799_v40  ;;  %v5383_v59 = vrot.slane %v5372_v63, %v12377_v19  ;;  %v12576_v6 = vrot.slane %v12568_v30, %v12377_v19  ;;  %v12590_v41 = vld [vmem:[#allocation3 + $0x10] sm:$0x3] }
 0x5c9   :  { %v5208_v51 = vshrl.u32 %v5206_v2, 16  ;;  %v5210_v5 = vshll.u32 %v5206_v2, 16  ;;  %v12602_v13 = vrot.slane %v12590_v41, %v12377_v19 }
 0x5ca   :  { %v5385_v29 = vshrl.u32 %v5383_v59, 16  ;;  %v5387_v3 = vshll.u32 %v5383_v59, 16  ;;  %v4932_v44 = vpop.permute.xlu0 %4931  ;;  %v12578_v25 = vld [vmem:[#allocation3 + $0x6] sm:$0x3]  ;;  %v5154_v12 = vshrl.u32 %v12576_v6, 16  ;;  %v5156_v26 = vshll.u32 %v12576_v6, 16 }
 0x5cb   :  { %v5108_v50 = vpop.permute.xlu1 %5107  ;;  %v12580_v8 = vld [vmem:[#allocation3 + $0xe] sm:$0x3]  ;;  %v12582_v24 = vld [vmem:[#allocation3 + $0x6] sm:$0x3]  ;;  %4934 = vst.msk [vmem:[#allocation3 + $0x8] sm:$0x1] %vm4801_vm9, %v4932_v44  ;;  %v5221_v0 = vrot.slane %v12578_v25, %v12377_v19 }
 0x5cc   :  { %5110 = vst.msk [vmem:[#allocation3 + $0x14] sm:$0x1] %vm4801_vm9, %v5108_v50  ;;  %v5212_v27 = vrot.slane %v5210_v5, 1  ;;  %v5389_v28 = vrot.slane %v5387_v3, 1  ;;  %v5310_v16 = vrot.slane %v12580_v8, %v12377_v19  ;;  %v5167_v7 = vrot.slane %v12582_v24, %v12377_v19 }
 0x5cd   :  { %v5223_v14 = vshrl.u32 %v5221_v0, 16  ;;  %v5225_v43 = vshll.u32 %v5221_v0, 16  ;;  %vm13158_vm9 = vcmask 1044484  }
 0x5ce   :  { %v5213_v15 = vor.u32 %v5212_v27, %v5208_v51  ;;  %v5390_v52 = vor.u32 %v5389_v28, %v5385_v29  ;;  %v4761_v53 = vpop.permute.xlu0 %4760  ;;  %v5312_v31 = vshrl.u32 %v5310_v16, 16  ;;  %v5314_v61 = vshll.u32 %v5310_v16, 16  ;;  %v12598_v1 = vld [vmem:[#allocation3 + $0x12] sm:$0x3] }
 0x5cf   :  { %v4809_v55 = vpop.permute.xlu1 %4808  ;;  %v12596_v33 = vld [vmem:[#allocation3 + $0x2] sm:$0x3]  ;;  %v4763_v58 = vsel %vm2665_vm0, %v12397_v57, %v4761_v53  ;;  %v5227_v18 = vrot.slane %v5225_v43, 1  ;;  %v5398_v49 = vrot.slane %v12598_v1, %v12377_v19  ;;  %v5169_v34 = vshrl.u32 %v5167_v7, 16 }
 0x5d0   :  { %v4811_v11 = vsel %vm2665_vm0, %v12381_v9, %v4809_v55  ;;  %v9320_v39 = vcombine.low %v5195_v32, %v5213_v15  ;;  %v9328_v23 = vcombine.low %v5372_v63, %v5390_v52  ;;  %4764 = vst [vmem:[#allocation34] sm:$0x3] %v4763_v58  ;;  %v5137_v54 = vrot.slane %v12596_v33, %v12377_v19  ;;  %v12612_v63 = vld [vmem:[#allocation3 + $0x12] sm:$0x3] }
 0x5d1   :  { %4812 = vst [vmem:[#allocation34 + $0x2] sm:$0x3] %v4811_v11  ;;  %v5316_v17 = vrot.slane %v5314_v61, 1  ;;  %v5171_v45 = vshll.u32 %v5167_v7, 16  ;;  %v5228_v40 = vor.u32 %v5227_v18, %v5223_v14  ;;  %v5400_v5 = vshrl.u32 %v5398_v49, 16 }
 0x5d2   :  { %v5271_v56 = vrot.slane %v9320_v39, 7  ;;  %v5448_v35 = vrot.slane %v9328_v23, 5  ;;  %v4853_v57 = vpop.permute.xlu0 %4852  ;;  %v5139_v47 = vshrl.u32 %v5137_v54, 16  ;;  %v5141_v9 = vshll.u32 %v5137_v54, 16  ;;  %v12614_v2 = vld [vmem:[#allocation3 + $0x8] sm:$0x3] }
 0x5d3   :  { %v4897_v4 = vpop.permute.xlu1 %4896  ;;  %v5317_v32 = vor.u32 %v5316_v17, %v5312_v31  ;;  %v4855_v59 = vsel %vm2665_vm0, %v12389_v20, %v4853_v57  ;;  %v5402_v29 = vshll.u32 %v5398_v49, 16  ;;  %v9321_v44 = vcombine.low %v12578_v25, %v5228_v40  ;;  %v12631_v31 = vld [vmem:[#allocation3 + $0x14] sm:$0x3] }
 0x5d4   :  { %v4899_v51 = vsel %vm2665_vm0, %v12405_v46, %v4897_v4  ;;  %5279 = vst [vmem:[#allocation7] sm:$0x22] %v5271_v56  ;;  %5456 = vst [vmem:[#allocation7] sm:$0x88] %v5448_v35  ;;  %v5143_v3 = vrot.slane %v5141_v9, 1  ;;  %v5173_v27 = vrot.slane %v5171_v45, 1  ;;  %v5340_v0 = vrot.slane %v12612_v63, %v12377_v19 }
 0x5d5   :  { %4856 = vst [vmem:[#allocation34 + $0x4] sm:$0x3] %v4855_v59  ;;  %4900 = vst [vmem:[#allocation34 + $0x6] sm:$0x3] %v4899_v51  ;;  %v9325_v50 = vcombine.low %v12580_v8, %v5317_v32  ;;  %v5404_v28 = vrot.slane %v5402_v29, 1  ;;  %v5158_v20 = vrot.slane %v5156_v26, 1  ;;  %v5236_v46 = vrot.slane %v12614_v2, %v12377_v19 }
 0x5d6   :  { %v4941_v16 = vpop.permute.xlu0 %4940  ;;  %v5144_v15 = vor.u32 %v5143_v3, %v5139_v47  ;;  %v5272_v52 = vrot.slane %v9321_v44, 7  ;;  %v5174_v43 = vor.u32 %v5173_v27, %v5169_v34  ;;  %v5327_v55 = vshrl.u32 %v12602_v13, 16  ;;  %v10440_v35 = vld [vmem:[#allocation24 + $0x100] sm:$0xff]   ;;  %v10442_v34 = vld [vmem:[#allocation24 + $0x148] sm:$0xff]  }
 0x5d7   :  { %v4985_v7 = vpop.permute.xlu1 %4984  ;;  %v5361_v14 = vrot.slane %v9325_v50, 6  ;;  %v4943_v25 = vsel %vm2665_vm0, %v12387_v38, %v4941_v16  ;;  %v5405_v53 = vor.u32 %v5404_v28, %v5400_v5  ;;  %v5344_v58 = vshll.u32 %v5340_v0, 16  ;;  %v10889_v32 = vld [vmem:[#allocation9] ss:$2 sm:$0xf]  ;;  %v10444_v29 = vld [vmem:[#allocation24 + $0x108] sm:$0xff]  }
 0x5d8   :  { %v4987_v8 = vsel %vm2665_vm0, %v12379_v60, %v4985_v7  ;;  %4944 = vst [vmem:[#allocation34 + $0x8] sm:$0x3] %v4943_v25  ;;  %v9317_v26 = vcombine.low %v12596_v33, %v5144_v15  ;;  %5280 = vst [vmem:[#allocation7 + $0x8] sm:$0x22] %v5272_v52  ;;  %v9319_v61 = vcombine.low %v12582_v24, %v5174_v43  ;;  %v5342_v60 = vshrl.u32 %v5340_v0, 16  ;;  %v10447_v50 = vld [vmem:[#allocation24 + $0x150] sm:$0xff]  }
 0x5d9   :  { %4988 = vst [vmem:[#allocation34 + $0xa] sm:$0x3] %v4987_v8  ;;  %5369 = vst [vmem:[#allocation7 + $0x8] sm:$0x44] %v5361_v14  ;;  %v5159_v38 = vor.u32 %v5158_v20, %v5154_v12  ;;  %v9329_v11 = vcombine.low %v12598_v1, %v5405_v53  ;;  %v5240_v39 = vshll.u32 %v5236_v46, 16  ;;  %v5329_v23 = vshll.u32 %v12602_v13, 16 }
 0x5da   :  { %v5029_v54 = vpop.permute.xlu0 %5028  ;;  %5192 = vst [vmem:[#allocation7 + $0x8] sm:$0x11] %v9317_v26  ;;  %5194 = vst [vmem:[#allocation7 + $0x18] sm:$0x11] %v9319_v61  ;;  %v5346_v33 = vrot.slane %v5344_v58, 1  ;;  %v5238_v56 = vshrl.u32 %v5236_v46, 16  ;;  %v5413_v24 = vrot.slane %v12631_v31, %v12377_v19 }
 0x5db   :  { %v5073_v18 = vpop.permute.xlu1 %5072  ;;  %v5460_v17 = vld [vmem:[#allocation7] sm:$0xff]  ;;  %v9318_v49 = vcombine.low %v12568_v30, %v5159_v38  ;;  %v5031_v6 = vsel %vm2665_vm0, %v12395_v22, %v5029_v54  ;;  %v5449_v45 = vrot.slane %v9329_v11, 5  ;;  %v5242_v30 = vrot.slane %v5240_v39, 1  ;;  %v10890_v51 = vld [vmem:[#allocation9 + $0x8] ss:$2 sm:$0xf] }
 0x5dc   :  { %v5075_v12 = vsel %vm2665_vm0, %v12407_v48, %v5073_v18  ;;  %v9332_v1 = vcombine.low %v5460_v17, %v5460_v17  ;;  %v9333_v13 = vcombine.high %v5460_v17, %v5460_v17  ;;  %5032 = vst [vmem:[#allocation34 + $0xc] sm:$0x3] %v5031_v6  ;;  %v5347_v57 = vor.u32 %v5346_v33, %v5342_v60  ;;  %v10891_v15 = vld [vmem:[#allocation9 + $0x10] ss:$2 sm:$0xf]  ;;  %v10449_v25 = vld [vmem:[#allocation24 + $0x110] sm:$0xff]  }
 0x5dd   :  { %5076 = vst [vmem:[#allocation34 + $0xe] sm:$0x3] %v5075_v12  ;;  %5193 = vst [vmem:[#allocation7 + $0x10] sm:$0x11] %v9318_v49  ;;  %v5331_v4 = vrot.slane %v5329_v23, 1  ;;  %v5417_v47 = vshll.u32 %v5413_v24, 16  ;;  %v5243_v48 = vor.u32 %v5242_v30, %v5238_v56 }
 0x5de   :  { %6036 = vmatprep.mubr.bf16.mxu0 %v9333_v13  ;;  %v2892_v19 = vpop.permute.xlu0 %2891  ;;  %5457 = vst [vmem:[#allocation7 + $0x8] sm:$0x88] %v5449_v45  ;;  %v9327_v22 = vcombine.low %v12612_v63, %v5347_v57  ;;  %v5415_v3 = vshrl.u32 %v5413_v24, 16  ;;  %v10892_v14 = vld [vmem:[#allocation9 + $0x18] ss:$2 sm:$0xf] }
 0x5df   :  { %6037 = vmatmul.mubr.bf16.vlgmr.msra.gmra.mrb[16].mxu0 %v9332_v1  ;;  %v2930_v9 = vpop.permute.xlu1 %2929  ;;  %v5332_v40 = vor.u32 %v5331_v4, %v5327_v55  ;;  %v2894_v59 = vsel %vm2665_vm0, %v10889_v32, %v2892_v19  ;;  %v5419_v44 = vrot.slane %v5417_v47, 1  ;;  %v9322_v28 = vcombine.low %v12614_v2, %v5243_v48  ;;  %v10450_v58 = vld [vmem:[#allocation24 + $0x180] sm:$0xff]   ;;  %v10893_v11 = vld [vmem:[#allocation9 + $0x20] ss:$2 sm:$0xf]  ;;  %v10456_v23 = vld [vmem:[#allocation24 + $0x1c8] sm:$0xff]  }
 0x5e0   :  { %10115 = vmatpush3.bf16.msra.mxu0 %v10440_v35  ;;  %v2932_v5 = vsel %vm2665_vm0, %v10890_v51, %v2930_v9  ;;  %2895 = vst [vmem:[#allocation33] sm:$0xf] %v2894_v59  ;;  %v5363_v27 = vrot.slane %v9327_v22, 6  ;;  %v10894_v39 = vld [vmem:[#allocation9 + $0x28] ss:$2 sm:$0xf] }
 0x5e1   :  { %2933 = vst [vmem:[#allocation33 + $0x4] sm:$0xf] %v2932_v5  ;;  %10116 = vmatprep.subr.bf16.mxu0 %v10442_v34  ;;  %v9326_v63 = vcombine.low %v12590_v41, %v5332_v40  ;;  %v5420_v0 = vor.u32 %v5419_v44, %v5415_v3  ;;  %v5273_v16 = vrot.slane %v9322_v28, 7  ;;  %v10453_v41 = vld [vmem:[#allocation24 + $0x158] sm:$0xff]   ;;  %v10459_v18 = vld [vmem:[#allocation24 + $0x160] sm:$0xff]   ;;  %v10458_v56 = vld [vmem:[#allocation24 + $0x188] sm:$0xff]  }
 0x5e2   :  { %v2964_v20 = vpop.permute.xlu0 %2963  ;;  %5371 = vst [vmem:[#allocation7 + $0x18] sm:$0x44] %v5363_v27  ;;  %v10457_v54 = vld [vmem:[#allocation24 + $0x118] sm:$0xff]   ;;  %v10895_v6 = vld [vmem:[#allocation9 + $0x30] ss:$2 sm:$0xf] }
 0x5e3   :  { %v2998_v46 = vpop.permute.xlu1 %2997  ;;  %v5362_v7 = vrot.slane %v9326_v63, 6  ;;  %v2966_v52 = vsel %vm2665_vm0, %v10891_v15, %v2964_v20  ;;  %v9330_v8 = vcombine.low %v12631_v31, %v5420_v0  ;;  %5281 = vst [vmem:[#allocation7 + $0x10] sm:$0x22] %v5273_v16  ;;  %v10896_v1 = vld [vmem:[#allocation9 + $0x38] ss:$2 sm:$0xf] }
 0x5e4   :  { %10117 = vmatpush3.bf16.msra.mxu0 %v10444_v29  ;;  %v3000_v43 = vsel %vm2665_vm0, %v10892_v14, %v2998_v46  ;;  %2967 = vst [vmem:[#allocation33 + $0x8] sm:$0xf] %v2966_v52  ;;  %v10460_v35 = vld [vmem:[#allocation24 + $0x1d0] sm:$0xff]   ;;  %v10461_v34 = vld [vmem:[#allocation24 + $0x120] sm:$0xff]   ;;  %v10463_v45 = vld [vmem:[#allocation24 + $0x168] sm:$0xff]  }
 0x5e5   :  { %3001 = vst [vmem:[#allocation33 + $0xc] sm:$0xf] %v3000_v43  ;;  %10118 = vmatprep.subr.bf16.mxu0 %v10447_v50  ;;  %5370 = vst [vmem:[#allocation7 + $0x10] sm:$0x44] %v5362_v7  ;;  %v5461_v2 = vld [vmem:[#allocation7 + $0x8] sm:$0xff]  ;;  %v5450_v53 = vrot.slane %v9330_v8, 5 }
 0x5e6   :  { %v9334_v55 = vcombine.low %v5461_v2, %v5461_v2  ;;  %v9335_v26 = vcombine.high %v5461_v2, %v5461_v2  ;;  %v3032_v61 = vpop.permute.xlu0 %3031  ;;  %v10462_v4 = vld [vmem:[#allocation24 + $0x190] sm:$0xff]   ;;  %v10464_v48 = vld [vmem:[#allocation24 + $0x1d8] sm:$0xff]   ;;  %v10465_v40 = vld [vmem:[#allocation24 + $0x128] sm:$0xff]  }
 0x5e7   :  { %v3066_v38 = vpop.permute.xlu1 %3065  ;;  %v3034_v60 = vsel %vm2665_vm0, %v10893_v11, %v3032_v61  ;;  %5458 = vst [vmem:[#allocation7 + $0x10] sm:$0x88] %v5450_v53  ;;  %v10897_v9 = vld [vmem:[#allocation9 + $0x40] ss:$2 sm:$0xf]  ;;  %v10466_v29 = vld [vmem:[#allocation24 + $0x198] sm:$0xff]  }
 0x5e8   :  { %10119 = vmatpush3.bf16.msra.mxu0 %v10449_v25  ;;  %v3068_v31 = vsel %vm2665_vm0, %v10894_v39, %v3066_v38  ;;  %6076 = vmatprep.mubr.bf16.mxu1 %v9335_v26  ;;  %3035 = vst [vmem:[#allocation33 + $0x10] sm:$0xf] %v3034_v60  ;;  %v10898_v32 = vld [vmem:[#allocation9 + $0x48] ss:$2 sm:$0xf]  ;;  %v10467_v51 = vld [vmem:[#allocation24 + $0x170] sm:$0xff]  }
 0x5e9   :  { %3069 = vst [vmem:[#allocation33 + $0x14] sm:$0xf] %v3068_v31  ;;  %10120 = vmatprep.subr.bf16.mxu0 %v10453_v41  ;;  %6077 = vmatmul.mubr.bf16.vlgmr.msra.gmra.mrb[144].mxu1 %v9334_v55  ;;  %v12656_v17 = vld [vmem:[#allocation7 + $0x18] sm:$0xff]  ;;  %v10899_v44 = vld [vmem:[#allocation9 + $0x50] ss:$2 sm:$0xf] }
 0x5ea   :  { %10137 = vmatpush3.bf16.msra.mxu1 %v10450_v58  ;;  %v9339_v33 = vcombine.high %v12656_v17, %v12656_v17  ;;  %v3100_v49 = vpop.permute.xlu0 %3099  ;;  %v10900_v27 = vld [vmem:[#allocation9 + $0x58] ss:$2 sm:$0xf]  ;;  %v10468_v63 = vld [vmem:[#allocation24 + $0x1e0] sm:$0xff]   ;;  %v10469_v0 = vld [vmem:[#allocation24 + $0x130] sm:$0xff]  }
 0x5eb   :  { %v3134_v24 = vpop.permute.xlu1 %3133  ;;  %10138 = vmatprep.subr.bf16.mxu1 %v10456_v23  ;;  %v3102_v12 = vsel %vm2665_vm0, %v10895_v6, %v3100_v49  ;;  %v10471_v20 = vld [vmem:[#allocation24 + $0x178] sm:$0xff]   ;;  %v10470_v16 = vld [vmem:[#allocation24 + $0x1a0] sm:$0xff]   ;;  %v10901_v15 = vld [vmem:[#allocation9 + $0x60] ss:$2 sm:$0xf]  ;;  %v9338_v23 = vcombine.low %v12656_v17, %v12656_v17  ;;  %v11317_v49 = vmov 0  }
 0x5ec   :  { %10121 = vmatpush3.bf16.msra.mxu0 %v10457_v54  ;;  %v3136_v13 = vsel %vm2665_vm0, %v10896_v1, %v3134_v24  ;;  %6156 = vmatprep.mubr.bf16.mxu1 %v9339_v33  ;;  %3103 = vst [vmem:[#allocation33 + $0x18] sm:$0xf] %v3102_v12  ;;  %v10902_v14 = vld [vmem:[#allocation9 + $0x68] ss:$2 sm:$0xf]  ;;  %v10472_v25 = vld [vmem:[#allocation24 + $0x1e8] sm:$0xff]  }
 0x5ed   :  { %3137 = vst [vmem:[#allocation33 + $0x1c] sm:$0xf] %v3136_v13  ;;  %10122 = vmatprep.subr.bf16.mxu0 %v10459_v18  ;;  %v10473_v8 = vld [vmem:[#allocation24 + $0x138] sm:$0xff]   ;;  %v10474_v2 = vld [vmem:[#allocation24 + $0x1a8] sm:$0xff]   ;;  %v10475_v38 = vld [vmem:[#allocation24 + $0x1f0] sm:$0xff]  }
 0x5ee   :  { %v12662_v57 = vld [vmem:[#allocation7 + $0x10] sm:$0xff]  ;;  %10139 = vmatpush3.bf16.msra.mxu1 %v10458_v56  ;;  %v3168_v30 = vpop.permute.xlu0 %3167  ;;  %v10903_v55 = vld [vmem:[#allocation9 + $0x70] ss:$2 sm:$0xf]  ;;  %v10477_v39 = vld [vmem:[#allocation24 + $0x1f8] sm:$0xff]  }
 0x5ef   :  { %v3202_v47 = vpop.permute.xlu1 %3201  ;;  %v9337_v19 = vcombine.high %v12662_v57, %v12662_v57  ;;  %10140 = vmatprep.subr.bf16.mxu1 %v10460_v35  ;;  %v3170_v22 = vsel %vm2665_vm0, %v10897_v9, %v3168_v30  ;;  %v10904_v61 = vld [vmem:[#allocation9 + $0x78] ss:$2 sm:$0xf]  ;;  %v9336_v11 = vcombine.low %v12662_v57, %v12662_v57  ;;  %v10476_v60 = vld [vmem:[#allocation24 + $0x1b0] sm:$0xff]   ;;  %v10478_v31 = vld [vmem:[#allocation24 + $0x1b8] sm:$0xff]  }
 0x5f0   :  { %10123 = vmatpush3.bf16.msra.mxu0 %v10461_v34  ;;  %3171 = vst [vmem:[#allocation33 + $0x20] sm:$0xf] %v3170_v22  ;;  %v3204_v59 = vsel %vm2665_vm0, %v10898_v32, %v3202_v47  ;;  %v452_v18 = vld [vmem:[#allocation4 + $0x2] sm:$0x3]  ;;  %v455_v33 = vld [vmem:[#allocation4 + $0x4] sm:$0x3] }
 0x5f1   :  { %10124 = vmatprep.subr.bf16.mxu0 %v10463_v45  ;;  %6116 = vmatprep.mubr.bf16.mxu0 %v9337_v19  ;;  %3205 = vst [vmem:[#allocation33 + $0x24] sm:$0xf] %v3204_v59  ;;  %443 = vst [vmem:[#allocation4] sm:$0x3] %v11317_v49  ;;  %v464_v24 = vld [vmem:[#allocation4 + $0xa] sm:$0x3] }
 0x5f2   :  { %10141 = vmatpush3.bf16.msra.mxu1 %v10462_v4  ;;  %v3236_v5 = vpop.permute.xlu0 %3235  ;;  %444 = vst [vmem:[#allocation4 + $0x8] sm:$0x3] %v11317_v49  ;;  %446 = vst [vmem:[#allocation4 + $0x6] sm:$0x3] %v11317_v49  ;;  %v467_v6 = vld [vmem:[#allocation4 + $0xc] sm:$0x3] }
 0x5f3   :  { %v3270_v3 = vpop.permute.xlu1 %3269  ;;  %10142 = vmatprep.subr.bf16.mxu1 %v10464_v48  ;;  %v3238_v50 = vsel %vm2665_vm0, %v10899_v44, %v3236_v5  ;;  %447 = vst [vmem:[#allocation4 + $0xe] sm:$0x3] %v11317_v49  ;;  %v10506_v49 = vld [vmem:[#allocation29 + $0x240] ss:$8 sps:$4 sm:$0xff]  }
 0x5f4   :  { %10125 = vmatpush3.bf16.msra.mxu0 %v10465_v40  ;;  %v3272_v28 = vsel %vm2665_vm0, %v10900_v27, %v3270_v3  ;;  %3239 = vst [vmem:[#allocation33 + $0x28] sm:$0xf] %v3238_v50 }
 0x5f5   :  { %3273 = vst [vmem:[#allocation33 + $0x2c] sm:$0xf] %v3272_v28  ;;  %10126 = vmatprep.subr.bf16.mxu0 %v10467_v51 }
 0x5f6   :  { %10143 = vmatpush3.bf16.msra.mxu1 %v10466_v29  ;;  %v3304_v46 = vpop.permute.xlu0 %3303 }
 0x5f7   :  { %v3338_v7 = vpop.permute.xlu1 %3337  ;;  %10144 = vmatprep.subr.bf16.mxu1 %v10468_v63  ;;  %v3306_v52 = vsel %vm2665_vm0, %v10901_v15, %v3304_v46  ;;  %v10479_v46 = vld [vmem:[#allocation29] ss:$8 sps:$4 sm:$0xff]   ;;  %v10487_v15 = vld [vmem:[#allocation29 + $0x14] ss:$8 sps:$4 sm:$0xff]  }
 0x5f8   :  { %10127 = vmatpush3.bf16.msra.mxu0 %v10469_v0  ;;  %v3340_v43 = vsel %vm2665_vm0, %v10902_v14, %v3338_v7  ;;  %3307 = vst [vmem:[#allocation33 + $0x30] sm:$0xf] %v3306_v52  ;;  %v449_v35 = vld [vmem:[#allocation4] sm:$0x3]  ;;  %v10482_v7 = vld [vmem:[#allocation29 + $0x200] ss:$8 sps:$4 sm:$0xff]  }
 0x5f9   :  { %3341 = vst [vmem:[#allocation33 + $0x34] sm:$0xf] %v3340_v43  ;;  %10128 = vmatprep.subr.bf16.mxu0 %v10471_v20  ;;  %v458_v34 = vld [vmem:[#allocation4 + $0x6] sm:$0x3]  ;;  %v461_v45 = vld [vmem:[#allocation4 + $0x8] sm:$0x3] }
 0x5fa   :  { %10145 = vmatpush3.bf16.msra.mxu1 %v10470_v16  ;;  %v3372_v41 = vpop.permute.xlu0 %3371  ;;  %v470_v47 = vld [vmem:[#allocation4 + $0xe] sm:$0x3]  ;;  %v10481_v20 = vld [vmem:[#allocation29 + $0x4] ss:$8 sps:$4 sm:$0xff]   ;;  %v10490_v14 = vld [vmem:[#allocation29 + $0x214] ss:$8 sps:$4 sm:$0xff]  }
 0x5fb   :  { %v3406_v53 = vpop.permute.xlu1 %3405  ;;  %10146 = vmatprep.subr.bf16.mxu1 %v10472_v25  ;;  %v3374_v26 = vsel %vm2665_vm0, %v10903_v55, %v3372_v41  ;;  %v10484_v16 = vld [vmem:[#allocation29 + $0x204] ss:$8 sps:$4 sm:$0xff]   ;;  %v10485_v52 = vld [vmem:[#allocation29 + $0x10] ss:$8 sps:$4 sm:$0xff]   ;;  %v10494_v41 = vld [vmem:[#allocation29 + $0x220] ss:$8 sps:$4 sm:$0xff]  }
 0x5fc   :  { %10129 = vmatpush3.bf16.msra.mxu0 %v10473_v8  ;;  %v3408_v58 = vsel %vm2665_vm0, %v10904_v61, %v3406_v53  ;;  %3375 = vst [vmem:[#allocation33 + $0x38] sm:$0xf] %v3374_v26  ;;  %vm12682_vm0 = vmor %vm12327_vm11, %vm11774_vm5  ;;  %vm473_vm11 = vsmask.f32 7938  ;;  %v10488_v43 = vld [vmem:[#allocation29 + $0x210] ss:$8 sps:$4 sm:$0xff]  }
 0x5fd   :  { %3409 = vst [vmem:[#allocation33 + $0x3c] sm:$0xf] %v3408_v58  ;;  %v453_v56 = vsel %vm12682_vm0, 0, %v452_v18  ;;  %v456_v17 = vsel %vm12682_vm0, 0, %v455_v33  ;;  %v465_v10 = vsel %vm12682_vm0, 0, %v464_v24  ;;  %v468_v12 = vsel %vm12682_vm0, 0, %v467_v6  ;;  %vm12695_vm13 = vmand %vm228_vm2, %vm473_vm11  ;;  %8640 = vmatprep.subr.bf16.mxu0 %v10484_v16 }
 0x5fe   :  { %10147 = vmatpush3.bf16.msra.mxu1 %v10474_v2  ;;  %454 = vst [vmem:[#allocation4 + $0x2] sm:$0x3] %v453_v56  ;;  %457 = vst [vmem:[#allocation4 + $0x4] sm:$0x3] %v456_v17  ;;  %v450_v57 = vsel %vm12682_vm0, 0, %v449_v35  ;;  %v459_v30 = vsel %vm12682_vm0, 0, %v458_v34 }
 0x5ff   :  { %6117 = vmatmul.mubr.bf16.vlgmr.msra.gmra.mrb[20].mxu0 %v9336_v11  ;;  %10148 = vmatprep.subr.bf16.mxu1 %v10475_v38  ;;  %466 = vst [vmem:[#allocation4 + $0xa] sm:$0x3] %v465_v10  ;;  %469 = vst [vmem:[#allocation4 + $0xc] sm:$0x3] %v468_v12  ;;  %v462_v4 = vsel %vm12682_vm0, 0, %v461_v45  ;;  %v471_v19 = vsel %vm12682_vm0, 0, %v470_v47 }
 0x600   :  { %vm12702_vm15 = vmor %vm476_vm14, %vm12695_vm13  ;;  %451 = vst [vmem:[#allocation4] sm:$0x3] %v450_v57  ;;  %8641 = vmatpush1.bf16.msra.mxu0 %v10482_v7  ;;  %v10493_v25 = vld [vmem:[#allocation29 + $0x24] ss:$8 sps:$4 sm:$0xff]   ;;  %v10491_v8 = vld [vmem:[#allocation29 + $0x20] ss:$8 sps:$4 sm:$0xff]  }
 0x601   :  { %460 = vst [vmem:[#allocation4 + $0x6] sm:$0x3] %v459_v30  ;;  %463 = vst [vmem:[#allocation4 + $0x8] sm:$0x3] %v462_v4  ;;  %8642 = vmatprep.subr.bf16.mxu0 %v10490_v14  ;;  %v10496_v2 = vld [vmem:[#allocation29 + $0x224] ss:$8 sps:$4 sm:$0xff]  }
 0x602   :  { %10149 = vmatpush3.bf16.msra.mxu1 %v10476_v60  ;;  %472 = vst [vmem:[#allocation4 + $0xe] sm:$0x3] %v471_v19  ;;  %v10497_v53 = vld [vmem:[#allocation29 + $0x30] ss:$8 sps:$4 sm:$0xff]   ;;  %v10499_v55 = vld [vmem:[#allocation29 + $0x34] ss:$8 sps:$4 sm:$0xff]   ;;  %vm6626_vm7 = vmor %vm11780_vm6, %vm12682_vm0 }
 0x603   :  { %10150 = vmatprep.subr.bf16.mxu1 %v10477_v39  ;;  %v10502_v26 = vld [vmem:[#allocation29 + $0x234] ss:$8 sps:$4 sm:$0xff]   ;;  %v10505_v61 = vld [vmem:[#allocation29 + $0x44] ss:$8 sps:$4 sm:$0xff]   ;;  %v10500_v38 = vld [vmem:[#allocation29 + $0x230] ss:$8 sps:$4 sm:$0xff]  }
 0x604   :  { %8643 = vmatpush1.bf16.msra.mxu0 %v10488_v43  ;;  %v10508_v60 = vld [vmem:[#allocation29 + $0x244] ss:$8 sps:$4 sm:$0xff]   ;;  %v10511_v33 = vld [vmem:[#allocation29 + $0x54] ss:$8 sps:$4 sm:$0xff]   ;;  %v10509_v17 = vld [vmem:[#allocation29 + $0x50] ss:$8 sps:$4 sm:$0xff]  }
 0x605   :  { %v481_v9 = vld [vmem:[#allocation4 + $0x2] sm:$0x3]  ;;  %v484_v22 = vld [vmem:[#allocation4 + $0x4] sm:$0x3]  ;;  %8644 = vmatprep.subr.bf16.mxu0 %v10496_v2  ;;  %v10514_v56 = vld [vmem:[#allocation29 + $0x254] ss:$8 sps:$4 sm:$0xff]  }
 0x606   :  { %10151 = vmatpush3.bf16.msra.mxu1 %v10478_v31  ;;  %v482_v48 = vsel %vm12702_vm15, 0, %v481_v9  ;;  %v485_v40 = vsel %vm12702_vm15, 0, %v484_v22  ;;  %v493_v32 = vld [vmem:[#allocation4 + $0xa] sm:$0x3]  ;;  %v496_v59 = vld [vmem:[#allocation4 + $0xc] sm:$0x3] }
 0x607   :  { %483 = vst [vmem:[#allocation4 + $0x2] sm:$0x3] %v482_v48  ;;  %486 = vst [vmem:[#allocation4 + $0x4] sm:$0x3] %v485_v40  ;;  %v494_v51 = vsel %vm12702_vm15, 0, %v493_v32  ;;  %v497_v5 = vsel %vm12702_vm15, 0, %v496_v59  ;;  %8558 = vmatprep.subr.bf16.mxu1 %v10481_v20 }
 0x608   :  { %495 = vst [vmem:[#allocation4 + $0xa] sm:$0x3] %v494_v51  ;;  %498 = vst [vmem:[#allocation4 + $0xc] sm:$0x3] %v497_v5  ;;  %v478_v29 = vld [vmem:[#allocation4] sm:$0x3]  ;;  %8645 = vmatpush1.bf16.msra.mxu0 %v10494_v41 }
 0x609   :  { %6157 = vmatmul.mubr.bf16.vlgmr.msra.gmra.mrb[148].mxu1 %v9338_v23  ;;  %v487_v3 = vld [vmem:[#allocation4 + $0x6] sm:$0x3]  ;;  %v490_v44 = vld [vmem:[#allocation4 + $0x8] sm:$0x3]  ;;  %v479_v50 = vsel %vm12702_vm15, 0, %v478_v29  ;;  %8646 = vmatprep.subr.bf16.mxu0 %v10502_v26  ;;  %vm6635_vm14 = vcmask 1045509  }
 0x60a   :  { %v488_v27 = vsel %vm12702_vm15, 0, %v487_v3  ;;  %v491_v28 = vsel %vm12702_vm15, 0, %v490_v44  ;;  %v499_v63 = vld [vmem:[#allocation4 + $0xe] sm:$0x3]  ;;  %480 = vst [vmem:[#allocation4] sm:$0x3] %v479_v50  ;;  %8559 = vmatpush1.bf16.msra.mxu1 %v10479_v46 }
 0x60b   :  { %v500_v0 = vsel %vm12702_vm15, 0, %v499_v63  ;;  %489 = vst [vmem:[#allocation4 + $0x6] sm:$0x3] %v488_v27  ;;  %492 = vst [vmem:[#allocation4 + $0x8] sm:$0x3] %v491_v28  ;;  %8560 = vmatprep.subr.bf16.mxu1 %v10487_v15 }
 0x60c   :  { %501 = vst [vmem:[#allocation4 + $0xe] sm:$0x3] %v500_v0  ;;  %v10503_v23 = vld [vmem:[#allocation29 + $0x40] ss:$8 sps:$4 sm:$0xff]   ;;  %8647 = vmatpush1.bf16.msra.mxu0 %v10500_v38  ;;  %v10517_v24 = vld [vmem:[#allocation29 + $0x64] ss:$8 sps:$4 sm:$0xff]  }
 0x60d   :  { %8648 = vmatprep.subr.bf16.mxu0 %v10508_v60  ;;  %v10512_v6 = vld [vmem:[#allocation29 + $0x250] ss:$8 sps:$4 sm:$0xff]   ;;  %v10520_v10 = vld [vmem:[#allocation29 + $0x264] ss:$8 sps:$4 sm:$0xff]   ;;  %v10515_v12 = vld [vmem:[#allocation29 + $0x60] ss:$8 sps:$4 sm:$0xff]  }
 0x60e   :  { %8561 = vmatpush1.bf16.msra.mxu1 %v10485_v52  ;;  %v10523_v34 = vld [vmem:[#allocation29 + $0x74] ss:$8 sps:$4 sm:$0xff]   ;;  %v10518_v57 = vld [vmem:[#allocation29 + $0x260] ss:$8 sps:$4 sm:$0xff]   ;;  %v10521_v9 = vld [vmem:[#allocation29 + $0x70] ss:$8 sps:$4 sm:$0xff]  }
 0x60f   :  { %8562 = vmatprep.subr.bf16.mxu1 %v10493_v25  ;;  %v10526_v47 = vld [vmem:[#allocation29 + $0x274] ss:$8 sps:$4 sm:$0xff]   ;;  %v10529_v48 = vld [vmem:[#allocation29 + $0x84] ss:$8 sps:$4 sm:$0xff]   ;;  %v10524_v40 = vld [vmem:[#allocation29 + $0x270] ss:$8 sps:$4 sm:$0xff]  }
 0x610   :  { %8649 = vmatpush1.bf16.msra.mxu0 %v10506_v49  ;;  %v10532_v32 = vld [vmem:[#allocation29 + $0x284] ss:$8 sps:$4 sm:$0xff]   ;;  %v10527_v59 = vld [vmem:[#allocation29 + $0x80] ss:$8 sps:$4 sm:$0xff]   ;;  %v10535_v51 = vld [vmem:[#allocation29 + $0x94] ss:$8 sps:$4 sm:$0xff]  }
 0x611   :  { %8650 = vmatprep.subr.bf16.mxu0 %v10514_v56  ;;  %v10530_v5 = vld [vmem:[#allocation29 + $0x280] ss:$8 sps:$4 sm:$0xff]   ;;  %v10538_v29 = vld [vmem:[#allocation29 + $0x294] ss:$8 sps:$4 sm:$0xff]   ;;  %v10533_v3 = vld [vmem:[#allocation29 + $0x90] ss:$8 sps:$4 sm:$0xff]  }
 0x612   :  { %8563 = vmatpush1.bf16.msra.mxu1 %v10491_v8  ;;  %v10541_v44 = vld [vmem:[#allocation29 + $0xa4] ss:$8 sps:$4 sm:$0xff]   ;;  %v10536_v50 = vld [vmem:[#allocation29 + $0x290] ss:$8 sps:$4 sm:$0xff]   ;;  %v10539_v28 = vld [vmem:[#allocation29 + $0xa0] ss:$8 sps:$4 sm:$0xff]  }
 0x613   :  { %8564 = vmatprep.subr.bf16.mxu1 %v10499_v55  ;;  %v10544_v27 = vld [vmem:[#allocation29 + $0x2a4] ss:$8 sps:$4 sm:$0xff]   ;;  %v10547_v63 = vld [vmem:[#allocation29 + $0xb4] ss:$8 sps:$4 sm:$0xff]   ;;  %v10542_v0 = vld [vmem:[#allocation29 + $0x2a0] ss:$8 sps:$4 sm:$0xff]  }
 0x614   :  { %8651 = vmatpush1.bf16.msra.mxu0 %v10512_v6  ;;  %v10550_v20 = vld [vmem:[#allocation29 + $0x2b4] ss:$8 sps:$4 sm:$0xff]   ;;  %v10545_v46 = vld [vmem:[#allocation29 + $0xb0] ss:$8 sps:$4 sm:$0xff]   ;;  %v10553_v16 = vld [vmem:[#allocation29 + $0xc4] ss:$8 sps:$4 sm:$0xff]  }
 0x615   :  { %8652 = vmatprep.subr.bf16.mxu0 %v10520_v10  ;;  %v10548_v15 = vld [vmem:[#allocation29 + $0x2b0] ss:$8 sps:$4 sm:$0xff]   ;;  %v10556_v14 = vld [vmem:[#allocation29 + $0x2c4] ss:$8 sps:$4 sm:$0xff]   ;;  %v10551_v8 = vld [vmem:[#allocation29 + $0xc0] ss:$8 sps:$4 sm:$0xff]  }
 0x616   :  { %8565 = vmatpush1.bf16.msra.mxu1 %v10497_v53  ;;  %v10559_v2 = vld [vmem:[#allocation29 + $0xd4] ss:$8 sps:$4 sm:$0xff]   ;;  %v10554_v55 = vld [vmem:[#allocation29 + $0x2c0] ss:$8 sps:$4 sm:$0xff]   ;;  %v10560_v38 = vld [vmem:[#allocation29 + $0x2d0] ss:$8 sps:$4 sm:$0xff]  }
 0x617   :  { %8566 = vmatprep.subr.bf16.mxu1 %v10505_v61  ;;  %v10562_v26 = vld [vmem:[#allocation29 + $0x2d4] ss:$8 sps:$4 sm:$0xff]   ;;  %v10557_v61 = vld [vmem:[#allocation29 + $0xd0] ss:$8 sps:$4 sm:$0xff]   ;;  %v10563_v60 = vld [vmem:[#allocation29 + $0xe0] ss:$8 sps:$4 sm:$0xff]  }
 0x618   :  { %8653 = vmatpush1.bf16.msra.mxu0 %v10518_v57  ;;  %v10574_v56 = vld [vmem:[#allocation29 + $0x2f4] ss:$8 sps:$4 sm:$0xff]   ;;  %v10577_v10 = vld [vmem:[#allocation29 + $0x104] ss:$8 sps:$4 sm:$0xff]   ;;  %vm6632_vm11 = vsmask.f32 4352 }
 0x619   :  { %8654 = vmatprep.subr.bf16.mxu0 %v10526_v47  ;;  %vm6636_vm6 = vsmask.f32 5376  ;;  %vm6644_vm0 = vsmask.f32 7424 }
 0x61a   :  { %8567 = vmatpush1.bf16.msra.mxu1 %v10503_v23 }
 0x61b   :  { %8568 = vmatprep.subr.bf16.mxu1 %v10511_v33 }
 0x61c   :  { %8655 = vmatpush1.bf16.msra.mxu0 %v10524_v40 }
 0x61d   :  { %8656 = vmatprep.subr.bf16.mxu0 %v10532_v32 }
 0x61e   :  { %8569 = vmatpush1.bf16.msra.mxu1 %v10509_v17 }
 0x61f   :  { %8570 = vmatprep.subr.bf16.mxu1 %v10517_v24  ;;  %v10569_v24 = vld [vmem:[#allocation29 + $0xf0] ss:$8 sps:$4 sm:$0xff]  }
 0x620   :  { %8657 = vmatpush1.bf16.msra.mxu0 %v10530_v5 }
 0x621   :  { %8658 = vmatprep.subr.bf16.mxu0 %v10538_v29 }
 0x622   :  { %8571 = vmatpush1.bf16.msra.mxu1 %v10515_v12  ;;  %v10572_v12 = vld [vmem:[#allocation29 + $0x2f0] ss:$8 sps:$4 sm:$0xff]  }
 0x623   :  { %8572 = vmatprep.subr.bf16.mxu1 %v10523_v34  ;;  %v10580_v34 = vld [vmem:[#allocation29 + $0x304] ss:$8 sps:$4 sm:$0xff]  }
 0x624   :  { %8659 = vmatpush1.bf16.msra.mxu0 %v10536_v50 }
 0x625   :  { %8660 = vmatprep.subr.bf16.mxu0 %v10544_v27  ;;  %v11318_v27 = vmov 1966171168  }
 0x626   :  { %8573 = vmatpush1.bf16.msra.mxu1 %v10521_v9 }
 0x627   :  { %8574 = vmatprep.subr.bf16.mxu1 %v10529_v48 }
 0x628   :  { %8661 = vmatpush1.bf16.msra.mxu0 %v10542_v0 }
 0x629   :  { %8662 = vmatprep.subr.bf16.mxu0 %v10550_v20  ;;  %v9405_v20 = vld.sshfl [vmem:[#allocation4] sm:$0x11 pattern:$0x75316420] }
 0x62a   :  { %8575 = vmatpush1.bf16.msra.mxu1 %v10527_v59 }
 0x62b   :  { %8576 = vmatprep.subr.bf16.mxu1 %v10535_v51 }
 0x62c   :  { %8663 = vmatpush1.bf16.msra.mxu0 %v10548_v15 }
 0x62d   :  { %8664 = vmatprep.subr.bf16.mxu0 %v10556_v14 }
 0x62e   :  { %8577 = vmatpush1.bf16.msra.mxu1 %v10533_v3 }
 0x62f   :  { %8578 = vmatprep.subr.bf16.mxu1 %v10541_v44  ;;  %v6180_v44 = vld [vmem:[#allocation26] sm:$0x1] }
 0x630   :  { %8665 = vmatpush1.bf16.msra.mxu0 %v10554_v55 }
 0x631   :  { %8666 = vmatprep.subr.bf16.mxu0 %v10562_v26 }
 0x632   :  { %8579 = vmatpush1.bf16.msra.mxu1 %v10539_v28  ;;  %v6209_v28 = vunpack.c.l.s4 %v11318_v27  ;;  %v6403_v27 = vld [vmem:[#allocation4 + $0xd] sm:$0x1] }
 0x633   :  { %8580 = vmatprep.subr.bf16.mxu1 %v10547_v63 }
 0x634   :  { %8667 = vmatpush1.bf16.msra.mxu0 %v10560_v38 }
 0x636   :  { %8581 = vmatpush1.bf16.msra.mxu1 %v10545_v46  ;;  %v6210_v46 = vunpack.c.0.s8 %v6209_v28 }
 0x637   :  { %8582 = vmatprep.subr.bf16.mxu1 %v10553_v16  ;;  %v9404_v16 = vld [vmem:[#allocation27] ss:$0 sm:$0xff] }
 0x63a   :  { %8583 = vmatpush1.bf16.msra.mxu1 %v10551_v8 }
 0x63b   :  { %8584 = vmatprep.subr.bf16.mxu1 %v10559_v2 }
 0x63e   :  { %8585 = vmatpush1.bf16.msra.mxu1 %v10557_v61  ;;  %v9408_v61 = vld.sshfl [vmem:[#allocation4 + $0x6] sm:$0x11 pattern:$0x75316420] }
 0x6b2   :  { %v10086_v58 = vpop.f32.mrb[16].mxu0 }
 0x6b3   :  { %v10087_v11 = vpop.f32.mrb[17].mxu0 }
 0x6b4   :  { %v10088_v39 = vadd.f32 %v10087_v11, %v10086_v58  ;;  %v10089_v31 = vpop.f32.mrb[18].mxu0  ;;  %v10565_v58 = vld [vmem:[#allocation29 + $0xe4] ss:$8 sps:$4 sm:$0xff]  }
 0x6b5   :  { %v10090_v18 = vpop.f32.mrb[19].mxu0  ;;  %v10568_v11 = vld [vmem:[#allocation29 + $0x2e4] ss:$8 sps:$4 sm:$0xff]   ;;  %8586 = vmatprep.subr.bf16.mxu1 %v10565_v58  ;;  %v10571_v31 = vld [vmem:[#allocation29 + $0xf4] ss:$8 sps:$4 sm:$0xff]  }
 0x6b6   :  { %v10566_v18 = vld [vmem:[#allocation29 + $0x2e0] ss:$8 sps:$4 sm:$0xff]   ;;  %8668 = vmatprep.subr.bf16.mxu0 %v10568_v11  ;;  %8587 = vmatpush1.bf16.msra.mxu1 %v10563_v60 }
 0x6b7   :  { %8588 = vmatprep.subr.bf16.mxu1 %v10571_v31  ;;  %8669 = vmatpush1.bf16.msra.mxu0 %v10566_v18  ;;  %v12750_v31 = vld.sshfl [vmem:[#allocation4 + $0xe] sm:$0x11 pattern:$0x75316420]  ;;  %v6303_v18 = vld [vmem:[#allocation4 + $0x5] sm:$0x1] }
 0x6b8   :  { %8670 = vmatprep.subr.bf16.mxu0 %v10574_v56 }
 0x6ba   :  { %8589 = vmatpush1.bf16.msra.mxu1 %v10569_v24 }
 0x6bb   :  { %8599 = vmatprep.subr.bf16.mxu1 %v10577_v10  ;;  %8671 = vmatpush1.bf16.msra.mxu0 %v10572_v12 }
 0x6bc   :  { %v10108_v35 = vpop.f32.mrb[144].mxu1  ;;  %8681 = vmatprep.subr.bf16.mxu0 %v10580_v34 }
 0x6bd   :  { %v10109_v45 = vpop.f32.mrb[145].mxu1 }
 0x6be   :  { %v10110_v30 = vadd.f32 %v10109_v45, %v10108_v35  ;;  %v10111_v4 = vpop.f32.mrb[146].mxu1 }
 0x6bf   :  { %v10112_v19 = vpop.f32.mrb[147].mxu1 }
 0x6c0   :  { %v6079_v22 = vadd.f32 %v10110_v30, %v10088_v39 }
 0x6d2   :  { %v10130_v7 = vpop.f32.mrb[20].mxu0 }
 0x6d3   :  { %v10131_v52 = vpop.f32.mrb[21].mxu0 }
 0x6d4   :  { %v10132_v43 = vadd.f32 %v10131_v52, %v10130_v7  ;;  %v10133_v25 = vpop.f32.mrb[22].mxu0  ;;  %v9409_v7 = vld.sshfl [vmem:[#allocation4 + $0x8] sm:$0x11 pattern:$0x75316420]  ;;  %v6418_v52 = vcombine.high %v9405_v20, %v9405_v20 }
 0x6d5   :  { %v10134_v41 = vpop.f32.mrb[23].mxu0  ;;  %v12732_v25 = vsub.s32 %v6210_v46, %v11957_v37 }
 0x6d6   :  { %v6119_v53 = vadd.f32 %v10132_v43, %v6079_v22  ;;  %v6666_v43 = vcombine.high %v9409_v7, %v9409_v7 }
 0x6d7   :  { %v12735_v41 = vrot.slane %v9405_v20, %v12732_v25  ;;  %v12738_v2 = vrot.slane %v6418_v52, %v12732_v25  ;;  %v12741_v55 = vrot.slane %v9409_v7, %v12732_v25  ;;  %v12766_v34 = vrot.slane %v9408_v61, %v12732_v25  ;;  %v6249_v52 = vld [vmem:[#allocation4 + $0x2] sm:$0x1] }
 0x6d8   :  { %v12744_v26 = vrot.slane %v6666_v43, %v12732_v25 }
 0x6d9   :  { %v6434_v58 = vshrl.u32 %v12735_v41, 16  ;;  %v6437_v38 = vshrl.u32 %v12738_v2, 16  ;;  %v6682_v11 = vshrl.u32 %v12741_v55, 16  ;;  %v6521_v1 = vshrl.u32 %v12766_v34, 16 }
 0x6da   :  { %v6685_v60 = vshrl.u32 %v12744_v26, 16 }
 0x6db   :  { %v12754_v56 = vcombine.low %v6434_v58, %v6437_v38  ;;  %v6299_v58 = vld [vmem:[#allocation4 + $0x4] sm:$0x1]  ;;  %v6349_v38 = vld [vmem:[#allocation4 + $0xa] sm:$0x1] }
 0x6dc   :  { %v10152_v39 = vpop.f32.mrb[148].mxu1 }
 0x6dd   :  { %v10153_v23 = vpop.f32.mrb[149].mxu1 }
 0x6de   :  { %v10154_v33 = vadd.f32 %v10153_v23, %v10152_v39  ;;  %v10155_v49 = vpop.f32.mrb[150].mxu1  ;;  %v6505_v39 = vcombine.high %v9408_v61, %v9408_v61  ;;  %v6253_v23 = vld [vmem:[#allocation4 + $0x3] sm:$0x1] }
 0x6df   :  { %v10156_v17 = vpop.f32.mrb[151].mxu1  ;;  %v6526_v49 = vcombine.low %v12735_v41, %v12738_v2  ;;  %v10619_v41 = vld [vmem:[#allocation29 + $0x174] ss:$8 sps:$4 sm:$0xff]  }
 0x6e0   :  { %v6159_v6 = vadd.f32 %v10154_v33, %v6119_v53  ;;  %v6353_v33 = vld [vmem:[#allocation4 + $0xb] sm:$0x1]  ;;  %v6774_v17 = vcombine.low %v12741_v55, %v12744_v26 }
 0x6e2   :  { %v6164_v35 = vrot.slane %v6159_v6, 4 }
 0x6e4   :  { %v6165_v45 = vadd.f32 %v6164_v35, %v6159_v6  ;;  %v12763_v35 = vcombine.low %v6682_v11, %v6685_v60 }
 0x6e6   :  { %v6166_v57 = vrot.slane %v6165_v45, 2 }
 0x6e8   :  { %v6167_v30 = vadd.f32 %v6166_v57, %v6165_v45  ;;  %v12769_v45 = vrot.slane %v6505_v39, %v12732_v25  ;;  %v6753_v57 = vcombine.high %v12750_v31, %v12750_v31 }
 0x6ea   :  { %v6168_v4 = vrot.slane %v6167_v30, 1  ;;  %v6577_v2 = vcombine.low %v12766_v34, %v12769_v45 }
 0x6ec   :  { %v6169_v47 = vadd.f32 %v6168_v4, %v6167_v30 }
 0x6ee   :  { %v6170_v19 = vmul.f32 0.125, %v6169_v47 }
 0x6f0   :  { %v6171_v9 = vsub.f32 %v6159_v6, %v6170_v19 }
 0x6f2   :  { %v6172_v22 = vmul.f32 %v6171_v9, %v6171_v9 }
 0x6f4   :  { %v6173_v48 = vrot.slane %v6172_v22, 4 }
 0x6f6   :  { %v6174_v40 = vadd.f32 %v6173_v48, %v6172_v22 }
 0x6f8   :  { %v6175_v32 = vrot.slane %v6174_v40, 2 }
 0x6fa   :  { %v6176_v59 = vadd.f32 %v6175_v32, %v6174_v40 }
 0x6fc   :  { %v6177_v51 = vrot.slane %v6176_v59, 1 }
 0x6fe   :  { %v6178_v5 = vadd.f32 %v6177_v51, %v6176_v59 }
 0x700   :  { %v6179_v29 = vmul.f32 0.125, %v6178_v5 }
 0x702   :  { %v6181_v3 = vadd.f32 1e-05, %v6179_v29 }
 0x704   :  { %10867 = vrsqrt.f32 %v6181_v3 }
 0x70e   :  { %v10868_v50 = vpop.eup %10867 }
 0x70f   :  { %v6183_v63 = vmul.f32 %v10868_v50, %v6180_v44 }
 0x711   :  { %v6188_v0 = vrot.slane %v6183_v63, %v11960_v42 }
 0x713   :  { %v6190_v15 = vmul.f32 %v6188_v0, %v6171_v9 }
 0x715   :  { %v6198_v14 = vadd.f32 %v9404_v16, %v6190_v15 }
 0x717   :  { %vm6199_vm2 = vcmp.ge.f32.partialorder %v6198_v14, 0.0  ;;  %v6200_v8 = vmul.f32 0.2, %v6198_v14 }
 0x719   :  { %v6201_v53 = vsel %vm6199_vm2, %v6198_v14, %v6200_v8  ;;  %vm12823_vm2 = vmand %vm291_vm4, %vm6880_vm12 }
 0x71a   :  { %6202 = vst [vmem:[#allocation11] sm:$0xff] %v6201_v53  ;;  %vm12845_vm4 = vmand %vm13158_vm9, %vm6632_vm11  ;;  %vm6640_vm11 = vsmask.f32 6400  ;;  %vm6886_vm9 = vsmask.f32 7954 }
 0x71b   :  { %vm6882_vm12 = vmor %vm12823_vm2, %vm12702_vm15  ;;  %vm13202_vm2 = vcmask 1046534  }
 0x721   :  { %v6203_v6 = vld [vmem:[#allocation11] sm:$0x1]  ;;  %v6204_v10 = vld [vmem:[#allocation11 + $0x1] sm:$0x1]  ;;  %v6256_v12 = vld [vmem:[#allocation11 + $0x2] sm:$0x1] }
 0x722   :  { %v6228_v30 = vpack.c.bf16 %v6204_v10, %v6204_v10  ;;  %v6252_v36 = vpack.c.bf16 %v6203_v6, %v6203_v6  ;;  %v6257_v4 = vld [vmem:[#allocation11 + $0x3] sm:$0x1]  ;;  %v6302_v47 = vpack.c.bf16 %v6256_v12, %v6256_v12  ;;  %v6306_v19 = vld [vmem:[#allocation11 + $0x4] sm:$0x1]  ;;  %v6307_v9 = vld [vmem:[#allocation11 + $0x5] sm:$0x1]  ;;  %v6207_v22 = vcombine.low %v6203_v6, %v6204_v10 }
 0x723   :  { %v6278_v48 = vpack.c.bf16 %v6257_v4, %v6257_v4  ;;  %v6328_v40 = vpack.c.bf16 %v6307_v9, %v6307_v9  ;;  %v6352_v32 = vpack.c.bf16 %v6306_v19, %v6306_v19  ;;  %v6356_v59 = vld [vmem:[#allocation11 + $0x6] sm:$0x1]  ;;  %v6357_v51 = vld [vmem:[#allocation11 + $0x7] sm:$0x1]  ;;  %v6260_v5 = vcombine.low %v6256_v12, %v6257_v4 }
 0x724   :  { %v6236_v29 = vrot.slane %v6228_v30, %v12732_v25  ;;  %v6254_v3 = vsel %vm11774_vm5, %v6252_v36, %v6253_v23  ;;  %v6304_v44 = vsel %vm11774_vm5, %v6302_v47, %v6303_v18  ;;  %v6378_v50 = vpack.c.bf16 %v6357_v51, %v6357_v51 }
 0x725   :  { %6255 = vst [vmem:[#allocation4 + $0x3] sm:$0x1] %v6254_v3  ;;  %v6286_v28 = vrot.slane %v6278_v48, %v12732_v25  ;;  %6305 = vst [vmem:[#allocation4 + $0x5] sm:$0x1] %v6304_v44  ;;  %v6336_v63 = vrot.slane %v6328_v40, %v12732_v25  ;;  %v6354_v0 = vsel %vm11774_vm5, %v6352_v32, %v6353_v33  ;;  %v6399_v33 = vld [vmem:[#allocation4 + $0xc] sm:$0x1] }
 0x726   :  { %v6402_v20 = vpack.c.bf16 %v6356_v59, %v6356_v59  ;;  %v6243_v46 = vrot.slane %v6236_v29, %v12732_v25  ;;  %6355 = vst [vmem:[#allocation4 + $0xb] sm:$0x1] %v6354_v0  ;;  %v6386_v16 = vrot.slane %v6378_v50, %v12732_v25  ;;  %v6214_v7 = vrot.slane %v6207_v22, %v12732_v25 }
 0x727   :  { %v6267_v15 = vrot.slane %v6260_v5, %v12732_v25  ;;  %v6293_v14 = vrot.slane %v6286_v28, %v12732_v25  ;;  %v6343_v43 = vrot.slane %v6336_v63, %v12732_v25  ;;  %v6310_v53 = vcombine.low %v6306_v19, %v6307_v9  ;;  %v6650_v63 = vld [vmem:[#allocation8 + $0x8] sm:$0xff] }
 0x728   :  { %v6404_v8 = vsel %vm11774_vm5, %v6402_v20, %v6403_v27  ;;  %v6245_v61 = vshll.u32 %v6243_v46, 16  ;;  %v6393_v11 = vrot.slane %v6386_v16, %v12732_v25  ;;  %v6221_v60 = vrot.slane %v6214_v7, %v12732_v25  ;;  %vm12802_vm5 = vmand %vm6627_vm10, %vm6628_vm3 }
 0x729   :  { %6405 = vst [vmem:[#allocation4 + $0xd] sm:$0x1] %v6404_v8  ;;  %v6274_v39 = vrot.slane %v6267_v15, %v12732_v25  ;;  %v6295_v23 = vshll.u32 %v6293_v14, 16  ;;  %v6345_v18 = vshll.u32 %v6343_v43, 16  ;;  %v6317_v21 = vrot.slane %v6310_v53, %v12732_v25  ;;  %vm12834_vm3 = vmor %vm12802_vm5, %vm6626_vm7 }
 0x72a   :  { %v6360_v6 = vcombine.low %v6356_v59, %v6357_v51  ;;  %v6250_v10 = vsel %vm12695_vm13, %v6245_v61, %v6249_v52  ;;  %v6395_v12 = vshll.u32 %v6393_v11, 16  ;;  %v6760_v36 = vrot.slane %v12750_v31, %v12732_v25  ;;  %6227 = vst.msk [vmem:[#allocation36] ss:$4 sm:$0x3] %vm12759_vm8, %v6221_v60  ;;  %vm6634_vm1 = vmor %vm12845_vm4, %vm12834_vm3 }
 0x72b   :  { %v6767_v4 = vrot.slane %v6753_v57, %v12732_v25  ;;  %6277 = vst.msk [vmem:[#allocation36 + $0x1] ss:$4 sm:$0x3] %vm12759_vm8, %v6274_v39  ;;  %6251 = vst [vmem:[#allocation4 + $0x2] sm:$0x1] %v6250_v10  ;;  %v6300_v47 = vsel %vm12695_vm13, %v6295_v23, %v6299_v58  ;;  %v6350_v19 = vsel %vm12695_vm13, %v6345_v18, %v6349_v38  ;;  %v6524_v40 = vshrl.u32 %v12769_v45, 16 }
 0x72c   :  { %v6324_v9 = vrot.slane %v6317_v21, %v12732_v25  ;;  %v6367_v22 = vrot.slane %v6360_v6, %v12732_v25  ;;  %6301 = vst [vmem:[#allocation4 + $0x4] sm:$0x1] %v6300_v47  ;;  %6351 = vst [vmem:[#allocation4 + $0xa] sm:$0x1] %v6350_v19  ;;  %v6400_v31 = vsel %vm12695_vm13, %v6395_v12, %v6399_v33  ;;  %vm6883_vm13 = vsmask.f32 7950 }
 0x72d   :  { %6401 = vst [vmem:[#allocation4 + $0xc] sm:$0x1] %v6400_v31  ;;  %v6769_v54 = vshrl.u32 %v6760_v36, 16  ;;  %v6772_v59 = vshrl.u32 %v6767_v4, 16  ;;  %v6536_v51 = vrot.slane %v6526_v49, %v12732_v25  ;;  %v6543_v5 = vrot.slane %v12754_v56, %v12732_v25  ;;  %vm12869_vm5 = vmand %vm6627_vm10, %vm6883_vm13  ;;  %v10601_v57 = vld [vmem:[#allocation29 + $0x144] ss:$8 sps:$4 sm:$0xff]  }
 0x72e   :  { %6327 = vst.msk [vmem:[#allocation36 + $0x2] ss:$4 sm:$0x3] %vm12759_vm8, %v6324_v9  ;;  %v6374_v32 = vrot.slane %v6367_v22, %v12732_v25  ;;  %v6784_v29 = vrot.slane %v6774_v17, %v12732_v25  ;;  %v6791_v3 = vrot.slane %v12763_v35, %v12732_v25  ;;  %v6825_v55 = vcombine.low %v6760_v36, %v6767_v4  ;;  %vm12881_vm10 = vmand %vm6635_vm14, %vm6636_vm6  ;;  %v10584_v36 = vld [vmem:[#allocation29 + $0x310] ss:$8 sps:$4 sm:$0xff]  }
 0x72f   :  { %v6578_v26 = vcombine.low %v6521_v1, %v6524_v40  ;;  %v6826_v17 = vcombine.low %v6769_v54, %v6772_v59  ;;  %v12886_v34 = vcombine.low %v6536_v51, %v6543_v5  ;;  %vm12897_vm6 = vmor %vm12869_vm5, %vm6882_vm12  ;;  %vm13197_vm13 = vcmask 1044484  }
 0x730   :  { %6377 = vst.msk [vmem:[#allocation36 + $0x3] ss:$4 sm:$0x3] %vm12759_vm8, %v6374_v32  ;;  %vm6889_vm8 = vsmask.f32 7958  ;;  %v12888_v44 = vcombine.low %v6784_v29, %v6791_v3  ;;  %vm12904_vm7 = vmand %vm13197_vm13, %vm6886_vm9  ;;  %v6599_v20 = vrot.slane %v6577_v2, %v12732_v25  ;;  %v6847_v13 = vrot.slane %v6825_v55, %v12732_v25 }
 0x731   :  { %vm12918_vm15 = vmor %vm12881_vm10, %vm6634_vm1  ;;  %vm6895_vm9 = vsmask.f32 7966  ;;  %v6606_v52 = vrot.slane %v6578_v26, %v12732_v25  ;;  %v6854_v58 = vrot.slane %v6826_v17, %v12732_v25  ;;  %v6566_v5 = vrot.slane %v12886_v34, %v12732_v25 }
 0x732   :  { %v9406_v49 = vld.sshfl [vmem:[#allocation4 + $0x2] sm:$0x11 pattern:$0x75316420]  ;;  %vm12926_vm12 = vmand %vm13202_vm2, %vm6640_vm11  ;;  %vm13205_vm11 = vcmask 1047559   ;;  %v6814_v55 = vrot.slane %v12888_v44, %v12732_v25 }
 0x733   :  { %v6447_v24 = vcombine.high %v9406_v49, %v9406_v49  ;;  %v6454_v35 = vrot.slane %v9406_v49, %v12732_v25  ;;  %v9410_v45 = vld.sshfl [vmem:[#allocation4 + $0xa] sm:$0x11 pattern:$0x75316420]  ;;  %vm6888_vm1 = vmor %vm12904_vm7, %vm12897_vm6  ;;  %v6608_v1 = vcombine.low %v6599_v20, %v6606_v52  ;;  %v6856_v59 = vcombine.low %v6847_v13, %v6854_v58 }
 0x734   :  { %v6695_v27 = vcombine.high %v9410_v45, %v9410_v45  ;;  %v6702_v28 = vrot.slane %v9410_v45, %v12732_v25  ;;  %v9407_v0 = vld.sshfl [vmem:[#allocation4 + $0x4] sm:$0x11 pattern:$0x75316420]  ;;  %vm6890_vm3 = vmand %vm6635_vm14, %vm6889_vm8 }
 0x735   :  { %v6461_v46 = vrot.slane %v6447_v24, %v12732_v25  ;;  %v6476_v7 = vcombine.high %v9407_v0, %v9407_v0  ;;  %v6483_v15 = vrot.slane %v9407_v0, %v12732_v25  ;;  %v9411_v14 = vld.sshfl [vmem:[#allocation4 + $0xc] sm:$0x11 pattern:$0x75316420]  ;;  %v6463_v38 = vshrl.u32 %v6454_v35, 16  ;;  %vm6642_vm4 = vmor %vm12926_vm12, %vm12918_vm15 }
 0x736   :  { %v6709_v8 = vrot.slane %v6695_v27, %v12732_v25  ;;  %v6724_v53 = vcombine.high %v9411_v14, %v9411_v14  ;;  %v6731_v61 = vrot.slane %v9411_v14, %v12732_v25  ;;  %v6711_v23 = vshrl.u32 %v6702_v28, 16  ;;  %vm12947_vm5 = vmand %vm13205_vm11, %vm6644_vm0 }
 0x737   :  { %v6466_v11 = vshrl.u32 %v6461_v46, 16  ;;  %v6528_v60 = vcombine.low %v6454_v35, %v6461_v46  ;;  %v6490_v39 = vrot.slane %v6476_v7, %v12732_v25  ;;  %v6492_v10 = vshrl.u32 %v6483_v15, 16  ;;  %vm12958_vm14 = vmor %vm6890_vm3, %vm6888_vm1  ;;  %v6647_v35 = vld [vmem:[#allocation8] sm:$0xff] }
 0x738   :  { %v6714_v18 = vshrl.u32 %v6709_v8, 16  ;;  %v6776_v33 = vcombine.low %v6702_v28, %v6709_v8  ;;  %v6738_v21 = vrot.slane %v6724_v53, %v12732_v25  ;;  %v6740_v47 = vshrl.u32 %v6731_v61, 16  ;;  %vm13211_vm8 = vmmov %vm13202_vm2 }
 0x739   :  { %v6529_v6 = vcombine.low %v6463_v38, %v6466_v11  ;;  %v6495_v12 = vshrl.u32 %v6490_v39, 16  ;;  %v6575_v30 = vcombine.low %v6483_v15, %v6490_v39  ;;  %v6550_v22 = vrot.slane %v6528_v60, %v12732_v25  ;;  %vm12981_vm7 = vmor %vm12947_vm5, %vm6642_vm4  ;;  %v10575_v38 = vld [vmem:[#allocation29 + $0x100] ss:$8 sps:$4 sm:$0xff]   ;;  %v10583_v39 = vld [vmem:[#allocation29 + $0x114] ss:$8 sps:$4 sm:$0xff]  }
 0x73a   :  { %v6777_v4 = vcombine.low %v6711_v23, %v6714_v18  ;;  %v6743_v19 = vshrl.u32 %v6738_v21, 16  ;;  %v6823_v9 = vcombine.low %v6731_v61, %v6738_v21  ;;  %v6798_v40 = vrot.slane %v6776_v33, %v12732_v25  ;;  %vm13216_vm6 = vmmov %vm13205_vm11  ;;  %v10578_v33 = vld [vmem:[#allocation29 + $0x300] ss:$8 sps:$4 sm:$0xff]  }
 0x73b   :  { %v6557_v31 = vrot.slane %v6529_v6, %v12732_v25  ;;  %v6576_v48 = vcombine.low %v6492_v10, %v6495_v12  ;;  %vm13210_vm0 = vsmask.f32 7962  ;;  %v6585_v29 = vrot.slane %v6575_v30, %v12732_v25  ;;  %vm6896_vm15 = vmand %vm13216_vm6, %vm6895_vm9  ;;  %v10581_v6 = vld [vmem:[#allocation29 + $0x110] ss:$8 sps:$4 sm:$0xff]   ;;  %v10586_v12 = vld [vmem:[#allocation29 + $0x314] ss:$8 sps:$4 sm:$0xff]  }
 0x73c   :  { %v6805_v32 = vrot.slane %v6777_v4, %v12732_v25  ;;  %vm12966_vm10 = vmand %vm13211_vm8, %vm13210_vm0  ;;  %v6824_v54 = vcombine.low %v6740_v47, %v6743_v19  ;;  %v6833_v26 = vrot.slane %v6823_v9, %v12732_v25  ;;  %v6622_v24 = vrot.slane %v6608_v1, %v12732_v25  ;;  %v10589_v30 = vld [vmem:[#allocation29 + $0x124] ss:$8 sps:$4 sm:$0xff]   ;;  %v10587_v4 = vld [vmem:[#allocation29 + $0x120] ss:$8 sps:$4 sm:$0xff]  }
 0x73d   :  { %v6559_v51 = vcombine.low %v6550_v22, %v6557_v31  ;;  %v6592_v3 = vrot.slane %v6576_v48, %v12732_v25  ;;  %vm6894_vm13 = vmor %vm12966_vm10, %vm12958_vm14  ;;  %v6870_v44 = vrot.slane %v6856_v59, %v12732_v25  ;;  %v10592_v47 = vld [vmem:[#allocation29 + $0x324] ss:$8 sps:$4 sm:$0xff]   ;;  %v10595_v19 = vld [vmem:[#allocation29 + $0x134] ss:$8 sps:$4 sm:$0xff]  }
 0x73e   :  { %v6807_v2 = vcombine.low %v6798_v40, %v6805_v32  ;;  %v6840_v49 = vrot.slane %v6824_v54, %v12732_v25  ;;  %vm6897_vm2 = vmor %vm6896_vm15, %vm6894_vm13  ;;  %v10590_v9 = vld [vmem:[#allocation29 + $0x320] ss:$8 sps:$4 sm:$0xff]   ;;  %v10593_v22 = vld [vmem:[#allocation29 + $0x130] ss:$8 sps:$4 sm:$0xff]  }
 0x73f   :  { %v6573_v56 = vrot.slane %v6559_v51, %v12732_v25  ;;  %v6607_v17 = vcombine.low %v6585_v29, %v6592_v3  ;;  %v10598_v31 = vld [vmem:[#allocation29 + $0x334] ss:$8 sps:$4 sm:$0xff]   ;;  %v10596_v48 = vld [vmem:[#allocation29 + $0x330] ss:$8 sps:$4 sm:$0xff]   ;;  %v10599_v1 = vld [vmem:[#allocation29 + $0x140] ss:$8 sps:$4 sm:$0xff]  }
 0x740   :  { %v6821_v34 = vrot.slane %v6807_v2, %v12732_v25  ;;  %v6855_v45 = vcombine.low %v6833_v26, %v6840_v49  ;;  %v10604_v40 = vld [vmem:[#allocation29 + $0x344] ss:$8 sps:$4 sm:$0xff]   ;;  %v10607_v32 = vld [vmem:[#allocation29 + $0x154] ss:$8 sps:$4 sm:$0xff]   ;;  %v10605_v54 = vld [vmem:[#allocation29 + $0x150] ss:$8 sps:$4 sm:$0xff]  }
 0x741   :  { %v6574_v50 = vcombine.low %v6566_v5, %v6573_v56  ;;  %v6615_v27 = vrot.slane %v6607_v17, %v12732_v25  ;;  %v10610_v59 = vld [vmem:[#allocation29 + $0x354] ss:$8 sps:$4 sm:$0xff]   ;;  %v10613_v51 = vld [vmem:[#allocation29 + $0x164] ss:$8 sps:$4 sm:$0xff]   ;;  %v10608_v5 = vld [vmem:[#allocation29 + $0x350] ss:$8 sps:$4 sm:$0xff]  }
 0x742   :  { %v6822_v28 = vcombine.low %v6814_v55, %v6821_v34  ;;  %v6863_v0 = vrot.slane %v6855_v45, %v12732_v25  ;;  %v10611_v29 = vld [vmem:[#allocation29 + $0x160] ss:$8 sps:$4 sm:$0xff]   ;;  %v10616_v3 = vld [vmem:[#allocation29 + $0x364] ss:$8 sps:$4 sm:$0xff]   ;;  %v10617_v55 = vld [vmem:[#allocation29 + $0x170] ss:$8 sps:$4 sm:$0xff]  }
 0x743   :  { %v6648_v20 = vsel %vm12981_vm7, %v6574_v50, %v6647_v35  ;;  %v6623_v13 = vcombine.low %v6615_v27, %v6622_v24  ;;  %v10614_v2 = vld [vmem:[#allocation29 + $0x360] ss:$8 sps:$4 sm:$0xff]   ;;  %v10622_v26 = vld [vmem:[#allocation29 + $0x374] ss:$8 sps:$4 sm:$0xff]   ;;  %v10625_v49 = vld [vmem:[#allocation29 + $0x184] ss:$8 sps:$4 sm:$0xff]  }
 0x744   :  { %v6873_v46 = vshll.u32 %v6822_v28, 16  ;;  %v6871_v16 = vcombine.low %v6863_v0, %v6870_v44  ;;  %v10620_v56 = vld [vmem:[#allocation29 + $0x370] ss:$8 sps:$4 sm:$0xff]   ;;  %v10623_v17 = vld [vmem:[#allocation29 + $0x180] ss:$8 sps:$4 sm:$0xff]  }
 0x745   :  { %v6651_v7 = vsel %vm12981_vm7, %v6623_v13, %v6650_v63  ;;  %v10628_v24 = vld [vmem:[#allocation29 + $0x384] ss:$8 sps:$4 sm:$0xff]   ;;  %v10631_v35 = vld [vmem:[#allocation29 + $0x194] ss:$8 sps:$4 sm:$0xff]   ;;  %v10626_v34 = vld [vmem:[#allocation29 + $0x380] ss:$8 sps:$4 sm:$0xff]  }
 0x746   :  { %v6899_v15 = vsel %vm6897_vm2, %v6873_v46, %v6648_v20  ;;  %v6876_v52 = vshll.u32 %v6871_v16, 16  ;;  %v10629_v45 = vld [vmem:[#allocation29 + $0x190] ss:$8 sps:$4 sm:$0xff]   ;;  %v10634_v44 = vld [vmem:[#allocation29 + $0x394] ss:$8 sps:$4 sm:$0xff]  }
 0x747   :  { %6900 = vst [vmem:[#allocation8] sm:$0xff] %v6899_v15  ;;  %v7171_v14 = vrot.slane %v6899_v15, %v12732_v25  ;;  %v7164_v43 = vcombine.high %v6899_v15, %v6899_v15  ;;  %v10637_v50 = vld [vmem:[#allocation29 + $0x1a4] ss:$8 sps:$4 sm:$0xff]   ;;  %v10632_v27 = vld [vmem:[#allocation29 + $0x390] ss:$8 sps:$4 sm:$0xff]  }
 0x748   :  { %v13006_v8 = vsel %vm6897_vm2, %v6876_v52, %v6651_v7  ;;  %v10635_v28 = vld [vmem:[#allocation29 + $0x1a0] ss:$8 sps:$4 sm:$0xff]   ;;  %v10640_v63 = vld [vmem:[#allocation29 + $0x3a4] ss:$8 sps:$4 sm:$0xff]   ;;  %v10643_v0 = vld [vmem:[#allocation29 + $0x1b4] ss:$8 sps:$4 sm:$0xff]  }
 0x749   :  { %v7179_v53 = vcombine.high %v7171_v14, %v7171_v14  ;;  %v7178_v61 = vrot.slane %v7164_v43, %v12732_v25  ;;  %6903 = vst [vmem:[#allocation8 + $0x8] sm:$0xff] %v13006_v8  ;;  %v13012_v60 = vrot.slane %v7171_v14, %v12732_v25  ;;  %v10638_v20 = vld [vmem:[#allocation29 + $0x3a0] ss:$8 sps:$4 sm:$0xff]   ;;  %v10641_v13 = vld [vmem:[#allocation29 + $0x1b0] ss:$8 sps:$4 sm:$0xff]  }
 0x74a   :  { %v10646_v46 = vld [vmem:[#allocation29 + $0x3b4] ss:$8 sps:$4 sm:$0xff]   ;;  %v10649_v16 = vld [vmem:[#allocation29 + $0x1c4] ss:$8 sps:$4 sm:$0xff]   ;;  %v10644_v7 = vld [vmem:[#allocation29 + $0x3b0] ss:$8 sps:$4 sm:$0xff]  }
 0x74b   :  { %v7201_v58 = vrot.slane %v7179_v53, %v12732_v25  ;;  %v7180_v11 = vcombine.high %v7178_v61, %v7178_v61  ;;  %v13017_v21 = vrot.slane %v7178_v61, %v12732_v25  ;;  %v10647_v15 = vld [vmem:[#allocation29 + $0x1c0] ss:$8 sps:$4 sm:$0xff]   ;;  %v10652_v52 = vld [vmem:[#allocation29 + $0x3c4] ss:$8 sps:$4 sm:$0xff]   ;;  %v10655_v14 = vld [vmem:[#allocation29 + $0x1d4] ss:$8 sps:$4 sm:$0xff]  }
 0x74c   :  { %v10650_v43 = vld [vmem:[#allocation29 + $0x3c0] ss:$8 sps:$4 sm:$0xff]   ;;  %v10653_v53 = vld [vmem:[#allocation29 + $0x1d0] ss:$8 sps:$4 sm:$0xff]   ;;  %v10658_v61 = vld [vmem:[#allocation29 + $0x3d4] ss:$8 sps:$4 sm:$0xff]  }
 0x74d   :  { %8590 = vmatprep.mubr.bf16.mxu1 %v7201_v58  ;;  %v7211_v23 = vcombine.high %v7201_v58, %v7201_v58  ;;  %v7208_v18 = vrot.slane %v7180_v11, %v12732_v25  ;;  %v10661_v58 = vld [vmem:[#allocation29 + $0x1e4] ss:$8 sps:$4 sm:$0xff]   ;;  %v10659_v11 = vld [vmem:[#allocation29 + $0x1e0] ss:$8 sps:$4 sm:$0xff]  }
 0x74e   :  { %8591 = vmatmul.mubr.bf16.vlgmr.msra.gmra.mrb[152].mxu1 %v13012_v60 }
 0x74f   :  { %8600 = vmatpush1.bf16.msra.mxu1 %v10575_v38  ;;  %8631 = vmatprep.mubr.bf16.mxu1 %v7211_v23  ;;  %v7212_v10 = vcombine.high %v7208_v18, %v7208_v18  ;;  %v10656_v38 = vld [vmem:[#allocation29 + $0x3d0] ss:$8 sps:$4 sm:$0xff]   ;;  %v10667_v23 = vld [vmem:[#allocation29 + $0x1f4] ss:$8 sps:$4 sm:$0xff]  }
 0x750   :  { %8672 = vmatprep.mubr.bf16.mxu0 %v7208_v18  ;;  %8601 = vmatprep.subr.bf16.mxu1 %v10583_v39  ;;  %v10664_v39 = vld [vmem:[#allocation29 + $0x3e4] ss:$8 sps:$4 sm:$0xff]   ;;  %v10662_v18 = vld [vmem:[#allocation29 + $0x3e0] ss:$8 sps:$4 sm:$0xff]  }
 0x751   :  { %8673 = vmatmul.mubr.bf16.vlgmr.msra.gmra.mrb[24].mxu0 %v13017_v21 }
 0x752   :  { %8682 = vmatpush1.bf16.msra.mxu0 %v10578_v33  ;;  %8713 = vmatprep.mubr.bf16.mxu0 %v7212_v10  ;;  %v10665_v33 = vld [vmem:[#allocation29 + $0x1f0] ss:$8 sps:$4 sm:$0xff]   ;;  %v13022_v10 = vrot.slane %v13006_v8, %v12732_v25 }
 0x753   :  { %8602 = vmatpush1.bf16.msra.mxu1 %v10581_v6  ;;  %8683 = vmatprep.subr.bf16.mxu0 %v10586_v12  ;;  %v10670_v6 = vld [vmem:[#allocation29 + $0x3f4] ss:$8 sps:$4 sm:$0xff]   ;;  %v10668_v12 = vld [vmem:[#allocation29 + $0x3f0] ss:$8 sps:$4 sm:$0xff]  }
 0x754   :  { %8603 = vmatprep.subr.bf16.mxu1 %v10589_v30  ;;  %v10673_v30 = vld [vmem:[#allocation29 + $0x404] ss:$8 sps:$4 sm:$0xff]  }
 0x756   :  { %8684 = vmatpush1.bf16.msra.mxu0 %v10584_v36  ;;  %v7209_v36 = vcombine.high %v13012_v60, %v13012_v60  ;;  %v10679_v60 = vld [vmem:[#allocation29 + $0x424] ss:$8 sps:$4 sm:$0xff]  }
 0x757   :  { %8604 = vmatpush1.bf16.msra.mxu1 %v10587_v4  ;;  %8685 = vmatprep.subr.bf16.mxu0 %v10592_v47  ;;  %v7228_v4 = vcombine.high %v13022_v10, %v13022_v10  ;;  %v10671_v47 = vld [vmem:[#allocation29 + $0x400] ss:$8 sps:$4 sm:$0xff]  }
 0x758   :  { %8605 = vmatprep.subr.bf16.mxu1 %v10595_v19  ;;  %v7210_v19 = vcombine.high %v13017_v21, %v13017_v21  ;;  %v10685_v21 = vld [vmem:[#allocation29 + $0x444] ss:$8 sps:$4 sm:$0xff]  }
 0x75a   :  { %8686 = vmatpush1.bf16.msra.mxu0 %v10590_v9  ;;  %v10676_v9 = vld [vmem:[#allocation29 + $0x414] ss:$8 sps:$4 sm:$0xff]  }
 0x75b   :  { %8606 = vmatpush1.bf16.msra.mxu1 %v10593_v22  ;;  %8687 = vmatprep.subr.bf16.mxu0 %v10598_v31  ;;  %v13031_v22 = vrot.slane %v7228_v4, %v12732_v25  ;;  %v10674_v31 = vld [vmem:[#allocation29 + $0x410] ss:$8 sps:$4 sm:$0xff]   ;;  %v10757_v4 = vld [vmem:[#allocation29 + $0x5c4] ss:$8 sps:$4 sm:$0xff]  }
 0x75c   :  { %8607 = vmatprep.subr.bf16.mxu1 %v10601_v57  ;;  %v10677_v57 = vld [vmem:[#allocation29 + $0x420] ss:$8 sps:$4 sm:$0xff]  }
 0x75e   :  { %8688 = vmatpush1.bf16.msra.mxu0 %v10596_v48  ;;  %v10682_v48 = vld [vmem:[#allocation29 + $0x434] ss:$8 sps:$4 sm:$0xff]  }
 0x75f   :  { %8608 = vmatpush1.bf16.msra.mxu1 %v10599_v1  ;;  %8689 = vmatprep.subr.bf16.mxu0 %v10604_v40  ;;  %v10680_v1 = vld [vmem:[#allocation29 + $0x430] ss:$8 sps:$4 sm:$0xff]   ;;  %v10683_v40 = vld [vmem:[#allocation29 + $0x440] ss:$8 sps:$4 sm:$0xff]  }
 0x760   :  { %8609 = vmatprep.subr.bf16.mxu1 %v10607_v32  ;;  %v10688_v32 = vld [vmem:[#allocation29 + $0x454] ss:$8 sps:$4 sm:$0xff]  }
 0x762   :  { %8690 = vmatpush1.bf16.msra.mxu0 %v10602_v62  ;;  %v10686_v62 = vld [vmem:[#allocation29 + $0x450] ss:$8 sps:$4 sm:$0xff]  }
 0x763   :  { %8610 = vmatpush1.bf16.msra.mxu1 %v10605_v54  ;;  %8691 = vmatprep.subr.bf16.mxu0 %v10610_v59  ;;  %v10691_v54 = vld [vmem:[#allocation29 + $0x464] ss:$8 sps:$4 sm:$0xff]   ;;  %v10689_v59 = vld [vmem:[#allocation29 + $0x460] ss:$8 sps:$4 sm:$0xff]  }
 0x764   :  { %8611 = vmatprep.subr.bf16.mxu1 %v10613_v51  ;;  %v10694_v51 = vld [vmem:[#allocation29 + $0x474] ss:$8 sps:$4 sm:$0xff]  }
 0x766   :  { %8692 = vmatpush1.bf16.msra.mxu0 %v10608_v5  ;;  %v10692_v5 = vld [vmem:[#allocation29 + $0x470] ss:$8 sps:$4 sm:$0xff]  }
 0x767   :  { %8612 = vmatpush1.bf16.msra.mxu1 %v10611_v29  ;;  %8693 = vmatprep.subr.bf16.mxu0 %v10616_v3  ;;  %v10697_v29 = vld [vmem:[#allocation29 + $0x484] ss:$8 sps:$4 sm:$0xff]   ;;  %v10695_v3 = vld [vmem:[#allocation29 + $0x480] ss:$8 sps:$4 sm:$0xff]  }
 0x768   :  { %8613 = vmatprep.subr.bf16.mxu1 %v10619_v41  ;;  %v10700_v41 = vld [vmem:[#allocation29 + $0x494] ss:$8 sps:$4 sm:$0xff]  }
 0x76a   :  { %8694 = vmatpush1.bf16.msra.mxu0 %v10614_v2  ;;  %v10698_v2 = vld [vmem:[#allocation29 + $0x490] ss:$8 sps:$4 sm:$0xff]  }
 0x76b   :  { %8614 = vmatpush1.bf16.msra.mxu1 %v10617_v55  ;;  %8695 = vmatprep.subr.bf16.mxu0 %v10622_v26  ;;  %v10703_v55 = vld [vmem:[#allocation29 + $0x4a4] ss:$8 sps:$4 sm:$0xff]   ;;  %v10701_v26 = vld [vmem:[#allocation29 + $0x4a0] ss:$8 sps:$4 sm:$0xff]  }
 0x76c   :  { %8615 = vmatprep.subr.bf16.mxu1 %v10625_v49  ;;  %v10706_v49 = vld [vmem:[#allocation29 + $0x4b4] ss:$8 sps:$4 sm:$0xff]  }
 0x76e   :  { %8696 = vmatpush1.bf16.msra.mxu0 %v10620_v56  ;;  %v10704_v56 = vld [vmem:[#allocation29 + $0x4b0] ss:$8 sps:$4 sm:$0xff]  }
 0x76f   :  { %8616 = vmatpush1.bf16.msra.mxu1 %v10623_v17  ;;  %8697 = vmatprep.subr.bf16.mxu0 %v10628_v24  ;;  %v10709_v17 = vld [vmem:[#allocation29 + $0x4c4] ss:$8 sps:$4 sm:$0xff]   ;;  %v10707_v24 = vld [vmem:[#allocation29 + $0x4c0] ss:$8 sps:$4 sm:$0xff]  }
 0x770   :  { %8617 = vmatprep.subr.bf16.mxu1 %v10631_v35  ;;  %v10712_v35 = vld [vmem:[#allocation29 + $0x4d4] ss:$8 sps:$4 sm:$0xff]  }
 0x772   :  { %8698 = vmatpush1.bf16.msra.mxu0 %v10626_v34  ;;  %v10710_v34 = vld [vmem:[#allocation29 + $0x4d0] ss:$8 sps:$4 sm:$0xff]  }
 0x773   :  { %8618 = vmatpush1.bf16.msra.mxu1 %v10629_v45  ;;  %8699 = vmatprep.subr.bf16.mxu0 %v10634_v44  ;;  %v10715_v45 = vld [vmem:[#allocation29 + $0x4e4] ss:$8 sps:$4 sm:$0xff]   ;;  %v10713_v44 = vld [vmem:[#allocation29 + $0x4e0] ss:$8 sps:$4 sm:$0xff]  }
 0x774   :  { %8619 = vmatprep.subr.bf16.mxu1 %v10637_v50  ;;  %v10718_v50 = vld [vmem:[#allocation29 + $0x4f4] ss:$8 sps:$4 sm:$0xff]  }
 0x776   :  { %8700 = vmatpush1.bf16.msra.mxu0 %v10632_v27  ;;  %v10716_v27 = vld [vmem:[#allocation29 + $0x4f0] ss:$8 sps:$4 sm:$0xff]  }
 0x777   :  { %8620 = vmatpush1.bf16.msra.mxu1 %v10635_v28  ;;  %8701 = vmatprep.subr.bf16.mxu0 %v10640_v63  ;;  %v10721_v28 = vld [vmem:[#allocation29 + $0x504] ss:$8 sps:$4 sm:$0xff]   ;;  %v10719_v63 = vld [vmem:[#allocation29 + $0x500] ss:$8 sps:$4 sm:$0xff]  }
 0x778   :  { %8621 = vmatprep.subr.bf16.mxu1 %v10643_v0  ;;  %v13036_v0 = vrot.slane %v13022_v10, %v12732_v25  ;;  %v10751_v10 = vld [vmem:[#allocation29 + $0x5a4] ss:$8 sps:$4 sm:$0xff]  }
 0x77a   :  { %8702 = vmatpush1.bf16.msra.mxu0 %v10638_v20  ;;  %v10724_v20 = vld [vmem:[#allocation29 + $0x514] ss:$8 sps:$4 sm:$0xff]  }
 0x77b   :  { %8622 = vmatpush1.bf16.msra.mxu1 %v10641_v13  ;;  %8703 = vmatprep.subr.bf16.mxu0 %v10646_v46  ;;  %v7260_v13 = vcombine.high %v13031_v22, %v13031_v22  ;;  %v10722_v46 = vld [vmem:[#allocation29 + $0x510] ss:$8 sps:$4 sm:$0xff]  }
 0x77c   :  { %8623 = vmatprep.subr.bf16.mxu1 %v10649_v16  ;;  %v10727_v16 = vld [vmem:[#allocation29 + $0x524] ss:$8 sps:$4 sm:$0xff]  }
 0x77e   :  { %8704 = vmatpush1.bf16.msra.mxu0 %v10644_v7  ;;  %v10725_v7 = vld [vmem:[#allocation29 + $0x520] ss:$8 sps:$4 sm:$0xff]  }
 0x77f   :  { %8624 = vmatpush1.bf16.msra.mxu1 %v10647_v15  ;;  %8705 = vmatprep.subr.bf16.mxu0 %v10652_v52  ;;  %v10730_v15 = vld [vmem:[#allocation29 + $0x534] ss:$8 sps:$4 sm:$0xff]   ;;  %v10728_v52 = vld [vmem:[#allocation29 + $0x530] ss:$8 sps:$4 sm:$0xff]  }
 0x780   :  { %8625 = vmatprep.subr.bf16.mxu1 %v10655_v14  ;;  %v10733_v14 = vld [vmem:[#allocation29 + $0x544] ss:$8 sps:$4 sm:$0xff]  }
 0x782   :  { %8706 = vmatpush1.bf16.msra.mxu0 %v10650_v43  ;;  %v10731_v43 = vld [vmem:[#allocation29 + $0x540] ss:$8 sps:$4 sm:$0xff]  }
 0x783   :  { %8626 = vmatpush1.bf16.msra.mxu1 %v10653_v53  ;;  %8707 = vmatprep.subr.bf16.mxu0 %v10658_v61  ;;  %v10736_v53 = vld [vmem:[#allocation29 + $0x554] ss:$8 sps:$4 sm:$0xff]   ;;  %v10734_v61 = vld [vmem:[#allocation29 + $0x550] ss:$8 sps:$4 sm:$0xff]  }
 0x784   :  { %8627 = vmatprep.subr.bf16.mxu1 %v10661_v58  ;;  %v10739_v58 = vld [vmem:[#allocation29 + $0x564] ss:$8 sps:$4 sm:$0xff]  }
 0x786   :  { %8708 = vmatpush1.bf16.msra.mxu0 %v10656_v38  ;;  %v10737_v38 = vld [vmem:[#allocation29 + $0x560] ss:$8 sps:$4 sm:$0xff]  }
 0x787   :  { %8628 = vmatpush1.bf16.msra.mxu1 %v10659_v11  ;;  %8709 = vmatprep.subr.bf16.mxu0 %v10664_v39  ;;  %v10742_v11 = vld [vmem:[#allocation29 + $0x574] ss:$8 sps:$4 sm:$0xff]   ;;  %v10740_v39 = vld [vmem:[#allocation29 + $0x570] ss:$8 sps:$4 sm:$0xff]  }
 0x788   :  { %8629 = vmatprep.subr.bf16.mxu1 %v10667_v23  ;;  %v10745_v23 = vld [vmem:[#allocation29 + $0x584] ss:$8 sps:$4 sm:$0xff]  }
 0x78a   :  { %8710 = vmatpush1.bf16.msra.mxu0 %v10662_v18  ;;  %v10743_v18 = vld [vmem:[#allocation29 + $0x580] ss:$8 sps:$4 sm:$0xff]  }
 0x78b   :  { %8630 = vmatpush1.bf16.msra.mxu1 %v10665_v33  ;;  %8711 = vmatprep.subr.bf16.mxu0 %v10670_v6  ;;  %v10748_v33 = vld [vmem:[#allocation29 + $0x594] ss:$8 sps:$4 sm:$0xff]   ;;  %v10746_v6 = vld [vmem:[#allocation29 + $0x590] ss:$8 sps:$4 sm:$0xff]  }
 0x78e   :  { %8712 = vmatpush1.bf16.msra.mxu0 %v10668_v12  ;;  %8632 = vmatmul.mubr.bf16.vlgmr.msra.gmra.mrb[152].mxu1 %v7209_v36  ;;  %v10749_v12 = vld [vmem:[#allocation29 + $0x5a0] ss:$8 sps:$4 sm:$0xff]   ;;  %v10752_v36 = vld [vmem:[#allocation29 + $0x5b0] ss:$8 sps:$4 sm:$0xff]  }
 0x78f   :  { %8722 = vmatprep.subr.bf16.mxu0 %v10673_v30  ;;  %v10754_v30 = vld [vmem:[#allocation29 + $0x5b4] ss:$8 sps:$4 sm:$0xff]  }
 0x791   :  { %8714 = vmatmul.mubr.bf16.vlgmr.msra.gmra.mrb[24].mxu0 %v7210_v19  ;;  %v10760_v19 = vld [vmem:[#allocation29 + $0x5d4] ss:$8 sps:$4 sm:$0xff]  }
 0x792   :  { %8723 = vmatpush1.bf16.msra.mxu0 %v10671_v47  ;;  %8754 = vmatprep.mubr.bf16.mxu0 %v13031_v22  ;;  %v10755_v47 = vld [vmem:[#allocation29 + $0x5c0] ss:$8 sps:$4 sm:$0xff]   ;;  %v10763_v22 = vld [vmem:[#allocation29 + $0x5e4] ss:$8 sps:$4 sm:$0xff]  }
 0x793   :  { %8724 = vmatprep.subr.bf16.mxu0 %v10676_v9  ;;  %v10758_v9 = vld [vmem:[#allocation29 + $0x5d0] ss:$8 sps:$4 sm:$0xff]  }
 0x796   :  { %8725 = vmatpush1.bf16.msra.mxu0 %v10674_v31  ;;  %v7213_v31 = vcombine.high %v13006_v8, %v13006_v8  ;;  %v10772_v8 = vld [vmem:[#allocation29 + $0x614] ss:$8 sps:$4 sm:$0xff]  }
 0x797   :  { %8726 = vmatprep.subr.bf16.mxu0 %v10679_v60  ;;  %v10761_v60 = vld [vmem:[#allocation29 + $0x5e0] ss:$8 sps:$4 sm:$0xff]  }
 0x79a   :  { %8727 = vmatpush1.bf16.msra.mxu0 %v10677_v57  ;;  %v10766_v57 = vld [vmem:[#allocation29 + $0x5f4] ss:$8 sps:$4 sm:$0xff]  }
 0x79b   :  { %8728 = vmatprep.subr.bf16.mxu0 %v10682_v48  ;;  %v13044_v48 = vrot.slane %v7213_v31, %v12732_v25  ;;  %v10836_v31 = vld [vmem:[#allocation29 + $0x770] ss:$8 sps:$4 sm:$0xff]  }
 0x79e   :  { %8729 = vmatpush1.bf16.msra.mxu0 %v10680_v1  ;;  %v10764_v1 = vld [vmem:[#allocation29 + $0x5f0] ss:$8 sps:$4 sm:$0xff]  }
 0x79f   :  { %8730 = vmatprep.subr.bf16.mxu0 %v10685_v21  ;;  %v10769_v21 = vld [vmem:[#allocation29 + $0x604] ss:$8 sps:$4 sm:$0xff]  }
 0x7a2   :  { %8731 = vmatpush1.bf16.msra.mxu0 %v10683_v40  ;;  %v7229_v40 = vcombine.high %v13044_v48, %v13044_v48 }
 0x7a3   :  { %8732 = vmatprep.subr.bf16.mxu0 %v10688_v32  ;;  %v10767_v32 = vld [vmem:[#allocation29 + $0x600] ss:$8 sps:$4 sm:$0xff]  }
 0x7a6   :  { %8733 = vmatpush1.bf16.msra.mxu0 %v10686_v62  ;;  %v7258_v62 = vcombine.high %v13036_v0, %v13036_v0 }
 0x7a7   :  { %8734 = vmatprep.subr.bf16.mxu0 %v10691_v54  ;;  %v13051_v54 = vrot.slane %v7229_v40, %v12732_v25  ;;  %v10845_v40 = vld [vmem:[#allocation29 + $0x7a0] ss:$8 sps:$4 sm:$0xff]  }
 0x7aa   :  { %8735 = vmatpush1.bf16.msra.mxu0 %v10689_v59  ;;  %v10770_v59 = vld [vmem:[#allocation29 + $0x610] ss:$8 sps:$4 sm:$0xff]  }
 0x7ab   :  { %8736 = vmatprep.subr.bf16.mxu0 %v10694_v51  ;;  %v10775_v51 = vld [vmem:[#allocation29 + $0x624] ss:$8 sps:$4 sm:$0xff]  }
 0x7ae   :  { %8737 = vmatpush1.bf16.msra.mxu0 %v10692_v5  ;;  %v10773_v5 = vld [vmem:[#allocation29 + $0x620] ss:$8 sps:$4 sm:$0xff]  }
 0x7af   :  { %8738 = vmatprep.subr.bf16.mxu0 %v10697_v29  ;;  %v10778_v29 = vld [vmem:[#allocation29 + $0x634] ss:$8 sps:$4 sm:$0xff]  }
 0x7b2   :  { %8739 = vmatpush1.bf16.msra.mxu0 %v10695_v3  ;;  %v10776_v3 = vld [vmem:[#allocation29 + $0x630] ss:$8 sps:$4 sm:$0xff]  }
 0x7b3   :  { %8740 = vmatprep.subr.bf16.mxu0 %v10700_v41  ;;  %v10781_v41 = vld [vmem:[#allocation29 + $0x644] ss:$8 sps:$4 sm:$0xff]  }
 0x7b6   :  { %8741 = vmatpush1.bf16.msra.mxu0 %v10698_v2  ;;  %v10779_v2 = vld [vmem:[#allocation29 + $0x640] ss:$8 sps:$4 sm:$0xff]  }
 0x7b7   :  { %8742 = vmatprep.subr.bf16.mxu0 %v10703_v55  ;;  %v10784_v55 = vld [vmem:[#allocation29 + $0x654] ss:$8 sps:$4 sm:$0xff]  }
 0x7ba   :  { %8743 = vmatpush1.bf16.msra.mxu0 %v10701_v26  ;;  %v10782_v26 = vld [vmem:[#allocation29 + $0x650] ss:$8 sps:$4 sm:$0xff]  }
 0x7bb   :  { %8744 = vmatprep.subr.bf16.mxu0 %v10706_v49  ;;  %v10787_v49 = vld [vmem:[#allocation29 + $0x664] ss:$8 sps:$4 sm:$0xff]  }
 0x7be   :  { %8745 = vmatpush1.bf16.msra.mxu0 %v10704_v56  ;;  %v10785_v56 = vld [vmem:[#allocation29 + $0x660] ss:$8 sps:$4 sm:$0xff]  }
 0x7bf   :  { %8746 = vmatprep.subr.bf16.mxu0 %v10709_v17  ;;  %v10790_v17 = vld [vmem:[#allocation29 + $0x674] ss:$8 sps:$4 sm:$0xff]  }
 0x7c2   :  { %8747 = vmatpush1.bf16.msra.mxu0 %v10707_v24  ;;  %v10788_v24 = vld [vmem:[#allocation29 + $0x670] ss:$8 sps:$4 sm:$0xff]  }
 0x7c3   :  { %8748 = vmatprep.subr.bf16.mxu0 %v10712_v35  ;;  %v10793_v35 = vld [vmem:[#allocation29 + $0x684] ss:$8 sps:$4 sm:$0xff]  }
 0x7c6   :  { %8749 = vmatpush1.bf16.msra.mxu0 %v10710_v34  ;;  %v10791_v34 = vld [vmem:[#allocation29 + $0x680] ss:$8 sps:$4 sm:$0xff]  }
 0x7c7   :  { %8750 = vmatprep.subr.bf16.mxu0 %v10715_v45  ;;  %v10796_v45 = vld [vmem:[#allocation29 + $0x694] ss:$8 sps:$4 sm:$0xff]  }
 0x7ca   :  { %8751 = vmatpush1.bf16.msra.mxu0 %v10713_v44  ;;  %v10794_v44 = vld [vmem:[#allocation29 + $0x690] ss:$8 sps:$4 sm:$0xff]  }
 0x7cb   :  { %8752 = vmatprep.subr.bf16.mxu0 %v10718_v50  ;;  %v10799_v50 = vld [vmem:[#allocation29 + $0x6a4] ss:$8 sps:$4 sm:$0xff]  }
 0x7ce   :  { %8753 = vmatpush1.bf16.msra.mxu0 %v10716_v27  ;;  %v10797_v27 = vld [vmem:[#allocation29 + $0x6a0] ss:$8 sps:$4 sm:$0xff]  }
 0x7cf   :  { %8763 = vmatprep.subr.bf16.mxu0 %v10721_v28  ;;  %v10802_v28 = vld [vmem:[#allocation29 + $0x6b4] ss:$8 sps:$4 sm:$0xff]  }
 0x7d1   :  { %8755 = vmatmul.mubr.bf16.vlgmr.msra.gmra.mrb[24].mxu0 %v13036_v0  ;;  %v10805_v0 = vld [vmem:[#allocation29 + $0x6c4] ss:$8 sps:$4 sm:$0xff]  }
 0x7d2   :  { %8764 = vmatpush1.bf16.msra.mxu0 %v10719_v63  ;;  %8795 = vmatprep.mubr.bf16.mxu0 %v7260_v13  ;;  %v10800_v63 = vld [vmem:[#allocation29 + $0x6b0] ss:$8 sps:$4 sm:$0xff]   ;;  %v10808_v13 = vld [vmem:[#allocation29 + $0x6d4] ss:$8 sps:$4 sm:$0xff]  }
 0x7d3   :  { %8765 = vmatprep.subr.bf16.mxu0 %v10724_v20  ;;  %v10803_v20 = vld [vmem:[#allocation29 + $0x6c0] ss:$8 sps:$4 sm:$0xff]  }
 0x7d6   :  { %8766 = vmatpush1.bf16.msra.mxu0 %v10722_v46  ;;  %v10806_v46 = vld [vmem:[#allocation29 + $0x6d0] ss:$8 sps:$4 sm:$0xff]  }
 0x7d7   :  { %8767 = vmatprep.subr.bf16.mxu0 %v10727_v16  ;;  %v10811_v16 = vld [vmem:[#allocation29 + $0x6e4] ss:$8 sps:$4 sm:$0xff]  }
 0x7da   :  { %8768 = vmatpush1.bf16.msra.mxu0 %v10725_v7  ;;  %v10809_v7 = vld [vmem:[#allocation29 + $0x6e0] ss:$8 sps:$4 sm:$0xff]  }
 0x7db   :  { %8769 = vmatprep.subr.bf16.mxu0 %v10730_v15  ;;  %v10814_v15 = vld [vmem:[#allocation29 + $0x6f4] ss:$8 sps:$4 sm:$0xff]  }
 0x7de   :  { %8770 = vmatpush1.bf16.msra.mxu0 %v10728_v52  ;;  %v10812_v52 = vld [vmem:[#allocation29 + $0x6f0] ss:$8 sps:$4 sm:$0xff]  }
 0x7df   :  { %8771 = vmatprep.subr.bf16.mxu0 %v10733_v14  ;;  %v10817_v14 = vld [vmem:[#allocation29 + $0x704] ss:$8 sps:$4 sm:$0xff]  }
 0x7e2   :  { %8772 = vmatpush1.bf16.msra.mxu0 %v10731_v43  ;;  %v10815_v43 = vld [vmem:[#allocation29 + $0x700] ss:$8 sps:$4 sm:$0xff]  }
 0x7e3   :  { %8773 = vmatprep.subr.bf16.mxu0 %v10736_v53  ;;  %v13056_v53 = vrot.slane %v13044_v48, %v12732_v25  ;;  %v10844_v48 = vld [vmem:[#allocation29 + $0x794] ss:$8 sps:$4 sm:$0xff]  }
 0x7e6   :  { %8774 = vmatpush1.bf16.msra.mxu0 %v10734_v61  ;;  %v10820_v61 = vld [vmem:[#allocation29 + $0x714] ss:$8 sps:$4 sm:$0xff]  }
 0x7e7   :  { %8775 = vmatprep.subr.bf16.mxu0 %v10739_v58  ;;  %v7261_v58 = vcombine.high %v13051_v54, %v13051_v54 }
 0x7ea   :  { %8776 = vmatpush1.bf16.msra.mxu0 %v10737_v38  ;;  %v10818_v38 = vld [vmem:[#allocation29 + $0x710] ss:$8 sps:$4 sm:$0xff]  }
 0x7eb   :  { %8777 = vmatprep.subr.bf16.mxu0 %v10742_v11  ;;  %v10823_v11 = vld [vmem:[#allocation29 + $0x724] ss:$8 sps:$4 sm:$0xff]  }
 0x7ee   :  { %8778 = vmatpush1.bf16.msra.mxu0 %v10740_v39  ;;  %v10821_v39 = vld [vmem:[#allocation29 + $0x720] ss:$8 sps:$4 sm:$0xff]  }
 0x7ef   :  { %8779 = vmatprep.subr.bf16.mxu0 %v10745_v23  ;;  %v10826_v23 = vld [vmem:[#allocation29 + $0x734] ss:$8 sps:$4 sm:$0xff]  }
 0x7f2   :  { %8780 = vmatpush1.bf16.msra.mxu0 %v10743_v18  ;;  %v10824_v18 = vld [vmem:[#allocation29 + $0x730] ss:$8 sps:$4 sm:$0xff]  }
 0x7f3   :  { %8781 = vmatprep.subr.bf16.mxu0 %v10748_v33  ;;  %v10829_v33 = vld [vmem:[#allocation29 + $0x744] ss:$8 sps:$4 sm:$0xff]  }
 0x7f6   :  { %8782 = vmatpush1.bf16.msra.mxu0 %v10746_v6  ;;  %v10827_v6 = vld [vmem:[#allocation29 + $0x740] ss:$8 sps:$4 sm:$0xff]  }
 0x7f7   :  { %8783 = vmatprep.subr.bf16.mxu0 %v10751_v10  ;;  %v10832_v10 = vld [vmem:[#allocation29 + $0x754] ss:$8 sps:$4 sm:$0xff]  }
 0x7fa   :  { %8784 = vmatpush1.bf16.msra.mxu0 %v10749_v12 }
 0x7fb   :  { %8785 = vmatprep.subr.bf16.mxu0 %v10754_v30 }
 0x7fe   :  { %8786 = vmatpush1.bf16.msra.mxu0 %v10752_v36  ;;  %v10830_v36 = vld [vmem:[#allocation29 + $0x750] ss:$8 sps:$4 sm:$0xff]  }
 0x7ff   :  { %8787 = vmatprep.subr.bf16.mxu0 %v10757_v4 }
 0x802   :  { %8788 = vmatpush1.bf16.msra.mxu0 %v10755_v47  ;;  %v10835_v47 = vld [vmem:[#allocation29 + $0x764] ss:$8 sps:$4 sm:$0xff]  }
 0x803   :  { %8789 = vmatprep.subr.bf16.mxu0 %v10760_v19 }
 0x806   :  { %8790 = vmatpush1.bf16.msra.mxu0 %v10758_v9  ;;  %v10833_v9 = vld [vmem:[#allocation29 + $0x760] ss:$8 sps:$4 sm:$0xff]  }
 0x807   :  { %8791 = vmatprep.subr.bf16.mxu0 %v10763_v22  ;;  %v10838_v22 = vld [vmem:[#allocation29 + $0x774] ss:$8 sps:$4 sm:$0xff]  }
 0x80a   :  { %8792 = vmatpush1.bf16.msra.mxu0 %v10761_v60  ;;  %v10841_v60 = vld [vmem:[#allocation29 + $0x784] ss:$8 sps:$4 sm:$0xff]  }
 0x80b   :  { %8793 = vmatprep.subr.bf16.mxu0 %v10766_v57  ;;  %v10839_v57 = vld [vmem:[#allocation29 + $0x780] ss:$8 sps:$4 sm:$0xff]  }
 0x80e   :  { %8794 = vmatpush1.bf16.msra.mxu0 %v10764_v1  ;;  %v10842_v1 = vld [vmem:[#allocation29 + $0x790] ss:$8 sps:$4 sm:$0xff]  }
 0x80f   :  { %8804 = vmatprep.subr.bf16.mxu0 %v10769_v21  ;;  %v10847_v21 = vld [vmem:[#allocation29 + $0x7a4] ss:$8 sps:$4 sm:$0xff]  }
 0x811   :  { %8796 = vmatmul.mubr.bf16.vlgmr.msra.gmra.mrb[24].mxu0 %v7258_v62  ;;  %v10848_v62 = vld [vmem:[#allocation29 + $0x7b0] ss:$8 sps:$4 sm:$0xff]  }
 0x812   :  { %8805 = vmatpush1.bf16.msra.mxu0 %v10767_v32  ;;  %8836 = vmatprep.mubr.bf16.mxu0 %v13051_v54  ;;  %v10850_v32 = vld [vmem:[#allocation29 + $0x7b4] ss:$8 sps:$4 sm:$0xff]   ;;  %v10851_v54 = vld [vmem:[#allocation29 + $0x7c0] ss:$8 sps:$4 sm:$0xff]  }
 0x813   :  { %8806 = vmatprep.subr.bf16.mxu0 %v10772_v8  ;;  %v10853_v8 = vld [vmem:[#allocation29 + $0x7c4] ss:$8 sps:$4 sm:$0xff]  }
 0x816   :  { %8807 = vmatpush1.bf16.msra.mxu0 %v10770_v59  ;;  %v10856_v59 = vld [vmem:[#allocation29 + $0x7d4] ss:$8 sps:$4 sm:$0xff]  }
 0x817   :  { %8808 = vmatprep.subr.bf16.mxu0 %v10775_v51  ;;  %v10854_v51 = vld [vmem:[#allocation29 + $0x7d0] ss:$8 sps:$4 sm:$0xff]  }
 0x81a   :  { %8809 = vmatpush1.bf16.msra.mxu0 %v10773_v5  ;;  %v10859_v5 = vld [vmem:[#allocation29 + $0x7e4] ss:$8 sps:$4 sm:$0xff]  }
 0x81b   :  { %8810 = vmatprep.subr.bf16.mxu0 %v10778_v29  ;;  %v10857_v29 = vld [vmem:[#allocation29 + $0x7e0] ss:$8 sps:$4 sm:$0xff]  }
 0x81e   :  { %8811 = vmatpush1.bf16.msra.mxu0 %v10776_v3  ;;  %v10862_v3 = vld [vmem:[#allocation29 + $0x7f4] ss:$8 sps:$4 sm:$0xff]  }
 0x81f   :  { %8812 = vmatprep.subr.bf16.mxu0 %v10781_v41  ;;  %v10860_v41 = vld [vmem:[#allocation29 + $0x7f0] ss:$8 sps:$4 sm:$0xff]  }
 0x822   :  { %8813 = vmatpush1.bf16.msra.mxu0 %v10779_v2  ;;  %v7259_v2 = vcombine.high %v13056_v53, %v13056_v53 }
 0x823   :  { %8814 = vmatprep.subr.bf16.mxu0 %v10784_v55 }
 0x826   :  { %8815 = vmatpush1.bf16.msra.mxu0 %v10782_v26 }
 0x827   :  { %8816 = vmatprep.subr.bf16.mxu0 %v10787_v49 }
 0x82a   :  { %8817 = vmatpush1.bf16.msra.mxu0 %v10785_v56 }
 0x82b   :  { %8818 = vmatprep.subr.bf16.mxu0 %v10790_v17 }
 0x82e   :  { %8819 = vmatpush1.bf16.msra.mxu0 %v10788_v24 }
 0x82f   :  { %8820 = vmatprep.subr.bf16.mxu0 %v10793_v35 }
 0x832   :  { %8821 = vmatpush1.bf16.msra.mxu0 %v10791_v34 }
 0x833   :  { %8822 = vmatprep.subr.bf16.mxu0 %v10796_v45 }
 0x836   :  { %8823 = vmatpush1.bf16.msra.mxu0 %v10794_v44 }
 0x837   :  { %8824 = vmatprep.subr.bf16.mxu0 %v10799_v50 }
 0x83a   :  { %8825 = vmatpush1.bf16.msra.mxu0 %v10797_v27 }
 0x83b   :  { %8826 = vmatprep.subr.bf16.mxu0 %v10802_v28 }
 0x83e   :  { %8827 = vmatpush1.bf16.msra.mxu0 %v10800_v63 }
 0x83f   :  { %8828 = vmatprep.subr.bf16.mxu0 %v10805_v0 }
 0x842   :  { %8829 = vmatpush1.bf16.msra.mxu0 %v10803_v20 }
 0x843   :  { %8830 = vmatprep.subr.bf16.mxu0 %v10808_v13 }
 0x846   :  { %8831 = vmatpush1.bf16.msra.mxu0 %v10806_v46 }
 0x847   :  { %8832 = vmatprep.subr.bf16.mxu0 %v10811_v16 }
 0x84a   :  { %8833 = vmatpush1.bf16.msra.mxu0 %v10809_v7 }
 0x84b   :  { %8834 = vmatprep.subr.bf16.mxu0 %v10814_v15 }
 0x84e   :  { %8835 = vmatpush1.bf16.msra.mxu0 %v10812_v52 }
 0x84f   :  { %8845 = vmatprep.subr.bf16.mxu0 %v10817_v14 }
 0x851   :  { %8837 = vmatmul.mubr.bf16.vlgmr.msra.gmra.mrb[24].mxu0 %v13056_v53 }
 0x852   :  { %8846 = vmatpush1.bf16.msra.mxu0 %v10815_v43  ;;  %8877 = vmatprep.mubr.bf16.mxu0 %v7261_v58 }
 0x853   :  { %8847 = vmatprep.subr.bf16.mxu0 %v10820_v61 }
 0x856   :  { %8848 = vmatpush1.bf16.msra.mxu0 %v10818_v38 }
 0x857   :  { %8849 = vmatprep.subr.bf16.mxu0 %v10823_v11 }
 0x85a   :  { %8850 = vmatpush1.bf16.msra.mxu0 %v10821_v39 }
 0x85b   :  { %8851 = vmatprep.subr.bf16.mxu0 %v10826_v23 }
 0x85e   :  { %8852 = vmatpush1.bf16.msra.mxu0 %v10824_v18 }
 0x85f   :  { %8853 = vmatprep.subr.bf16.mxu0 %v10829_v33 }
 0x861   :  { %v13061_v12 = vpop.f32.mrb[152].mxu1 }
 0x862   :  { %8854 = vmatpush1.bf16.msra.mxu0 %v10827_v6  ;;  %v13063_v30 = vpop.f32.mrb[153].mxu1 }
 0x863   :  { %v8637_v4 = vpop.f32.mrb[154].mxu1  ;;  %8855 = vmatprep.subr.bf16.mxu0 %v10832_v10 }
 0x864   :  { %v8638_v19 = vpop.f32.mrb[155].mxu1 }
 0x866   :  { %8856 = vmatpush1.bf16.msra.mxu0 %v10830_v36 }
 0x867   :  { %8857 = vmatprep.subr.bf16.mxu0 %v10835_v47 }
 0x86a   :  { %8858 = vmatpush1.bf16.msra.mxu0 %v10833_v9 }
 0x86b   :  { %8859 = vmatprep.subr.bf16.mxu0 %v10838_v22 }
 0x86e   :  { %8860 = vmatpush1.bf16.msra.mxu0 %v10836_v31 }
 0x86f   :  { %8861 = vmatprep.subr.bf16.mxu0 %v10841_v60 }
 0x872   :  { %8862 = vmatpush1.bf16.msra.mxu0 %v10839_v57 }
 0x873   :  { %8863 = vmatprep.subr.bf16.mxu0 %v10844_v48 }
 0x876   :  { %8864 = vmatpush1.bf16.msra.mxu0 %v10842_v1 }
 0x877   :  { %8865 = vmatprep.subr.bf16.mxu0 %v10847_v21 }
 0x87a   :  { %8866 = vmatpush1.bf16.msra.mxu0 %v10845_v40 }
 0x87b   :  { %8867 = vmatprep.subr.bf16.mxu0 %v10850_v32 }
 0x87e   :  { %8868 = vmatpush1.bf16.msra.mxu0 %v10848_v62 }
 0x87f   :  { %8869 = vmatprep.subr.bf16.mxu0 %v10853_v8 }
 0x882   :  { %8870 = vmatpush1.bf16.msra.mxu0 %v10851_v54 }
 0x883   :  { %8871 = vmatprep.subr.bf16.mxu0 %v10856_v59 }
 0x886   :  { %8872 = vmatpush1.bf16.msra.mxu0 %v10854_v51 }
 0x887   :  { %8873 = vmatprep.subr.bf16.mxu0 %v10859_v5 }
 0x88a   :  { %8874 = vmatpush1.bf16.msra.mxu0 %v10857_v29 }
 0x88b   :  { %8875 = vmatprep.subr.bf16.mxu0 %v10862_v3 }
 0x88e   :  { %8876 = vmatpush1.bf16.msra.mxu0 %v10860_v41 }
 0x891   :  { %8878 = vmatmul.mubr.bf16.vlgmr.msra.gmra.mrb[24].mxu0 %v7259_v2 }
 0x892   :  { %11202 = shalt.err (!%p11199_p10)
}
 0x893   :  { %s11203_s24 = scalar_lea.hbm %s13153_s14, 256 }
 0x894   :  { %p11204_p11 = scmp.ne.s32.totalorder %s13153_s14, %s11203_s24  ;;  %p11207_p12 = scmp.lt.u32.totalorder %s11203_s24, %s13153_s14 }
 0x896   :  { %p11209_p13 = pnand %p11207_p12, %p11204_p11 }
 0x898   :  { %11212 = shalt.err (!%p11209_p13)
}
 0x899   :  { %9015 = dma.vmem_to_hbm [thread:$0]  %s9010_s18, 256, %s13153_s14, [#allocation35], %s11313_s8, %s11313_s8, %s11314_s1  }
 0x89a   :  { %s11213_s9 = scalar_lea.vmem %s13067_s5, 1024  ;;  %p11218_p1 = scmp.lt.s32.totalorder %s13067_s5, %s13067_s5 }
 0x89b   :  { %p11214_p0 = scmp.ne.s32.totalorder %s13067_s5, %s11213_s9  ;;  %p11219_p2 = scmp.lt.s32.totalorder %s11213_s9, %s11213_s9 }
 0x89d   :  { %p11220_p3 = por %p11219_p2, %p11218_p1 }
 0x89f   :  { %p11221_p4 = pnand %p11220_p3, %p11214_p0 }
 0x8a1   :  { %11224 = shalt.err (!%p11221_p4)
}
 0x8a2   :  { %s11225_s7 = scalar_lea.hbm %s13152_s13, 1024 }
 0x8a3   :  { %p11226_p5 = scmp.ne.s32.totalorder %s13152_s13, %s11225_s7  ;;  %p11229_p6 = scmp.lt.u32.totalorder %s11225_s7, %s13152_s13 }
 0x8a5   :  { %p11231_p7 = pnand %p11229_p6, %p11226_p5 }
 0x8a7   :  { %11234 = shalt.err (!%p11231_p7)
}
 0x8a8   :  { %9003 = dma.vmem_to_hbm [thread:$0]  %s13067_s5, 1024, %s13152_s13, [#allocation14], %s11313_s8, %s11313_s8, %s11314_s1  }
 0x8a9   :  { %s11321_s10 = smov [#allocation36]  }
 0x8aa   :  { %s9022_s23 = sshll.u32 %s11321_s10, 4  ;;  %s9023_s23 = int_to_ptr.vmem [resolvable:$true] %s9022_s23 }
 0x8ab   :  { %s11235_s12 = scalar_lea.vmem %s9023_s23, 128  ;;  %p11240_p9 = scmp.lt.s32.totalorder %s9023_s23, %s9023_s23 }
 0x8ac   :  { %p11236_p8 = scmp.ne.s32.totalorder %s9023_s23, %s11235_s12  ;;  %p11241_p10 = scmp.lt.s32.totalorder %s11235_s12, %s11235_s12 }
 0x8ae   :  { %p11242_p11 = por %p11241_p10, %p11240_p9 }
 0x8b0   :  { %p11243_p12 = pnand %p11242_p11, %p11236_p8 }
 0x8b2   :  { %11246 = shalt.err (!%p11243_p12)
}
 0x8b3   :  { %s11247_s28 = scalar_lea.hbm %s13154_s15, 128 }
 0x8b4   :  { %p11248_p13 = scmp.ne.s32.totalorder %s13154_s15, %s11247_s28  ;;  %p11251_p0 = scmp.lt.u32.totalorder %s11247_s28, %s13154_s15 }
 0x8b6   :  { %p11253_p1 = pnand %p11251_p0, %p11248_p13 }
 0x8b8   :  { %11256 = shalt.err (!%p11253_p1)
}
 0x8b9   :  { %9025 = dma.vmem_to_hbm [thread:$0]  %s9023_s23, 128, %s13154_s15, [#allocation35]   ;;  %vm13217_vm9 = vcmask 1041408   ;;  %v8923_v21 = vld [vmem:[#allocation30] sm:$0x3]  ;;  %v8954_v32 = vsub.s32 1, %v11957_v37 }
 0x8ba   :  { %vm13218_vm12 = vmmov %vm13217_vm9  ;;  %v8960_v62 = vld [vmem:[#allocation32] sm:$0x3]  ;;  %s11322_s15 = smov [#allocation37]  }
 0x8bb   :  { %vm13219_vm1 = vmmov %vm13217_vm9  ;;  %v8965_v51 = vrot.slane %v8960_v62, %v11960_v42  ;;  %v8969_v5 = vrot.slane %v8960_v62, %v8954_v32  ;;  %s9032_s5 = sshll.u32 %s11322_s15, 4  ;;  %s9033_s5 = int_to_ptr.vmem [resolvable:$true] %s9032_s5 }
 0x8bc   :  { %vm13220_vm3 = vmmov %vm13219_vm1  ;;  %s11257_s11 = scalar_lea.vmem %s9033_s5, 64  ;;  %p11262_p3 = scmp.lt.s32.totalorder %s9033_s5, %s9033_s5 }
 0x8bd   :  { %p11258_p2 = scmp.ne.s32.totalorder %s9033_s5, %s11257_s11  ;;  %p11263_p4 = scmp.lt.s32.totalorder %s11257_s11, %s11257_s11 }
 0x8bf   :  { %p11264_p5 = por %p11263_p4, %p11262_p3 }
 0x8c1   :  { %p11265_p6 = pnand %p11264_p5, %p11258_p2 }
 0x964   :  { %v8879_v55 = vpop.f32.mrb[24].mxu0 }
 0x965   :  { %v10158_v26 = vadd.f32 %v8879_v55, %v13061_v12  ;;  %v8881_v49 = vpop.f32.mrb[25].mxu0 }
 0x966   :  { %v10159_v56 = vadd.f32 %v8881_v49, %v13063_v30  ;;  %v8883_v17 = vpop.f32.mrb[26].mxu0 }
 0x967   :  { %v8887_v24 = vsel %vm13217_vm9, %v10158_v26, 0.0  ;;  %v8884_v35 = vpop.f32.mrb[27].mxu0 }
 0x968   :  { %v8888_v34 = vrot.slane %v8887_v24, 4  ;;  %v8894_v45 = vsel %vm13218_vm12, %v10159_v56, 0.0 }
 0x969   :  { %v8895_v44 = vrot.slane %v8894_v45, 4 }
 0x96a   :  { %v8889_v50 = vadd.f32 %v8888_v34, %v8887_v24 }
 0x96b   :  { %v8896_v27 = vadd.f32 %v8895_v44, %v8894_v45 }
 0x96c   :  { %v8890_v28 = vrot.slane %v8889_v50, 2 }
 0x96d   :  { %v8897_v63 = vrot.slane %v8896_v27, 2 }
 0x96e   :  { %v8891_v0 = vadd.f32 %v8890_v28, %v8889_v50 }
 0x96f   :  { %v8898_v20 = vadd.f32 %v8897_v63, %v8896_v27 }
 0x970   :  { %v8892_v13 = vrot.slane %v8891_v0, 1 }
 0x971   :  { %v8899_v46 = vrot.slane %v8898_v20, 1 }
 0x972   :  { %v8893_v16 = vadd.f32 %v8892_v13, %v8891_v0 }
 0x973   :  { %v8900_v7 = vadd.f32 %v8899_v46, %v8898_v20 }
 0x974   :  { %v8901_v15 = vmul.f32 0.5, %v8893_v16 }
 0x975   :  { %v8902_v52 = vmul.f32 0.5, %v8900_v7 }
 0x976   :  { %v8903_v14 = vsub.f32 %v10158_v26, %v8901_v15 }
 0x977   :  { %v8904_v43 = vsub.f32 %v10159_v56, %v8902_v52 }
 0x978   :  { %v8905_v53 = vmul.f32 %v8903_v14, %v8903_v14 }
 0x979   :  { %v8906_v61 = vmul.f32 %v8904_v43, %v8904_v43 }
 0x97a   :  { %v8907_v58 = vsel %vm13219_vm1, %v8905_v53, 0.0 }
 0x97b   :  { %v8908_v38 = vrot.slane %v8907_v58, 4  ;;  %v8914_v11 = vsel %vm13220_vm3, %v8906_v61, 0.0 }
 0x97c   :  { %v8915_v39 = vrot.slane %v8914_v11, 4 }
 0x97d   :  { %v8909_v23 = vadd.f32 %v8908_v38, %v8907_v58 }
 0x97e   :  { %v8916_v18 = vadd.f32 %v8915_v39, %v8914_v11 }
 0x97f   :  { %v8910_v33 = vrot.slane %v8909_v23, 2 }
 0x980   :  { %v8917_v6 = vrot.slane %v8916_v18, 2 }
 0x981   :  { %v8911_v10 = vadd.f32 %v8910_v33, %v8909_v23 }
 0x982   :  { %v8918_v12 = vadd.f32 %v8917_v6, %v8916_v18 }
 0x983   :  { %v8912_v30 = vrot.slane %v8911_v10, 1 }
 0x984   :  { %v8919_v36 = vrot.slane %v8918_v12, 1 }
 0x985   :  { %v8913_v4 = vadd.f32 %v8912_v30, %v8911_v10 }
 0x986   :  { %v8920_v47 = vadd.f32 %v8919_v36, %v8918_v12 }
 0x987   :  { %v8921_v19 = vmul.f32 0.5, %v8913_v4 }
 0x988   :  { %v8922_v9 = vmul.f32 0.5, %v8920_v47 }
 0x989   :  { %v8924_v22 = vadd.f32 1e-05, %v8921_v19 }
 0x98a   :  { %v8925_v31 = vadd.f32 1e-05, %v8922_v9 }
 0x98b   :  { %10869 = vrsqrt.f32 %v8924_v22 }
 0x98c   :  { %10871 = vrsqrt.f32 %v8925_v31 }
 0x995   :  { %v10870_v60 = vpop.eup %10869 }
 0x996   :  { %v10872_v57 = vpop.eup %10871 }
 0x997   :  { %v8930_v48 = vcombine.low %v10870_v60, %v10872_v57 }
 0x999   :  { %v8937_v1 = vrot.slane %v8930_v48, %v12732_v25 }
 0x99b   :  { %v8944_v40 = vrot.slane %v8937_v1, %v12732_v25 }
 0x99d   :  { %v8946_v8 = vmul.f32 %v8944_v40, %v8923_v21 }
 0x99f   :  { %v8951_v54 = vrot.slane %v8946_v8, %v11960_v42  ;;  %v8955_v59 = vrot.slane %v8946_v8, %v8954_v32 }
 0x9a1   :  { %v8959_v29 = vmul.f32 %v8955_v59, %v8904_v43  ;;  %v8958_v3 = vmul.f32 %v8951_v54, %v8903_v14 }
 0x9a3   :  { %v8973_v41 = vadd.f32 %v8969_v5, %v8959_v29  ;;  %v8972_v2 = vadd.f32 %v8965_v51, %v8958_v3 }
 0x9a5   :  { %vm8974_vm4 = vcmp.ge.f32.partialorder %v8972_v2, 0.0  ;;  %vm8975_vm11 = vcmp.ge.f32.partialorder %v8973_v41, 0.0  ;;  %v8976_v55 = vmul.f32 0.2, %v8972_v2  ;;  %v8977_v25 = vmul.f32 0.2, %v8973_v41 }
 0x9a7   :  { %v8978_v26 = vsel %vm8974_vm4, %v8972_v2, %v8976_v55  ;;  %v8979_v37 = vsel %vm8975_vm11, %v8973_v41, %v8977_v25 }
 0x9a8   :  { %v8982_v49 = vcombine.low %v8978_v26, %v8979_v37 }
 0x9aa   :  { %9669 = vst.sshfl [vmem:[#allocation37] sm:$0x33 pattern:$0x76325410] %v8982_v49 }
 0x9ab   :  { %11268 = shalt.err (!%p11265_p6)
}
 0x9ac   :  { %s11269_s22 = scalar_lea.hbm %s13155_s16, 64 }
 0x9ad   :  { %p11270_p7 = scmp.ne.s32.totalorder %s13155_s16, %s11269_s22  ;;  %p11273_p8 = scmp.lt.u32.totalorder %s11269_s22, %s13155_s16 }
 0x9af   :  { %p11275_p9 = pnand %p11273_p8, %p11270_p7 }
 0x9b1   :  { %11278 = shalt.err (!%p11275_p9)
}
 0x9b2   :  { %9035 = dma.vmem_to_hbm [thread:$0]  %s9033_s5, 64, %s13155_s16, [#allocation38]  }
 0x9b3   :  { %11293 = dma.done.wait [#allocation14], 1024  }
 0x9b4   :  { %11294 = vsyncadd [#allocation14], 4294966272 }
 0x9b5   :  { %11295 = dma.done.wait [#allocation35], 384  }
 0x9b6   :  { %11296 = vsyncadd [#allocation35], 4294966912 }
 0x9b7   :  { %11297 = dma.done.wait [#allocation38], 64  }
 0x9b8   :  { %11298 = vsyncadd [#allocation38], 4294967232 }
 0x9b9   :  { %9048 = vsyncpa [#allocation13], 1 }
 0x9ba   :  { %9049 = vsyncpa [#allocation16], 1 }
 0x9bb   :  { %9050 = vsyncpa [#allocation19], 1 }
 0x9bc   :  { %9051 = vsyncpa [#allocation22], 1 }
 0x9bd   :  { %9052 = vsyncpa [#allocation25], 1 }
 0x9be   :  { %9053 = vsyncpa [#allocation28], 1 }
 0x9bf   :  { %9054 = vsyncpa [#allocation31], 1 }
 0x9c0   :  { %9055 = vsyncpa [#allocation14], 1 }
 0x9c1   :  { %9056 = vsyncpa [#allocation35], 1 }
 0x9c2   :  { %9057 = vsyncpa [#allocation38], 1 }

</bundles_post_ra>
